<compile_context>
chip_gen: v6e
topology: v6e:2x2x1
jax: 0.10.0
libtpu: 0.0.40
codegen_flags: <defaults>
</compile_context>

<pallas_src>
import jax
import jax.numpy as jnp
import numpy as np
from jax.experimental import pallas as pl
from jax.experimental.pallas import tpu as pltpu

# ---- static geometry (Linear(784, 120) in the module fixes input to 28x28) ---
H = W = 28
WP = 32                      # conv1 padded grid width  (28 + 2*2)
X_COLS = WP * WP + 8         # 1032: flat padded image + slack for tap windows
M1 = H * WP                  # 896 : conv1 outputs laid out on the (28, 32) grid
H2 = W2 = 14
W2P = 18                     # conv2 padded grid width  (14 + 2*2)
A2_COLS = W2P * W2P + 8      # 332 : flat padded pool1 output + tap slack
M2 = H2 * W2P                # 252 : conv2 outputs laid out on the (14, 18) grid


# ------------------------------ fused kernel ---------------------------------

def _lenet_kernel(x_ref, w1_ref, b1_ref, s1_ref, w2_ref, b2_ref, s2_ref,
                  w1f_ref, b1f_ref, w2f_ref, b2f_ref, w3f_ref, b3f_ref,
                  out_ref, a2_ref):
    f32 = jnp.float32

    # conv1 + ReLU -> (6, 896): channels on sublanes, flat (28,32) grid on lanes
    y1 = jnp.zeros((6, M1), f32)
    for kh in range(5):
        for kw in range(5):
            t = kh * 5 + kw
            o = kh * WP + kw
            y1 = y1 + w1_ref[:, t:t + 1] * x_ref[0, :, o:o + M1]
    y1 = jnp.maximum(y1 + b1_ref[...], 0.0)

    # pool1 (2x2 mean) + zero-pad for conv2, as one constant matmul -> (6, 332)
    a2_ref[...] = jnp.dot(y1, s1_ref[...], preferred_element_type=f32)

    # conv2 + ReLU -> (16, 252): channels x flat (14,18) grid
    y2 = jnp.zeros((16, M2), f32)
    for kh in range(5):
        for kw in range(5):
            t = kh * 5 + kw
            o = kh * W2P + kw
            y2 = y2 + jnp.dot(w2_ref[t], a2_ref[:, o:o + M2],
                              preferred_element_type=f32)
    y2 = jnp.maximum(y2 + b2_ref[...], 0.0)

    # pool2 -> (16, 49); column s = h*7 + w, row = channel
    p2 = jnp.dot(y2, s2_ref[...], preferred_element_type=f32)

    # fc1 (+ReLU): sum the 16 per-channel blocks of the (784, 120) weight so
    # the PyTorch (c, h, w) flatten order is honoured without any relayout.
    z = b1f_ref[...]
    for c in range(16):
        z = z + jnp.dot(p2[c:c + 1, :], w1f_ref[c], preferred_element_type=f32)
    z = jnp.maximum(z, 0.0)
    # fc2 (+ReLU), fc3
    z = jnp.maximum(jnp.dot(z, w2f_ref[...], preferred_element_type=f32)
                    + b2f_ref[...], 0.0)
    z = jnp.dot(z, w3f_ref[...], preferred_element_type=f32) + b3f_ref[...]
    out_ref[0] = z


# ----------------------- one-time parameter preparation -----------------------

def _pool_scatter_matrix(src_rows, src_w, pooled, dst_w, dst_off, dst_cols):
    """Constant matrix that 2x2-mean-pools a flat (., src_w)-grid layout and
    scatters the result into a flat (., dst_w)-grid layout with a zero ring."""
    s = np.zeros((src_rows, dst_cols), np.float32)
    for ph in range(pooled):
        for pw in range(pooled):
            dst = (ph + dst_off) * dst_w + (pw + dst_off)
            for dh in range(2):
                for dw in range(2):
                    s[(2 * ph + dh) * src_w + (2 * pw + dw), dst] = 0.25
    return s


def prepare_params(params):
    """Pre-transpose / reshape PyTorch-layout weights into kernel layouts."""
    w1 = np.asarray(params['conv1_w'], np.float32).reshape(6, 25)          # (co, kh*5+kw)
    b1 = np.asarray(params['conv1_b'], np.float32).reshape(6, 1)
    w2 = np.asarray(params['conv2_w'], np.float32).transpose(2, 3, 0, 1)   # (kh,kw,co,ci)
    w2 = w2.reshape(25, 16, 6)
    b2 = np.asarray(params['conv2_b'], np.float32).reshape(16, 1)
    w1f = np.asarray(params['fc1_w'], np.float32).T.reshape(16, 49, 120)   # (c, h*7+w, out)
    b1f = np.asarray(params['fc1_b'], np.float32).reshape(1, 120)
    w2f = np.asarray(params['fc2_w'], np.float32).T                        # (120, 84)
    b2f = np.asarray(params['fc2_b'], np.float32).reshape(1, 84)
    w3f = np.asarray(params['fc3_w'], np.float32).T                        # (84, 10)
    b3f = np.asarray(params['fc3_b'], np.float32).reshape(1, 10)
    prep = dict(
        w1=w1, b1=b1,
        s1=_pool_scatter_matrix(M1, WP, 14, W2P, 2, A2_COLS),              # (896, 332)
        w2=w2, b2=b2,
        s2=_pool_scatter_matrix(M2, W2P, 7, 7, 0, 49),                     # (252, 49)
        w1f=w1f, b1f=b1f, w2f=w2f, b2f=b2f, w3f=w3f, b3f=b3f)
    return {k: jnp.asarray(v) for k, v in prep.items()}


_PREP_ORDER = ('w1', 'b1', 's1', 'w2', 'b2', 's2',
               'w1f', 'b1f', 'w2f', 'b2f', 'w3f', 'b3f')


# ----------------------------------- forward ----------------------------------

@jax.jit
def lenet_small_forward(prep, x):
    n = x.shape[0]
    # pad 28x28 -> 32x32 and flatten to the padded-grid row layout (tiny host op)
    xp = jnp.pad(x[:, 0], ((0, 0), (2, 2), (2, 2)))                        # (N, 32, 32)
    xf = jnp.pad(xp.reshape(n, WP * WP), ((0, 0), (0, X_COLS - WP * WP)))  # (N, 1032)
    xf = xf[:, None, :]                                                    # (N, 1, 1032)

    def const_spec(a):
        nd = a.ndim
        return pl.BlockSpec(a.shape, lambda i, _nd=nd: (0,) * _nd)

    in_specs = [pl.BlockSpec((1, 1, X_COLS), lambda i: (i, 0, 0))]
    in_specs += [const_spec(prep[k]) for k in _PREP_ORDER]

    out = pl.pallas_call(
        _lenet_kernel,
        out_shape=jax.ShapeDtypeStruct((n, 1, 10), jnp.float32),
        grid=(n,),
        in_specs=in_specs,
        out_specs=pl.BlockSpec((1, 1, 10), lambda i: (i, 0, 0)),
        scratch_shapes=[pltpu.VMEM((6, A2_COLS), jnp.float32)],
        compiler_params=pltpu.CompilerParams(
            dimension_semantics=("parallel",)),
    )(xf, *(prep[k] for k in _PREP_ORDER))
    return out[:, 0, :]


# -------------------------- parameters + pure-JAX reference -------------------

def init_params(key):
    def layer_init(k, fan_in, shape_w, shape_b):
        kw, kb = jax.random.split(k)
        bound = 1.0 / np.sqrt(fan_in)
        return (jax.random.uniform(kw, shape_w, jnp.float32, -bound, bound),
                jax.random.uniform(kb, shape_b, jnp.float32, -bound, bound))
    ks = jax.random.split(key, 5)
    p = {}
    p['conv1_w'], p['conv1_b'] = layer_init(ks[0], 1 * 25, (6, 1, 5, 5), (6,))
    p['conv2_w'], p['conv2_b'] = layer_init(ks[1], 6 * 25, (16, 6, 5, 5), (16,))
    p['fc1_w'], p['fc1_b'] = layer_init(ks[2], 784, (120, 784), (120,))
    p['fc2_w'], p['fc2_b'] = layer_init(ks[3], 120, (84, 120), (84,))
    p['fc3_w'], p['fc3_b'] = layer_init(ks[4], 84, (10, 84), (10,))
    return p


def reference_forward(params, x):
    hp = jax.lax.Precision.HIGHEST
    def conv(x, w, b):
        y = jax.lax.conv_general_dilated(
            x, w, window_strides=(1, 1), padding=((2, 2), (2, 2)),
            dimension_numbers=('NCHW', 'OIHW', 'NCHW'), precision=hp)
        return jax.nn.relu(y + b[None, :, None, None])
    def pool(a):
        N, C, Hh, Ww = a.shape
        return a.reshape(N, C, Hh // 2, 2, Ww // 2, 2).mean(axis=(3, 5))
    a = pool(conv(x, params['conv1_w'], params['conv1_b']))
    a = pool(conv(a, params['conv2_w'], params['conv2_b']))
    a = a.reshape(a.shape[0], -1)
    a = jax.nn.relu(jnp.dot(a, params['fc1_w'].T, precision=hp) + params['fc1_b'])
    a = jax.nn.relu(jnp.dot(a, params['fc2_w'].T, precision=hp) + params['fc2_b'])
    return jnp.dot(a, params['fc3_w'].T, precision=hp) + params['fc3_b']


if __name__ == "__main__":
    key = jax.random.PRNGKey(0)
    pkey, xkey = jax.random.split(key)
    params = init_params(pkey)
    prep = prepare_params(params)
    # Input is NCHW; Linear(784, 120) in the module implies 28x28 spatial.
    x = jax.random.normal(xkey, (2, 1, 28, 28), jnp.float32)

    out = jax.block_until_ready(lenet_small_forward(prep, x))
    assert out.shape == (2, 10) and out.dtype == jnp.float32

    ref = reference_forward(params, x)
    np.testing.assert_allclose(np.asarray(out), np.asarray(ref),
                               rtol=2e-2, atol=2e-2)
    print("KERNEL_OK")
</pallas_src>

<mosaic_0001>
module attributes {stable_mosaic.version = 11 : i64} {
  func.func @_lenet_kernel(%arg0: i32, %arg1: memref<1x1x1032xf32, #tpu.memory_space<vmem>>, %arg2: memref<6x25xf32, #tpu.memory_space<vmem>>, %arg3: memref<6x1xf32, #tpu.memory_space<vmem>>, %arg4: memref<896x332xf32, #tpu.memory_space<vmem>>, %arg5: memref<25x16x6xf32, #tpu.memory_space<vmem>>, %arg6: memref<16x1xf32, #tpu.memory_space<vmem>>, %arg7: memref<252x49xf32, #tpu.memory_space<vmem>>, %arg8: memref<16x49x120xf32, #tpu.memory_space<vmem>>, %arg9: memref<1x120xf32, #tpu.memory_space<vmem>>, %arg10: memref<120x84xf32, #tpu.memory_space<vmem>>, %arg11: memref<1x84xf32, #tpu.memory_space<vmem>>, %arg12: memref<84x10xf32, #tpu.memory_space<vmem>>, %arg13: memref<1x10xf32, #tpu.memory_space<vmem>>, %arg14: memref<1x1x10xf32, #tpu.memory_space<vmem>>, %arg15: memref<6x332xf32, #tpu.memory_space<vmem>>) attributes {dimension_semantics = [#tpu.dimension_semantics<parallel>], iteration_bounds = array<i64: 2>, scalar_prefetch = 0 : i64, scratch_operands = 1 : i64, tpu.core_type = #tpu.core_type<tc>, window_params = [{transform_indices = @transform_0, window_bounds = array<i64: 1, 1, 1032>}, {pipeline_mode = #tpu.pipeline_mode<synchronous>, transform_indices = @transform_1, window_bounds = array<i64: 6, 25>}, {pipeline_mode = #tpu.pipeline_mode<synchronous>, transform_indices = @transform_2, window_bounds = array<i64: 6, 1>}, {pipeline_mode = #tpu.pipeline_mode<synchronous>, transform_indices = @transform_3, window_bounds = array<i64: 896, 332>}, {pipeline_mode = #tpu.pipeline_mode<synchronous>, transform_indices = @transform_4, window_bounds = array<i64: 25, 16, 6>}, {pipeline_mode = #tpu.pipeline_mode<synchronous>, transform_indices = @transform_5, window_bounds = array<i64: 16, 1>}, {pipeline_mode = #tpu.pipeline_mode<synchronous>, transform_indices = @transform_6, window_bounds = array<i64: 252, 49>}, {pipeline_mode = #tpu.pipeline_mode<synchronous>, transform_indices = @transform_7, window_bounds = array<i64: 16, 49, 120>}, {pipeline_mode = #tpu.pipeline_mode<synchronous>, transform_indices = @transform_8, window_bounds = array<i64: 1, 120>}, {pipeline_mode = #tpu.pipeline_mode<synchronous>, transform_indices = @transform_9, window_bounds = array<i64: 120, 84>}, {pipeline_mode = #tpu.pipeline_mode<synchronous>, transform_indices = @transform_10, window_bounds = array<i64: 1, 84>}, {pipeline_mode = #tpu.pipeline_mode<synchronous>, transform_indices = @transform_11, window_bounds = array<i64: 84, 10>}, {pipeline_mode = #tpu.pipeline_mode<synchronous>, transform_indices = @transform_12, window_bounds = array<i64: 1, 10>}, {transform_indices = @transform_13, window_bounds = array<i64: 1, 1, 10>}]} {
    %cst = arith.constant 0.000000e+00 : f32
    %0 = vector.broadcast %cst : f32 to vector<6x896xf32>
    %c0 = arith.constant 0 : index
    %c0_0 = arith.constant 0 : index
    %1 = vector.load %arg2[%c0, %c0_0] : memref<6x25xf32, #tpu.memory_space<vmem>>, vector<6x1xf32>
    %c0_1 = arith.constant 0 : index
    %c0_2 = arith.constant 0 : index
    %c0_3 = arith.constant 0 : index
    %2 = vector.load %arg1[%c0_1, %c0_2, %c0_3] : memref<1x1x1032xf32, #tpu.memory_space<vmem>>, vector<1x1x896xf32>
    %3 = vector.shape_cast %2 : vector<1x1x896xf32> to vector<1x896xf32>
    %4 = vector.broadcast %1 : vector<6x1xf32> to vector<6x896xf32>
    %5 = vector.broadcast %3 : vector<1x896xf32> to vector<6x896xf32>
    %6 = arith.mulf %4, %5 : vector<6x896xf32>
    %7 = arith.addf %0, %6 : vector<6x896xf32>
    %c0_4 = arith.constant 0 : index
    %c1 = arith.constant 1 : index
    %8 = vector.load %arg2[%c0_4, %c1] : memref<6x25xf32, #tpu.memory_space<vmem>>, vector<6x1xf32>
    %c0_5 = arith.constant 0 : index
    %c0_6 = arith.constant 0 : index
    %c1_7 = arith.constant 1 : index
    %9 = vector.load %arg1[%c0_5, %c0_6, %c1_7] : memref<1x1x1032xf32, #tpu.memory_space<vmem>>, vector<1x1x896xf32>
    %10 = vector.shape_cast %9 : vector<1x1x896xf32> to vector<1x896xf32>
    %11 = vector.broadcast %8 : vector<6x1xf32> to vector<6x896xf32>
    %12 = vector.broadcast %10 : vector<1x896xf32> to vector<6x896xf32>
    %13 = arith.mulf %11, %12 : vector<6x896xf32>
    %14 = arith.addf %7, %13 : vector<6x896xf32>
    %c0_8 = arith.constant 0 : index
    %c2 = arith.constant 2 : index
    %15 = vector.load %arg2[%c0_8, %c2] : memref<6x25xf32, #tpu.memory_space<vmem>>, vector<6x1xf32>
    %c0_9 = arith.constant 0 : index
    %c0_10 = arith.constant 0 : index
    %c2_11 = arith.constant 2 : index
    %16 = vector.load %arg1[%c0_9, %c0_10, %c2_11] : memref<1x1x1032xf32, #tpu.memory_space<vmem>>, vector<1x1x896xf32>
    %17 = vector.shape_cast %16 : vector<1x1x896xf32> to vector<1x896xf32>
    %18 = vector.broadcast %15 : vector<6x1xf32> to vector<6x896xf32>
    %19 = vector.broadcast %17 : vector<1x896xf32> to vector<6x896xf32>
    %20 = arith.mulf %18, %19 : vector<6x896xf32>
    %21 = arith.addf %14, %20 : vector<6x896xf32>
    %c0_12 = arith.constant 0 : index
    %c3 = arith.constant 3 : index
    %22 = vector.load %arg2[%c0_12, %c3] : memref<6x25xf32, #tpu.memory_space<vmem>>, vector<6x1xf32>
    %c0_13 = arith.constant 0 : index
    %c0_14 = arith.constant 0 : index
    %c3_15 = arith.constant 3 : index
    %23 = vector.load %arg1[%c0_13, %c0_14, %c3_15] : memref<1x1x1032xf32, #tpu.memory_space<vmem>>, vector<1x1x896xf32>
    %24 = vector.shape_cast %23 : vector<1x1x896xf32> to vector<1x896xf32>
    %25 = vector.broadcast %22 : vector<6x1xf32> to vector<6x896xf32>
    %26 = vector.broadcast %24 : vector<1x896xf32> to vector<6x896xf32>
    %27 = arith.mulf %25, %26 : vector<6x896xf32>
    %28 = arith.addf %21, %27 : vector<6x896xf32>
    %c0_16 = arith.constant 0 : index
    %c4 = arith.constant 4 : index
    %29 = vector.load %arg2[%c0_16, %c4] : memref<6x25xf32, #tpu.memory_space<vmem>>, vector<6x1xf32>
    %c0_17 = arith.constant 0 : index
    %c0_18 = arith.constant 0 : index
    %c4_19 = arith.constant 4 : index
    %30 = vector.load %arg1[%c0_17, %c0_18, %c4_19] : memref<1x1x1032xf32, #tpu.memory_space<vmem>>, vector<1x1x896xf32>
    %31 = vector.shape_cast %30 : vector<1x1x896xf32> to vector<1x896xf32>
    %32 = vector.broadcast %29 : vector<6x1xf32> to vector<6x896xf32>
    %33 = vector.broadcast %31 : vector<1x896xf32> to vector<6x896xf32>
    %34 = arith.mulf %32, %33 : vector<6x896xf32>
    %35 = arith.addf %28, %34 : vector<6x896xf32>
    %c0_20 = arith.constant 0 : index
    %c5 = arith.constant 5 : index
    %36 = vector.load %arg2[%c0_20, %c5] : memref<6x25xf32, #tpu.memory_space<vmem>>, vector<6x1xf32>
    %c0_21 = arith.constant 0 : index
    %c0_22 = arith.constant 0 : index
    %c32 = arith.constant 32 : index
    %37 = vector.load %arg1[%c0_21, %c0_22, %c32] : memref<1x1x1032xf32, #tpu.memory_space<vmem>>, vector<1x1x896xf32>
    %38 = vector.shape_cast %37 : vector<1x1x896xf32> to vector<1x896xf32>
    %39 = vector.broadcast %36 : vector<6x1xf32> to vector<6x896xf32>
    %40 = vector.broadcast %38 : vector<1x896xf32> to vector<6x896xf32>
    %41 = arith.mulf %39, %40 : vector<6x896xf32>
    %42 = arith.addf %35, %41 : vector<6x896xf32>
    %c0_23 = arith.constant 0 : index
    %c6 = arith.constant 6 : index
    %43 = vector.load %arg2[%c0_23, %c6] : memref<6x25xf32, #tpu.memory_space<vmem>>, vector<6x1xf32>
    %c0_24 = arith.constant 0 : index
    %c0_25 = arith.constant 0 : index
    %c33 = arith.constant 33 : index
    %44 = vector.load %arg1[%c0_24, %c0_25, %c33] : memref<1x1x1032xf32, #tpu.memory_space<vmem>>, vector<1x1x896xf32>
    %45 = vector.shape_cast %44 : vector<1x1x896xf32> to vector<1x896xf32>
    %46 = vector.broadcast %43 : vector<6x1xf32> to vector<6x896xf32>
    %47 = vector.broadcast %45 : vector<1x896xf32> to vector<6x896xf32>
    %48 = arith.mulf %46, %47 : vector<6x896xf32>
    %49 = arith.addf %42, %48 : vector<6x896xf32>
    %c0_26 = arith.constant 0 : index
    %c7 = arith.constant 7 : index
    %50 = vector.load %arg2[%c0_26, %c7] : memref<6x25xf32, #tpu.memory_space<vmem>>, vector<6x1xf32>
    %c0_27 = arith.constant 0 : index
    %c0_28 = arith.constant 0 : index
    %c34 = arith.constant 34 : index
    %51 = vector.load %arg1[%c0_27, %c0_28, %c34] : memref<1x1x1032xf32, #tpu.memory_space<vmem>>, vector<1x1x896xf32>
    %52 = vector.shape_cast %51 : vector<1x1x896xf32> to vector<1x896xf32>
    %53 = vector.broadcast %50 : vector<6x1xf32> to vector<6x896xf32>
    %54 = vector.broadcast %52 : vector<1x896xf32> to vector<6x896xf32>
    %55 = arith.mulf %53, %54 : vector<6x896xf32>
    %56 = arith.addf %49, %55 : vector<6x896xf32>
    %c0_29 = arith.constant 0 : index
    %c8 = arith.constant 8 : index
    %57 = vector.load %arg2[%c0_29, %c8] : memref<6x25xf32, #tpu.memory_space<vmem>>, vector<6x1xf32>
    %c0_30 = arith.constant 0 : index
    %c0_31 = arith.constant 0 : index
    %c35 = arith.constant 35 : index
    %58 = vector.load %arg1[%c0_30, %c0_31, %c35] : memref<1x1x1032xf32, #tpu.memory_space<vmem>>, vector<1x1x896xf32>
    %59 = vector.shape_cast %58 : vector<1x1x896xf32> to vector<1x896xf32>
    %60 = vector.broadcast %57 : vector<6x1xf32> to vector<6x896xf32>
    %61 = vector.broadcast %59 : vector<1x896xf32> to vector<6x896xf32>
    %62 = arith.mulf %60, %61 : vector<6x896xf32>
    %63 = arith.addf %56, %62 : vector<6x896xf32>
    %c0_32 = arith.constant 0 : index
    %c9 = arith.constant 9 : index
    %64 = vector.load %arg2[%c0_32, %c9] : memref<6x25xf32, #tpu.memory_space<vmem>>, vector<6x1xf32>
    %c0_33 = arith.constant 0 : index
    %c0_34 = arith.constant 0 : index
    %c36 = arith.constant 36 : index
    %65 = vector.load %arg1[%c0_33, %c0_34, %c36] : memref<1x1x1032xf32, #tpu.memory_space<vmem>>, vector<1x1x896xf32>
    %66 = vector.shape_cast %65 : vector<1x1x896xf32> to vector<1x896xf32>
    %67 = vector.broadcast %64 : vector<6x1xf32> to vector<6x896xf32>
    %68 = vector.broadcast %66 : vector<1x896xf32> to vector<6x896xf32>
    %69 = arith.mulf %67, %68 : vector<6x896xf32>
    %70 = arith.addf %63, %69 : vector<6x896xf32>
    %c0_35 = arith.constant 0 : index
    %c10 = arith.constant 10 : index
    %71 = vector.load %arg2[%c0_35, %c10] : memref<6x25xf32, #tpu.memory_space<vmem>>, vector<6x1xf32>
    %c0_36 = arith.constant 0 : index
    %c0_37 = arith.constant 0 : index
    %c64 = arith.constant 64 : index
    %72 = vector.load %arg1[%c0_36, %c0_37, %c64] : memref<1x1x1032xf32, #tpu.memory_space<vmem>>, vector<1x1x896xf32>
    %73 = vector.shape_cast %72 : vector<1x1x896xf32> to vector<1x896xf32>
    %74 = vector.broadcast %71 : vector<6x1xf32> to vector<6x896xf32>
    %75 = vector.broadcast %73 : vector<1x896xf32> to vector<6x896xf32>
    %76 = arith.mulf %74, %75 : vector<6x896xf32>
    %77 = arith.addf %70, %76 : vector<6x896xf32>
    %c0_38 = arith.constant 0 : index
    %c11 = arith.constant 11 : index
    %78 = vector.load %arg2[%c0_38, %c11] : memref<6x25xf32, #tpu.memory_space<vmem>>, vector<6x1xf32>
    %c0_39 = arith.constant 0 : index
    %c0_40 = arith.constant 0 : index
    %c65 = arith.constant 65 : index
    %79 = vector.load %arg1[%c0_39, %c0_40, %c65] : memref<1x1x1032xf32, #tpu.memory_space<vmem>>, vector<1x1x896xf32>
    %80 = vector.shape_cast %79 : vector<1x1x896xf32> to vector<1x896xf32>
    %81 = vector.broadcast %78 : vector<6x1xf32> to vector<6x896xf32>
    %82 = vector.broadcast %80 : vector<1x896xf32> to vector<6x896xf32>
    %83 = arith.mulf %81, %82 : vector<6x896xf32>
    %84 = arith.addf %77, %83 : vector<6x896xf32>
    %c0_41 = arith.constant 0 : index
    %c12 = arith.constant 12 : index
    %85 = vector.load %arg2[%c0_41, %c12] : memref<6x25xf32, #tpu.memory_space<vmem>>, vector<6x1xf32>
    %c0_42 = arith.constant 0 : index
    %c0_43 = arith.constant 0 : index
    %c66 = arith.constant 66 : index
    %86 = vector.load %arg1[%c0_42, %c0_43, %c66] : memref<1x1x1032xf32, #tpu.memory_space<vmem>>, vector<1x1x896xf32>
    %87 = vector.shape_cast %86 : vector<1x1x896xf32> to vector<1x896xf32>
    %88 = vector.broadcast %85 : vector<6x1xf32> to vector<6x896xf32>
    %89 = vector.broadcast %87 : vector<1x896xf32> to vector<6x896xf32>
    %90 = arith.mulf %88, %89 : vector<6x896xf32>
    %91 = arith.addf %84, %90 : vector<6x896xf32>
    %c0_44 = arith.constant 0 : index
    %c13 = arith.constant 13 : index
    %92 = vector.load %arg2[%c0_44, %c13] : memref<6x25xf32, #tpu.memory_space<vmem>>, vector<6x1xf32>
    %c0_45 = arith.constant 0 : index
    %c0_46 = arith.constant 0 : index
    %c67 = arith.constant 67 : index
    %93 = vector.load %arg1[%c0_45, %c0_46, %c67] : memref<1x1x1032xf32, #tpu.memory_space<vmem>>, vector<1x1x896xf32>
    %94 = vector.shape_cast %93 : vector<1x1x896xf32> to vector<1x896xf32>
    %95 = vector.broadcast %92 : vector<6x1xf32> to vector<6x896xf32>
    %96 = vector.broadcast %94 : vector<1x896xf32> to vector<6x896xf32>
    %97 = arith.mulf %95, %96 : vector<6x896xf32>
    %98 = arith.addf %91, %97 : vector<6x896xf32>
    %c0_47 = arith.constant 0 : index
    %c14 = arith.constant 14 : index
    %99 = vector.load %arg2[%c0_47, %c14] : memref<6x25xf32, #tpu.memory_space<vmem>>, vector<6x1xf32>
    %c0_48 = arith.constant 0 : index
    %c0_49 = arith.constant 0 : index
    %c68 = arith.constant 68 : index
    %100 = vector.load %arg1[%c0_48, %c0_49, %c68] : memref<1x1x1032xf32, #tpu.memory_space<vmem>>, vector<1x1x896xf32>
    %101 = vector.shape_cast %100 : vector<1x1x896xf32> to vector<1x896xf32>
    %102 = vector.broadcast %99 : vector<6x1xf32> to vector<6x896xf32>
    %103 = vector.broadcast %101 : vector<1x896xf32> to vector<6x896xf32>
    %104 = arith.mulf %102, %103 : vector<6x896xf32>
    %105 = arith.addf %98, %104 : vector<6x896xf32>
    %c0_50 = arith.constant 0 : index
    %c15 = arith.constant 15 : index
    %106 = vector.load %arg2[%c0_50, %c15] : memref<6x25xf32, #tpu.memory_space<vmem>>, vector<6x1xf32>
    %c0_51 = arith.constant 0 : index
    %c0_52 = arith.constant 0 : index
    %c96 = arith.constant 96 : index
    %107 = vector.load %arg1[%c0_51, %c0_52, %c96] : memref<1x1x1032xf32, #tpu.memory_space<vmem>>, vector<1x1x896xf32>
    %108 = vector.shape_cast %107 : vector<1x1x896xf32> to vector<1x896xf32>
    %109 = vector.broadcast %106 : vector<6x1xf32> to vector<6x896xf32>
    %110 = vector.broadcast %108 : vector<1x896xf32> to vector<6x896xf32>
    %111 = arith.mulf %109, %110 : vector<6x896xf32>
    %112 = arith.addf %105, %111 : vector<6x896xf32>
    %c0_53 = arith.constant 0 : index
    %c16 = arith.constant 16 : index
    %113 = vector.load %arg2[%c0_53, %c16] : memref<6x25xf32, #tpu.memory_space<vmem>>, vector<6x1xf32>
    %c0_54 = arith.constant 0 : index
    %c0_55 = arith.constant 0 : index
    %c97 = arith.constant 97 : index
    %114 = vector.load %arg1[%c0_54, %c0_55, %c97] : memref<1x1x1032xf32, #tpu.memory_space<vmem>>, vector<1x1x896xf32>
    %115 = vector.shape_cast %114 : vector<1x1x896xf32> to vector<1x896xf32>
    %116 = vector.broadcast %113 : vector<6x1xf32> to vector<6x896xf32>
    %117 = vector.broadcast %115 : vector<1x896xf32> to vector<6x896xf32>
    %118 = arith.mulf %116, %117 : vector<6x896xf32>
    %119 = arith.addf %112, %118 : vector<6x896xf32>
    %c0_56 = arith.constant 0 : index
    %c17 = arith.constant 17 : index
    %120 = vector.load %arg2[%c0_56, %c17] : memref<6x25xf32, #tpu.memory_space<vmem>>, vector<6x1xf32>
    %c0_57 = arith.constant 0 : index
    %c0_58 = arith.constant 0 : index
    %c98 = arith.constant 98 : index
    %121 = vector.load %arg1[%c0_57, %c0_58, %c98] : memref<1x1x1032xf32, #tpu.memory_space<vmem>>, vector<1x1x896xf32>
    %122 = vector.shape_cast %121 : vector<1x1x896xf32> to vector<1x896xf32>
    %123 = vector.broadcast %120 : vector<6x1xf32> to vector<6x896xf32>
    %124 = vector.broadcast %122 : vector<1x896xf32> to vector<6x896xf32>
    %125 = arith.mulf %123, %124 : vector<6x896xf32>
    %126 = arith.addf %119, %125 : vector<6x896xf32>
    %c0_59 = arith.constant 0 : index
    %c18 = arith.constant 18 : index
    %127 = vector.load %arg2[%c0_59, %c18] : memref<6x25xf32, #tpu.memory_space<vmem>>, vector<6x1xf32>
    %c0_60 = arith.constant 0 : index
    %c0_61 = arith.constant 0 : index
    %c99 = arith.constant 99 : index
    %128 = vector.load %arg1[%c0_60, %c0_61, %c99] : memref<1x1x1032xf32, #tpu.memory_space<vmem>>, vector<1x1x896xf32>
    %129 = vector.shape_cast %128 : vector<1x1x896xf32> to vector<1x896xf32>
    %130 = vector.broadcast %127 : vector<6x1xf32> to vector<6x896xf32>
    %131 = vector.broadcast %129 : vector<1x896xf32> to vector<6x896xf32>
    %132 = arith.mulf %130, %131 : vector<6x896xf32>
    %133 = arith.addf %126, %132 : vector<6x896xf32>
    %c0_62 = arith.constant 0 : index
    %c19 = arith.constant 19 : index
    %134 = vector.load %arg2[%c0_62, %c19] : memref<6x25xf32, #tpu.memory_space<vmem>>, vector<6x1xf32>
    %c0_63 = arith.constant 0 : index
    %c0_64 = arith.constant 0 : index
    %c100 = arith.constant 100 : index
    %135 = vector.load %arg1[%c0_63, %c0_64, %c100] : memref<1x1x1032xf32, #tpu.memory_space<vmem>>, vector<1x1x896xf32>
    %136 = vector.shape_cast %135 : vector<1x1x896xf32> to vector<1x896xf32>
    %137 = vector.broadcast %134 : vector<6x1xf32> to vector<6x896xf32>
    %138 = vector.broadcast %136 : vector<1x896xf32> to vector<6x896xf32>
    %139 = arith.mulf %137, %138 : vector<6x896xf32>
    %140 = arith.addf %133, %139 : vector<6x896xf32>
    %c0_65 = arith.constant 0 : index
    %c20 = arith.constant 20 : index
    %141 = vector.load %arg2[%c0_65, %c20] : memref<6x25xf32, #tpu.memory_space<vmem>>, vector<6x1xf32>
    %c0_66 = arith.constant 0 : index
    %c0_67 = arith.constant 0 : index
    %c128 = arith.constant 128 : index
    %142 = vector.load %arg1[%c0_66, %c0_67, %c128] : memref<1x1x1032xf32, #tpu.memory_space<vmem>>, vector<1x1x896xf32>
    %143 = vector.shape_cast %142 : vector<1x1x896xf32> to vector<1x896xf32>
    %144 = vector.broadcast %141 : vector<6x1xf32> to vector<6x896xf32>
    %145 = vector.broadcast %143 : vector<1x896xf32> to vector<6x896xf32>
    %146 = arith.mulf %144, %145 : vector<6x896xf32>
    %147 = arith.addf %140, %146 : vector<6x896xf32>
    %c0_68 = arith.constant 0 : index
    %c21 = arith.constant 21 : index
    %148 = vector.load %arg2[%c0_68, %c21] : memref<6x25xf32, #tpu.memory_space<vmem>>, vector<6x1xf32>
    %c0_69 = arith.constant 0 : index
    %c0_70 = arith.constant 0 : index
    %c129 = arith.constant 129 : index
    %149 = vector.load %arg1[%c0_69, %c0_70, %c129] : memref<1x1x1032xf32, #tpu.memory_space<vmem>>, vector<1x1x896xf32>
    %150 = vector.shape_cast %149 : vector<1x1x896xf32> to vector<1x896xf32>
    %151 = vector.broadcast %148 : vector<6x1xf32> to vector<6x896xf32>
    %152 = vector.broadcast %150 : vector<1x896xf32> to vector<6x896xf32>
    %153 = arith.mulf %151, %152 : vector<6x896xf32>
    %154 = arith.addf %147, %153 : vector<6x896xf32>
    %c0_71 = arith.constant 0 : index
    %c22 = arith.constant 22 : index
    %155 = vector.load %arg2[%c0_71, %c22] : memref<6x25xf32, #tpu.memory_space<vmem>>, vector<6x1xf32>
    %c0_72 = arith.constant 0 : index
    %c0_73 = arith.constant 0 : index
    %c130 = arith.constant 130 : index
    %156 = vector.load %arg1[%c0_72, %c0_73, %c130] : memref<1x1x1032xf32, #tpu.memory_space<vmem>>, vector<1x1x896xf32>
    %157 = vector.shape_cast %156 : vector<1x1x896xf32> to vector<1x896xf32>
    %158 = vector.broadcast %155 : vector<6x1xf32> to vector<6x896xf32>
    %159 = vector.broadcast %157 : vector<1x896xf32> to vector<6x896xf32>
    %160 = arith.mulf %158, %159 : vector<6x896xf32>
    %161 = arith.addf %154, %160 : vector<6x896xf32>
    %c0_74 = arith.constant 0 : index
    %c23 = arith.constant 23 : index
    %162 = vector.load %arg2[%c0_74, %c23] : memref<6x25xf32, #tpu.memory_space<vmem>>, vector<6x1xf32>
    %c0_75 = arith.constant 0 : index
    %c0_76 = arith.constant 0 : index
    %c131 = arith.constant 131 : index
    %163 = vector.load %arg1[%c0_75, %c0_76, %c131] : memref<1x1x1032xf32, #tpu.memory_space<vmem>>, vector<1x1x896xf32>
    %164 = vector.shape_cast %163 : vector<1x1x896xf32> to vector<1x896xf32>
    %165 = vector.broadcast %162 : vector<6x1xf32> to vector<6x896xf32>
    %166 = vector.broadcast %164 : vector<1x896xf32> to vector<6x896xf32>
    %167 = arith.mulf %165, %166 : vector<6x896xf32>
    %168 = arith.addf %161, %167 : vector<6x896xf32>
    %c0_77 = arith.constant 0 : index
    %c24 = arith.constant 24 : index
    %169 = vector.load %arg2[%c0_77, %c24] : memref<6x25xf32, #tpu.memory_space<vmem>>, vector<6x1xf32>
    %c0_78 = arith.constant 0 : index
    %c0_79 = arith.constant 0 : index
    %c132 = arith.constant 132 : index
    %170 = vector.load %arg1[%c0_78, %c0_79, %c132] : memref<1x1x1032xf32, #tpu.memory_space<vmem>>, vector<1x1x896xf32>
    %171 = vector.shape_cast %170 : vector<1x1x896xf32> to vector<1x896xf32>
    %172 = vector.broadcast %169 : vector<6x1xf32> to vector<6x896xf32>
    %173 = vector.broadcast %171 : vector<1x896xf32> to vector<6x896xf32>
    %174 = arith.mulf %172, %173 : vector<6x896xf32>
    %175 = arith.addf %168, %174 : vector<6x896xf32>
    %c0_80 = arith.constant 0 : index
    %c0_81 = arith.constant 0 : index
    %176 = vector.load %arg3[%c0_80, %c0_81] : memref<6x1xf32, #tpu.memory_space<vmem>>, vector<6x1xf32>
    %177 = vector.broadcast %176 : vector<6x1xf32> to vector<6x896xf32>
    %178 = arith.addf %175, %177 : vector<6x896xf32>
    %cst_82 = arith.constant 0.000000e+00 : f32
    %179 = vector.broadcast %cst_82 : f32 to vector<6x896xf32>
    %180 = arith.maximumf %178, %179 : vector<6x896xf32>
    %c0_83 = arith.constant 0 : index
    %c0_84 = arith.constant 0 : index
    %181 = vector.load %arg4[%c0_83, %c0_84] : memref<896x332xf32, #tpu.memory_space<vmem>>, vector<896x332xf32>
    %cst_85 = arith.constant dense<0.000000e+00> : vector<6x332xf32>
    %182 = tpu.matmul %180, %181, %cst_85 {dimension_numbers = #tpu.dot_dimension_numbers<[1], [0], [0], [1], [0, 0, 1, 1], [], []>} : vector<6x896xf32>, vector<896x332xf32>, vector<6x332xf32> -> vector<6x332xf32>
    %c0_86 = arith.constant 0 : index
    %c0_87 = arith.constant 0 : index
    %183 = vector.load %arg15[%c0_86, %c0_87] : memref<6x332xf32, #tpu.memory_space<vmem>>, vector<6x332xf32>
    tpu.vector_store %arg15[%c0_86, %c0_87], %182 {strides = array<i32>} : memref<6x332xf32, #tpu.memory_space<vmem>>, vector<6x332xf32>,
    %cst_88 = arith.constant 0.000000e+00 : f32
    %184 = vector.broadcast %cst_88 : f32 to vector<16x252xf32>
    %c0_89 = arith.constant 0 : index
    %c0_90 = arith.constant 0 : index
    %c0_91 = arith.constant 0 : index
    %185 = vector.load %arg5[%c0_89, %c0_90, %c0_91] : memref<25x16x6xf32, #tpu.memory_space<vmem>>, vector<1x16x6xf32>
    %186 = vector.shape_cast %185 : vector<1x16x6xf32> to vector<16x6xf32>
    %c0_92 = arith.constant 0 : index
    %c0_93 = arith.constant 0 : index
    %187 = vector.load %arg15[%c0_92, %c0_93] : memref<6x332xf32, #tpu.memory_space<vmem>>, vector<6x252xf32>
    %cst_94 = arith.constant dense<0.000000e+00> : vector<16x252xf32>
    %188 = tpu.matmul %186, %187, %cst_94 {dimension_numbers = #tpu.dot_dimension_numbers<[1], [0], [0], [1], [0, 0, 1, 1], [], []>} : vector<16x6xf32>, vector<6x252xf32>, vector<16x252xf32> -> vector<16x252xf32>
    %189 = arith.addf %184, %188 : vector<16x252xf32>
    %c1_95 = arith.constant 1 : index
    %c0_96 = arith.constant 0 : index
    %c0_97 = arith.constant 0 : index
    %190 = vector.load %arg5[%c1_95, %c0_96, %c0_97] : memref<25x16x6xf32, #tpu.memory_space<vmem>>, vector<1x16x6xf32>
    %191 = vector.shape_cast %190 : vector<1x16x6xf32> to vector<16x6xf32>
    %c0_98 = arith.constant 0 : index
    %c1_99 = arith.constant 1 : index
    %192 = vector.load %arg15[%c0_98, %c1_99] : memref<6x332xf32, #tpu.memory_space<vmem>>, vector<6x252xf32>
    %cst_100 = arith.constant dense<0.000000e+00> : vector<16x252xf32>
    %193 = tpu.matmul %191, %192, %cst_100 {dimension_numbers = #tpu.dot_dimension_numbers<[1], [0], [0], [1], [0, 0, 1, 1], [], []>} : vector<16x6xf32>, vector<6x252xf32>, vector<16x252xf32> -> vector<16x252xf32>
    %194 = arith.addf %189, %193 : vector<16x252xf32>
    %c2_101 = arith.constant 2 : index
    %c0_102 = arith.constant 0 : index
    %c0_103 = arith.constant 0 : index
    %195 = vector.load %arg5[%c2_101, %c0_102, %c0_103] : memref<25x16x6xf32, #tpu.memory_space<vmem>>, vector<1x16x6xf32>
    %196 = vector.shape_cast %195 : vector<1x16x6xf32> to vector<16x6xf32>
    %c0_104 = arith.constant 0 : index
    %c2_105 = arith.constant 2 : index
    %197 = vector.load %arg15[%c0_104, %c2_105] : memref<6x332xf32, #tpu.memory_space<vmem>>, vector<6x252xf32>
    %cst_106 = arith.constant dense<0.000000e+00> : vector<16x252xf32>
    %198 = tpu.matmul %196, %197, %cst_106 {dimension_numbers = #tpu.dot_dimension_numbers<[1], [0], [0], [1], [0, 0, 1, 1], [], []>} : vector<16x6xf32>, vector<6x252xf32>, vector<16x252xf32> -> vector<16x252xf32>
    %199 = arith.addf %194, %198 : vector<16x252xf32>
    %c3_107 = arith.constant 3 : index
    %c0_108 = arith.constant 0 : index
    %c0_109 = arith.constant 0 : index
    %200 = vector.load %arg5[%c3_107, %c0_108, %c0_109] : memref<25x16x6xf32, #tpu.memory_space<vmem>>, vector<1x16x6xf32>
    %201 = vector.shape_cast %200 : vector<1x16x6xf32> to vector<16x6xf32>
    %c0_110 = arith.constant 0 : index
    %c3_111 = arith.constant 3 : index
    %202 = vector.load %arg15[%c0_110, %c3_111] : memref<6x332xf32, #tpu.memory_space<vmem>>, vector<6x252xf32>
    %cst_112 = arith.constant dense<0.000000e+00> : vector<16x252xf32>
    %203 = tpu.matmul %201, %202, %cst_112 {dimension_numbers = #tpu.dot_dimension_numbers<[1], [0], [0], [1], [0, 0, 1, 1], [], []>} : vector<16x6xf32>, vector<6x252xf32>, vector<16x252xf32> -> vector<16x252xf32>
    %204 = arith.addf %199, %203 : vector<16x252xf32>
    %c4_113 = arith.constant 4 : index
    %c0_114 = arith.constant 0 : index
    %c0_115 = arith.constant 0 : index
    %205 = vector.load %arg5[%c4_113, %c0_114, %c0_115] : memref<25x16x6xf32, #tpu.memory_space<vmem>>, vector<1x16x6xf32>
    %206 = vector.shape_cast %205 : vector<1x16x6xf32> to vector<16x6xf32>
    %c0_116 = arith.constant 0 : index
    %c4_117 = arith.constant 4 : index
    %207 = vector.load %arg15[%c0_116, %c4_117] : memref<6x332xf32, #tpu.memory_space<vmem>>, vector<6x252xf32>
    %cst_118 = arith.constant dense<0.000000e+00> : vector<16x252xf32>
    %208 = tpu.matmul %206, %207, %cst_118 {dimension_numbers = #tpu.dot_dimension_numbers<[1], [0], [0], [1], [0, 0, 1, 1], [], []>} : vector<16x6xf32>, vector<6x252xf32>, vector<16x252xf32> -> vector<16x252xf32>
    %209 = arith.addf %204, %208 : vector<16x252xf32>
    %c5_119 = arith.constant 5 : index
    %c0_120 = arith.constant 0 : index
    %c0_121 = arith.constant 0 : index
    %210 = vector.load %arg5[%c5_119, %c0_120, %c0_121] : memref<25x16x6xf32, #tpu.memory_space<vmem>>, vector<1x16x6xf32>
    %211 = vector.shape_cast %210 : vector<1x16x6xf32> to vector<16x6xf32>
    %c0_122 = arith.constant 0 : index
    %c18_123 = arith.constant 18 : index
    %212 = vector.load %arg15[%c0_122, %c18_123] : memref<6x332xf32, #tpu.memory_space<vmem>>, vector<6x252xf32>
    %cst_124 = arith.constant dense<0.000000e+00> : vector<16x252xf32>
    %213 = tpu.matmul %211, %212, %cst_124 {dimension_numbers = #tpu.dot_dimension_numbers<[1], [0], [0], [1], [0, 0, 1, 1], [], []>} : vector<16x6xf32>, vector<6x252xf32>, vector<16x252xf32> -> vector<16x252xf32>
    %214 = arith.addf %209, %213 : vector<16x252xf32>
    %c6_125 = arith.constant 6 : index
    %c0_126 = arith.constant 0 : index
    %c0_127 = arith.constant 0 : index
    %215 = vector.load %arg5[%c6_125, %c0_126, %c0_127] : memref<25x16x6xf32, #tpu.memory_space<vmem>>, vector<1x16x6xf32>
    %216 = vector.shape_cast %215 : vector<1x16x6xf32> to vector<16x6xf32>
    %c0_128 = arith.constant 0 : index
    %c19_129 = arith.constant 19 : index
    %217 = vector.load %arg15[%c0_128, %c19_129] : memref<6x332xf32, #tpu.memory_space<vmem>>, vector<6x252xf32>
    %cst_130 = arith.constant dense<0.000000e+00> : vector<16x252xf32>
    %218 = tpu.matmul %216, %217, %cst_130 {dimension_numbers = #tpu.dot_dimension_numbers<[1], [0], [0], [1], [0, 0, 1, 1], [], []>} : vector<16x6xf32>, vector<6x252xf32>, vector<16x252xf32> -> vector<16x252xf32>
    %219 = arith.addf %214, %218 : vector<16x252xf32>
    %c7_131 = arith.constant 7 : index
    %c0_132 = arith.constant 0 : index
    %c0_133 = arith.constant 0 : index
    %220 = vector.load %arg5[%c7_131, %c0_132, %c0_133] : memref<25x16x6xf32, #tpu.memory_space<vmem>>, vector<1x16x6xf32>
    %221 = vector.shape_cast %220 : vector<1x16x6xf32> to vector<16x6xf32>
    %c0_134 = arith.constant 0 : index
    %c20_135 = arith.constant 20 : index
    %222 = vector.load %arg15[%c0_134, %c20_135] : memref<6x332xf32, #tpu.memory_space<vmem>>, vector<6x252xf32>
    %cst_136 = arith.constant dense<0.000000e+00> : vector<16x252xf32>
    %223 = tpu.matmul %221, %222, %cst_136 {dimension_numbers = #tpu.dot_dimension_numbers<[1], [0], [0], [1], [0, 0, 1, 1], [], []>} : vector<16x6xf32>, vector<6x252xf32>, vector<16x252xf32> -> vector<16x252xf32>
    %224 = arith.addf %219, %223 : vector<16x252xf32>
    %c8_137 = arith.constant 8 : index
    %c0_138 = arith.constant 0 : index
    %c0_139 = arith.constant 0 : index
    %225 = vector.load %arg5[%c8_137, %c0_138, %c0_139] : memref<25x16x6xf32, #tpu.memory_space<vmem>>, vector<1x16x6xf32>
    %226 = vector.shape_cast %225 : vector<1x16x6xf32> to vector<16x6xf32>
    %c0_140 = arith.constant 0 : index
    %c21_141 = arith.constant 21 : index
    %227 = vector.load %arg15[%c0_140, %c21_141] : memref<6x332xf32, #tpu.memory_space<vmem>>, vector<6x252xf32>
    %cst_142 = arith.constant dense<0.000000e+00> : vector<16x252xf32>
    %228 = tpu.matmul %226, %227, %cst_142 {dimension_numbers = #tpu.dot_dimension_numbers<[1], [0], [0], [1], [0, 0, 1, 1], [], []>} : vector<16x6xf32>, vector<6x252xf32>, vector<16x252xf32> -> vector<16x252xf32>
    %229 = arith.addf %224, %228 : vector<16x252xf32>
    %c9_143 = arith.constant 9 : index
    %c0_144 = arith.constant 0 : index
    %c0_145 = arith.constant 0 : index
    %230 = vector.load %arg5[%c9_143, %c0_144, %c0_145] : memref<25x16x6xf32, #tpu.memory_space<vmem>>, vector<1x16x6xf32>
    %231 = vector.shape_cast %230 : vector<1x16x6xf32> to vector<16x6xf32>
    %c0_146 = arith.constant 0 : index
    %c22_147 = arith.constant 22 : index
    %232 = vector.load %arg15[%c0_146, %c22_147] : memref<6x332xf32, #tpu.memory_space<vmem>>, vector<6x252xf32>
    %cst_148 = arith.constant dense<0.000000e+00> : vector<16x252xf32>
    %233 = tpu.matmul %231, %232, %cst_148 {dimension_numbers = #tpu.dot_dimension_numbers<[1], [0], [0], [1], [0, 0, 1, 1], [], []>} : vector<16x6xf32>, vector<6x252xf32>, vector<16x252xf32> -> vector<16x252xf32>
    %234 = arith.addf %229, %233 : vector<16x252xf32>
    %c10_149 = arith.constant 10 : index
    %c0_150 = arith.constant 0 : index
    %c0_151 = arith.constant 0 : index
    %235 = vector.load %arg5[%c10_149, %c0_150, %c0_151] : memref<25x16x6xf32, #tpu.memory_space<vmem>>, vector<1x16x6xf32>
    %236 = vector.shape_cast %235 : vector<1x16x6xf32> to vector<16x6xf32>
    %c0_152 = arith.constant 0 : index
    %c36_153 = arith.constant 36 : index
    %237 = vector.load %arg15[%c0_152, %c36_153] : memref<6x332xf32, #tpu.memory_space<vmem>>, vector<6x252xf32>
    %cst_154 = arith.constant dense<0.000000e+00> : vector<16x252xf32>
    %238 = tpu.matmul %236, %237, %cst_154 {dimension_numbers = #tpu.dot_dimension_numbers<[1], [0], [0], [1], [0, 0, 1, 1], [], []>} : vector<16x6xf32>, vector<6x252xf32>, vector<16x252xf32> -> vector<16x252xf32>
    %239 = arith.addf %234, %238 : vector<16x252xf32>
    %c11_155 = arith.constant 11 : index
    %c0_156 = arith.constant 0 : index
    %c0_157 = arith.constant 0 : index
    %240 = vector.load %arg5[%c11_155, %c0_156, %c0_157] : memref<25x16x6xf32, #tpu.memory_space<vmem>>, vector<1x16x6xf32>
    %241 = vector.shape_cast %240 : vector<1x16x6xf32> to vector<16x6xf32>
    %c0_158 = arith.constant 0 : index
    %c37 = arith.constant 37 : index
    %242 = vector.load %arg15[%c0_158, %c37] : memref<6x332xf32, #tpu.memory_space<vmem>>, vector<6x252xf32>
    %cst_159 = arith.constant dense<0.000000e+00> : vector<16x252xf32>
    %243 = tpu.matmul %241, %242, %cst_159 {dimension_numbers = #tpu.dot_dimension_numbers<[1], [0], [0], [1], [0, 0, 1, 1], [], []>} : vector<16x6xf32>, vector<6x252xf32>, vector<16x252xf32> -> vector<16x252xf32>
    %244 = arith.addf %239, %243 : vector<16x252xf32>
    %c12_160 = arith.constant 12 : index
    %c0_161 = arith.constant 0 : index
    %c0_162 = arith.constant 0 : index
    %245 = vector.load %arg5[%c12_160, %c0_161, %c0_162] : memref<25x16x6xf32, #tpu.memory_space<vmem>>, vector<1x16x6xf32>
    %246 = vector.shape_cast %245 : vector<1x16x6xf32> to vector<16x6xf32>
    %c0_163 = arith.constant 0 : index
    %c38 = arith.constant 38 : index
    %247 = vector.load %arg15[%c0_163, %c38] : memref<6x332xf32, #tpu.memory_space<vmem>>, vector<6x252xf32>
    %cst_164 = arith.constant dense<0.000000e+00> : vector<16x252xf32>
    %248 = tpu.matmul %246, %247, %cst_164 {dimension_numbers = #tpu.dot_dimension_numbers<[1], [0], [0], [1], [0, 0, 1, 1], [], []>} : vector<16x6xf32>, vector<6x252xf32>, vector<16x252xf32> -> vector<16x252xf32>
    %249 = arith.addf %244, %248 : vector<16x252xf32>
    %c13_165 = arith.constant 13 : index
    %c0_166 = arith.constant 0 : index
    %c0_167 = arith.constant 0 : index
    %250 = vector.load %arg5[%c13_165, %c0_166, %c0_167] : memref<25x16x6xf32, #tpu.memory_space<vmem>>, vector<1x16x6xf32>
    %251 = vector.shape_cast %250 : vector<1x16x6xf32> to vector<16x6xf32>
    %c0_168 = arith.constant 0 : index
    %c39 = arith.constant 39 : index
    %252 = vector.load %arg15[%c0_168, %c39] : memref<6x332xf32, #tpu.memory_space<vmem>>, vector<6x252xf32>
    %cst_169 = arith.constant dense<0.000000e+00> : vector<16x252xf32>
    %253 = tpu.matmul %251, %252, %cst_169 {dimension_numbers = #tpu.dot_dimension_numbers<[1], [0], [0], [1], [0, 0, 1, 1], [], []>} : vector<16x6xf32>, vector<6x252xf32>, vector<16x252xf32> -> vector<16x252xf32>
    %254 = arith.addf %249, %253 : vector<16x252xf32>
    %c14_170 = arith.constant 14 : index
    %c0_171 = arith.constant 0 : index
    %c0_172 = arith.constant 0 : index
    %255 = vector.load %arg5[%c14_170, %c0_171, %c0_172] : memref<25x16x6xf32, #tpu.memory_space<vmem>>, vector<1x16x6xf32>
    %256 = vector.shape_cast %255 : vector<1x16x6xf32> to vector<16x6xf32>
    %c0_173 = arith.constant 0 : index
    %c40 = arith.constant 40 : index
    %257 = vector.load %arg15[%c0_173, %c40] : memref<6x332xf32, #tpu.memory_space<vmem>>, vector<6x252xf32>
    %cst_174 = arith.constant dense<0.000000e+00> : vector<16x252xf32>
    %258 = tpu.matmul %256, %257, %cst_174 {dimension_numbers = #tpu.dot_dimension_numbers<[1], [0], [0], [1], [0, 0, 1, 1], [], []>} : vector<16x6xf32>, vector<6x252xf32>, vector<16x252xf32> -> vector<16x252xf32>
    %259 = arith.addf %254, %258 : vector<16x252xf32>
    %c15_175 = arith.constant 15 : index
    %c0_176 = arith.constant 0 : index
    %c0_177 = arith.constant 0 : index
    %260 = vector.load %arg5[%c15_175, %c0_176, %c0_177] : memref<25x16x6xf32, #tpu.memory_space<vmem>>, vector<1x16x6xf32>
    %261 = vector.shape_cast %260 : vector<1x16x6xf32> to vector<16x6xf32>
    %c0_178 = arith.constant 0 : index
    %c54 = arith.constant 54 : index
    %262 = vector.load %arg15[%c0_178, %c54] : memref<6x332xf32, #tpu.memory_space<vmem>>, vector<6x252xf32>
    %cst_179 = arith.constant dense<0.000000e+00> : vector<16x252xf32>
    %263 = tpu.matmul %261, %262, %cst_179 {dimension_numbers = #tpu.dot_dimension_numbers<[1], [0], [0], [1], [0, 0, 1, 1], [], []>} : vector<16x6xf32>, vector<6x252xf32>, vector<16x252xf32> -> vector<16x252xf32>
    %264 = arith.addf %259, %263 : vector<16x252xf32>
    %c16_180 = arith.constant 16 : index
    %c0_181 = arith.constant 0 : index
    %c0_182 = arith.constant 0 : index
    %265 = vector.load %arg5[%c16_180, %c0_181, %c0_182] : memref<25x16x6xf32, #tpu.memory_space<vmem>>, vector<1x16x6xf32>
    %266 = vector.shape_cast %265 : vector<1x16x6xf32> to vector<16x6xf32>
    %c0_183 = arith.constant 0 : index
    %c55 = arith.constant 55 : index
    %267 = vector.load %arg15[%c0_183, %c55] : memref<6x332xf32, #tpu.memory_space<vmem>>, vector<6x252xf32>
    %cst_184 = arith.constant dense<0.000000e+00> : vector<16x252xf32>
    %268 = tpu.matmul %266, %267, %cst_184 {dimension_numbers = #tpu.dot_dimension_numbers<[1], [0], [0], [1], [0, 0, 1, 1], [], []>} : vector<16x6xf32>, vector<6x252xf32>, vector<16x252xf32> -> vector<16x252xf32>
    %269 = arith.addf %264, %268 : vector<16x252xf32>
    %c17_185 = arith.constant 17 : index
    %c0_186 = arith.constant 0 : index
    %c0_187 = arith.constant 0 : index
    %270 = vector.load %arg5[%c17_185, %c0_186, %c0_187] : memref<25x16x6xf32, #tpu.memory_space<vmem>>, vector<1x16x6xf32>
    %271 = vector.shape_cast %270 : vector<1x16x6xf32> to vector<16x6xf32>
    %c0_188 = arith.constant 0 : index
    %c56 = arith.constant 56 : index
    %272 = vector.load %arg15[%c0_188, %c56] : memref<6x332xf32, #tpu.memory_space<vmem>>, vector<6x252xf32>
    %cst_189 = arith.constant dense<0.000000e+00> : vector<16x252xf32>
    %273 = tpu.matmul %271, %272, %cst_189 {dimension_numbers = #tpu.dot_dimension_numbers<[1], [0], [0], [1], [0, 0, 1, 1], [], []>} : vector<16x6xf32>, vector<6x252xf32>, vector<16x252xf32> -> vector<16x252xf32>
    %274 = arith.addf %269, %273 : vector<16x252xf32>
    %c18_190 = arith.constant 18 : index
    %c0_191 = arith.constant 0 : index
    %c0_192 = arith.constant 0 : index
    %275 = vector.load %arg5[%c18_190, %c0_191, %c0_192] : memref<25x16x6xf32, #tpu.memory_space<vmem>>, vector<1x16x6xf32>
    %276 = vector.shape_cast %275 : vector<1x16x6xf32> to vector<16x6xf32>
    %c0_193 = arith.constant 0 : index
    %c57 = arith.constant 57 : index
    %277 = vector.load %arg15[%c0_193, %c57] : memref<6x332xf32, #tpu.memory_space<vmem>>, vector<6x252xf32>
    %cst_194 = arith.constant dense<0.000000e+00> : vector<16x252xf32>
    %278 = tpu.matmul %276, %277, %cst_194 {dimension_numbers = #tpu.dot_dimension_numbers<[1], [0], [0], [1], [0, 0, 1, 1], [], []>} : vector<16x6xf32>, vector<6x252xf32>, vector<16x252xf32> -> vector<16x252xf32>
    %279 = arith.addf %274, %278 : vector<16x252xf32>
    %c19_195 = arith.constant 19 : index
    %c0_196 = arith.constant 0 : index
    %c0_197 = arith.constant 0 : index
    %280 = vector.load %arg5[%c19_195, %c0_196, %c0_197] : memref<25x16x6xf32, #tpu.memory_space<vmem>>, vector<1x16x6xf32>
    %281 = vector.shape_cast %280 : vector<1x16x6xf32> to vector<16x6xf32>
    %c0_198 = arith.constant 0 : index
    %c58 = arith.constant 58 : index
    %282 = vector.load %arg15[%c0_198, %c58] : memref<6x332xf32, #tpu.memory_space<vmem>>, vector<6x252xf32>
    %cst_199 = arith.constant dense<0.000000e+00> : vector<16x252xf32>
    %283 = tpu.matmul %281, %282, %cst_199 {dimension_numbers = #tpu.dot_dimension_numbers<[1], [0], [0], [1], [0, 0, 1, 1], [], []>} : vector<16x6xf32>, vector<6x252xf32>, vector<16x252xf32> -> vector<16x252xf32>
    %284 = arith.addf %279, %283 : vector<16x252xf32>
    %c20_200 = arith.constant 20 : index
    %c0_201 = arith.constant 0 : index
    %c0_202 = arith.constant 0 : index
    %285 = vector.load %arg5[%c20_200, %c0_201, %c0_202] : memref<25x16x6xf32, #tpu.memory_space<vmem>>, vector<1x16x6xf32>
    %286 = vector.shape_cast %285 : vector<1x16x6xf32> to vector<16x6xf32>
    %c0_203 = arith.constant 0 : index
    %c72 = arith.constant 72 : index
    %287 = vector.load %arg15[%c0_203, %c72] : memref<6x332xf32, #tpu.memory_space<vmem>>, vector<6x252xf32>
    %cst_204 = arith.constant dense<0.000000e+00> : vector<16x252xf32>
    %288 = tpu.matmul %286, %287, %cst_204 {dimension_numbers = #tpu.dot_dimension_numbers<[1], [0], [0], [1], [0, 0, 1, 1], [], []>} : vector<16x6xf32>, vector<6x252xf32>, vector<16x252xf32> -> vector<16x252xf32>
    %289 = arith.addf %284, %288 : vector<16x252xf32>
    %c21_205 = arith.constant 21 : index
    %c0_206 = arith.constant 0 : index
    %c0_207 = arith.constant 0 : index
    %290 = vector.load %arg5[%c21_205, %c0_206, %c0_207] : memref<25x16x6xf32, #tpu.memory_space<vmem>>, vector<1x16x6xf32>
    %291 = vector.shape_cast %290 : vector<1x16x6xf32> to vector<16x6xf32>
    %c0_208 = arith.constant 0 : index
    %c73 = arith.constant 73 : index
    %292 = vector.load %arg15[%c0_208, %c73] : memref<6x332xf32, #tpu.memory_space<vmem>>, vector<6x252xf32>
    %cst_209 = arith.constant dense<0.000000e+00> : vector<16x252xf32>
    %293 = tpu.matmul %291, %292, %cst_209 {dimension_numbers = #tpu.dot_dimension_numbers<[1], [0], [0], [1], [0, 0, 1, 1], [], []>} : vector<16x6xf32>, vector<6x252xf32>, vector<16x252xf32> -> vector<16x252xf32>
    %294 = arith.addf %289, %293 : vector<16x252xf32>
    %c22_210 = arith.constant 22 : index
    %c0_211 = arith.constant 0 : index
    %c0_212 = arith.constant 0 : index
    %295 = vector.load %arg5[%c22_210, %c0_211, %c0_212] : memref<25x16x6xf32, #tpu.memory_space<vmem>>, vector<1x16x6xf32>
    %296 = vector.shape_cast %295 : vector<1x16x6xf32> to vector<16x6xf32>
    %c0_213 = arith.constant 0 : index
    %c74 = arith.constant 74 : index
    %297 = vector.load %arg15[%c0_213, %c74] : memref<6x332xf32, #tpu.memory_space<vmem>>, vector<6x252xf32>
    %cst_214 = arith.constant dense<0.000000e+00> : vector<16x252xf32>
    %298 = tpu.matmul %296, %297, %cst_214 {dimension_numbers = #tpu.dot_dimension_numbers<[1], [0], [0], [1], [0, 0, 1, 1], [], []>} : vector<16x6xf32>, vector<6x252xf32>, vector<16x252xf32> -> vector<16x252xf32>
    %299 = arith.addf %294, %298 : vector<16x252xf32>
    %c23_215 = arith.constant 23 : index
    %c0_216 = arith.constant 0 : index
    %c0_217 = arith.constant 0 : index
    %300 = vector.load %arg5[%c23_215, %c0_216, %c0_217] : memref<25x16x6xf32, #tpu.memory_space<vmem>>, vector<1x16x6xf32>
    %301 = vector.shape_cast %300 : vector<1x16x6xf32> to vector<16x6xf32>
    %c0_218 = arith.constant 0 : index
    %c75 = arith.constant 75 : index
    %302 = vector.load %arg15[%c0_218, %c75] : memref<6x332xf32, #tpu.memory_space<vmem>>, vector<6x252xf32>
    %cst_219 = arith.constant dense<0.000000e+00> : vector<16x252xf32>
    %303 = tpu.matmul %301, %302, %cst_219 {dimension_numbers = #tpu.dot_dimension_numbers<[1], [0], [0], [1], [0, 0, 1, 1], [], []>} : vector<16x6xf32>, vector<6x252xf32>, vector<16x252xf32> -> vector<16x252xf32>
    %304 = arith.addf %299, %303 : vector<16x252xf32>
    %c24_220 = arith.constant 24 : index
    %c0_221 = arith.constant 0 : index
    %c0_222 = arith.constant 0 : index
    %305 = vector.load %arg5[%c24_220, %c0_221, %c0_222] : memref<25x16x6xf32, #tpu.memory_space<vmem>>, vector<1x16x6xf32>
    %306 = vector.shape_cast %305 : vector<1x16x6xf32> to vector<16x6xf32>
    %c0_223 = arith.constant 0 : index
    %c76 = arith.constant 76 : index
    %307 = vector.load %arg15[%c0_223, %c76] : memref<6x332xf32, #tpu.memory_space<vmem>>, vector<6x252xf32>
    %cst_224 = arith.constant dense<0.000000e+00> : vector<16x252xf32>
    %308 = tpu.matmul %306, %307, %cst_224 {dimension_numbers = #tpu.dot_dimension_numbers<[1], [0], [0], [1], [0, 0, 1, 1], [], []>} : vector<16x6xf32>, vector<6x252xf32>, vector<16x252xf32> -> vector<16x252xf32>
    %309 = arith.addf %304, %308 : vector<16x252xf32>
    %c0_225 = arith.constant 0 : index
    %c0_226 = arith.constant 0 : index
    %310 = vector.load %arg6[%c0_225, %c0_226] : memref<16x1xf32, #tpu.memory_space<vmem>>, vector<16x1xf32>
    %311 = vector.broadcast %310 : vector<16x1xf32> to vector<16x252xf32>
    %312 = arith.addf %309, %311 : vector<16x252xf32>
    %cst_227 = arith.constant 0.000000e+00 : f32
    %313 = vector.broadcast %cst_227 : f32 to vector<16x252xf32>
    %314 = arith.maximumf %312, %313 : vector<16x252xf32>
    %c0_228 = arith.constant 0 : index
    %c0_229 = arith.constant 0 : index
    %315 = vector.load %arg7[%c0_228, %c0_229] : memref<252x49xf32, #tpu.memory_space<vmem>>, vector<252x49xf32>
    %cst_230 = arith.constant dense<0.000000e+00> : vector<16x49xf32>
    %316 = tpu.matmul %314, %315, %cst_230 {dimension_numbers = #tpu.dot_dimension_numbers<[1], [0], [0], [1], [0, 0, 1, 1], [], []>} : vector<16x252xf32>, vector<252x49xf32>, vector<16x49xf32> -> vector<16x49xf32>
    %c0_231 = arith.constant 0 : index
    %c0_232 = arith.constant 0 : index
    %317 = vector.load %arg9[%c0_231, %c0_232] : memref<1x120xf32, #tpu.memory_space<vmem>>, vector<1x120xf32>
    %318 = vector.extract_strided_slice %316 {offsets = [0, 0], sizes = [1, 49], strides = [1, 1]} : vector<16x49xf32> to vector<1x49xf32>
    %c0_233 = arith.constant 0 : index
    %c0_234 = arith.constant 0 : index
    %c0_235 = arith.constant 0 : index
    %319 = vector.load %arg8[%c0_233, %c0_234, %c0_235] : memref<16x49x120xf32, #tpu.memory_space<vmem>>, vector<1x49x120xf32>
    %320 = vector.shape_cast %319 : vector<1x49x120xf32> to vector<49x120xf32>
    %cst_236 = arith.constant dense<0.000000e+00> : vector<1x120xf32>
    %321 = tpu.matmul %318, %320, %cst_236 {dimension_numbers = #tpu.dot_dimension_numbers<[1], [0], [0], [1], [0, 0, 1, 1], [], []>} : vector<1x49xf32>, vector<49x120xf32>, vector<1x120xf32> -> vector<1x120xf32>
    %322 = arith.addf %317, %321 : vector<1x120xf32>
    %323 = vector.extract_strided_slice %316 {offsets = [1, 0], sizes = [1, 49], strides = [1, 1]} : vector<16x49xf32> to vector<1x49xf32>
    %c1_237 = arith.constant 1 : index
    %c0_238 = arith.constant 0 : index
    %c0_239 = arith.constant 0 : index
    %324 = vector.load %arg8[%c1_237, %c0_238, %c0_239] : memref<16x49x120xf32, #tpu.memory_space<vmem>>, vector<1x49x120xf32>
    %325 = vector.shape_cast %324 : vector<1x49x120xf32> to vector<49x120xf32>
    %cst_240 = arith.constant dense<0.000000e+00> : vector<1x120xf32>
    %326 = tpu.matmul %323, %325, %cst_240 {dimension_numbers = #tpu.dot_dimension_numbers<[1], [0], [0], [1], [0, 0, 1, 1], [], []>} : vector<1x49xf32>, vector<49x120xf32>, vector<1x120xf32> -> vector<1x120xf32>
    %327 = arith.addf %322, %326 : vector<1x120xf32>
    %328 = vector.extract_strided_slice %316 {offsets = [2, 0], sizes = [1, 49], strides = [1, 1]} : vector<16x49xf32> to vector<1x49xf32>
    %c2_241 = arith.constant 2 : index
    %c0_242 = arith.constant 0 : index
    %c0_243 = arith.constant 0 : index
    %329 = vector.load %arg8[%c2_241, %c0_242, %c0_243] : memref<16x49x120xf32, #tpu.memory_space<vmem>>, vector<1x49x120xf32>
    %330 = vector.shape_cast %329 : vector<1x49x120xf32> to vector<49x120xf32>
    %cst_244 = arith.constant dense<0.000000e+00> : vector<1x120xf32>
    %331 = tpu.matmul %328, %330, %cst_244 {dimension_numbers = #tpu.dot_dimension_numbers<[1], [0], [0], [1], [0, 0, 1, 1], [], []>} : vector<1x49xf32>, vector<49x120xf32>, vector<1x120xf32> -> vector<1x120xf32>
    %332 = arith.addf %327, %331 : vector<1x120xf32>
    %333 = vector.extract_strided_slice %316 {offsets = [3, 0], sizes = [1, 49], strides = [1, 1]} : vector<16x49xf32> to vector<1x49xf32>
    %c3_245 = arith.constant 3 : index
    %c0_246 = arith.constant 0 : index
    %c0_247 = arith.constant 0 : index
    %334 = vector.load %arg8[%c3_245, %c0_246, %c0_247] : memref<16x49x120xf32, #tpu.memory_space<vmem>>, vector<1x49x120xf32>
    %335 = vector.shape_cast %334 : vector<1x49x120xf32> to vector<49x120xf32>
    %cst_248 = arith.constant dense<0.000000e+00> : vector<1x120xf32>
    %336 = tpu.matmul %333, %335, %cst_248 {dimension_numbers = #tpu.dot_dimension_numbers<[1], [0], [0], [1], [0, 0, 1, 1], [], []>} : vector<1x49xf32>, vector<49x120xf32>, vector<1x120xf32> -> vector<1x120xf32>
    %337 = arith.addf %332, %336 : vector<1x120xf32>
    %338 = vector.extract_strided_slice %316 {offsets = [4, 0], sizes = [1, 49], strides = [1, 1]} : vector<16x49xf32> to vector<1x49xf32>
    %c4_249 = arith.constant 4 : index
    %c0_250 = arith.constant 0 : index
    %c0_251 = arith.constant 0 : index
    %339 = vector.load %arg8[%c4_249, %c0_250, %c0_251] : memref<16x49x120xf32, #tpu.memory_space<vmem>>, vector<1x49x120xf32>
    %340 = vector.shape_cast %339 : vector<1x49x120xf32> to vector<49x120xf32>
    %cst_252 = arith.constant dense<0.000000e+00> : vector<1x120xf32>
    %341 = tpu.matmul %338, %340, %cst_252 {dimension_numbers = #tpu.dot_dimension_numbers<[1], [0], [0], [1], [0, 0, 1, 1], [], []>} : vector<1x49xf32>, vector<49x120xf32>, vector<1x120xf32> -> vector<1x120xf32>
    %342 = arith.addf %337, %341 : vector<1x120xf32>
    %343 = vector.extract_strided_slice %316 {offsets = [5, 0], sizes = [1, 49], strides = [1, 1]} : vector<16x49xf32> to vector<1x49xf32>
    %c5_253 = arith.constant 5 : index
    %c0_254 = arith.constant 0 : index
    %c0_255 = arith.constant 0 : index
    %344 = vector.load %arg8[%c5_253, %c0_254, %c0_255] : memref<16x49x120xf32, #tpu.memory_space<vmem>>, vector<1x49x120xf32>
    %345 = vector.shape_cast %344 : vector<1x49x120xf32> to vector<49x120xf32>
    %cst_256 = arith.constant dense<0.000000e+00> : vector<1x120xf32>
    %346 = tpu.matmul %343, %345, %cst_256 {dimension_numbers = #tpu.dot_dimension_numbers<[1], [0], [0], [1], [0, 0, 1, 1], [], []>} : vector<1x49xf32>, vector<49x120xf32>, vector<1x120xf32> -> vector<1x120xf32>
    %347 = arith.addf %342, %346 : vector<1x120xf32>
    %348 = vector.extract_strided_slice %316 {offsets = [6, 0], sizes = [1, 49], strides = [1, 1]} : vector<16x49xf32> to vector<1x49xf32>
    %c6_257 = arith.constant 6 : index
    %c0_258 = arith.constant 0 : index
    %c0_259 = arith.constant 0 : index
    %349 = vector.load %arg8[%c6_257, %c0_258, %c0_259] : memref<16x49x120xf32, #tpu.memory_space<vmem>>, vector<1x49x120xf32>
    %350 = vector.shape_cast %349 : vector<1x49x120xf32> to vector<49x120xf32>
    %cst_260 = arith.constant dense<0.000000e+00> : vector<1x120xf32>
    %351 = tpu.matmul %348, %350, %cst_260 {dimension_numbers = #tpu.dot_dimension_numbers<[1], [0], [0], [1], [0, 0, 1, 1], [], []>} : vector<1x49xf32>, vector<49x120xf32>, vector<1x120xf32> -> vector<1x120xf32>
    %352 = arith.addf %347, %351 : vector<1x120xf32>
    %353 = vector.extract_strided_slice %316 {offsets = [7, 0], sizes = [1, 49], strides = [1, 1]} : vector<16x49xf32> to vector<1x49xf32>
    %c7_261 = arith.constant 7 : index
    %c0_262 = arith.constant 0 : index
    %c0_263 = arith.constant 0 : index
    %354 = vector.load %arg8[%c7_261, %c0_262, %c0_263] : memref<16x49x120xf32, #tpu.memory_space<vmem>>, vector<1x49x120xf32>
    %355 = vector.shape_cast %354 : vector<1x49x120xf32> to vector<49x120xf32>
    %cst_264 = arith.constant dense<0.000000e+00> : vector<1x120xf32>
    %356 = tpu.matmul %353, %355, %cst_264 {dimension_numbers = #tpu.dot_dimension_numbers<[1], [0], [0], [1], [0, 0, 1, 1], [], []>} : vector<1x49xf32>, vector<49x120xf32>, vector<1x120xf32> -> vector<1x120xf32>
    %357 = arith.addf %352, %356 : vector<1x120xf32>
    %358 = vector.extract_strided_slice %316 {offsets = [8, 0], sizes = [1, 49], strides = [1, 1]} : vector<16x49xf32> to vector<1x49xf32>
    %c8_265 = arith.constant 8 : index
    %c0_266 = arith.constant 0 : index
    %c0_267 = arith.constant 0 : index
    %359 = vector.load %arg8[%c8_265, %c0_266, %c0_267] : memref<16x49x120xf32, #tpu.memory_space<vmem>>, vector<1x49x120xf32>
    %360 = vector.shape_cast %359 : vector<1x49x120xf32> to vector<49x120xf32>
    %cst_268 = arith.constant dense<0.000000e+00> : vector<1x120xf32>
    %361 = tpu.matmul %358, %360, %cst_268 {dimension_numbers = #tpu.dot_dimension_numbers<[1], [0], [0], [1], [0, 0, 1, 1], [], []>} : vector<1x49xf32>, vector<49x120xf32>, vector<1x120xf32> -> vector<1x120xf32>
    %362 = arith.addf %357, %361 : vector<1x120xf32>
    %363 = vector.extract_strided_slice %316 {offsets = [9, 0], sizes = [1, 49], strides = [1, 1]} : vector<16x49xf32> to vector<1x49xf32>
    %c9_269 = arith.constant 9 : index
    %c0_270 = arith.constant 0 : index
    %c0_271 = arith.constant 0 : index
    %364 = vector.load %arg8[%c9_269, %c0_270, %c0_271] : memref<16x49x120xf32, #tpu.memory_space<vmem>>, vector<1x49x120xf32>
    %365 = vector.shape_cast %364 : vector<1x49x120xf32> to vector<49x120xf32>
    %cst_272 = arith.constant dense<0.000000e+00> : vector<1x120xf32>
    %366 = tpu.matmul %363, %365, %cst_272 {dimension_numbers = #tpu.dot_dimension_numbers<[1], [0], [0], [1], [0, 0, 1, 1], [], []>} : vector<1x49xf32>, vector<49x120xf32>, vector<1x120xf32> -> vector<1x120xf32>
    %367 = arith.addf %362, %366 : vector<1x120xf32>
    %368 = vector.extract_strided_slice %316 {offsets = [10, 0], sizes = [1, 49], strides = [1, 1]} : vector<16x49xf32> to vector<1x49xf32>
    %c10_273 = arith.constant 10 : index
    %c0_274 = arith.constant 0 : index
    %c0_275 = arith.constant 0 : index
    %369 = vector.load %arg8[%c10_273, %c0_274, %c0_275] : memref<16x49x120xf32, #tpu.memory_space<vmem>>, vector<1x49x120xf32>
    %370 = vector.shape_cast %369 : vector<1x49x120xf32> to vector<49x120xf32>
    %cst_276 = arith.constant dense<0.000000e+00> : vector<1x120xf32>
    %371 = tpu.matmul %368, %370, %cst_276 {dimension_numbers = #tpu.dot_dimension_numbers<[1], [0], [0], [1], [0, 0, 1, 1], [], []>} : vector<1x49xf32>, vector<49x120xf32>, vector<1x120xf32> -> vector<1x120xf32>
    %372 = arith.addf %367, %371 : vector<1x120xf32>
    %373 = vector.extract_strided_slice %316 {offsets = [11, 0], sizes = [1, 49], strides = [1, 1]} : vector<16x49xf32> to vector<1x49xf32>
    %c11_277 = arith.constant 11 : index
    %c0_278 = arith.constant 0 : index
    %c0_279 = arith.constant 0 : index
    %374 = vector.load %arg8[%c11_277, %c0_278, %c0_279] : memref<16x49x120xf32, #tpu.memory_space<vmem>>, vector<1x49x120xf32>
    %375 = vector.shape_cast %374 : vector<1x49x120xf32> to vector<49x120xf32>
    %cst_280 = arith.constant dense<0.000000e+00> : vector<1x120xf32>
    %376 = tpu.matmul %373, %375, %cst_280 {dimension_numbers = #tpu.dot_dimension_numbers<[1], [0], [0], [1], [0, 0, 1, 1], [], []>} : vector<1x49xf32>, vector<49x120xf32>, vector<1x120xf32> -> vector<1x120xf32>
    %377 = arith.addf %372, %376 : vector<1x120xf32>
    %378 = vector.extract_strided_slice %316 {offsets = [12, 0], sizes = [1, 49], strides = [1, 1]} : vector<16x49xf32> to vector<1x49xf32>
    %c12_281 = arith.constant 12 : index
    %c0_282 = arith.constant 0 : index
    %c0_283 = arith.constant 0 : index
    %379 = vector.load %arg8[%c12_281, %c0_282, %c0_283] : memref<16x49x120xf32, #tpu.memory_space<vmem>>, vector<1x49x120xf32>
    %380 = vector.shape_cast %379 : vector<1x49x120xf32> to vector<49x120xf32>
    %cst_284 = arith.constant dense<0.000000e+00> : vector<1x120xf32>
    %381 = tpu.matmul %378, %380, %cst_284 {dimension_numbers = #tpu.dot_dimension_numbers<[1], [0], [0], [1], [0, 0, 1, 1], [], []>} : vector<1x49xf32>, vector<49x120xf32>, vector<1x120xf32> -> vector<1x120xf32>
    %382 = arith.addf %377, %381 : vector<1x120xf32>
    %383 = vector.extract_strided_slice %316 {offsets = [13, 0], sizes = [1, 49], strides = [1, 1]} : vector<16x49xf32> to vector<1x49xf32>
    %c13_285 = arith.constant 13 : index
    %c0_286 = arith.constant 0 : index
    %c0_287 = arith.constant 0 : index
    %384 = vector.load %arg8[%c13_285, %c0_286, %c0_287] : memref<16x49x120xf32, #tpu.memory_space<vmem>>, vector<1x49x120xf32>
    %385 = vector.shape_cast %384 : vector<1x49x120xf32> to vector<49x120xf32>
    %cst_288 = arith.constant dense<0.000000e+00> : vector<1x120xf32>
    %386 = tpu.matmul %383, %385, %cst_288 {dimension_numbers = #tpu.dot_dimension_numbers<[1], [0], [0], [1], [0, 0, 1, 1], [], []>} : vector<1x49xf32>, vector<49x120xf32>, vector<1x120xf32> -> vector<1x120xf32>
    %387 = arith.addf %382, %386 : vector<1x120xf32>
    %388 = vector.extract_strided_slice %316 {offsets = [14, 0], sizes = [1, 49], strides = [1, 1]} : vector<16x49xf32> to vector<1x49xf32>
    %c14_289 = arith.constant 14 : index
    %c0_290 = arith.constant 0 : index
    %c0_291 = arith.constant 0 : index
    %389 = vector.load %arg8[%c14_289, %c0_290, %c0_291] : memref<16x49x120xf32, #tpu.memory_space<vmem>>, vector<1x49x120xf32>
    %390 = vector.shape_cast %389 : vector<1x49x120xf32> to vector<49x120xf32>
    %cst_292 = arith.constant dense<0.000000e+00> : vector<1x120xf32>
    %391 = tpu.matmul %388, %390, %cst_292 {dimension_numbers = #tpu.dot_dimension_numbers<[1], [0], [0], [1], [0, 0, 1, 1], [], []>} : vector<1x49xf32>, vector<49x120xf32>, vector<1x120xf32> -> vector<1x120xf32>
    %392 = arith.addf %387, %391 : vector<1x120xf32>
    %393 = vector.extract_strided_slice %316 {offsets = [15, 0], sizes = [1, 49], strides = [1, 1]} : vector<16x49xf32> to vector<1x49xf32>
    %c15_293 = arith.constant 15 : index
    %c0_294 = arith.constant 0 : index
    %c0_295 = arith.constant 0 : index
    %394 = vector.load %arg8[%c15_293, %c0_294, %c0_295] : memref<16x49x120xf32, #tpu.memory_space<vmem>>, vector<1x49x120xf32>
    %395 = vector.shape_cast %394 : vector<1x49x120xf32> to vector<49x120xf32>
    %cst_296 = arith.constant dense<0.000000e+00> : vector<1x120xf32>
    %396 = tpu.matmul %393, %395, %cst_296 {dimension_numbers = #tpu.dot_dimension_numbers<[1], [0], [0], [1], [0, 0, 1, 1], [], []>} : vector<1x49xf32>, vector<49x120xf32>, vector<1x120xf32> -> vector<1x120xf32>
    %397 = arith.addf %392, %396 : vector<1x120xf32>
    %cst_297 = arith.constant 0.000000e+00 : f32
    %398 = vector.broadcast %cst_297 : f32 to vector<1x120xf32>
    %399 = arith.maximumf %397, %398 : vector<1x120xf32>
    %c0_298 = arith.constant 0 : index
    %c0_299 = arith.constant 0 : index
    %400 = vector.load %arg10[%c0_298, %c0_299] : memref<120x84xf32, #tpu.memory_space<vmem>>, vector<120x84xf32>
    %cst_300 = arith.constant dense<0.000000e+00> : vector<1x84xf32>
    %401 = tpu.matmul %399, %400, %cst_300 {dimension_numbers = #tpu.dot_dimension_numbers<[1], [0], [0], [1], [0, 0, 1, 1], [], []>} : vector<1x120xf32>, vector<120x84xf32>, vector<1x84xf32> -> vector<1x84xf32>
    %c0_301 = arith.constant 0 : index
    %c0_302 = arith.constant 0 : index
    %402 = vector.load %arg11[%c0_301, %c0_302] : memref<1x84xf32, #tpu.memory_space<vmem>>, vector<1x84xf32>
    %403 = arith.addf %401, %402 : vector<1x84xf32>
    %cst_303 = arith.constant 0.000000e+00 : f32
    %404 = vector.broadcast %cst_303 : f32 to vector<1x84xf32>
    %405 = arith.maximumf %403, %404 : vector<1x84xf32>
    %c0_304 = arith.constant 0 : index
    %c0_305 = arith.constant 0 : index
    %406 = vector.load %arg12[%c0_304, %c0_305] : memref<84x10xf32, #tpu.memory_space<vmem>>, vector<84x10xf32>
    %cst_306 = arith.constant dense<0.000000e+00> : vector<1x10xf32>
    %407 = tpu.matmul %405, %406, %cst_306 {dimension_numbers = #tpu.dot_dimension_numbers<[1], [0], [0], [1], [0, 0, 1, 1], [], []>} : vector<1x84xf32>, vector<84x10xf32>, vector<1x10xf32> -> vector<1x10xf32>
    %c0_307 = arith.constant 0 : index
    %c0_308 = arith.constant 0 : index
    %408 = vector.load %arg13[%c0_307, %c0_308] : memref<1x10xf32, #tpu.memory_space<vmem>>, vector<1x10xf32>
    %409 = arith.addf %407, %408 : vector<1x10xf32>
    %c0_309 = arith.constant 0 : index
    %c0_310 = arith.constant 0 : index
    %c0_311 = arith.constant 0 : index
    %410 = vector.load %arg14[%c0_309, %c0_310, %c0_311] : memref<1x1x10xf32, #tpu.memory_space<vmem>>, vector<1x1x10xf32>
    %411 = vector.shape_cast %410 : vector<1x1x10xf32> to vector<1x10xf32>
    %412 = vector.shape_cast %409 : vector<1x10xf32> to vector<1x1x10xf32>
    tpu.vector_store %arg14[%c0_309, %c0_310, %c0_311], %412 {strides = array<i32>} : memref<1x1x10xf32, #tpu.memory_space<vmem>>, vector<1x1x10xf32>,
    return
  }
  func.func @transform_0(%arg0: i32) -> (i32, i32, i32) {
    %c0_i32 = arith.constant 0 : i32
    %c0_i32_0 = arith.constant 0 : i32
    %c0_i32_1 = arith.constant 0 : i32
    return %arg0, %c0_i32, %c0_i32_0 : i32, i32, i32
  }
  func.func @transform_1(%arg0: i32) -> (i32, i32) {
    %c0_i32 = arith.constant 0 : i32
    %c0_i32_0 = arith.constant 0 : i32
    %c0_i32_1 = arith.constant 0 : i32
    return %c0_i32, %c0_i32_0 : i32, i32
  }
  func.func @transform_2(%arg0: i32) -> (i32, i32) {
    %c0_i32 = arith.constant 0 : i32
    %c0_i32_0 = arith.constant 0 : i32
    %c0_i32_1 = arith.constant 0 : i32
    return %c0_i32, %c0_i32_0 : i32, i32
  }
  func.func @transform_3(%arg0: i32) -> (i32, i32) {
    %c0_i32 = arith.constant 0 : i32
    %c0_i32_0 = arith.constant 0 : i32
    %c0_i32_1 = arith.constant 0 : i32
    return %c0_i32, %c0_i32_0 : i32, i32
  }
  func.func @transform_4(%arg0: i32) -> (i32, i32, i32) {
    %c0_i32 = arith.constant 0 : i32
    %c0_i32_0 = arith.constant 0 : i32
    %c0_i32_1 = arith.constant 0 : i32
    %c0_i32_2 = arith.constant 0 : i32
    return %c0_i32, %c0_i32_0, %c0_i32_1 : i32, i32, i32
  }
  func.func @transform_5(%arg0: i32) -> (i32, i32) {
    %c0_i32 = arith.constant 0 : i32
    %c0_i32_0 = arith.constant 0 : i32
    %c0_i32_1 = arith.constant 0 : i32
    return %c0_i32, %c0_i32_0 : i32, i32
  }
  func.func @transform_6(%arg0: i32) -> (i32, i32) {
    %c0_i32 = arith.constant 0 : i32
    %c0_i32_0 = arith.constant 0 : i32
    %c0_i32_1 = arith.constant 0 : i32
    return %c0_i32, %c0_i32_0 : i32, i32
  }
  func.func @transform_7(%arg0: i32) -> (i32, i32, i32) {
    %c0_i32 = arith.constant 0 : i32
    %c0_i32_0 = arith.constant 0 : i32
    %c0_i32_1 = arith.constant 0 : i32
    %c0_i32_2 = arith.constant 0 : i32
    return %c0_i32, %c0_i32_0, %c0_i32_1 : i32, i32, i32
  }
  func.func @transform_8(%arg0: i32) -> (i32, i32) {
    %c0_i32 = arith.constant 0 : i32
    %c0_i32_0 = arith.constant 0 : i32
    %c0_i32_1 = arith.constant 0 : i32
    return %c0_i32, %c0_i32_0 : i32, i32
  }
  func.func @transform_9(%arg0: i32) -> (i32, i32) {
    %c0_i32 = arith.constant 0 : i32
    %c0_i32_0 = arith.constant 0 : i32
    %c0_i32_1 = arith.constant 0 : i32
    return %c0_i32, %c0_i32_0 : i32, i32
  }
  func.func @transform_10(%arg0: i32) -> (i32, i32) {
    %c0_i32 = arith.constant 0 : i32
    %c0_i32_0 = arith.constant 0 : i32
    %c0_i32_1 = arith.constant 0 : i32
    return %c0_i32, %c0_i32_0 : i32, i32
  }
  func.func @transform_11(%arg0: i32) -> (i32, i32) {
    %c0_i32 = arith.constant 0 : i32
    %c0_i32_0 = arith.constant 0 : i32
    %c0_i32_1 = arith.constant 0 : i32
    return %c0_i32, %c0_i32_0 : i32, i32
  }
  func.func @transform_12(%arg0: i32) -> (i32, i32) {
    %c0_i32 = arith.constant 0 : i32
    %c0_i32_0 = arith.constant 0 : i32
    %c0_i32_1 = arith.constant 0 : i32
    return %c0_i32, %c0_i32_0 : i32, i32
  }
  func.func @transform_13(%arg0: i32) -> (i32, i32, i32) {
    %c0_i32 = arith.constant 0 : i32
    %c0_i32_0 = arith.constant 0 : i32
    %c0_i32_1 = arith.constant 0 : i32
    return %arg0, %c0_i32, %c0_i32_0 : i32, i32, i32
  }
}

</mosaic_0001>

<bundles_post_ra>
// kernel: lenet_small_forward.1
= control target key start
LH: loop header
LB: loop body
LE: loop exit
PB: predicated region body
PF: predicated region fallthrough
CT: control target
= control target key end

     0   :  { %s12456_s0 = inlined_call_operand.vmem [shape: f32[2,1,1032], index: 0, kind: input, shape index: {}]   ;;  %s12457_s1 = inlined_call_operand.vmem [shape: f32[6,25], index: 1, kind: input, shape index: {}]   ;;  %s12458_s2 = inlined_call_operand.vmem [shape: f32[6,1], index: 2, kind: input, shape index: {}]   ;;  %s12459_s3 = inlined_call_operand.vmem [shape: f32[896,332], index: 3, kind: input, shape index: {}]   ;;  %s12460_s4 = inlined_call_operand.vmem [shape: f32[25,16,6], index: 4, kind: input, shape index: {}]   ;;  %s12461_s5 = inlined_call_operand.vmem [shape: f32[16,1], index: 5, kind: input, shape index: {}]   ;;  %s12462_s6 = inlined_call_operand.vmem [shape: f32[252,49], index: 6, kind: input, shape index: {}]   ;;  %s12463_s7 = inlined_call_operand.vmem [shape: f32[16,49,120], index: 7, kind: input, shape index: {}]   ;;  %s12464_s8 = inlined_call_operand.vmem [shape: f32[1,120], index: 8, kind: input, shape index: {}]   ;;  %s12465_s9 = inlined_call_operand.vmem [shape: f32[120,84], index: 9, kind: input, shape index: {}]   ;;  %s12466_s10 = inlined_call_operand.vmem [shape: f32[1,84], index: 10, kind: input, shape index: {}]   ;;  %s12467_s11 = inlined_call_operand.vmem [shape: f32[84,10], index: 11, kind: input, shape index: {}]   ;;  %s12468_s12 = inlined_call_operand.vmem [shape: f32[1,10], index: 12, kind: input, shape index: {}]   ;;  %s12469_s13 = inlined_call_operand.hbm [shape: f32[2,1,10], index: 13, kind: output, shape index: {}]  }
   0x1   :  { %12626 = sst [smem:[#allocation65_spill]] %s12456_s0 }
   0x2   :  { %12627 = sst [smem:[#allocation66_spill]] %s12457_s1 }
   0x3   :  { %12628 = sst [smem:[#allocation67_spill]] %s12458_s2 }
   0x4   :  { %12629 = sst [smem:[#allocation68_spill]] %s12462_s6 }
   0x5   :  { %12630 = sst [smem:[#allocation69_spill]] %s12463_s7 }
   0x6   :  { %12631 = sst [smem:[#allocation70_spill]] %s12464_s8 }
   0x7   :  { %12632 = sst [smem:[#allocation71_spill]] %s12465_s9 }
   0x8   :  { %12633 = sst [smem:[#allocation72_spill]] %s12466_s10 }
   0x9   :  { %12634 = sst [smem:[#allocation73_spill]] %s12467_s11 }
   0xa   :  { %12635 = sst [smem:[#allocation74_spill]] %s12468_s12 }
   0xb   :  { %12636 = sst [smem:[#allocation75_spill]] %s12469_s13 }
   0xc   :  { %18 = vsyncpa [#allocation4], 0 }
   0xd   :  { %20 = vsyncpa [#allocation4 + $0x1], 0  ;;  %s8497_s25 = smov 0   ;;  %s8499_s26 = smov 0  }
   0xe   :  { %s8501_s27 = smov 0   ;;  %s8503_s28 = smov 0  }
   0xf LB: > { %12637 = sst [smem:[#allocation6_spill]] %s8347_s25  ;;  %s8518_s29 = sadd.s32 4294967295, %s8359_s28   ;;  %s8359_s28 = sphi %s8503_s28, %s12877_s28   ;;  %s8355_s27 = sphi %s8501_s27, %s12880_s27   ;;  %s8351_s26 = sphi %s8499_s26, %s12879_s26   ;;  %s8347_s25 = sphi %s8497_s25, %s12878_s25  }
  0x10   : > { %12638 = sst [smem:[#allocation7_spill]] %s8351_s26  ;;  %s7187_s30 = sadd.s32 4294967294, %s8359_s28  }
  0x11   : > { %12639 = sst [smem:[#allocation8_spill]] %s8355_s27  ;;  %s8522_s14 = sadd.s32 1, %s8359_s28  }
  0x12   : > { %12640 = sst [smem:[#allocation9_spill]] %s8359_s28  ;;  %s311_s15 = sadd.s32 1, %s8355_s27 }
  0x13   : > { %12641 = sst [smem:[#allocation10_spill]] %s8518_s29  ;;  %s308_s16 = ssub.s32 %s8359_s28, %s8522_s14 }
  0x14   : > { %12642 = sst [smem:[#allocation11_spill]] %s8522_s14  ;;  %p321_p0 = scmp.ne.s32.totalorder %s8355_s27, %s8351_s26 }
  0x15   : > { %p309_p1 = scmp.eq.s32.totalorder %s308_s16, 0  ;;  %p322_p2 = scmp.eq.s32.totalorder %s8518_s29, 1 }
  0x16   : > { %p327_p3 = scmp.ne.s32.totalorder %s8351_s26, %s8347_s25  ;;  %p328_p4 = scmp.eq.s32.totalorder %s7187_s30, 1 }
  0x17   : > { %s8533_s17 = scalar_select %p309_p1, %s8355_s27, %s311_s15  }
  0x18   : > { %p8535_p5 = por %p322_p2, %p321_p0  ;;  %p8539_p6 = por %p328_p4, %p327_p3 }
  0x19   : > { %12643 = sst [smem:[#allocation12_spill]] %s8533_s17  ;;  %p7190_p7 = scmp.ge.s32.totalorder %s8359_s28, 1 }
  0x1a   : > { %s12644_s18 = scalar_select %p8535_p5, 1, 0 }
  0x1b   : > { %s12646_s19 = scalar_select %p8539_p6, 1, 0 }
  0x1c   : > { %12645 = sst [smem:[#allocation13_spill]] %s12644_s18  ;;  %p389_p8 = scmp.lt.s32.totalorder %s8359_s28, 3 }
  0x1d   : > { %12647 = sst [smem:[#allocation14_spill]] %s12646_s19 }
  0x1e   : > { %p390_p9 = pnand %p7190_p7, %p389_p8 }
  0x20   : > { %393 = sbr.rel (%p390_p9) target bundleno = 2262 (0x8d6), region = 72 }
  0x25   : > { %s12648_s1 = sld [smem:[#allocation66_spill]]  ;;  %v8361_v1 = vmov 1   ;;  %v8362_v2 = vmov 3   ;;  %v8363_v3 = vmov 2   ;;  %v8364_v4 = vmov 4   ;;  %p431_p10 = scmp.lt.s32.totalorder %s8518_s29, 1 }
  0x26   : > { %8271 = vset.pattern.permute.xlu0 %v8361_v1  ;;  %8273 = vset.pattern.permute.xlu1 %v8362_v2  ;;  %v8365_v5 = vmov 5   ;;  %v8366_v6 = vmov 6   ;;  %v8367_v7 = vmov 7   ;;  %v8368_v8 = vmov 9   ;;  %s12650_s0 = sld [smem:[#allocation65_spill]]  ;;  %s12502_s16 = smov 127  }
  0x27   : > { %v8369_v9 = vmov 8   ;;  %v8370_v10 = vmov 12   ;;  %v8371_v11 = vmov 10   ;;  %v8372_v12 = vmov 15   ;;  %s432_s22 = scalar_select %p431_p10, %s8518_s29, 1 }
  0x28   : > { %v8373_v13 = vmov 11   ;;  %v8374_v14 = vmov 18   ;;  %v8375_v15 = vmov 13   ;;  %v8376_v16 = vmov 22   ;;  %s12500_s20 = smov 126   ;;  %s12498_s21 = smov 125  }
  0x29   : > { %v8377_v17 = vmov 14   ;;  %v8378_v18 = vmov 16   ;;  %v8379_v19 = vmov 17   ;;  %v8380_v20 = vmov 19   ;;  %s8166_s23 = smul.u32 9, %s432_s22  ;;  %s12494_s22 = smov 124  }
  0x2a   : > { %v8381_v21 = vmov 21   ;;  %v8382_v22 = vmov 23   ;;  %v8383_v23 = vmov 24   ;;  %v443_v24 = vlaneseq  ;;  %s12472_s24 = smov 95   ;;  %s12474_s30 = smov 94  }
  0x2b   : > { %v8548_v0 = vld [vmem:[%s12648_s1] sm:$0x3f]  ;;  %v8384_v25 = vmov 20   ;;  %v8385_v27 = vmov 0   ;;  %s12506_s17 = smov 28   ;;  %s12676_s14 = smov 127  }
  0x2c   : > { %494 = vperm.xlu0 %8271, %v8548_v0   ;;  %651 = vperm.xlu1 %8273, %v8548_v0   ;;  %v8575_v26 = vshrl.u32 %v443_v24, 7  ;;  %s8580_s15 = scalar_lea.vmem %s12650_s0, %s8166_s23  ;;  %s12470_s23 = smov 96   ;;  %vm570_vm0 = vcmask 1039360   ;;  %vm628_vm1 = vcmask 1031168   ;;  %vm686_vm2 = vcmask 1022976  }
  0x2d   : > { %v8586_v30 = vld [vmem:[%s8580_s15] sm:$0xff]  ;;  %s12674_s0 = smov 93   ;;  %s12678_s19 = smov 92   ;;  %vm744_vm3 = vcmask 1014784   ;;  %vm802_vm4 = vcmask 785408   ;;  %vm860_vm5 = vcmask 777216  }
  0x2e   : > { %12649 = vst [vmem:[#allocation15_spill] sm:$0xff] %v8575_v26  ;;  %v449_v28 = vsub.s32 1, %v8575_v26  ;;  %v445_v29 = vsub.s32 0, %v8575_v26  ;;  %v8599_v33 = vsub.s32 2, %v8575_v26  ;;  %v8747_v24 = vsub.s32 3, %v8575_v26  ;;  %s12679_s25 = smov 126  }
  0x2f   : > { %s12684_s13 = smov 64   ;;  %s12689_s2 = sld [smem:[#allocation67_spill]]  ;;  %vm918_vm6 = vcmask 769024   ;;  %vm976_vm7 = vcmask 760832   ;;  %vm1034_vm8 = vcmask 752640   ;;  %vm1092_vm9 = vcmask 523264  }
  0x30   : > { %8272 = vset.pattern.permute.xlu0 %v8363_v3  ;;  %8274 = vset.pattern.permute.xlu1 %v8364_v4  ;;  %v8591_v31 = vrot.slane %v8586_v30, %v449_v28  ;;  %v8596_v32 = vrot.slane %v8586_v30, %v445_v29  ;;  %12651 = vst [vmem:[#allocation16_spill] sm:$0xff] %v8599_v33  ;;  %12661 = vst [vmem:[#allocation26_spill] sm:$0xff] %v8747_v24  ;;  %s12694_s12 = smov 124   ;;  %s12695_s18 = smov 62   ;;  %vm1150_vm10 = vcmask 515072   ;;  %vm12607_vm11 = vcmask 506880  }
  0x31   : > { %593 = vperm.xlu0 %8272, %v8548_v0   ;;  %709 = vperm.xlu1 %8274, %v8548_v0   ;;  %v8609_v37 = vrot.slane %v8586_v30, %v8599_v33  ;;  %s12697_s1 = smov 61   ;;  %s12700_s29 = smov 60   ;;  %vm12606_vm12 = vcmask 498688   ;;  %vm12580_vm13 = vcmask 490496   ;;  %vm12581_vm14 = vcmask 261120  }
  0x32   : > { %s12707_s10 = smov 30   ;;  %s12712_s8 = smov 28   ;;  %vm12582_vm15 = vcmask 252928  }
  0x33   : > { %12652 = vst [vmem:[#allocation17_spill] sm:$0xff] %v8609_v37  ;;  %s8412_s28 = smov 108   ;;  %s8415_s9 = smov 89  }
  0x34   : > { %s8422_s27 = smov 55   ;;  %s8424_s11 = smov 53  }
  0x35   : > { %8275 = vset.pattern.permute.xlu1 %v8365_v5  ;;  %8276 = vset.pattern.permute.xlu0 %v8366_v6  ;;  %s12864_s7 = sld [smem:[#allocation69_spill]] }
  0x36   : > { %767 = vperm.xlu1 %8275, %v8548_v0   ;;  %825 = vperm.xlu0 %8276, %v8548_v0  }
  0x3a   : > { %8277 = vset.pattern.permute.xlu1 %v8367_v7  ;;  %8279 = vset.pattern.permute.xlu0 %v8368_v8 }
  0x3b   : > { %883 = vperm.xlu1 %8277, %v8548_v0   ;;  %999 = vperm.xlu0 %8279, %v8548_v0  }
  0x3f   : > { %8278 = vset.pattern.permute.xlu1 %v8369_v9  ;;  %8282 = vset.pattern.permute.xlu0 %v8370_v10 }
  0x40   : > { %941 = vperm.xlu1 %8278, %v8548_v0   ;;  %1173 = vperm.xlu0 %8282, %v8548_v0  }
  0x44   : > { %8280 = vset.pattern.permute.xlu1 %v8371_v11  ;;  %8285 = vset.pattern.permute.xlu0 %v8372_v12 }
  0x45   : > { %1057 = vperm.xlu1 %8280, %v8548_v0   ;;  %1347 = vperm.xlu0 %8285, %v8548_v0  }
  0x49   : > { %8281 = vset.pattern.permute.xlu1 %v8373_v13  ;;  %8288 = vset.pattern.permute.xlu0 %v8374_v14 }
  0x4a   : > { %1115 = vperm.xlu1 %8281, %v8548_v0   ;;  %1521 = vperm.xlu0 %8288, %v8548_v0  }
  0x4e   : > { %8283 = vset.pattern.permute.xlu1 %v8375_v15  ;;  %8291 = vset.pattern.permute.xlu0 %v8376_v16 }
  0x4f   : > { %1231 = vperm.xlu1 %8283, %v8548_v0   ;;  %1791 = vperm.xlu0 %8291, %v8548_v0  }
  0x53   : > { %8284 = vset.pattern.permute.xlu1 %v8377_v17  ;;  %8294 = vset.pattern.permute.xlu0 %v8384_v25 }
  0x54   : > { %1289 = vperm.xlu1 %8284, %v8548_v0  }
  0x58   : > { %8286 = vset.pattern.permute.xlu1 %v8378_v18 }
  0x59   : > { %1405 = vperm.xlu1 %8286, %v8548_v0  }
  0x5d   : > { %8287 = vset.pattern.permute.xlu1 %v8379_v19 }
  0x5e   : > { %1463 = vperm.xlu1 %8287, %v8548_v0  }
  0x62   : > { %8289 = vset.pattern.permute.xlu1 %v8380_v20 }
  0x63   : > { %1579 = vperm.xlu1 %8289, %v8548_v0  }
  0x67   : > { %8290 = vset.pattern.permute.xlu1 %v8381_v21  ;;  %v8738_v21 = vsub.s32 4, %v8575_v26 }
  0x68   : > { %1693 = vperm.xlu1 %8290, %v8548_v0  }
  0x69   : > { %12660 = vst [vmem:[#allocation25_spill] sm:$0xff] %v8738_v21  ;;  %v8751_v25 = vrot.slane %v8586_v30, %v8738_v21 }
  0x6c   : > { %8292 = vset.pattern.permute.xlu1 %v8382_v22 }
  0x6d   : > { %1848 = vperm.xlu1 %8292, %v8548_v0  }
  0x71   : > { %8293 = vset.pattern.permute.xlu1 %v8383_v23 }
  0x72   : > { %1905 = vperm.xlu1 %8293, %v8548_v0  }
  0x76   : > { %8296 = vset.pattern.permute.xlu1 %v8385_v27 }
  0xa7   : > { %v8601_v34 = vpop.permute.xlu0 %494  ;;  %v8617_v40 = vpop.permute.xlu1 %651 }
  0xa8   : > { %v539_v35 = vmul.f32 %v8591_v31, %v8601_v34  ;;  %v538_v36 = vmul.f32 %v8596_v32, %v8601_v34  ;;  %v540_v39 = vmul.f32 %v8609_v37, %v8601_v34  ;;  %v655_v43 = vmul.f32 %v8617_v40, %v8591_v31 }
  0xa9   : > { %v654_v45 = vmul.f32 %v8617_v40, %v8596_v32  ;;  %v656_v48 = vmul.f32 %v8617_v40, %v8609_v37 }
  0xaa   : > { %556 = vrot.lane.b32.xlu1 %v539_v35, %s12502_s16  ;;  %554 = vrot.lane.b32.xlu0 %v538_v36, %s12502_s16 }
  0xac   : > { %v8613_v38 = vpop.permute.xlu0 %593  ;;  %v8628_v44 = vpop.permute.xlu1 %709 }
  0xad   : > { %v598_v41 = vmul.f32 %v8613_v38, %v8609_v37  ;;  %v597_v42 = vmul.f32 %v8613_v38, %v8591_v31  ;;  %v596_v46 = vmul.f32 %v8613_v38, %v8596_v32  ;;  %v714_v47 = vmul.f32 %v8628_v44, %v8609_v37 }
  0xae   : > { %558 = vrot.lane.b32.xlu1 %v540_v39, %s12502_s16  ;;  %v713_v50 = vmul.f32 %v8628_v44, %v8591_v31  ;;  %v712_v53 = vmul.f32 %v8628_v44, %v8596_v32  ;;  %v8761_v39 = vrot.slane %v8586_v30, %v8747_v24 }
  0xaf   : > { %616 = vrot.lane.b32.xlu0 %v598_v41, %s12500_s20  ;;  %v542_v41 = vmul.f32 %v8751_v25, %v8601_v34 }
  0xb0   : > { %12663 = vst [vmem:[#allocation28_spill] sm:$0xff] %v8761_v39 }
  0xb1   : > { %v8641_v49 = vpop.permute.xlu1 %767  ;;  %v8655_v54 = vpop.permute.xlu0 %825 }
  0xb2   : > { %614 = vrot.lane.b32.xlu1 %v597_v42, %s12500_s20  ;;  %v771_v51 = vmul.f32 %v8641_v49, %v8591_v31  ;;  %v770_v52 = vmul.f32 %v8641_v49, %v8596_v32  ;;  %v830_v55 = vmul.f32 %v8655_v54, %v8609_v37  ;;  %v772_v56 = vmul.f32 %v8641_v49, %v8609_v37 }
  0xb3   : > { %672 = vrot.lane.b32.xlu0 %v655_v43, %s12498_s21  ;;  %v829_v58 = vmul.f32 %v8655_v54, %v8591_v31  ;;  %v828_v61 = vmul.f32 %v8655_v54, %v8596_v32  ;;  %v541_v43 = vmul.f32 %v8761_v39, %v8601_v34 }
  0xb6   : > { %612 = vrot.lane.b32.xlu1 %v596_v46, %s12500_s20  ;;  %v8663_v57 = vpop.permute.xlu1 %883  ;;  %v8685_v2 = vpop.permute.xlu0 %999 }
  0xb7   : > { %670 = vrot.lane.b32.xlu0 %v654_v45, %s12498_s21  ;;  %12653 = vst [vmem:[#allocation18_spill] sm:$0xff] %v8663_v57  ;;  %v887_v59 = vmul.f32 %v8663_v57, %v8591_v31  ;;  %v886_v60 = vmul.f32 %v8663_v57, %v8596_v32  ;;  %v888_v1 = vmul.f32 %v8663_v57, %v8609_v37  ;;  %12655 = vst [vmem:[#allocation20_spill] sm:$0xff] %v8685_v2 }
  0xb8   : > { %v1003_v4 = vmul.f32 %v8685_v2, %v8591_v31  ;;  %v1002_v6 = vmul.f32 %v8685_v2, %v8596_v32  ;;  %v1004_v9 = vmul.f32 %v8685_v2, %v8609_v37 }
  0xba   : > { %674 = vrot.lane.b32.xlu1 %v656_v48, %s12498_s21  ;;  %v599_v48 = vmul.f32 %v8613_v38, %v8761_v39 }
  0xbb   : > { %732 = vrot.lane.b32.xlu0 %v714_v47, %s12494_s22  ;;  %v8677_v62 = vpop.permute.xlu1 %941  ;;  %v8721_v15 = vpop.permute.xlu0 %1173 }
  0xbc   : > { %12654 = vst [vmem:[#allocation19_spill] sm:$0xff] %v8677_v62  ;;  %v946_v63 = vmul.f32 %v8677_v62, %v8609_v37  ;;  %v945_v3 = vmul.f32 %v8677_v62, %v8591_v31  ;;  %v944_v7 = vmul.f32 %v8677_v62, %v8596_v32  ;;  %12658 = vst [vmem:[#allocation23_spill] sm:$0xff] %v8721_v15 }
  0xbd   : > { %v1178_v16 = vmul.f32 %v8721_v15, %v8609_v37  ;;  %v1177_v19 = vmul.f32 %v8721_v15, %v8591_v31  ;;  %v1176_v23 = vmul.f32 %v8721_v15, %v8596_v32 }
  0xbe   : > { %730 = vrot.lane.b32.xlu1 %v713_v50, %s12494_s22 }
  0xbf   : > { %788 = vrot.lane.b32.xlu0 %v771_v51, %s12470_s23 }
  0xc0   : > { %v8694_v5 = vpop.permute.xlu1 %1057  ;;  %v8777_v47 = vpop.permute.xlu0 %1347 }
  0xc1   : > { %12656 = vst [vmem:[#allocation21_spill] sm:$0xff] %v8694_v5  ;;  %v1062_v8 = vmul.f32 %v8694_v5, %v8609_v37  ;;  %v1061_v11 = vmul.f32 %v8694_v5, %v8591_v31  ;;  %v1060_v14 = vmul.f32 %v8694_v5, %v8596_v32  ;;  %12665 = vst [vmem:[#allocation30_spill] sm:$0xff] %v8777_v47 }
  0xc2   : > { %728 = vrot.lane.b32.xlu1 %v712_v53, %s12494_s22  ;;  %v1351_v51 = vmul.f32 %v8777_v47, %v8591_v31  ;;  %v1350_v53 = vmul.f32 %v8777_v47, %v8596_v32 }
  0xc3   : > { %786 = vrot.lane.b32.xlu0 %v770_v52, %s12470_s23 }
  0xc5   : > { %v8707_v10 = vpop.permute.xlu1 %1115 }
  0xc6   : > { %790 = vrot.lane.b32.xlu1 %v772_v56, %s12470_s23  ;;  %s12476_s23 = smov 93   ;;  %12657 = vst [vmem:[#allocation22_spill] sm:$0xff] %v8707_v10  ;;  %v1119_v12 = vmul.f32 %v8707_v10, %v8591_v31  ;;  %v1118_v13 = vmul.f32 %v8707_v10, %v8596_v32  ;;  %v1120_v17 = vmul.f32 %v8707_v10, %v8609_v37 }
  0xc7   : > { %848 = vrot.lane.b32.xlu0 %v830_v55, %s12472_s24  ;;  %v600_v55 = vmul.f32 %v8613_v38, %v8751_v25 }
  0xca   : > { %846 = vrot.lane.b32.xlu1 %v829_v58, %s12472_s24  ;;  %v8729_v18 = vpop.permute.xlu1 %1231  ;;  %v1352_v58 = vmul.f32 %v8777_v47, %v8609_v37 }
  0xcb   : > { %904 = vrot.lane.b32.xlu0 %v887_v59, %s12474_s30  ;;  %12659 = vst [vmem:[#allocation24_spill] sm:$0xff] %v8729_v18  ;;  %v1235_v20 = vmul.f32 %v8729_v18, %v8591_v31  ;;  %v1234_v22 = vmul.f32 %v8729_v18, %v8596_v32  ;;  %v1236_v35 = vmul.f32 %v8729_v18, %v8609_v37 }
  0xcc   : > { %v658_v59 = vmul.f32 %v8617_v40, %v8751_v25 }
  0xce   : > { %844 = vrot.lane.b32.xlu1 %v828_v61, %s12472_s24  ;;  %s12478_s24 = smov 92   ;;  %v657_v61 = vmul.f32 %v8617_v40, %v8761_v39 }
  0xcf   : > { %902 = vrot.lane.b32.xlu0 %v886_v60, %s12474_s30  ;;  %v8757_v36 = vpop.permute.xlu1 %1289 }
  0xd0   : > { %12662 = vst [vmem:[#allocation27_spill] sm:$0xff] %v8757_v36  ;;  %v1294_v42 = vmul.f32 %v8757_v36, %v8609_v37  ;;  %v1293_v46 = vmul.f32 %v8757_v36, %v8591_v31  ;;  %v1292_v52 = vmul.f32 %v8757_v36, %v8596_v32 }
  0xd2   : > { %906 = vrot.lane.b32.xlu1 %v888_v1, %s12474_s30  ;;  %s12480_s30 = smov 64  }
  0xd3   : > { %964 = vrot.lane.b32.xlu0 %v946_v63, %s12476_s23 }
  0xd4   : > { %v8771_v45 = vpop.permute.xlu1 %1405 }
  0xd5   : > { %12664 = vst [vmem:[#allocation29_spill] sm:$0xff] %v8771_v45  ;;  %v1410_v63 = vmul.f32 %v8771_v45, %v8609_v37  ;;  %v1409_v1 = vmul.f32 %v8771_v45, %v8591_v31 }
  0xd6   : > { %962 = vrot.lane.b32.xlu1 %v945_v3, %s12476_s23 }
  0xd7   : > { %1020 = vrot.lane.b32.xlu0 %v1003_v4, %s12478_s24  ;;  %v8817_v4 = vpop.permute.xlu0 %1521 }
  0xd8   : > { %12668 = vst [vmem:[#allocation33_spill] sm:$0xff] %v8817_v4 }
  0xd9   : > { %v8782_v50 = vpop.permute.xlu1 %1463 }
  0xda   : > { %960 = vrot.lane.b32.xlu1 %v944_v7, %s12476_s23  ;;  %s12496_s23 = smov 63   ;;  %12666 = vst [vmem:[#allocation31_spill] sm:$0xff] %v8782_v50  ;;  %v1408_v7 = vmul.f32 %v8771_v45, %v8596_v32 }
  0xdb   : > { %1018 = vrot.lane.b32.xlu0 %v1002_v6, %s12478_s24  ;;  %v715_v6 = vmul.f32 %v8628_v44, %v8761_v39 }
  0xde   : > { %1022 = vrot.lane.b32.xlu1 %v1004_v9, %s12478_s24  ;;  %s12482_s24 = smov 62   ;;  %v8795_v56 = vpop.permute.xlu1 %1579 }
  0xdf   : > { %1080 = vrot.lane.b32.xlu0 %v1062_v8, %s12480_s30  ;;  %v1467_v8 = vmul.f32 %v8782_v50, %v8591_v31 }
  0xe2   : > { %1078 = vrot.lane.b32.xlu1 %v1061_v11, %s12480_s30  ;;  %v8830_v11 = vpop.permute.xlu0 %1791 }
  0xe3   : > { %1136 = vrot.lane.b32.xlu0 %v1119_v12, %s12496_s23  ;;  %v8804_v60 = vpop.permute.xlu1 %1693  ;;  %v716_v12 = vmul.f32 %v8628_v44, %v8751_v25 }
  0xe4   : > { %12667 = vst [vmem:[#allocation32_spill] sm:$0xff] %v8804_v60 }
  0xe6   : > { %1076 = vrot.lane.b32.xlu1 %v1060_v14, %s12480_s30  ;;  %s12484_s30 = smov 61  }
  0xe7   : > { %1134 = vrot.lane.b32.xlu0 %v1118_v13, %s12496_s23 }
  0xe8   : > { %v8815_v3 = vpop.permute.xlu1 %1848 }
  0xea   : > { %1138 = vrot.lane.b32.xlu1 %v1120_v17, %s12496_s23  ;;  %s12866_s23 = sld [smem:[#allocation73_spill]] }
  0xeb   : > { %1196 = vrot.lane.b32.xlu0 %v1178_v16, %s12482_s24  ;;  %v1468_v16 = vmul.f32 %v8782_v50, %v8609_v37 }
  0xed   : > { %v8828_v9 = vpop.permute.xlu1 %1905 }
  0xee   : > { %1194 = vrot.lane.b32.xlu1 %v1177_v19, %s12482_s24  ;;  %12669 = vst [vmem:[#allocation34_spill] sm:$0xff] %v8828_v9  ;;  %v1466_v19 = vmul.f32 %v8782_v50, %v8596_v32 }
  0xef   : > { %1252 = vrot.lane.b32.xlu0 %v1235_v20, %s12484_s30 }
  0xf2   : > { %1192 = vrot.lane.b32.xlu1 %v1176_v23, %s12482_s24  ;;  %s12486_s24 = smov 60  }
  0xf3   : > { %1250 = vrot.lane.b32.xlu0 %v1234_v22, %s12484_s30  ;;  %v774_v22 = vmul.f32 %v8641_v49, %v8751_v25 }
  0xf6   : > { %1254 = vrot.lane.b32.xlu1 %v1236_v35, %s12484_s30  ;;  %s12488_s30 = smov 32  }
  0xf7   : > { %562 = vrot.lane.b32.xlu0 %v542_v41, %s12502_s16 }
  0xfa   : > { %560 = vrot.lane.b32.xlu1 %v541_v43, %s12502_s16  ;;  %s12673_s16 = smov 94  }
  0xfb   : > { %1312 = vrot.lane.b32.xlu0 %v1294_v42, %s12486_s24  ;;  %v1525_v42 = vmul.f32 %v8817_v4, %v8591_v31 }
  0xfe   : > { %1310 = vrot.lane.b32.xlu1 %v1293_v46, %s12486_s24  ;;  %v831_v46 = vmul.f32 %v8655_v54, %v8761_v39 }
  0xff   : > { %618 = vrot.lane.b32.xlu0 %v599_v48, %s12500_s20  ;;  %v2027_v48 = vld [vmem:[%s12459_s3 + $0x170] sm:$0xff] }
 0x100   : > { %2317 = vmatprep.subr.mxu0 %v2027_v48  ;;  %v2012_v48 = vld [vmem:[%s12459_s3 + $0xf8] sm:$0xff] }
 0x102   : > { %1308 = vrot.lane.b32.xlu1 %v1292_v52, %s12486_s24  ;;  %s12490_s24 = smov 31   ;;  %v1524_v52 = vmul.f32 %v8817_v4, %v8596_v32 }
 0x103   : > { %1368 = vrot.lane.b32.xlu0 %v1351_v51, %s12488_s30 }
 0x106   : > { %620 = vrot.lane.b32.xlu1 %v600_v55, %s12500_s20  ;;  %s12701_s20 = smov 32  }
 0x107   : > { %1366 = vrot.lane.b32.xlu0 %v1350_v53, %s12488_s30  ;;  %v2026_v53 = vld [vmem:[%s12459_s3 + $0x168] sm:$0xff] }
 0x108   : > { %2318 = vmatpush1.msra.mxu0 %v2026_v53  ;;  %v2011_v53 = vld [vmem:[%s12459_s3 + $0xf0] sm:$0xff] }
 0x10a   : > { %1370 = vrot.lane.b32.xlu1 %v1352_v58, %s12488_s30  ;;  %s12492_s30 = smov 30   ;;  %v2024_v58 = vld [vmem:[%s12459_s3 + $0x158] sm:$0xff] }
 0x10b   : > { %678 = vrot.lane.b32.xlu0 %v658_v59, %s12498_s21  ;;  %v1583_v59 = vmul.f32 %v8795_v56, %v8591_v31  ;;  %2319 = vmatprep.subr.mxu0 %v2024_v58  ;;  %v8942_v58 = vld [vmem:[%s8580_s15 + $0x1] sm:$0xff] }
 0x10e   : > { %676 = vrot.lane.b32.xlu1 %v657_v61, %s12498_s21  ;;  %s12671_s21 = smov 95   ;;  %v2023_v61 = vld [vmem:[%s12459_s3 + $0x150] sm:$0xff] }
 0x10f   : > { %1428 = vrot.lane.b32.xlu0 %v1410_v63, %s12490_s24  ;;  %2320 = vmatpush1.msra.mxu0 %v2023_v61  ;;  %v2021_v63 = vld [vmem:[%s12459_s3 + $0x140] sm:$0xff] }
 0x110   : > { %2321 = vmatprep.subr.mxu0 %v2021_v63  ;;  %v889_v63 = vmul.f32 %v8663_v57, %v8761_v39 }
 0x112   : > { %1426 = vrot.lane.b32.xlu1 %v1409_v1, %s12490_s24 }
 0x113   : > { %734 = vrot.lane.b32.xlu0 %v715_v6, %s12494_s22  ;;  %v832_v6 = vmul.f32 %v8655_v54, %v8751_v25 }
 0x116   : > { %1424 = vrot.lane.b32.xlu1 %v1408_v7, %s12490_s24  ;;  %s12670_s24 = smov 96   ;;  %v2020_v7 = vld [vmem:[%s12459_s3 + $0x138] sm:$0xff] }
 0x117   : > { %1484 = vrot.lane.b32.xlu0 %v1467_v8, %s12492_s30  ;;  %2322 = vmatpush1.msra.mxu0 %v2020_v7 }
 0x11a   : > { %736 = vrot.lane.b32.xlu1 %v716_v12, %s12494_s22  ;;  %s12672_s22 = smov 29   ;;  %v2018_v12 = vld [vmem:[%s12459_s3 + $0x128] sm:$0xff] }
 0x11b   : > { %1638 = vperm.xlu0 %8294, %v8548_v0   ;;  %2323 = vmatprep.subr.mxu0 %v2018_v12  ;;  %v2006_v12 = vld [vmem:[%s12459_s3 + $0xc8] sm:$0xff] }
 0x11c   : > { %v8837_v13 = vpop.permute.xlu1 %556  ;;  %v8839_v14 = vpop.permute.xlu0 %554 }
 0x11e   : > { %1486 = vrot.lane.b32.xlu1 %v1468_v16, %s12492_s30  ;;  %v1582_v16 = vmul.f32 %v8795_v56, %v8596_v32 }
 0x11f   : > { %8295 = vset.pattern.permute.xlu0 %v8385_v27  ;;  %v773_v27 = vmul.f32 %v8641_v49, %v8761_v39 }
 0x120   : > { %v8845_v17 = vpop.permute.xlu1 %558  ;;  %439 = vperm.xlu0 %8295, %v8548_v0   ;;  %v1526_v0 = vmul.f32 %v8817_v4, %v8609_v37 }
 0x121   : > { %v8850_v20 = vpop.permute.xlu0 %616 }
 0x122   : > { %1482 = vrot.lane.b32.xlu1 %v1466_v19, %s12492_s30  ;;  %s12504_s30 = smov 29   ;;  %v2017_v19 = vld [vmem:[%s12459_s3 + $0x120] sm:$0xff] }
 0x123   : > { %2324 = vmatpush1.msra.mxu0 %v2017_v19  ;;  %v8965_v19 = vrot.slane %v8942_v58, %v8599_v33  ;;  %v1985_v33 = vld [vmem:[%s12459_s3 + $0x20] sm:$0xff] }
 0x124   : > { %v8855_v23 = vpop.permute.xlu1 %614  ;;  %794 = vrot.lane.b32.xlu0 %v774_v22, %s12670_s24  ;;  %v2015_v22 = vld [vmem:[%s12459_s3 + $0x110] sm:$0xff] }
 0x125   : > { %v8860_v35 = vpop.permute.xlu0 %672  ;;  %2325 = vmatprep.subr.mxu0 %v2015_v22  ;;  %v2005_v22 = vld [vmem:[%s12459_s3 + $0xc0] sm:$0xff] }
 0x126   : > { %792 = vrot.lane.b32.xlu1 %v773_v27, %s12670_s24 }
 0x128   : > { %v8865_v41 = vpop.permute.xlu1 %612  ;;  %1544 = vrot.lane.b32.xlu0 %v1526_v0, %s12504_s30  ;;  %v1584_v0 = vmul.f32 %v8795_v56, %v8609_v37 }
 0x129   : > { %v8870_v43 = vpop.permute.xlu0 %670 }
 0x12a   : > { %1542 = vrot.lane.b32.xlu1 %v1525_v42, %s12504_s30  ;;  %v2014_v42 = vld [vmem:[%s12459_s3 + $0x108] sm:$0xff]  ;;  %s12692_s30 = smov 63  }
 0x12b   : > { %2326 = vmatpush1.msra.mxu0 %v2014_v42 }
 0x12c   : > { %v8878_v51 = vpop.permute.xlu1 %674  ;;  %850 = vrot.lane.b32.xlu0 %v831_v46, %s12671_s21  ;;  %2327 = vmatprep.subr.mxu0 %v2012_v48  ;;  %v947_v48 = vmul.f32 %v8677_v62, %v8761_v39 }
 0x12d   : > { %v8886_v55 = vpop.permute.xlu0 %732  ;;  %2328 = vmatpush1.msra.mxu0 %v2011_v53  ;;  %v2002_v53 = vld [vmem:[%s12459_s3 + $0xa8] sm:$0xff] }
 0x12e   : > { %1540 = vrot.lane.b32.xlu1 %v1524_v52, %s12672_s22  ;;  %v890_v52 = vmul.f32 %v8663_v57, %v8751_v25 }
 0x130   : > { %v8900_v1 = vpop.permute.xlu1 %730  ;;  %1600 = vrot.lane.b32.xlu0 %v1583_v59, %s12506_s17  ;;  %v2009_v59 = vld [vmem:[%s12459_s3 + $0xe0] sm:$0xff] }
 0x131   : > { %v8908_v8 = vpop.permute.xlu0 %788  ;;  %2329 = vmatprep.subr.mxu0 %v2009_v59 }
 0x132   : > { %852 = vrot.lane.b32.xlu1 %v832_v6, %s12671_s21  ;;  %v2008_v6 = vld [vmem:[%s12459_s3 + $0xd8] sm:$0xff] }
 0x133   : > { %2330 = vmatpush1.msra.mxu0 %v2008_v6  ;;  %v1739_v6 = vmul.f32 %v8965_v19, %v8804_v60 }
 0x134   : > { %v8922_v27 = vpop.permute.xlu1 %728  ;;  %1598 = vrot.lane.b32.xlu0 %v1582_v16, %s12506_s17  ;;  %v948_v16 = vmul.f32 %v8677_v62, %v8751_v25  ;;  %2331 = vmatprep.subr.mxu0 %v2006_v12  ;;  %v1997_v12 = vld [vmem:[%s12459_s3 + $0x80] sm:$0xff] }
 0x135   : > { %v8930_v46 = vpop.permute.xlu0 %786  ;;  %2332 = vmatpush1.msra.mxu0 %v2005_v22  ;;  %v1981_v62 = vld [vmem:[%s12459_s3] sm:$0xff] }
 0x136   : > { %1602 = vrot.lane.b32.xlu1 %v1584_v0, %s12506_s17  ;;  %v2003_v0 = vld [vmem:[%s12459_s3 + $0xb0] sm:$0xff]  ;;  %s12687_s17 = smov 125  }
 0x137   : > { %2333 = vmatprep.subr.mxu0 %v2003_v0  ;;  %v9008_v0 = vrot.slane %v8942_v58, %v445_v29  ;;  %v1993_v29 = vld [vmem:[%s12459_s3 + $0x60] sm:$0xff] }
 0x138   : > { %v8947_v61 = vpop.permute.xlu1 %790  ;;  %910 = vrot.lane.b32.xlu0 %v890_v52, %s12673_s16  ;;  %v8981_v52 = vrot.slane %v8942_v58, %v449_v28  ;;  %2334 = vmatpush1.msra.mxu0 %v2002_v53  ;;  %v1999_v28 = vld [vmem:[%s12459_s3 + $0x90] sm:$0xff] }
 0x139   : > { %v8955_v7 = vpop.permute.xlu0 %848  ;;  %12677 = vst [vmem:[#allocation36_spill] sm:$0xff] %v9008_v0 }
 0x13a   : > { %908 = vrot.lane.b32.xlu1 %v889_v63, %s12673_s16  ;;  %12675 = vst [vmem:[#allocation35_spill] sm:$0xff] %v8981_v52  ;;  %v2000_v63 = vld [vmem:[%s12459_s3 + $0x98] sm:$0xff]  ;;  %v1738_v22 = vmul.f32 %v8981_v52, %v8804_v60 }
 0x13b   : > { %2335 = vmatprep.subr.mxu0 %v2000_v63  ;;  %v1994_v63 = vld [vmem:[%s12459_s3 + $0x68] sm:$0xff] }
 0x13c   : > { %v8973_v42 = vpop.permute.xlu1 %846  ;;  %968 = vrot.lane.b32.xlu0 %v948_v16, %s12674_s0  ;;  %2336 = vmatpush1.msra.mxu0 %v1999_v28  ;;  %v1991_v28 = vld [vmem:[%s12459_s3 + $0x50] sm:$0xff] }
 0x13d   : > { %v8986_v59 = vpop.permute.xlu0 %904  ;;  %2337 = vmatprep.subr.mxu0 %v1997_v12 }
 0x13e   : > { %966 = vrot.lane.b32.xlu1 %v947_v48, %s12674_s0  ;;  %v1996_v48 = vld [vmem:[%s12459_s3 + $0x78] sm:$0xff] }
 0x13f   : > { %2338 = vmatpush1.msra.mxu0 %v1996_v48  ;;  %v1990_v48 = vld [vmem:[%s12459_s3 + $0x48] sm:$0xff] }
 0x140   : > { %v9000_v16 = vpop.permute.xlu1 %844  ;;  %1757 = vrot.lane.b32.xlu0 %v1739_v6, %s12676_s14  ;;  %v1005_v6 = vmul.f32 %v8685_v2, %v8761_v39  ;;  %2339 = vmatprep.subr.mxu0 %v1994_v63 }
 0x141   : > { %v9013_v53 = vpop.permute.xlu0 %902  ;;  %2340 = vmatpush1.msra.mxu0 %v1993_v29  ;;  %v1988_v29 = vld [vmem:[%s12459_s3 + $0x38] sm:$0xff] }
 0x142   : > { %1755 = vrot.lane.b32.xlu1 %v1738_v22, %s12676_s14  ;;  %v1737_v22 = vmul.f32 %v9008_v0, %v8804_v60  ;;  %2341 = vmatprep.subr.mxu0 %v1991_v28  ;;  %v1987_v28 = vld [vmem:[%s12459_s3 + $0x30] sm:$0xff] }
 0x143   : > { %2342 = vmatpush1.msra.mxu0 %v1990_v48 }
 0x144   : > { %v9027_v12 = vpop.permute.xlu1 %906  ;;  %1024 = vrot.lane.b32.xlu0 %v1005_v6, %s12678_s19  ;;  %v1795_v6 = vmul.f32 %v8830_v11, %v8981_v52  ;;  %2343 = vmatprep.subr.mxu0 %v1988_v29  ;;  %v1984_v29 = vld [vmem:[%s12459_s3 + $0x18] sm:$0xff] }
 0x145   : > { %v9035_v63 = vpop.permute.xlu0 %964  ;;  %2344 = vmatpush1.msra.mxu0 %v1987_v28  ;;  %v1982_v28 = vld [vmem:[%s12459_s3 + $0x8] sm:$0xff] }
 0x146   : > { %1753 = vrot.lane.b32.xlu1 %v1737_v22, %s12676_s14  ;;  %v1006_v22 = vmul.f32 %v8685_v2, %v8751_v25  ;;  %2345 = vmatprep.subr.mxu0 %v1985_v33  ;;  %v1794_v33 = vmul.f32 %v8830_v11, %v9008_v0  ;;  %v2074_v2 = vld [vmem:[%s12459_s3 + $0x2e8] sm:$0xff] }
 0x147   : > { %2346 = vmatpush1.msra.mxu0 %v1984_v29  ;;  %v2072_v29 = vld [vmem:[%s12459_s3 + $0x2d8] sm:$0xff] }
 0x148   : > { %v9049_v48 = vpop.permute.xlu1 %962  ;;  %1812 = vrot.lane.b32.xlu0 %v1795_v6, %s12679_s25  ;;  %v2075_v6 = vld [vmem:[%s12459_s3 + $0x2f0] sm:$0xff]  ;;  %2347 = vmatprep.subr.mxu0 %v1982_v28 }
 0x149   : > { %v9060_v37 = vpop.permute.xlu0 %1020  ;;  %2348 = vmatpush1.msra.mxu0 %v1981_v62  ;;  %v2071_v28 = vld [vmem:[%s12459_s3 + $0x2d0] sm:$0xff]  ;;  %v2069_v62 = vld [vmem:[%s12459_s3 + $0x2c0] sm:$0xff] }
 0x14a   : > { %12680 = vst [vmem:[#allocation37_spill] sm:$0xff] %v9060_v37  ;;  %1026 = vrot.lane.b32.xlu1 %v1006_v22, %s12678_s19  ;;  %v1796_v22 = vmul.f32 %v8830_v11, %v8965_v19  ;;  %2349 = vmatprep.subr.mxu0 %v2075_v6  ;;  %v2068_v6 = vld [vmem:[%s12459_s3 + $0x2b8] sm:$0xff] }
 0x14b   : > { %2350 = vmatpush2.msra.mxu0 %v2074_v2  ;;  %v2066_v2 = vld [vmem:[%s12459_s3 + $0x2a8] sm:$0xff] }
 0x14c   : > { %v9077_v57 = vpop.permute.xlu1 %960  ;;  %1810 = vrot.lane.b32.xlu0 %v1794_v33, %s12679_s25  ;;  %v1064_v33 = vmul.f32 %v8694_v5, %v8751_v25  ;;  %2351 = vmatprep.subr.mxu0 %v2072_v29  ;;  %v2065_v29 = vld [vmem:[%s12459_s3 + $0x2a0] sm:$0xff] }
 0x14d   : > { %12681 = vst [vmem:[#allocation38_spill] sm:$0xff] %v9077_v57  ;;  %v9082_v37 = vpop.permute.xlu0 %1018  ;;  %2352 = vmatpush2.msra.mxu0 %v2071_v28  ;;  %v2063_v28 = vld [vmem:[%s12459_s3 + $0x290] sm:$0xff] }
 0x14e   : > { %12682 = vst [vmem:[#allocation39_spill] sm:$0xff] %v9082_v37  ;;  %1814 = vrot.lane.b32.xlu1 %v1796_v22, %s12679_s25  ;;  %v1063_v22 = vmul.f32 %v8694_v5, %v8761_v39  ;;  %2353 = vmatprep.subr.mxu0 %v2069_v62  ;;  %v2062_v62 = vld [vmem:[%s12459_s3 + $0x288] sm:$0xff] }
 0x14f   : > { %2354 = vmatpush2.msra.mxu0 %v2068_v6  ;;  %v2060_v6 = vld [vmem:[%s12459_s3 + $0x278] sm:$0xff] }
 0x150   : > { %v9099_v37 = vpop.permute.xlu1 %1022  ;;  %1084 = vrot.lane.b32.xlu0 %v1064_v33, %s12684_s13  ;;  %v1853_v33 = vmul.f32 %v8815_v3, %v8965_v19  ;;  %2355 = vmatprep.subr.mxu0 %v2066_v2  ;;  %v2059_v2 = vld [vmem:[%s12459_s3 + $0x270] sm:$0xff] }
 0x151   : > { %12683 = vst [vmem:[#allocation40_spill] sm:$0xff] %v9099_v37  ;;  %v9104_v57 = vpop.permute.xlu0 %1080  ;;  %2356 = vmatpush2.msra.mxu0 %v2065_v29  ;;  %v2057_v29 = vld [vmem:[%s12459_s3 + $0x260] sm:$0xff]  ;;  %v1122_v37 = vmul.f32 %v8707_v10, %v8751_v25 }
 0x152   : > { %12685 = vst [vmem:[#allocation41_spill] sm:$0xff] %v9104_v57  ;;  %1082 = vrot.lane.b32.xlu1 %v1063_v22, %s12684_s13  ;;  %v1852_v22 = vmul.f32 %v8815_v3, %v8981_v52  ;;  %2357 = vmatprep.subr.mxu0 %v2063_v28  ;;  %v2056_v28 = vld [vmem:[%s12459_s3 + $0x258] sm:$0xff] }
 0x153   : > { %2358 = vmatpush2.msra.mxu0 %v2062_v62  ;;  %v1961_v62 = vld [vmem:[%s12689_s2] sm:$0x3f]  ;;  %s12703_s2 = smov 31  }
 0x154   : > { %v9121_v5 = vpop.permute.xlu1 %1078  ;;  %1871 = vrot.lane.b32.xlu0 %v1853_v33, %s12687_s17  ;;  %v1851_v33 = vmul.f32 %v8815_v3, %v9008_v0  ;;  %2359 = vmatprep.subr.mxu0 %v2060_v6  ;;  %v2053_v6 = vld [vmem:[%s12459_s3 + $0x240] sm:$0xff] }
 0x155   : > { %12686 = vst [vmem:[#allocation42_spill] sm:$0xff] %v9121_v5  ;;  %v9126_v57 = vpop.permute.xlu0 %1136  ;;  %2360 = vmatpush2.msra.mxu0 %v2059_v2  ;;  %v2051_v2 = vld [vmem:[%s12459_s3 + $0x230] sm:$0xff] }
 0x156   : > { %12688 = vst [vmem:[#allocation43_spill] sm:$0xff] %v9126_v57  ;;  %1869 = vrot.lane.b32.xlu1 %v1852_v22, %s12687_s17  ;;  %v2054_v57 = vld [vmem:[%s12459_s3 + $0x248] sm:$0xff]  ;;  %2361 = vmatprep.subr.mxu0 %v2057_v29 }
 0x157   : > { %2362 = vmatpush2.msra.mxu0 %v2056_v28  ;;  %v2050_v29 = vld [vmem:[%s12459_s3 + $0x228] sm:$0xff]  ;;  %v1121_v28 = vmul.f32 %v8707_v10, %v8761_v39 }
 0x158   : > { %v9146_v5 = vpop.permute.xlu1 %1076  ;;  %1867 = vrot.lane.b32.xlu0 %v1851_v33, %s12687_s17  ;;  %2363 = vmatprep.subr.mxu0 %v2054_v57  ;;  %v2048_v33 = vld [vmem:[%s12459_s3 + $0x218] sm:$0xff]  ;;  %v2047_v57 = vld [vmem:[%s12459_s3 + $0x210] sm:$0xff]  ;;  %v2042_v10 = vld [vmem:[%s12459_s3 + $0x1e8] sm:$0xff] }
 0x159   : > { %v9152_v22 = vpop.permute.xlu0 %1134  ;;  %2364 = vmatpush2.msra.mxu0 %v2053_v6  ;;  %v2045_v6 = vld [vmem:[%s12459_s3 + $0x200] sm:$0xff] }
 0x15a   : > { %12690 = vst [vmem:[#allocation44_spill] sm:$0xff] %v9152_v22  ;;  %1964 = vperm.xlu1 %8296, %v1961_v62   ;;  %2365 = vmatprep.subr.mxu0 %v2051_v2  ;;  %v2044_v2 = vld [vmem:[%s12459_s3 + $0x1f8] sm:$0xff] }
 0x15b   : > { %2366 = vmatpush2.msra.mxu0 %v2050_v29 }
 0x15c   : > { %v9165_v22 = vpop.permute.xlu1 %1138  ;;  %1142 = vrot.lane.b32.xlu0 %v1122_v37, %s12692_s30  ;;  %v1910_v37 = vmul.f32 %v8828_v9, %v8965_v19  ;;  %2367 = vmatprep.subr.mxu0 %v2048_v33  ;;  %v2041_v19 = vld [vmem:[%s12459_s3 + $0x1e0] sm:$0xff]  ;;  %v2039_v33 = vld [vmem:[%s12459_s3 + $0x1d0] sm:$0xff] }
 0x15d   : > { %12691 = vst [vmem:[#allocation45_spill] sm:$0xff] %v9165_v22  ;;  %v9173_v62 = vpop.permute.xlu0 %1196  ;;  %2368 = vmatpush2.msra.mxu0 %v2047_v57  ;;  %v1179_v57 = vmul.f32 %v8721_v15, %v8761_v39 }
 0x15e   : > { %12693 = vst [vmem:[#allocation46_spill] sm:$0xff] %v9173_v62  ;;  %1140 = vrot.lane.b32.xlu1 %v1121_v28, %s12692_s30  ;;  %v1909_v28 = vmul.f32 %v8828_v9, %v8981_v52  ;;  %2369 = vmatprep.subr.mxu0 %v2045_v6  ;;  %v2038_v6 = vld [vmem:[%s12459_s3 + $0x1c8] sm:$0xff] }
 0x15f   : > { %2370 = vmatpush2.msra.mxu0 %v2044_v2 }
 0x160   : > { %v9187_v29 = vpop.permute.xlu1 %1194  ;;  %1928 = vrot.lane.b32.xlu0 %v1910_v37, %s12694_s12  ;;  %2371 = vmatprep.subr.mxu0 %v2042_v10  ;;  %v2036_v37 = vld [vmem:[%s12459_s3 + $0x1b8] sm:$0xff]  ;;  %v2035_v10 = vld [vmem:[%s12459_s3 + $0x1b0] sm:$0xff] }
 0x161   : > { %v9192_v62 = vpop.permute.xlu0 %1252  ;;  %2372 = vmatpush2.msra.mxu0 %v2041_v19  ;;  %v2033_v19 = vld [vmem:[%s12459_s3 + $0x1a0] sm:$0xff] }
 0x162   : > { %1926 = vrot.lane.b32.xlu1 %v1909_v28, %s12694_s12  ;;  %v1908_v28 = vmul.f32 %v8828_v9, %v9008_v0  ;;  %2373 = vmatprep.subr.mxu0 %v2039_v33  ;;  %v2032_v33 = vld [vmem:[%s12459_s3 + $0x198] sm:$0xff] }
 0x163   : > { %2374 = vmatpush2.msra.mxu0 %v2038_v6  ;;  %v2030_v6 = vld [vmem:[%s12459_s3 + $0x188] sm:$0xff] }
 0x164   : > { %v9209_v2 = vpop.permute.xlu1 %1192  ;;  %1198 = vrot.lane.b32.xlu0 %v1179_v57, %s12695_s18  ;;  %v1237_v57 = vmul.f32 %v8729_v18, %v8761_v39  ;;  %2375 = vmatprep.subr.mxu0 %v2036_v37  ;;  %v2029_v37 = vld [vmem:[%s12459_s3 + $0x180] sm:$0xff] }
 0x165   : > { %v9214_v52 = vpop.permute.xlu0 %1250  ;;  %2376 = vmatpush2.msra.mxu0 %v2035_v10  ;;  %v1295_v10 = vmul.f32 %v8757_v36, %v8761_v39 }
 0x166   : > { %12696 = vst [vmem:[#allocation47_spill] sm:$0xff] %v9214_v52  ;;  %1924 = vrot.lane.b32.xlu1 %v1908_v28, %s12694_s12  ;;  %v1180_v28 = vmul.f32 %v8721_v15, %v8751_v25  ;;  %2377 = vmatprep.subr.mxu0 %v2033_v19  ;;  %v1238_v19 = vmul.f32 %v8729_v18, %v8751_v25 }
 0x167   : > { %2378 = vmatpush2.msra.mxu0 %v2032_v33  ;;  %v1353_v33 = vmul.f32 %v8777_v47, %v8761_v39 }
 0x168   : > { %v9231_v0 = vpop.permute.xlu1 %1254  ;;  %1256 = vrot.lane.b32.xlu0 %v1237_v57, %s12697_s1  ;;  %2379 = vmatprep.subr.mxu0 %v2030_v6  ;;  %v1296_v6 = vmul.f32 %v8757_v36, %v8751_v25 }
 0x169   : > { %v9236_v52 = vpop.permute.xlu0 %562  ;;  %2380 = vmatpush2.msra.mxu0 %v2029_v37 }
 0x16a   : > { %12698 = vst [vmem:[#allocation48_spill] sm:$0xff] %v9236_v52  ;;  %1200 = vrot.lane.b32.xlu1 %v1180_v28, %s12695_s18  ;;  %v12551_v52 = vsub.s32 6, %v8575_v26 }
 0x16c   : > { %v9244_v9 = vpop.permute.xlu1 %560  ;;  %1314 = vrot.lane.b32.xlu0 %v1295_v10, %s12700_s29  ;;  %v1411_v10 = vmul.f32 %v8771_v45, %v8761_v39 }
 0x16d   : > { %12699 = vst [vmem:[#allocation49_spill] sm:$0xff] %v9244_v9  ;;  %v9249_v57 = vpop.permute.xlu0 %1312  ;;  %v1354_v9 = vmul.f32 %v8777_v47, %v8751_v25  ;;  %v12559_v47 = vsub.s32 7, %v8575_v26 }
 0x16e   : > { %1258 = vrot.lane.b32.xlu1 %v1238_v19, %s12697_s1 }
 0x170   : > { %v9254_v28 = vpop.permute.xlu1 %1310  ;;  %1372 = vrot.lane.b32.xlu0 %v1353_v33, %s12701_s20 }
 0x171   : > { %v9259_v37 = vpop.permute.xlu0 %618 }
 0x172   : > { %12702 = vst [vmem:[#allocation50_spill] sm:$0xff] %v9259_v37  ;;  %1316 = vrot.lane.b32.xlu1 %v1296_v6, %s12700_s29  ;;  %v1469_v37 = vmul.f32 %v8782_v50, %v8761_v39  ;;  %v9278_v6 = vrot.slane %v8586_v30, %v12551_v52  ;;  %v1470_v52 = vmul.f32 %v8782_v50, %v8751_v25  ;;  %v2120_v50 = vld [vmem:[%s12459_s3 + $0x458] sm:$0xff] }
 0x174   : > { %v9265_v19 = vpop.permute.xlu1 %1308  ;;  %1430 = vrot.lane.b32.xlu0 %v1411_v10, %s12703_s2  ;;  %12705 = vst [vmem:[#allocation52_spill] sm:$0xff] %v9278_v6  ;;  %v1412_v10 = vmul.f32 %v8771_v45, %v8751_v25 }
 0x175   : > { %v9270_v33 = vpop.permute.xlu0 %1368 }
 0x176   : > { %12704 = vst [vmem:[#allocation51_spill] sm:$0xff] %v9270_v33  ;;  %1374 = vrot.lane.b32.xlu1 %v1354_v9, %s12701_s20  ;;  %v544_v9 = vmul.f32 %v9278_v6, %v8601_v34  ;;  %v602_v33 = vmul.f32 %v8613_v38, %v9278_v6 }
 0x178   : > { %v9280_v36 = vpop.permute.xlu1 %620  ;;  %1488 = vrot.lane.b32.xlu0 %v1469_v37, %s12707_s10  ;;  %v9299_v37 = vrot.slane %v8586_v30, %v12559_v47 }
 0x179   : > { %12706 = vst [vmem:[#allocation53_spill] sm:$0xff] %v9280_v36  ;;  %v9286_v18 = vpop.permute.xlu0 %1366  ;;  %v2123_v36 = vld [vmem:[%s12459_s3 + $0x470] sm:$0xff] }
 0x17a   : > { %12708 = vst [vmem:[#allocation54_spill] sm:$0xff] %v9286_v18  ;;  %1432 = vrot.lane.b32.xlu1 %v1412_v10, %s12703_s2  ;;  %v1527_v10 = vmul.f32 %v8817_v4, %v8761_v39  ;;  %2388 = vmatprep.subr.mxu1 %v2123_v36  ;;  %v2119_v18 = vld [vmem:[%s12459_s3 + $0x450] sm:$0xff]  ;;  %v2116_v36 = vld [vmem:[%s12459_s3 + $0x438] sm:$0xff] }
 0x17c   : > { %v9291_v15 = vpop.permute.xlu1 %1370  ;;  %566 = vrot.lane.b32.xlu0 %v544_v9, %s12676_s14  ;;  %v2122_v9 = vld [vmem:[%s12459_s3 + $0x468] sm:$0xff] }
 0x17d   : > { %v9313_v45 = vpop.permute.xlu0 %678  ;;  %2389 = vmatpush1.msra.mxu1 %v2122_v9  ;;  %v1528_v9 = vmul.f32 %v8817_v4, %v8751_v25  ;;  %v2108_v4 = vld [vmem:[%s12459_s3 + $0x3f8] sm:$0xff] }
 0x17e   : > { %1490 = vrot.lane.b32.xlu1 %v1470_v52, %s12707_s10  ;;  %12709 = vst [vmem:[#allocation55_spill] sm:$0xff] %v9313_v45  ;;  %v545_v52 = vmul.f32 %v9299_v37, %v8601_v34  ;;  %2390 = vmatprep.subr.mxu1 %v2120_v50  ;;  %v2113_v50 = vld [vmem:[%s12459_s3 + $0x420] sm:$0xff] }
 0x17f   : > { %2391 = vmatpush1.msra.mxu1 %v2119_v18  ;;  %v2114_v18 = vld [vmem:[%s12459_s3 + $0x428] sm:$0xff] }
 0x180   : > { %v9315_v47 = vpop.permute.xlu1 %676  ;;  %1546 = vrot.lane.b32.xlu0 %v1527_v10, %s12672_s22  ;;  %v2117_v10 = vld [vmem:[%s12459_s3 + $0x440] sm:$0xff] }
 0x181   : > { %12710 = vst [vmem:[#allocation56_spill] sm:$0xff] %v9315_v47  ;;  %2392 = vmatprep.subr.mxu1 %v2117_v10  ;;  %v2111_v10 = vld [vmem:[%s12459_s3 + $0x410] sm:$0xff]  ;;  %v660_v47 = vmul.f32 %v8617_v40, %v9278_v6 }
 0x182   : > { %568 = vrot.lane.b32.xlu1 %v545_v52, %s12676_s14  ;;  %2393 = vmatpush1.msra.mxu1 %v2116_v36  ;;  %v9343_v52 = vpop.permute.xlu0 %1428  ;;  %v2110_v36 = vld [vmem:[%s12459_s3 + $0x408] sm:$0xff] }
 0x183   : > { %2394 = vmatprep.subr.mxu1 %v2114_v18  ;;  %v603_v18 = vmul.f32 %v8613_v38, %v9299_v37 }
 0x184   : > { %v9332_v45 = vpop.permute.xlu1 %1426  ;;  %624 = vrot.lane.b32.xlu0 %v602_v33, %s12679_s25  ;;  %v1585_v33 = vmul.f32 %v8795_v56, %v8761_v39  ;;  %2395 = vmatpush1.msra.mxu1 %v2113_v50  ;;  %v2107_v50 = vld [vmem:[%s12459_s3 + $0x3f0] sm:$0xff]  ;;  %v12713_v39 = vsub.s32 5, %v8575_v26 }
 0x185   : > { %2396 = vmatprep.subr.mxu1 %v2111_v10  ;;  %v2104_v10 = vld [vmem:[%s12459_s3 + $0x3d8] sm:$0xff]  ;;  %v2083_v26 = vld [vmem:[%s12459_s3 + $0x330] sm:$0xff] }
 0x186   : > { %1548 = vrot.lane.b32.xlu1 %v1528_v9, %s12672_s22  ;;  %2397 = vmatpush1.msra.mxu1 %v2110_v36  ;;  %v9380_v36 = vpop.permute.xlu0 %734 }
 0x187   : > { %2398 = vmatprep.subr.mxu1 %v2108_v4  ;;  %12714 = vst [vmem:[#allocation58_spill] sm:$0xff] %v9380_v36  ;;  %v2101_v4 = vld [vmem:[%s12459_s3 + $0x3c0] sm:$0xff]  ;;  %v2084_v36 = vld [vmem:[%s12459_s3 + $0x338] sm:$0xff] }
 0x188   : > { %v9358_v9 = vpop.permute.xlu1 %1424  ;;  %1604 = vrot.lane.b32.xlu0 %v1585_v33, %s12712_s8  ;;  %2399 = vmatpush1.msra.mxu1 %v2107_v50  ;;  %v2105_v33 = vld [vmem:[%s12459_s3 + $0x3e0] sm:$0xff] }
 0x189   : > { %12711 = vst [vmem:[#allocation57_spill] sm:$0xff] %v9358_v9  ;;  %v9372_v9 = vrot.slane %v8586_v30, %v12713_v39  ;;  %v1586_v30 = vmul.f32 %v8795_v56, %v8751_v25  ;;  %2400 = vmatprep.subr.mxu1 %v2105_v33  ;;  %v2102_v39 = vld [vmem:[%s12459_s3 + $0x3c8] sm:$0xff]  ;;  %v2099_v25 = vld [vmem:[%s12459_s3 + $0x3b0] sm:$0xff]  ;;  %v2096_v33 = vld [vmem:[%s12459_s3 + $0x398] sm:$0xff] }
 0x18a   : > { %626 = vrot.lane.b32.xlu1 %v603_v18, %s12679_s25  ;;  %2401 = vmatpush1.msra.mxu1 %v2104_v10 }
 0x18b   : > { %v543_v50 = vmul.f32 %v9372_v9, %v8601_v34  ;;  %2402 = vmatprep.subr.mxu1 %v2102_v39  ;;  %v661_v34 = vmul.f32 %v8617_v40, %v9299_v37  ;;  %v9413_v39 = vpop.permute.xlu0 %1484 }
 0x18c   : > { %v9382_v18 = vpop.permute.xlu1 %736  ;;  %682 = vrot.lane.b32.xlu0 %v660_v47, %s12687_s17  ;;  %2403 = vmatpush1.msra.mxu1 %v2101_v4  ;;  %v2098_v47 = vld [vmem:[%s12459_s3 + $0x3a8] sm:$0xff]  ;;  %v719_v4 = vmul.f32 %v8628_v44, %v9299_v37 }
 0x18d   : > { %12715 = vst [vmem:[#allocation59_spill] sm:$0xff] %v9382_v18  ;;  %2404 = vmatprep.subr.mxu1 %v2099_v25  ;;  %v9420_v18 = vrot.slane %v8942_v58, %v8747_v24  ;;  %v2092_v25 = vld [vmem:[%s12459_s3 + $0x378] sm:$0xff] }
 0x18e   : > { %1606 = vrot.lane.b32.xlu1 %v1586_v30, %s12712_s8  ;;  %v2095_v30 = vld [vmem:[%s12459_s3 + $0x390] sm:$0xff]  ;;  %2405 = vmatpush1.msra.mxu1 %v2098_v47 }
 0x18f   : > { %2406 = vmatprep.subr.mxu1 %v2096_v33  ;;  %v2090_v33 = vld [vmem:[%s12459_s3 + $0x368] sm:$0xff] }
 0x190   : > { %v9405_v10 = vpop.permute.xlu1 %1486  ;;  %564 = vrot.lane.b32.xlu0 %v543_v50, %s12676_s14  ;;  %2407 = vmatpush1.msra.mxu1 %v2095_v30  ;;  %v2093_v50 = vld [vmem:[%s12459_s3 + $0x380] sm:$0xff] }
 0x191   : > { %2408 = vmatprep.subr.mxu1 %v2093_v50  ;;  %v2089_v30 = vld [vmem:[%s12459_s3 + $0x360] sm:$0xff]  ;;  %v2087_v50 = vld [vmem:[%s12459_s3 + $0x350] sm:$0xff] }
 0x192   : > { %684 = vrot.lane.b32.xlu1 %v661_v34, %s12687_s17  ;;  %v718_v34 = vmul.f32 %v8628_v44, %v9278_v6  ;;  %2409 = vmatpush1.msra.mxu1 %v2092_v25  ;;  %v2086_v25 = vld [vmem:[%s12459_s3 + $0x348] sm:$0xff] }
 0x193   : > { %2410 = vmatprep.subr.mxu1 %v2090_v33  ;;  %v601_v33 = vmul.f32 %v8613_v38, %v9372_v9  ;;  %v2081_v38 = vld [vmem:[%s12459_s3 + $0x320] sm:$0xff] }
 0x194   : > { %v9428_v47 = vpop.permute.xlu1 %1482  ;;  %742 = vrot.lane.b32.xlu0 %v719_v4, %s12694_s12  ;;  %v1740_v4 = vmul.f32 %v9420_v18, %v8804_v60  ;;  %2411 = vmatpush1.msra.mxu1 %v2089_v30  ;;  %v9460_v30 = vrot.slane %v8942_v58, %v8738_v21 }
 0x195   : > { %2412 = vmatprep.subr.mxu1 %v2087_v50 }
 0x196   : > { %740 = vrot.lane.b32.xlu1 %v718_v34, %s12694_s12  ;;  %v9440_v24 = vpop.permute.xlu0 %1638  ;;  %2413 = vmatpush1.msra.mxu1 %v2086_v25 }
 0x197   : > { %12716 = vst [vmem:[#allocation60_spill] sm:$0xff] %v9440_v24  ;;  %2414 = vmatprep.subr.mxu1 %v2084_v36  ;;  %v1741_v36 = vmul.f32 %v9460_v30, %v8804_v60  ;;  %v2078_v60 = vld [vmem:[%s12459_s3 + $0x308] sm:$0xff] }
 0x198   : > { %v9453_v34 = vpop.permute.xlu1 %792  ;;  %1759 = vrot.lane.b32.xlu0 %v1740_v4, %s12676_s14  ;;  %2415 = vmatpush1.msra.mxu1 %v2083_v26  ;;  %v2080_v26 = vld [vmem:[%s12459_s3 + $0x318] sm:$0xff] }
 0x199   : > { %12717 = vst [vmem:[#allocation61_spill] sm:$0xff] %v9453_v34  ;;  %v776_v34 = vmul.f32 %v8641_v49, %v9278_v6  ;;  %2416 = vmatprep.subr.mxu1 %v2081_v38 }
 0x19a   : > { %622 = vrot.lane.b32.xlu1 %v601_v33, %s12679_s25  ;;  %v571_v33 = vsel %vm570_vm0, %v8839_v14, %v8837_v13  ;;  %v630_v14 = vsel %vm628_vm1, %v8855_v23, %v8850_v20  ;;  %2417 = vmatpush1.msra.mxu1 %v2080_v26  ;;  %v688_v26 = vsel %vm686_vm2, %v8860_v35, %v8878_v51 }
 0x19b   : > { %v9468_v4 = vpop.permute.xlu0 %439  ;;  %2418 = vmatprep.subr.mxu1 %v2078_v60  ;;  %v745_v60 = vsel %vm744_vm3, %v8922_v27, %v8900_v1  ;;  %v803_v27 = vsel %vm802_vm4, %v8930_v46, %v8908_v8  ;;  %v862_v46 = vsel %vm860_vm5, %v8973_v42, %v8955_v7 }
 0x19c   : > { %12718 = vst [vmem:[#allocation62_spill] sm:$0xff] %v9468_v4  ;;  %v478_v58 = vmul.f32 %v8596_v32, %v9468_v4  ;;  %v479_v50 = vmul.f32 %v8591_v31, %v9468_v4  ;;  %v9477_v25 = vpop.permute.xlu1 %1542  ;;  %798 = vrot.lane.b32.xlu0 %v776_v34, %s12670_s24  ;;  %v572_v32 = vsel %vm570_vm0, %v8837_v13, %v8845_v17 }
 0x19d   : > { %v659_v34 = vmul.f32 %v8617_v40, %v9372_v9  ;;  %v629_v13 = vsel %vm628_vm1, %v8865_v41, %v8855_v23  ;;  %v2171_v23 = vld [vmem:[%s12459_s3 + $0x5f0] sm:$0xff]  ;;  %v687_v41 = vsel %vm686_vm2, %v8870_v43, %v8860_v35  ;;  %v746_v43 = vsel %vm744_vm3, %v8900_v1, %v8886_v55 }
 0x19e   : > { %v585_v31 = vadd.f32 %v571_v33, %v478_v58  ;;  %v586_v21 = vadd.f32 %v572_v32, %v479_v50  ;;  %1761 = vrot.lane.b32.xlu1 %v1741_v36, %s12676_s14  ;;  %v2077_v58 = vld [vmem:[%s12459_s3 + $0x300] sm:$0xff]  ;;  %v777_v33 = vmul.f32 %v8641_v49, %v9299_v37  ;;  %v2167_v1 = vld [vmem:[%s12459_s3 + $0x5d0] sm:$0xff] }
 0x19f   : > { %v9503_v38 = vpop.permute.xlu0 %794  ;;  %2419 = vmatpush1.msra.mxu1 %v2077_v58 }
 0x1a0   : > { %v643_v40 = vadd.f32 %v629_v13, %v585_v31  ;;  %v644_v50 = vadd.f32 %v630_v14, %v586_v21  ;;  %v9508_v36 = vpop.permute.xlu1 %1540  ;;  %680 = vrot.lane.b32.xlu0 %v659_v34, %s12687_s17  ;;  %v1798_v31 = vmul.f32 %v8830_v11, %v9460_v30  ;;  %v2170_v34 = vld [vmem:[%s12459_s3 + $0x5e8] sm:$0xff]  ;;  %2420 = vmatprep.subr.mxu1 %v2171_v23  ;;  %v2168_v14 = vld [vmem:[%s12459_s3 + $0x5d8] sm:$0xff] }
 0x1a1   : > { %2421 = vmatpush2.msra.mxu1 %v2170_v34 }
 0x1a2   : > { %v701_v21 = vadd.f32 %v687_v41, %v643_v40  ;;  %v702_v32 = vadd.f32 %v688_v26, %v644_v50  ;;  %800 = vrot.lane.b32.xlu1 %v777_v33, %s12670_s24  ;;  %v1797_v50 = vmul.f32 %v8830_v11, %v9420_v18  ;;  %v804_v33 = vsel %vm802_vm4, %v8908_v8, %v8947_v61 }
 0x1a3   : > { %v9534_v35 = vpop.permute.xlu0 %1544  ;;  %v835_v26 = vmul.f32 %v8655_v54, %v9299_v37  ;;  %2422 = vmatprep.subr.mxu1 %v2168_v14  ;;  %v861_v8 = vsel %vm860_vm5, %v9000_v16, %v8973_v42  ;;  %v834_v14 = vmul.f32 %v8655_v54, %v9278_v6  ;;  %v2162_v42 = vld [vmem:[%s12459_s3 + $0x5a8] sm:$0xff]  ;;  %v919_v16 = vsel %vm918_vm6, %v9013_v53, %v8986_v59  ;;  %v2159_v53 = vld [vmem:[%s12459_s3 + $0x590] sm:$0xff] }
 0x1a4   : > { %12719 = vst [vmem:[#allocation63_spill] sm:$0xff] %v9534_v35  ;;  %v759_v13 = vadd.f32 %v745_v60, %v701_v21  ;;  %v760_v58 = vadd.f32 %v746_v43, %v702_v32  ;;  %v9539_v40 = vpop.permute.xlu1 %852  ;;  %1818 = vrot.lane.b32.xlu0 %v1798_v31, %s12679_s25  ;;  %v2165_v21 = vld [vmem:[%s12459_s3 + $0x5c0] sm:$0xff]  ;;  %2423 = vmatpush2.msra.mxu1 %v2167_v1  ;;  %v2164_v31 = vld [vmem:[%s12459_s3 + $0x5b8] sm:$0xff] }
 0x1a5   : > { %2424 = vmatprep.subr.mxu1 %v2165_v21 }
 0x1a6   : > { %v818_v23 = vadd.f32 %v804_v33, %v760_v58  ;;  %v817_v41 = vadd.f32 %v803_v27, %v759_v13  ;;  %1816 = vrot.lane.b32.xlu1 %v1797_v50, %s12679_s25  ;;  %v920_v13 = vsel %vm918_vm6, %v8986_v59, %v9027_v12  ;;  %v2161_v58 = vld [vmem:[%s12459_s3 + $0x5a0] sm:$0xff]  ;;  %v1854_v27 = vmul.f32 %v8815_v3, %v9420_v18  ;;  %v12721_v33 = vld [vmem:[#allocation38_spill] sm:$0xff] }
 0x1a7   : > { %v9565_v32 = vpop.permute.xlu0 %850  ;;  %2425 = vmatpush2.msra.mxu1 %v2164_v31  ;;  %v978_v59 = vsel %vm976_vm7, %v9049_v48, %v9035_v63  ;;  %v717_v31 = vmul.f32 %v8628_v44, %v9372_v9 }
 0x1a8   : > { %v875_v34 = vadd.f32 %v861_v8, %v817_v41  ;;  %v876_v43 = vadd.f32 %v862_v46, %v818_v23  ;;  %v9570_v60 = vpop.permute.xlu1 %1602  ;;  %858 = vrot.lane.b32.xlu0 %v835_v26, %s12671_s21  ;;  %v977_v23 = vsel %vm976_vm7, %v12721_v33, %v9049_v48  ;;  %2426 = vmatprep.subr.mxu1 %v2162_v42  ;;  %v2158_v26 = vld [vmem:[%s12459_s3 + $0x588] sm:$0xff]  ;;  %v2156_v48 = vld [vmem:[%s12459_s3 + $0x578] sm:$0xff] }
 0x1a9   : > { %12720 = vst [vmem:[#allocation64_spill] sm:$0xff] %v9570_v60  ;;  %2427 = vmatpush2.msra.mxu1 %v2161_v58  ;;  %v12724_v42 = vld [vmem:[#allocation40_spill] sm:$0xff]  ;;  %v12725_v58 = vld [vmem:[#allocation18_spill] sm:$0xff] }
 0x1aa   : > { %v933_v50 = vadd.f32 %v919_v16, %v875_v34  ;;  %v934_v1 = vadd.f32 %v920_v13, %v876_v43  ;;  %856 = vrot.lane.b32.xlu1 %v834_v14, %s12671_s21  ;;  %v12722_v34 = vld [vmem:[#allocation37_spill] sm:$0xff]  ;;  %v12723_v43 = vld [vmem:[#allocation39_spill] sm:$0xff]  ;;  %2428 = vmatprep.subr.mxu1 %v2159_v53  ;;  %v12727_v33 = vld [vmem:[#allocation42_spill] sm:$0xff] }
 0x1ab   : > { %v9599_v41 = vpop.permute.xlu0 %1600  ;;  %v1035_v14 = vsel %vm1034_vm8, %v12723_v43, %v12722_v34  ;;  %v1036_v16 = vsel %vm1034_vm8, %v12722_v34, %v12724_v42  ;;  %v2155_v13 = vld [vmem:[%s12459_s3 + $0x570] sm:$0xff]  ;;  %2429 = vmatpush2.msra.mxu1 %v2158_v26  ;;  %v2152_v26 = vld [vmem:[%s12459_s3 + $0x558] sm:$0xff]  ;;  %v1855_v43 = vmul.f32 %v8815_v3, %v9460_v30 }
 0x1ac   : > { %v991_v21 = vadd.f32 %v977_v23, %v933_v50  ;;  %v992_v46 = vadd.f32 %v978_v59, %v934_v1  ;;  %v9604_v8 = vpop.permute.xlu1 %908  ;;  %1873 = vrot.lane.b32.xlu0 %v1854_v27, %s12687_s17  ;;  %v892_v1 = vmul.f32 %v12725_v58, %v9278_v6  ;;  %v2153_v27 = vld [vmem:[%s12459_s3 + $0x560] sm:$0xff]  ;;  %v12726_v59 = vld [vmem:[#allocation41_spill] sm:$0xff]  ;;  %v1093_v23 = vsel %vm1092_vm9, %v9146_v5, %v12727_v33 }
 0x1ad   : > { %v1094_v53 = vsel %vm1092_vm9, %v12727_v33, %v12726_v59  ;;  %2430 = vmatprep.subr.mxu1 %v2156_v48  ;;  %v2150_v5 = vld [vmem:[%s12459_s3 + $0x548] sm:$0xff]  ;;  %v12728_v48 = vld [vmem:[#allocation43_spill] sm:$0xff]  ;;  %v2147_v33 = vld [vmem:[%s12459_s3 + $0x530] sm:$0xff] }
 0x1ae   : > { %v1049_v50 = vadd.f32 %v1035_v14, %v991_v21  ;;  %v1050_v44 = vadd.f32 %v1036_v16, %v992_v46  ;;  %738 = vrot.lane.b32.xlu1 %v717_v31, %s12694_s12  ;;  %2431 = vmatpush2.msra.mxu1 %v2155_v13  ;;  %v1152_v14 = vsel %vm1150_vm10, %v12728_v48, %v9165_v22  ;;  %v2149_v16 = vld [vmem:[%s12459_s3 + $0x540] sm:$0xff] }
 0x1af   : > { %v9633_v21 = vpop.permute.xlu0 %1598  ;;  %2432 = vmatprep.subr.mxu1 %v2153_v27  ;;  %v775_v13 = vmul.f32 %v8641_v49, %v9372_v9  ;;  %v12730_v27 = vld [vmem:[#allocation46_spill] sm:$0xff]  ;;  %v893_v49 = vmul.f32 %v12725_v58, %v9299_v37 }
 0x1b0   : > { %v1107_v46 = vadd.f32 %v1093_v23, %v1049_v50  ;;  %v1108_v31 = vadd.f32 %v1094_v53, %v1050_v44  ;;  %v9638_v34 = vpop.permute.xlu1 %966  ;;  %914 = vrot.lane.b32.xlu0 %v892_v1, %s12673_s16  ;;  %v12729_v50 = vld [vmem:[#allocation44_spill] sm:$0xff]  ;;  %2433 = vmatpush2.msra.mxu1 %v2152_v26  ;;  %v1210_v53 = vsel %vm12607_vm11, %v9187_v29, %v12730_v27  ;;  %v2144_v26 = vld [vmem:[%s12459_s3 + $0x518] sm:$0xff] }
 0x1b1   : > { %v1151_v44 = vsel %vm1150_vm10, %v12729_v50, %v12728_v48  ;;  %2434 = vmatprep.subr.mxu1 %v2150_v5  ;;  %v1209_v5 = vsel %vm12607_vm11, %v9209_v2, %v9187_v29  ;;  %v2140_v29 = vld [vmem:[%s12459_s3 + $0x4f8] sm:$0xff] }
 0x1b2   : > { %v1166_v1 = vadd.f32 %v1152_v14, %v1108_v31  ;;  %1875 = vrot.lane.b32.xlu1 %v1855_v43, %s12687_s17  ;;  %v1165_v23 = vadd.f32 %v1151_v44, %v1107_v46  ;;  %v2146_v31 = vld [vmem:[%s12459_s3 + $0x528] sm:$0xff]  ;;  %2435 = vmatpush2.msra.mxu1 %v2149_v16  ;;  %v2143_v46 = vld [vmem:[%s12459_s3 + $0x510] sm:$0xff]  ;;  %v1268_v14 = vsel %vm12606_vm12, %v9192_v62, %v9231_v0  ;;  %v2141_v44 = vld [vmem:[%s12459_s3 + $0x500] sm:$0xff] }
 0x1b3   : > { %v9664_v22 = vpop.permute.xlu0 %910  ;;  %2436 = vmatprep.subr.mxu1 %v2147_v33  ;;  %v12731_v16 = vld [vmem:[#allocation34_spill] sm:$0xff] }
 0x1b4   : > { %v1224_v43 = vadd.f32 %v1210_v53, %v1166_v1  ;;  %v9669_v48 = vpop.permute.xlu1 %1755  ;;  %796 = vrot.lane.b32.xlu0 %v775_v13, %s12670_s24  ;;  %v1912_v50 = vmul.f32 %v12731_v16, %v9460_v30  ;;  %2437 = vmatpush2.msra.mxu1 %v2146_v31  ;;  %v1223_v1 = vadd.f32 %v1209_v5, %v1165_v23  ;;  %v2138_v30 = vld [vmem:[%s12459_s3 + $0x4e8] sm:$0xff]  ;;  %v2137_v23 = vld [vmem:[%s12459_s3 + $0x4e0] sm:$0xff]  ;;  %s8423_s24 = smov 54  }
 0x1b5   : > { %2438 = vmatprep.subr.mxu1 %v2144_v26  ;;  %v1911_v2 = vmul.f32 %v12731_v16, %v9420_v18  ;;  %v12732_v31 = vld [vmem:[#allocation47_spill] sm:$0xff]  ;;  %v1326_v18 = vsel %vm12580_vm13, %v9254_v28, %v9249_v57 }
 0x1b6   : > { %916 = vrot.lane.b32.xlu1 %v893_v49, %s12673_s16  ;;  %v1282_v13 = vadd.f32 %v1268_v14, %v1224_v43  ;;  %2439 = vmatpush2.msra.mxu1 %v2143_v46  ;;  %v1267_v43 = vsel %vm12606_vm12, %v12732_v31, %v9192_v62  ;;  %v12733_v49 = vld [vmem:[#allocation19_spill] sm:$0xff]  ;;  %v2135_v46 = vld [vmem:[%s12459_s3 + $0x4d0] sm:$0xff]  ;;  %v2134_v62 = vld [vmem:[%s12459_s3 + $0x4c8] sm:$0xff] }
 0x1b7   : > { %v9692_v33 = vpop.permute.xlu0 %968  ;;  %2440 = vmatprep.subr.mxu1 %v2141_v44  ;;  %v951_v26 = vmul.f32 %v12733_v49, %v9299_v37  ;;  %v1281_v5 = vadd.f32 %v1267_v43, %v1223_v1  ;;  %v950_v44 = vmul.f32 %v12733_v49, %v9278_v6  ;;  %v1325_v1 = vsel %vm12580_vm13, %v9265_v19, %v9254_v28  ;;  %v2129_v19 = vld [vmem:[%s12459_s3 + $0x4a0] sm:$0xff] }
 0x1b8   : > { %1932 = vrot.lane.b32.xlu0 %v1912_v50, %s12694_s12  ;;  %v9703_v53 = vpop.permute.xlu1 %1753  ;;  %2441 = vmatpush2.msra.mxu1 %v2140_v29  ;;  %v1340_v14 = vadd.f32 %v1326_v18, %v1282_v13  ;;  %v2132_v29 = vld [vmem:[%s12459_s3 + $0x4b8] sm:$0xff]  ;;  %vm1498_vm13 = vcmask 244736  }
 0x1b9   : > { %2442 = vmatprep.subr.mxu1 %v2138_v30  ;;  %v12735_v13 = vld [vmem:[#allocation51_spill] sm:$0xff]  ;;  %v12736_v30 = vld [vmem:[#allocation20_spill] sm:$0xff]  ;;  %v1339_v43 = vadd.f32 %v1325_v1, %v1281_v5 }
 0x1ba   : > { %1930 = vrot.lane.b32.xlu1 %v1911_v2, %s12694_s12  ;;  %2443 = vmatpush2.msra.mxu1 %v2137_v23  ;;  %v1384_v2 = vsel %vm12581_vm14, %v12735_v13, %v9291_v15  ;;  %v1008_v31 = vmul.f32 %v12736_v30, %v9278_v6  ;;  %v2131_v23 = vld [vmem:[%s12459_s3 + $0x4b0] sm:$0xff]  ;;  %v2126_v5 = vld [vmem:[%s12459_s3 + $0x488] sm:$0xff]  ;;  %v2125_v1 = vld [vmem:[%s12459_s3 + $0x480] sm:$0xff] }
 0x1bb   : > { %v9720_v50 = vpop.permute.xlu0 %1757  ;;  %2444 = vmatprep.subr.mxu1 %v2135_v46  ;;  %v1398_v18 = vadd.f32 %v1384_v2, %v1340_v14  ;;  %v833_v46 = vmul.f32 %v8655_v54, %v9372_v9  ;;  %v12737_v14 = vld [vmem:[#allocation54_spill] sm:$0xff]  ;;  %v891_v54 = vmul.f32 %v12725_v58, %v9372_v9  ;;  %v12739_v58 = vld [vmem:[#allocation57_spill] sm:$0xff] }
 0x1bc   : > { %12734 = vst [vmem:[#allocation38_spill] sm:$0xff] %v9720_v50  ;;  %974 = vrot.lane.b32.xlu0 %v951_v26, %s12674_s0  ;;  %2445 = vmatpush2.msra.mxu1 %v2134_v62  ;;  %v9743_v26 = vpop.permute.xlu1 %1026  ;;  %v2128_v62 = vld [vmem:[%s12459_s3 + $0x498] sm:$0xff] }
 0x1bd   : > { %2446 = vmatprep.subr.mxu1 %v2132_v29  ;;  %v1442_v29 = vsel %vm12582_vm15, %v9332_v45, %v9343_v52 }
 0x1be   : > { %972 = vrot.lane.b32.xlu1 %v950_v44, %s12674_s0  ;;  %2447 = vmatpush2.msra.mxu1 %v2131_v23  ;;  %v1383_v44 = vsel %vm12581_vm14, %v12737_v14, %v12735_v13  ;;  %v1009_v13 = vmul.f32 %v12736_v30, %v9299_v37  ;;  %vm1556_vm14 = vcmask 236544  }
 0x1bf   : > { %v9745_v28 = vpop.permute.xlu0 %1024  ;;  %2448 = vmatprep.subr.mxu1 %v2129_v19  ;;  %v1397_v2 = vadd.f32 %v1383_v44, %v1339_v43  ;;  %v1441_v19 = vsel %vm12582_vm15, %v12739_v58, %v9332_v45  ;;  %v1500_v43 = vsel %vm1498_vm13, %v9413_v39, %v9405_v10  ;;  %v1499_v45 = vsel %vm1498_vm13, %v9428_v47, %v9413_v39 }
 0x1c0   : > { %1030 = vrot.lane.b32.xlu0 %v1008_v31, %s12678_s19  ;;  %v1456_v31 = vadd.f32 %v1442_v29, %v1398_v18  ;;  %2449 = vmatpush2.msra.mxu1 %v2128_v62  ;;  %v12740_v18 = vld [vmem:[#allocation21_spill] sm:$0xff]  ;;  %vm1614_vm15 = vcmask 228352   ;;  %v949_v39 = vmul.f32 %v12733_v49, %v9372_v9  ;;  %v1557_v47 = vsel %vm1556_vm14, %v9508_v36, %v9477_v25 }
 0x1c1   : > { %2450 = vmatprep.subr.mxu1 %v2126_v5  ;;  %v1067_v62 = vmul.f32 %v12740_v18, %v9299_v37  ;;  %v1455_v14 = vadd.f32 %v1441_v19, %v1397_v2  ;;  %v1066_v5 = vmul.f32 %v12740_v18, %v9278_v6 }
 0x1c2   : > { %854 = vrot.lane.b32.xlu1 %v833_v46, %s12671_s21  ;;  %v9776_v46 = vpop.permute.xlu1 %1814  ;;  %2451 = vmatpush2.msra.mxu1 %v2125_v1  ;;  %v1514_v44 = vadd.f32 %v1500_v43, %v1456_v31  ;;  %v12741_v1 = vld [vmem:[#allocation22_spill] sm:$0xff]  ;;  %v1616_v43 = vsel %vm1614_vm15, %v9599_v41, %v9570_v60  ;;  %s12870_s21 = sld [smem:[#allocation72_spill]] }
 0x1c3   : > { %v9771_v23 = vpop.permute.xlu0 %1812  ;;  %12738 = vst [vmem:[#allocation37_spill] sm:$0xff] %v9776_v46  ;;  %v1124_v2 = vmul.f32 %v12741_v1, %v9278_v6  ;;  %v1513_v31 = vadd.f32 %v1499_v45, %v1455_v14  ;;  %v1125_v49 = vmul.f32 %v12741_v1, %v9299_v37 }
 0x1c4   : > { %912 = vrot.lane.b32.xlu0 %v891_v54, %s12673_s16  ;;  %v1558_v54 = vsel %vm1556_vm14, %v9477_v25, %v9534_v35  ;;  %v12743_v25 = vld [vmem:[#allocation35_spill] sm:$0xff]  ;;  %s8407_s16 = smov 109  }
 0x1c5   : > { %v1571_v14 = vadd.f32 %v1557_v47, %v1513_v31  ;;  %v1678_v36 = vmul.f32 %v12743_v25, %v9440_v24 }
 0x1c6   : > { %1032 = vrot.lane.b32.xlu1 %v1009_v13, %s12678_s19  ;;  %v1572_v13 = vadd.f32 %v1558_v54, %v1514_v44  ;;  %v9799_v58 = vpop.permute.xlu1 %1082  ;;  %v1615_v54 = vsel %vm1614_vm15, %v9633_v21, %v9599_v41  ;;  %v1770_v41 = vsel %vm570_vm0, %v9669_v48, %v9720_v50  ;;  %v12747_v21 = vld [vmem:[#allocation24_spill] sm:$0xff] }
 0x1c7   : > { %v1811_v29 = vpop.permute.xlu0 %1810  ;;  %v1629_v31 = vadd.f32 %v1615_v54, %v1571_v14  ;;  %v1240_v14 = vmul.f32 %v12747_v21, %v9278_v6  ;;  %v1065_v54 = vmul.f32 %v12740_v18, %v9372_v9 }
 0x1c8   : > { %1090 = vrot.lane.b32.xlu0 %v1067_v62, %s12684_s13  ;;  %v1007_v62 = vmul.f32 %v12736_v30, %v9372_v9  ;;  %v1630_v44 = vadd.f32 %v1616_v43, %v1572_v13  ;;  %v12744_v30 = vld [vmem:[#allocation23_spill] sm:$0xff]  ;;  %v12745_v43 = vld [vmem:[#allocation36_spill] sm:$0xff] }
 0x1c9   : > { %v1182_v47 = vmul.f32 %v12744_v30, %v9278_v6 }
 0x1ca   : > { %1088 = vrot.lane.b32.xlu1 %v1066_v5, %s12684_s13  ;;  %v1870_v45 = vpop.permute.xlu1 %1869  ;;  %v1685_v13 = vadd.f32 %v1678_v36, %v1630_v44 }
 0x1cb   : > { %v9801_v19 = vpop.permute.xlu0 %1084 }
 0x1cc   : > { %1146 = vrot.lane.b32.xlu0 %v1124_v2, %s12692_s30  ;;  %v1183_v2 = vmul.f32 %v12744_v30, %v9299_v37 }
 0x1ce   : > { %970 = vrot.lane.b32.xlu1 %v949_v39, %s12674_s0  ;;  %s8408_s0 = smov 107  }
 0x1cf   : > { %v9815_v5 = vpop.permute.xlu0 %1871 }
 0x1d0   : > { %12742 = vst [vmem:[#allocation39_spill] sm:$0xff] %v9815_v5  ;;  %1028 = vrot.lane.b32.xlu0 %v1007_v62, %s12678_s19  ;;  %v1677_v62 = vmul.f32 %v12745_v43, %v9440_v24  ;;  %v1769_v43 = vsel %vm570_vm0, %v9703_v53, %v9669_v48  ;;  %v1241_v48 = vmul.f32 %v12747_v21, %v9299_v37 }
 0x1d2   : > { %1148 = vrot.lane.b32.xlu1 %v1125_v49, %s12692_s30  ;;  %v1684_v44 = vadd.f32 %v1677_v62, %v1629_v31  ;;  %v1784_v49 = vadd.f32 %v1770_v41, %v1685_v13  ;;  %v1884_v31 = vsel %vm686_vm2, %v1870_v45, %v9815_v5  ;;  %v1123_v13 = vmul.f32 %v12741_v1, %v9372_v9  ;;  %v12749_v1 = vld [vmem:[#allocation27_spill] sm:$0xff] }
 0x1d3   : > { %v1868_v39 = vpop.permute.xlu0 %1867 }
 0x1d4   : > { %1206 = vrot.lane.b32.xlu0 %v1183_v2, %s12695_s18  ;;  %v1783_v62 = vadd.f32 %v1769_v43, %v1684_v44  ;;  %v1883_v5 = vsel %vm686_vm2, %v1868_v39, %v1870_v45  ;;  %v1299_v44 = vmul.f32 %v12749_v1, %v9299_v37 }
 0x1d5   : > { %v9833_v25 = vpop.permute.xlu1 %1964 }
 0x1d6   : > { %12746 = vst [vmem:[#allocation40_spill] sm:$0xff] %v9833_v25  ;;  %1204 = vrot.lane.b32.xlu1 %v1182_v47, %s12695_s18  ;;  %v1827_v47 = vsel %vm628_vm1, %v9771_v23, %v9776_v46 }
 0x1d7   : > { %v9841_v36 = vpop.permute.xlu0 %1142  ;;  %v1841_v18 = vadd.f32 %v1827_v47, %v1784_v49 }
 0x1d8   : > { %1262 = vrot.lane.b32.xlu0 %v1240_v14, %s12697_s1  ;;  %v1826_v14 = vsel %vm628_vm1, %v1811_v29, %v9771_v23  ;;  %v1298_v29 = vmul.f32 %v12749_v1, %v9278_v6 }
 0x1d9   : > { %v9846_v2 = vpop.permute.xlu1 %1140  ;;  %v1898_v53 = vadd.f32 %v1884_v31, %v1841_v18  ;;  %v1840_v49 = vadd.f32 %v1826_v14, %v1783_v62 }
 0x1da   : > { %1086 = vrot.lane.b32.xlu1 %v1065_v54, %s12684_s13  ;;  %s8409_s13 = smov 90  }
 0x1db   : > { %v9859_v41 = vpop.permute.xlu0 %1928  ;;  %v1897_v47 = vadd.f32 %v1883_v5, %v1840_v49  ;;  %v2219_v5 = vld [vmem:[%s12459_s3 + $0x770] sm:$0xff] }
 0x1dc   : > { %12748 = vst [vmem:[#allocation18_spill] sm:$0xff] %v9859_v41  ;;  %1144 = vrot.lane.b32.xlu0 %v1123_v13, %s12692_s30  ;;  %v12751_v13 = vld [vmem:[#allocation30_spill] sm:$0xff]  ;;  %2459 = vmatprep.subr.mxu0 %v2219_v5  ;;  %s8410_s30 = smov 88  }
 0x1dd   : > { %v1927_v46 = vpop.permute.xlu1 %1926  ;;  %v1356_v62 = vmul.f32 %v12751_v13, %v9278_v6 }
 0x1de   : > { %v1941_v54 = vsel %vm744_vm3, %v1927_v46, %v9859_v41  ;;  %1264 = vrot.lane.b32.xlu1 %v1241_v48, %s12697_s1  ;;  %v12759_v41 = vld [vmem:[#allocation28_spill] sm:$0xff] }
 0x1df   : > { %v9872_v43 = vpop.permute.xlu0 %1198  ;;  %v1955_v23 = vadd.f32 %v1941_v54, %v1898_v53  ;;  %v1181_v53 = vmul.f32 %v12744_v30, %v9372_v9  ;;  %v2218_v30 = vld [vmem:[%s12459_s3 + $0x768] sm:$0xff]  ;;  %v481_v50 = vmul.f32 %v12759_v41, %v9468_v4  ;;  %v2189_v41 = vld [vmem:[%s12459_s3 + $0x680] sm:$0xff] }
 0x1e0   : > { %1322 = vrot.lane.b32.xlu0 %v1299_v44, %s12700_s29  ;;  %v1239_v44 = vmul.f32 %v12747_v21, %v9372_v9  ;;  %v2215_v21 = vld [vmem:[%s12459_s3 + $0x750] sm:$0xff] }
 0x1e1   : > { %v1925_v31 = vpop.permute.xlu1 %1924  ;;  %v9878_v45 = vadd.f32 %v9833_v25, %v1955_v23 }
 0x1e2   : > { %v1940_v39 = vsel %vm744_vm3, %v1925_v31, %v1927_v46  ;;  %1320 = vrot.lane.b32.xlu1 %v1298_v29, %s12700_s29  ;;  %v1357_v29 = vmul.f32 %v12751_v13, %v9299_v37 }
 0x1e3   : > { %12750 = vst [vmem:[#allocation41_spill] sm:$0xff] %v9878_v45  ;;  %v1954_v18 = vadd.f32 %v1940_v39, %v1897_v47  ;;  %v9884_v14 = vpop.permute.xlu0 %1256  ;;  %v12586_v48 = vmax.f32 %v9878_v45, 0.0  ;;  %v2216_v47 = vld [vmem:[%s12459_s3 + $0x758] sm:$0xff]  ;;  %v12753_v39 = vld [vmem:[#allocation29_spill] sm:$0xff] }
 0x1e4   : > { %1378 = vrot.lane.b32.xlu0 %v1356_v62, %s12701_s20  ;;  %v1415_v62 = vmul.f32 %v12753_v39, %v9299_v37  ;;  %v12757_v45 = vld [vmem:[#allocation33_spill] sm:$0xff] }
 0x1e5   : > { %v9893_v46 = vpop.permute.xlu1 %1200  ;;  %2381 = vmatprep.mubr.f32.mxu0 %v12586_v48  ;;  %v9898_v54 = vadd.f32 %v9833_v25, %v1954_v18  ;;  %v2213_v18 = vld [vmem:[%s12459_s3 + $0x740] sm:$0xff] }
 0x1e6   : > { %1202 = vrot.lane.b32.xlu1 %v1181_v53, %s12695_s18  ;;  %v2212_v53 = vld [vmem:[%s12459_s3 + $0x738] sm:$0xff]  ;;  %s8414_s18 = smov 91  }
 0x1e7   : > { %12752 = vst [vmem:[#allocation42_spill] sm:$0xff] %v9898_v54  ;;  %v9903_v49 = vpop.permute.xlu0 %1314  ;;  %v12585_v23 = vmax.f32 %v9898_v54, 0.0 }
 0x1e8   : > { %1260 = vrot.lane.b32.xlu0 %v1239_v44, %s12697_s1  ;;  %v1414_v44 = vmul.f32 %v12753_v39, %v9278_v6  ;;  %s8420_s1 = smov 70  }
 0x1e9   : > { %v9915_v31 = vpop.permute.xlu1 %1258  ;;  %2382 = vmatmul.mubr.f32.vlgmr.msra.gmra.mxu0 %v12585_v23  ;;  %v12754_v23 = vld [vmem:[#allocation31_spill] sm:$0xff] }
 0x1ea   : > { %1380 = vrot.lane.b32.xlu1 %v1357_v29, %s12701_s20  ;;  %2460 = vmatpush1.msra.mxu0 %v2218_v30  ;;  %v2210_v30 = vld [vmem:[%s12459_s3 + $0x728] sm:$0xff] }
 0x1eb   : > { %v9928_v5 = vpop.permute.xlu0 %1372  ;;  %2461 = vmatprep.subr.mxu0 %v2216_v47  ;;  %v2209_v47 = vld [vmem:[%s12459_s3 + $0x720] sm:$0xff] }
 0x1ec   : > { %1438 = vrot.lane.b32.xlu0 %v1415_v62, %s12703_s2  ;;  %2462 = vmatpush1.msra.mxu0 %v2215_v21  ;;  %v1472_v62 = vmul.f32 %v12754_v23, %v9278_v6  ;;  %v2207_v21 = vld [vmem:[%s12459_s3 + $0x710] sm:$0xff] }
 0x1ed   : > { %v9939_v29 = vpop.permute.xlu1 %1316  ;;  %2463 = vmatprep.subr.mxu0 %v2213_v18  ;;  %v2206_v18 = vld [vmem:[%s12459_s3 + $0x708] sm:$0xff] }
 0x1ee   : > { %1436 = vrot.lane.b32.xlu1 %v1414_v44, %s12703_s2  ;;  %2464 = vmatpush1.msra.mxu0 %v2212_v53  ;;  %v1297_v44 = vmul.f32 %v12749_v1, %v9372_v9  ;;  %v2204_v53 = vld [vmem:[%s12459_s3 + $0x6f8] sm:$0xff]  ;;  %v2201_v1 = vld [vmem:[%s12459_s3 + $0x6e0] sm:$0xff] }
 0x1ef   : > { %v9950_v48 = vpop.permute.xlu0 %1430  ;;  %2465 = vmatprep.subr.mxu0 %v2210_v30  ;;  %v2203_v30 = vld [vmem:[%s12459_s3 + $0x6f0] sm:$0xff] }
 0x1f0   : > { %1494 = vrot.lane.b32.xlu0 %v1472_v62, %s12707_s10  ;;  %2466 = vmatpush1.msra.mxu0 %v2209_v47  ;;  %v1355_v62 = vmul.f32 %v12751_v13, %v9372_v9  ;;  %v2198_v13 = vld [vmem:[%s12459_s3 + $0x6c8] sm:$0xff] }
 0x1f1   : > { %v9961_v54 = vpop.permute.xlu1 %1374  ;;  %2467 = vmatprep.subr.mxu0 %v2207_v21  ;;  %v2200_v21 = vld [vmem:[%s12459_s3 + $0x6d8] sm:$0xff] }
 0x1f2   : > { %12755 = vst [vmem:[#allocation43_spill] sm:$0xff] %v9961_v54  ;;  %1318 = vrot.lane.b32.xlu1 %v1297_v44, %s12700_s29  ;;  %2468 = vmatpush1.msra.mxu0 %v2206_v18  ;;  %v1473_v44 = vmul.f32 %v12754_v23, %v9299_v37  ;;  %s8425_s29 = smov 52  }
 0x1f3   : > { %v9972_v47 = vpop.permute.xlu0 %1488  ;;  %2469 = vmatprep.subr.mxu0 %v2204_v53  ;;  %v2197_v53 = vld [vmem:[%s12459_s3 + $0x6c0] sm:$0xff] }
 0x1f4   : > { %1376 = vrot.lane.b32.xlu0 %v1355_v62, %s12701_s20  ;;  %2470 = vmatpush1.msra.mxu0 %v2203_v30  ;;  %v1531_v62 = vmul.f32 %v12757_v45, %v9299_v37  ;;  %v2195_v30 = vld [vmem:[%s12459_s3 + $0x6b0] sm:$0xff] }
 0x1f5   : > { %v9983_v18 = vpop.permute.xlu1 %1432  ;;  %2471 = vmatprep.subr.mxu0 %v2201_v1  ;;  %v2194_v1 = vld [vmem:[%s12459_s3 + $0x6a8] sm:$0xff] }
 0x1f6   : > { %12756 = vst [vmem:[#allocation44_spill] sm:$0xff] %v9983_v18  ;;  %1496 = vrot.lane.b32.xlu1 %v1473_v44, %s12707_s10  ;;  %2472 = vmatpush1.msra.mxu0 %v2200_v21  ;;  %v1530_v44 = vmul.f32 %v12757_v45, %v9278_v6  ;;  %v2192_v21 = vld [vmem:[%s12459_s3 + $0x698] sm:$0xff] }
 0x1f7   : > { %v9994_v25 = vpop.permute.xlu0 %566  ;;  %2473 = vmatprep.subr.mxu0 %v2198_v13 }
 0x1f8   : > { %12758 = vst [vmem:[#allocation46_spill] sm:$0xff] %v9994_v25  ;;  %1554 = vrot.lane.b32.xlu0 %v1531_v62, %s12672_s22  ;;  %2474 = vmatpush1.msra.mxu0 %v2197_v53  ;;  %v12760_v25 = vld [vmem:[#allocation17_spill] sm:$0xff]  ;;  %v1588_v53 = vmul.f32 %v8795_v56, %v9278_v6  ;;  %v1413_v6 = vmul.f32 %v12753_v39, %v9372_v9 }
 0x1f9   : > { %v480_v13 = vmul.f32 %v12760_v25, %v9468_v4  ;;  %v10009_v24 = vpop.permute.xlu1 %1490  ;;  %2475 = vmatprep.subr.mxu0 %v2195_v30  ;;  %v2191_v62 = vld [vmem:[%s12459_s3 + $0x690] sm:$0xff]  ;;  %v2188_v25 = vld [vmem:[%s12459_s3 + $0x678] sm:$0xff]  ;;  %v12764_v4 = vld [vmem:[#allocation48_spill] sm:$0xff]  ;;  %v1471_v39 = vmul.f32 %v12754_v23, %v9372_v9 }
 0x1fa   : > { %12761 = vst [vmem:[#allocation34_spill] sm:$0xff] %v10009_v24  ;;  %1552 = vrot.lane.b32.xlu1 %v1530_v44, %s12672_s22  ;;  %2476 = vmatpush1.msra.mxu0 %v2194_v1  ;;  %v12763_v30 = vld [vmem:[#allocation49_spill] sm:$0xff]  ;;  %v12771_v23 = vld [vmem:[#allocation50_spill] sm:$0xff] }
 0x1fb   : > { %v10020_v60 = vpop.permute.xlu0 %1546  ;;  %2477 = vmatprep.subr.mxu0 %v2192_v21  ;;  %v573_v44 = vsel %vm570_vm0, %v8845_v17, %v12763_v30  ;;  %v574_v1 = vsel %vm570_vm0, %v12763_v30, %v12764_v4  ;;  %v2186_v21 = vld [vmem:[%s12459_s3 + $0x668] sm:$0xff]  ;;  %v2185_v17 = vld [vmem:[%s12459_s3 + $0x660] sm:$0xff] }
 0x1fc   : > { %12762 = vst [vmem:[#allocation47_spill] sm:$0xff] %v10020_v60  ;;  %1610 = vrot.lane.b32.xlu0 %v1588_v53, %s12712_s8  ;;  %2478 = vmatpush1.msra.mxu0 %v2191_v62  ;;  %v588_v35 = vadd.f32 %v574_v1, %v481_v50  ;;  %v587_v60 = vadd.f32 %v573_v44, %v480_v13  ;;  %v2315_v53 = vld [vmem:[%s12459_s3 + $0xa70] sm:$0xff]  ;;  %v10049_v62 = vld [vmem:[%s8580_s15 + $0x1] sm:$0xff] }
 0x1fd   : > { %v10037_v24 = vpop.permute.xlu1 %568  ;;  %2479 = vmatprep.subr.mxu0 %v2189_v41  ;;  %12766 = vst [vmem:[#allocation51_spill] sm:$0xff] %v10049_v62  ;;  %v12767_v50 = vld [vmem:[#allocation15_spill] sm:$0xff]  ;;  %v2183_v41 = vld [vmem:[%s12459_s3 + $0x650] sm:$0xff]  ;;  %2530 = vmatprep.subr.mxu1 %v2315_v53  ;;  %v631_v1 = vsel %vm628_vm1, %v8850_v20, %v12771_v23 }
 0x1fe   : > { %12765 = vst [vmem:[#allocation19_spill] sm:$0xff] %v10037_v24  ;;  %1434 = vrot.lane.b32.xlu1 %v1413_v6, %s12703_s2  ;;  %v12768_v13 = vsub.s32 6, %v12767_v50  ;;  %2480 = vmatpush1.msra.mxu0 %v2188_v25  ;;  %v2182_v6 = vld [vmem:[%s12459_s3 + $0x648] sm:$0xff]  ;;  %v645_v53 = vadd.f32 %v631_v1, %v587_v60  ;;  %v2179_v20 = vld [vmem:[%s12459_s3 + $0x630] sm:$0xff] }
 0x1ff   : > { %v10059_v44 = vpop.permute.xlu0 %624  ;;  %2481 = vmatprep.subr.mxu0 %v2186_v21  ;;  %v12772_v24 = vld [vmem:[#allocation53_spill] sm:$0xff]  ;;  %v2180_v21 = vld [vmem:[%s12459_s3 + $0x638] sm:$0xff]  ;;  %v12777_v1 = vld [vmem:[#allocation56_spill] sm:$0xff] }
 0x200   : > { %v10054_v30 = vrot.slane %v10049_v62, %v12768_v13  ;;  %12770 = vst [vmem:[#allocation54_spill] sm:$0xff] %v10059_v44  ;;  %v632_v25 = vsel %vm628_vm1, %v12771_v23, %v12772_v24  ;;  %1492 = vrot.lane.b32.xlu0 %v1471_v39, %s12707_s10  ;;  %v1589_v13 = vmul.f32 %v8795_v56, %v9299_v37  ;;  %v12774_v39 = vld [vmem:[#allocation32_spill] sm:$0xff]  ;;  %s8411_s10 = smov 110  }
 0x201   : > { %2482 = vmatpush1.msra.mxu0 %v2185_v17  ;;  %v646_v44 = vadd.f32 %v632_v25, %v588_v35  ;;  %v10076_v4 = vpop.permute.xlu1 %1548  ;;  %v2177_v37 = vld [vmem:[%s12459_s3 + $0x620] sm:$0xff]  ;;  %v12776_v35 = vsub.s32 7, %v12767_v50  ;;  %v1529_v24 = vmul.f32 %v12757_v45, %v9372_v9  ;;  %v2267_v45 = vld [vmem:[%s12459_s3 + $0x8f0] sm:$0xff] }
 0x202   : > { %12769 = vst [vmem:[#allocation20_spill] sm:$0xff] %v10054_v30  ;;  %12773 = vst [vmem:[#allocation57_spill] sm:$0xff] %v10076_v4  ;;  %2483 = vmatprep.subr.mxu0 %v2183_v41  ;;  %1612 = vrot.lane.b32.xlu1 %v1589_v13, %s12712_s8  ;;  %v1743_v23 = vmul.f32 %v10054_v30, %v12774_v39  ;;  %v2176_v41 = vld [vmem:[%s12459_s3 + $0x618] sm:$0xff] }
 0x203   : > { %2484 = vmatpush1.msra.mxu0 %v2182_v6  ;;  %v10087_v17 = vpop.permute.xlu0 %1604  ;;  %v10092_v60 = vrot.slane %v10049_v62, %v12776_v35  ;;  %v689_v6 = vsel %vm686_vm2, %v8878_v51, %v12777_v1  ;;  %v12778_v25 = vld [vmem:[#allocation55_spill] sm:$0xff] }
 0x204   : > { %12775 = vst [vmem:[#allocation21_spill] sm:$0xff] %v10087_v17  ;;  %2485 = vmatprep.subr.mxu0 %v2180_v21  ;;  %v690_v13 = vsel %vm686_vm2, %v12777_v1, %v12778_v25  ;;  %1765 = vrot.lane.b32.xlu0 %v1743_v23, %s12676_s14  ;;  %v2174_v21 = vld [vmem:[%s12459_s3 + $0x608] sm:$0xff]  ;;  %v703_v17 = vadd.f32 %v689_v6, %v645_v53  ;;  %v2173_v51 = vld [vmem:[%s12459_s3 + $0x600] sm:$0xff]  ;;  %v12780_v53 = vld [vmem:[#allocation58_spill] sm:$0xff] }
 0x205   : > { %2486 = vmatpush1.msra.mxu0 %v2179_v20  ;;  %v704_v35 = vadd.f32 %v690_v13, %v646_v44  ;;  %v10109_v4 = vpop.permute.xlu1 %626  ;;  %v1587_v23 = vmul.f32 %v8795_v56, %v9372_v9  ;;  %v2266_v44 = vld [vmem:[%s12459_s3 + $0x8e8] sm:$0xff]  ;;  %v2264_v1 = vld [vmem:[%s12459_s3 + $0x8d8] sm:$0xff] }
 0x206   : > { %12779 = vst [vmem:[#allocation22_spill] sm:$0xff] %v10109_v4  ;;  %2487 = vmatprep.subr.mxu0 %v2177_v37  ;;  %1550 = vrot.lane.b32.xlu1 %v1529_v24, %s12672_s22  ;;  %v747_v37 = vsel %vm744_vm3, %v8886_v55, %v12780_v53  ;;  %v12781_v24 = vld [vmem:[#allocation59_spill] sm:$0xff]  ;;  %v2263_v55 = vld [vmem:[%s12459_s3 + $0x8d0] sm:$0xff] }
 0x207   : > { %2488 = vmatpush1.msra.mxu0 %v2176_v41  ;;  %v10120_v20 = vpop.permute.xlu0 %682  ;;  %v748_v56 = vsel %vm744_vm3, %v12780_v53, %v12781_v24  ;;  %v1744_v41 = vmul.f32 %v10092_v60, %v12774_v39  ;;  %v761_v13 = vadd.f32 %v747_v37, %v703_v17  ;;  %v2260_v17 = vld [vmem:[%s12459_s3 + $0x8b8] sm:$0xff] }
 0x208   : > { %2489 = vmatprep.subr.mxu0 %v2174_v21  ;;  %1608 = vrot.lane.b32.xlu0 %v1587_v23, %s12712_s8  ;;  %v762_v6 = vadd.f32 %v748_v56, %v704_v35  ;;  %v1801_v23 = vmul.f32 %v8830_v11, %v10092_v60  ;;  %v12783_v35 = vld [vmem:[#allocation61_spill] sm:$0xff] }
 0x209   : > { %2490 = vmatpush1.msra.mxu0 %v2173_v51  ;;  %v10137_v21 = vpop.permute.xlu1 %1606  ;;  %v2261_v51 = vld [vmem:[%s12459_s3 + $0x8c0] sm:$0xff]  ;;  %v806_v37 = vsel %vm802_vm4, %v12783_v35, %v9503_v38  ;;  %v2258_v56 = vld [vmem:[%s12459_s3 + $0x8a8] sm:$0xff] }
 0x20a   : > { %12782 = vst [vmem:[#allocation35_spill] sm:$0xff] %v10137_v21  ;;  %2491 = vmatprep.subr.mxu0 %v2267_v45  ;;  %1767 = vrot.lane.b32.xlu1 %v1744_v41, %s12676_s14  ;;  %v805_v45 = vsel %vm802_vm4, %v8947_v61, %v12783_v35  ;;  %v820_v41 = vadd.f32 %v806_v37, %v762_v6  ;;  %v2257_v61 = vld [vmem:[%s12459_s3 + $0x8a0] sm:$0xff]  ;;  %v12784_v35 = vsub.s32 5, %v12767_v50  ;;  %v2252_v37 = vld [vmem:[%s12459_s3 + $0x878] sm:$0xff] }
 0x20b   : > { %2492 = vmatpush2.msra.mxu0 %v2266_v44  ;;  %v10148_v53 = vpop.permute.xlu0 %564  ;;  %v1800_v44 = vmul.f32 %v8830_v11, %v10054_v30  ;;  %v1858_v6 = vmul.f32 %v8815_v3, %v10092_v60  ;;  %v1857_v50 = vmul.f32 %v8815_v3, %v10054_v30 }
 0x20c   : > { %2493 = vmatprep.subr.mxu0 %v2264_v1  ;;  %1824 = vrot.lane.b32.xlu0 %v1801_v23, %s12679_s25  ;;  %v819_v1 = vadd.f32 %v805_v45, %v761_v13  ;;  %v863_v23 = vsel %vm860_vm5, %v8955_v7, %v9565_v32  ;;  %v2255_v13 = vld [vmem:[%s12459_s3 + $0x890] sm:$0xff]  ;;  %v10187_v7 = vrot.slane %v10049_v62, %v12784_v35 }
 0x20d   : > { %2494 = vmatpush2.msra.mxu0 %v2263_v55  ;;  %v10165_v4 = vpop.permute.xlu1 %684  ;;  %v864_v55 = vsel %vm860_vm5, %v9565_v32, %v9539_v40  ;;  %v2254_v32 = vld [vmem:[%s12459_s3 + $0x888] sm:$0xff]  ;;  %v922_v45 = vsel %vm918_vm6, %v9604_v8, %v9664_v22 }
 0x20e   : > { %2495 = vmatprep.subr.mxu0 %v2261_v51  ;;  %1822 = vrot.lane.b32.xlu1 %v1800_v44, %s12679_s25  ;;  %12785 = vst [vmem:[#allocation23_spill] sm:$0xff] %v10187_v7  ;;  %v877_v44 = vadd.f32 %v863_v23, %v819_v1  ;;  %v2249_v1 = vld [vmem:[%s12459_s3 + $0x860] sm:$0xff] }
 0x20f   : > { %2496 = vmatpush2.msra.mxu0 %v2260_v17  ;;  %v10182_v51 = vpop.permute.xlu0 %742  ;;  %v921_v17 = vsel %vm918_vm6, %v9027_v12, %v9604_v8  ;;  %v2251_v12 = vld [vmem:[%s12459_s3 + $0x870] sm:$0xff]  ;;  %v979_v8 = vsel %vm976_vm7, %v9035_v63, %v9638_v34  ;;  %v2248_v63 = vld [vmem:[%s12459_s3 + $0x858] sm:$0xff] }
 0x210   : > { %2497 = vmatprep.subr.mxu0 %v2258_v56  ;;  %1881 = vrot.lane.b32.xlu0 %v1858_v6, %s12687_s17  ;;  %v878_v56 = vadd.f32 %v864_v55, %v820_v41  ;;  %v1914_v41 = vmul.f32 %v12731_v16, %v10054_v30  ;;  %v935_v23 = vadd.f32 %v921_v17, %v877_v44  ;;  %v2246_v17 = vld [vmem:[%s12459_s3 + $0x848] sm:$0xff] }
 0x211   : > { %2498 = vmatpush2.msra.mxu0 %v2257_v61  ;;  %v10204_v35 = vpop.permute.xlu1 %740  ;;  %v980_v61 = vsel %vm976_vm7, %v9638_v34, %v9692_v33  ;;  %v1037_v34 = vsel %vm1034_vm8, %v12724_v42, %v9745_v28  ;;  %v2245_v42 = vld [vmem:[%s12459_s3 + $0x840] sm:$0xff]  ;;  %v1799_v44 = vmul.f32 %v8830_v11, %v10187_v7  ;;  %v1154_v11 = vsel %vm1150_vm10, %v9846_v2, %v9841_v36 }
 0x212   : > { %2499 = vmatprep.subr.mxu0 %v2255_v13  ;;  %1879 = vrot.lane.b32.xlu1 %v1857_v50, %s12687_s17  ;;  %v936_v55 = vadd.f32 %v922_v45, %v878_v56  ;;  %v1038_v13 = vsel %vm1034_vm8, %v9745_v28, %v9743_v26  ;;  %v993_v45 = vadd.f32 %v979_v8, %v935_v23  ;;  %v2243_v56 = vld [vmem:[%s12459_s3 + $0x830] sm:$0xff]  ;;  %v2240_v23 = vld [vmem:[%s12459_s3 + $0x818] sm:$0xff] }
 0x213   : > { %2500 = vmatpush2.msra.mxu0 %v2254_v32  ;;  %v10221_v6 = vpop.permute.xlu0 %1759  ;;  %v1742_v32 = vmul.f32 %v10187_v7, %v12774_v39  ;;  %v1095_v28 = vsel %vm1092_vm9, %v12726_v59, %v9799_v58  ;;  %v1096_v39 = vsel %vm1092_vm9, %v9799_v58, %v9801_v19  ;;  %v2242_v59 = vld [vmem:[%s12459_s3 + $0x828] sm:$0xff] }
 0x214   : > { %2501 = vmatprep.subr.mxu0 %v2252_v37  ;;  %1936 = vrot.lane.b32.xlu0 %v1914_v41, %s12694_s12  ;;  %v994_v50 = vadd.f32 %v980_v61, %v936_v55  ;;  %v12786_v58 = vld [vmem:[#allocation45_spill] sm:$0xff] }
 0x215   : > { %2502 = vmatpush2.msra.mxu0 %v2251_v12  ;;  %v10238_v37 = vpop.permute.xlu1 %622  ;;  %v1051_v12 = vadd.f32 %v1037_v34, %v993_v45  ;;  %v1153_v41 = vsel %vm1150_vm10, %v12786_v58, %v9846_v2  ;;  %v1211_v2 = vsel %vm12607_vm11, %v12730_v27, %v9872_v43  ;;  %v2236_v27 = vld [vmem:[%s12459_s3 + $0x7f8] sm:$0xff] }
 0x216   : > { %2503 = vmatprep.subr.mxu0 %v2249_v1  ;;  %1763 = vrot.lane.b32.xlu1 %v1742_v32, %s12676_s14  ;;  %v1052_v8 = vadd.f32 %v1038_v13, %v994_v50  ;;  %v1915_v1 = vmul.f32 %v12731_v16, %v10092_v60  ;;  %v2239_v13 = vld [vmem:[%s12459_s3 + $0x810] sm:$0xff]  ;;  %v1212_v60 = vsel %vm12607_vm11, %v9872_v43, %v9893_v46 }
 0x217   : > { %2504 = vmatpush2.msra.mxu0 %v2248_v63  ;;  %v10255_v61 = vpop.permute.xlu0 %798  ;;  %v1109_v55 = vadd.f32 %v1095_v28, %v1051_v12  ;;  %v1913_v32 = vmul.f32 %v12731_v16, %v10187_v7  ;;  %v1269_v43 = vsel %vm12606_vm12, %v9231_v0, %v9884_v14  ;;  %v1270_v16 = vsel %vm12606_vm12, %v9884_v14, %v9915_v31  ;;  %v2233_v0 = vld [vmem:[%s12459_s3 + $0x7e0] sm:$0xff] }
 0x218   : > { %2505 = vmatprep.subr.mxu0 %v2246_v17  ;;  %1820 = vrot.lane.b32.xlu0 %v1799_v44, %s12679_s25  ;;  %v1110_v63 = vadd.f32 %v1096_v39, %v1052_v8  ;;  %v2237_v17 = vld [vmem:[%s12459_s3 + $0x800] sm:$0xff]  ;;  %v1856_v28 = vmul.f32 %v8815_v3, %v10187_v7  ;;  %v2234_v39 = vld [vmem:[%s12459_s3 + $0x7e8] sm:$0xff]  ;;  %vm12788_vm12 = vcmask 490496   ;;  %v2231_v8 = vld [vmem:[%s12459_s3 + $0x7d0] sm:$0xff] }
 0x219   : > { %2506 = vmatpush2.msra.mxu0 %v2245_v42  ;;  %v10272_v34 = vpop.permute.xlu1 %1761  ;;  %v1167_v45 = vadd.f32 %v1153_v41, %v1109_v55  ;;  %v1327_v14 = vsel %vm12788_vm12, %v9249_v57, %v9903_v49  ;;  %vm12789_vm11 = vmmov %vm12788_vm12  ;;  %v2230_v57 = vld [vmem:[%s12459_s3 + $0x7c8] sm:$0xff]  ;;  %vm12791_vm12 = vcmask 261120   ;;  %v12815_v7 = vld [vmem:[#allocation46_spill] sm:$0xff] }
 0x21a   : > { %12787 = vst [vmem:[#allocation36_spill] sm:$0xff] %v10272_v34  ;;  %2507 = vmatprep.subr.mxu0 %v2243_v56  ;;  %1938 = vrot.lane.b32.xlu1 %v1915_v1, %s12694_s12  ;;  %v1168_v50 = vadd.f32 %v1154_v11, %v1110_v63  ;;  %v1328_v3 = vsel %vm12789_vm11, %v9903_v49, %v9939_v29  ;;  %vm12792_vm11 = vmmov %vm12791_vm12  ;;  %v2228_v1 = vld [vmem:[%s12459_s3 + $0x7b8] sm:$0xff] }
 0x21b   : > { %2508 = vmatpush2.msra.mxu0 %v2242_v59  ;;  %v10289_v42 = vpop.permute.xlu0 %680  ;;  %v1225_v44 = vadd.f32 %v1211_v2, %v1167_v45  ;;  %v1385_v49 = vsel %vm12791_vm12, %v9291_v15, %v9928_v5  ;;  %v1386_v11 = vsel %vm12792_vm11, %v9928_v5, %v9961_v54  ;;  %vm12793_vm12 = vcmask 252928   ;;  %v2225_v2 = vld [vmem:[%s12459_s3 + $0x7a0] sm:$0xff]  ;;  %v2224_v45 = vld [vmem:[%s12459_s3 + $0x798] sm:$0xff] }
 0x21c   : > { %2509 = vmatprep.subr.mxu0 %v2240_v23  ;;  %1934 = vrot.lane.b32.xlu0 %v1913_v32, %s12694_s12  ;;  %v1226_v56 = vadd.f32 %v1212_v60, %v1168_v50  ;;  %v1443_v15 = vsel %vm12793_vm12, %v9343_v52, %v9950_v48  ;;  %vm12794_vm11 = vmmov %vm12793_vm12  ;;  %v1501_v52 = vsel %vm1498_vm13, %v9405_v10, %v9972_v47  ;;  %v12795_v50 = vld [vmem:[#allocation34_spill] sm:$0xff]  ;;  %v12797_v10 = vld [vmem:[#allocation63_spill] sm:$0xff]  ;;  %vm12829_vm12 = vcmask 490496  }
 0x21d   : > { %2510 = vmatpush2.msra.mxu0 %v2239_v13  ;;  %v10306_v12 = vpop.permute.xlu1 %800  ;;  %v1283_v59 = vadd.f32 %v1269_v43, %v1225_v44  ;;  %v2227_v13 = vld [vmem:[%s12459_s3 + $0x7b0] sm:$0xff]  ;;  %v1444_v5 = vsel %vm12794_vm11, %v9950_v48, %v9983_v18  ;;  %v1502_v48 = vsel %vm1498_vm13, %v9972_v47, %v12795_v50  ;;  %v12796_v44 = vld [vmem:[#allocation47_spill] sm:$0xff]  ;;  %vm12830_vm11 = vmmov %vm12829_vm12 }
 0x21e   : > { %2511 = vmatprep.subr.mxu0 %v2237_v17  ;;  %1877 = vrot.lane.b32.xlu1 %v1856_v28, %s12687_s17  ;;  %v1284_v58 = vadd.f32 %v1270_v16, %v1226_v56  ;;  %v1559_v56 = vsel %vm1556_vm14, %v12797_v10, %v12796_v44 }
 0x21f   : > { %2512 = vmatpush2.msra.mxu0 %v2236_v27  ;;  %v10321_v41 = vpop.permute.xlu0 %1818  ;;  %v1341_v23 = vadd.f32 %v1327_v14, %v1283_v59  ;;  %v2222_v27 = vld [vmem:[%s12459_s3 + $0x788] sm:$0xff]  ;;  %v2172_v14 = vld [vmem:[%s12459_s3 + $0x5f8] sm:$0xff] }
 0x220   : > { %12790 = vst [vmem:[#allocation24_spill] sm:$0xff] %v10321_v41  ;;  %2513 = vmatprep.subr.mxu0 %v2234_v39  ;;  %v1342_v55 = vadd.f32 %v1328_v3, %v1284_v58  ;;  %v2221_v39 = vld [vmem:[%s12459_s3 + $0x780] sm:$0xff]  ;;  %v12799_v58 = vld [vmem:[#allocation21_spill] sm:$0xff] }
 0x221   : > { %2514 = vmatpush2.msra.mxu0 %v2233_v0  ;;  %v1817_v63 = vpop.permute.xlu1 %1816  ;;  %v1399_v60 = vadd.f32 %v1385_v49, %v1341_v23  ;;  %v12798_v0 = vld [vmem:[#allocation57_spill] sm:$0xff] }
 0x222   : > { %2515 = vmatprep.subr.mxu0 %v2231_v8  ;;  %v1400_v32 = vadd.f32 %v1386_v11, %v1342_v55  ;;  %v1560_v47 = vsel %vm1556_vm14, %v12796_v44, %v12798_v0  ;;  %v1618_v11 = vsel %vm1614_vm15, %v12799_v58, %v10137_v21  ;;  %v12801_v55 = vld [vmem:[#allocation16_spill] sm:$0xff]  ;;  %v1772_v44 = vsel %vm570_vm0, %v10221_v6, %v10272_v34  ;;  %v12818_v21 = vld [vmem:[#allocation53_spill] sm:$0xff] }
 0x223   : > { %2516 = vmatpush2.msra.mxu0 %v2230_v57  ;;  %v10347_v17 = vpop.permute.xlu0 %858  ;;  %v1457_v43 = vadd.f32 %v1443_v15, %v1399_v60  ;;  %v12800_v57 = vld [vmem:[#allocation64_spill] sm:$0xff]  ;;  %v12802_v15 = vld [vmem:[#allocation26_spill] sm:$0xff] }
 0x224   : > { %2517 = vmatprep.subr.mxu0 %v2228_v1  ;;  %v1458_v16 = vadd.f32 %v1444_v5, %v1400_v32  ;;  %v1617_v49 = vsel %vm1614_vm15, %v12800_v57, %v12799_v58  ;;  %v1657_v5 = vrot.slane %v10049_v62, %v12802_v15  ;;  %v2270_v34 = vld [vmem:[%s12459_s3 + $0x908] sm:$0xff] }
 0x225   : > { %2518 = vmatpush2.msra.mxu0 %v2227_v13  ;;  %v10361_v28 = vpop.permute.xlu1 %856  ;;  %v1515_v3 = vadd.f32 %v1501_v52, %v1457_v43  ;;  %v1653_v13 = vrot.slane %v10049_v62, %v12801_v55  ;;  %v12803_v52 = vld [vmem:[#allocation60_spill] sm:$0xff]  ;;  %v576_v62 = vsel %vm570_vm0, %v10148_v53, %v12815_v7 }
 0x226   : > { %2519 = vmatprep.subr.mxu0 %v2225_v2  ;;  %v1516_v8 = vadd.f32 %v1502_v48, %v1458_v16  ;;  %v12805_v16 = vld [vmem:[#allocation38_spill] sm:$0xff] }
 0x227   : > { %2520 = vmatpush2.msra.mxu0 %v2224_v45  ;;  %v1874_v59 = vpop.permute.xlu0 %1873  ;;  %v1573_v1 = vadd.f32 %v1559_v56, %v1515_v3  ;;  %v1679_v48 = vmul.f32 %v1653_v13, %v12803_v52 }
 0x228   : > { %2521 = vmatprep.subr.mxu0 %v2222_v27  ;;  %v1574_v23 = vadd.f32 %v1560_v47, %v1516_v8  ;;  %v1680_v27 = vmul.f32 %v1657_v5, %v12803_v52  ;;  %v1829_v8 = vsel %vm628_vm1, %v1817_v63, %v10321_v41  ;;  %v2273_v41 = vld [vmem:[%s12459_s3 + $0x920] sm:$0xff] }
 0x229   : > { %2522 = vmatpush2.msra.mxu0 %v2221_v39  ;;  %v10385_v2 = vpop.permute.xlu1 %738  ;;  %v1631_v60 = vadd.f32 %v1617_v49, %v1573_v1  ;;  %v1771_v39 = vsel %vm570_vm0, %v12805_v16, %v10221_v6 }
 0x22a   : > { %7520 = vmatprep.subr.mxu0 %v2172_v14  ;;  %v1632_v32 = vadd.f32 %v1618_v11, %v1574_v23  ;;  %v12806_v14 = vld [vmem:[#allocation37_spill] sm:$0xff]  ;;  %v12807_v11 = vld [vmem:[#allocation39_spill] sm:$0xff] }
 0x22b   : > { %v10387_v45 = vpop.permute.xlu0 %914  ;;  %v1686_v10 = vadd.f32 %v1679_v48, %v1631_v60  ;;  %v1828_v3 = vsel %vm628_vm1, %v12806_v14, %v1817_v63  ;;  %v1885_v1 = vsel %vm686_vm2, %v12807_v11, %v1874_v59  ;;  %v2312_v11 = vld [vmem:[%s12459_s3 + $0xa58] sm:$0xff] }
 0x22c   : > { %v1687_v56 = vadd.f32 %v1680_v27, %v1632_v32  ;;  %v12809_v32 = vld [vmem:[#allocation18_spill] sm:$0xff] }
 0x22d   : > { %v10391_v43 = vpop.permute.xlu1 %1875  ;;  %v1785_v58 = vadd.f32 %v1771_v39, %v1686_v10 }
 0x22e   : > { %12804 = vst [vmem:[#allocation27_spill] sm:$0xff] %v10391_v43  ;;  %v1786_v57 = vadd.f32 %v1772_v44, %v1687_v56  ;;  %v1886_v6 = vsel %vm686_vm2, %v1874_v59, %v10391_v43  ;;  %v12810_v59 = vld [vmem:[#allocation40_spill] sm:$0xff]  ;;  %v12813_v43 = vld [vmem:[#allocation25_spill] sm:$0xff] }
 0x22f   : > { %v10399_v47 = vpop.permute.xlu0 %796  ;;  %v1842_v23 = vadd.f32 %v1828_v3, %v1785_v58  ;;  %v2314_v58 = vld [vmem:[%s12459_s3 + $0xa68] sm:$0xff] }
 0x230   : > { %v1843_v55 = vadd.f32 %v1829_v8, %v1786_v57 }
 0x231   : > { %v10405_v49 = vpop.permute.xlu1 %916  ;;  %v1899_v15 = vadd.f32 %v1885_v1, %v1842_v23  ;;  %v2311_v1 = vld [vmem:[%s12459_s3 + $0xa50] sm:$0xff]  ;;  %v2309_v23 = vld [vmem:[%s12459_s3 + $0xa40] sm:$0xff] }
 0x232   : > { %v1900_v5 = vadd.f32 %v1886_v6, %v1843_v55  ;;  %v12608_v55 = vmov 0.0  }
 0x233   : > { %v10411_v13 = vpop.permute.xlu0 %1932 }
 0x234   : > { %12808 = vst [vmem:[#allocation30_spill] sm:$0xff] %v10411_v13 }
 0x235   : > { %v1931_v60 = vpop.permute.xlu1 %1930 }
 0x236   : > { %v1942_v63 = vsel %vm744_vm3, %v12809_v32, %v1931_v60  ;;  %v1943_v48 = vsel %vm744_vm3, %v1931_v60, %v10411_v13  ;;  %v2306_v60 = vld [vmem:[%s12459_s3 + $0xa28] sm:$0xff]  ;;  %v2305_v32 = vld [vmem:[%s12459_s3 + $0xa20] sm:$0xff] }
 0x237   : > { %v1956_v27 = vadd.f32 %v1942_v63, %v1899_v15  ;;  %v10417_v16 = vpop.permute.xlu0 %974  ;;  %v1957_v39 = vadd.f32 %v1943_v48, %v1900_v5  ;;  %v2308_v15 = vld [vmem:[%s12459_s3 + $0xa38] sm:$0xff]  ;;  %v2303_v48 = vld [vmem:[%s12459_s3 + $0xa10] sm:$0xff]  ;;  %v8298_v13 = vld [vmem:[%s8580_s15] sm:$0xff]  ;;  %s8413_s15 = smov 106  }
 0x239   : > { %v10419_v44 = vpop.permute.xlu1 %972  ;;  %v10422_v10 = vadd.f32 %v12810_v59, %v1957_v39  ;;  %v10425_v56 = vadd.f32 %v12810_v59, %v1956_v27  ;;  %v2302_v27 = vld [vmem:[%s12459_s3 + $0xa08] sm:$0xff]  ;;  %v462_v59 = vrot.slane %v8298_v13, %v12813_v43  ;;  %v12816_v43 = vld [vmem:[#allocation62_spill] sm:$0xff] }
 0x23a   : > { %v12814_v13 = vld [vmem:[#allocation48_spill] sm:$0xff] }
 0x23b   : > { %12811 = vst [vmem:[#allocation29_spill] sm:$0xff] %v10422_v10  ;;  %12812 = vst [vmem:[#allocation31_spill] sm:$0xff] %v10425_v56  ;;  %v10427_v14 = vpop.permute.xlu0 %1030  ;;  %v12611_v3 = vmax.f32 %v10422_v10, 0.0  ;;  %v12610_v8 = vmax.f32 %v10425_v56, 0.0  ;;  %v482_v30 = vmul.f32 %v462_v59, %v12816_v43 }
 0x23d   : > { %v10434_v57 = vpop.permute.xlu1 %854  ;;  %2452 = vmatprep.mubr.f32.mxu1 %v12611_v3 }
 0x23e   : > { %2453 = vmatmul.mubr.f32.vlgmr.msra.gmra.mxu1 %v12610_v8 }
 0x23f   : > { %v10446_v6 = vpop.permute.xlu0 %912  ;;  %2531 = vmatpush1.msra.mxu1 %v2314_v58  ;;  %2594 = vmatprep.mubr.f32.mxu1 %v12608_v55  ;;  %v2300_v58 = vld [vmem:[%s12459_s3 + $0x9f8] sm:$0xff] }
 0x240   : > { %2532 = vmatprep.subr.mxu1 %v2312_v11  ;;  %v2299_v11 = vld [vmem:[%s12459_s3 + $0x9f0] sm:$0xff] }
 0x241   : > { %v10455_v5 = vpop.permute.xlu1 %1032  ;;  %2533 = vmatpush1.msra.mxu1 %v2311_v1 }
 0x242   : > { %2534 = vmatprep.subr.mxu1 %v2309_v23  ;;  %v2297_v23 = vld [vmem:[%s12459_s3 + $0x9e0] sm:$0xff] }
 0x243   : > { %v10463_v63 = vpop.permute.xlu0 %1090  ;;  %2535 = vmatpush1.msra.mxu1 %v2308_v15  ;;  %v2296_v15 = vld [vmem:[%s12459_s3 + $0x9d8] sm:$0xff] }
 0x244   : > { %2536 = vmatprep.subr.mxu1 %v2306_v60 }
 0x245   : > { %v10471_v39 = vpop.permute.xlu1 %1088  ;;  %2537 = vmatpush1.msra.mxu1 %v2305_v32  ;;  %v2294_v32 = vld [vmem:[%s12459_s3 + $0x9c8] sm:$0xff] }
 0x246   : > { %2538 = vmatprep.subr.mxu1 %v2303_v48  ;;  %v2293_v48 = vld [vmem:[%s12459_s3 + $0x9c0] sm:$0xff] }
 0x247   : > { %v10479_v1 = vpop.permute.xlu0 %1146  ;;  %2539 = vmatpush1.msra.mxu1 %v2302_v27 }
 0x248   : > { %2540 = vmatprep.subr.mxu1 %v2300_v58  ;;  %v2291_v58 = vld [vmem:[%s12459_s3 + $0x9b0] sm:$0xff] }
 0x249   : > { %v10487_v60 = vpop.permute.xlu1 %970  ;;  %2541 = vmatpush1.msra.mxu1 %v2299_v11  ;;  %v2290_v11 = vld [vmem:[%s12459_s3 + $0x9a8] sm:$0xff] }
 0x24a   : > { %2542 = vmatprep.subr.mxu1 %v2297_v23  ;;  %v2288_v23 = vld [vmem:[%s12459_s3 + $0x998] sm:$0xff] }
 0x24b   : > { %v10495_v27 = vpop.permute.xlu0 %1028  ;;  %2543 = vmatpush1.msra.mxu1 %v2296_v15  ;;  %v2287_v15 = vld [vmem:[%s12459_s3 + $0x990] sm:$0xff] }
 0x24c   : > { %2544 = vmatprep.subr.mxu1 %v2294_v32  ;;  %v2285_v32 = vld [vmem:[%s12459_s3 + $0x980] sm:$0xff] }
 0x24d   : > { %v10503_v55 = vpop.permute.xlu1 %1148  ;;  %2545 = vmatpush1.msra.mxu1 %v2293_v48  ;;  %v2284_v48 = vld [vmem:[%s12459_s3 + $0x978] sm:$0xff] }
 0x24e   : > { %2546 = vmatprep.subr.mxu1 %v2291_v58  ;;  %v2282_v58 = vld [vmem:[%s12459_s3 + $0x968] sm:$0xff] }
 0x24f   : > { %v10511_v8 = vpop.permute.xlu0 %1206  ;;  %2547 = vmatpush1.msra.mxu1 %v2290_v11  ;;  %v2281_v11 = vld [vmem:[%s12459_s3 + $0x960] sm:$0xff] }
 0x250   : > { %2548 = vmatprep.subr.mxu1 %v2288_v23  ;;  %v2279_v23 = vld [vmem:[%s12459_s3 + $0x950] sm:$0xff] }
 0x251   : > { %v10519_v3 = vpop.permute.xlu1 %1204  ;;  %2549 = vmatpush1.msra.mxu1 %v2287_v15  ;;  %v2278_v15 = vld [vmem:[%s12459_s3 + $0x948] sm:$0xff] }
 0x252   : > { %2550 = vmatprep.subr.mxu1 %v2285_v32  ;;  %v2276_v32 = vld [vmem:[%s12459_s3 + $0x938] sm:$0xff] }
 0x253   : > { %v10527_v56 = vpop.permute.xlu0 %1262  ;;  %2551 = vmatpush1.msra.mxu1 %v2284_v48  ;;  %v2275_v48 = vld [vmem:[%s12459_s3 + $0x930] sm:$0xff] }
 0x254   : > { %2552 = vmatprep.subr.mxu1 %v2282_v58 }
 0x255   : > { %v10535_v10 = vpop.permute.xlu1 %1086  ;;  %2553 = vmatpush1.msra.mxu1 %v2281_v11  ;;  %v2272_v11 = vld [vmem:[%s12459_s3 + $0x918] sm:$0xff] }
 0x256   : > { %2554 = vmatprep.subr.mxu1 %v2279_v23 }
 0x257   : > { %v10545_v58 = vpop.permute.xlu0 %1144  ;;  %2555 = vmatpush1.msra.mxu1 %v2278_v15  ;;  %v575_v15 = vsel %vm570_vm0, %v12814_v13, %v10148_v53  ;;  %v2076_v13 = vld [vmem:[%s12459_s3 + $0x2f8] sm:$0xff]  ;;  %v633_v53 = vsel %vm628_vm1, %v12818_v21, %v10238_v37 }
 0x258   : > { %2556 = vmatprep.subr.mxu1 %v2276_v32  ;;  %v2269_v32 = vld [vmem:[%s12459_s3 + $0x900] sm:$0xff]  ;;  %v589_v59 = vadd.f32 %v575_v15, %v482_v30  ;;  %v750_v30 = vsel %vm744_vm3, %v10385_v2, %v10204_v35 }
 0x259   : > { %v10553_v23 = vpop.permute.xlu1 %1264  ;;  %2557 = vmatpush1.msra.mxu1 %v2275_v48  ;;  %v483_v48 = vmul.f32 %v9372_v9, %v12816_v43  ;;  %v691_v9 = vsel %vm686_vm2, %v12778_v25, %v10289_v42 }
 0x25a   : > { %2558 = vmatprep.subr.mxu1 %v2273_v41  ;;  %v12819_v41 = vld [vmem:[#allocation54_spill] sm:$0xff]  ;;  %v647_v21 = vadd.f32 %v633_v53, %v589_v59 }
 0x25b   : > { %v10570_v52 = vpop.permute.xlu0 %1322  ;;  %2559 = vmatpush1.msra.mxu1 %v2272_v11  ;;  %v634_v0 = vsel %vm628_vm1, %v10238_v37, %v12819_v41  ;;  %v590_v50 = vadd.f32 %v576_v62, %v483_v48  ;;  %v692_v11 = vsel %vm686_vm2, %v10289_v42, %v10120_v20  ;;  %v749_v62 = vsel %vm744_vm3, %v12781_v24, %v10385_v2  ;;  %v12820_v24 = vld [vmem:[#allocation19_spill] sm:$0xff]  ;;  %v12821_v2 = vld [vmem:[#allocation52_spill] sm:$0xff] }
 0x25c   : > { %12817 = vst [vmem:[#allocation33_spill] sm:$0xff] %v10570_v52  ;;  %2560 = vmatprep.subr.mxu1 %v2270_v34  ;;  %v705_v37 = vadd.f32 %v691_v9, %v647_v21  ;;  %v807_v42 = vsel %vm802_vm4, %v9503_v38, %v10399_v47  ;;  %v577_v48 = vsel %vm570_vm0, %v12815_v7, %v12820_v24  ;;  %v12822_v9 = vld [vmem:[#allocation22_spill] sm:$0xff] }
 0x25d   : > { %v10581_v18 = vpop.permute.xlu1 %1320  ;;  %2561 = vmatpush1.msra.mxu1 %v2269_v32  ;;  %v648_v54 = vadd.f32 %v634_v0, %v590_v50  ;;  %v808_v50 = vsel %vm802_vm4, %v10399_v47, %v10255_v61  ;;  %v866_v38 = vsel %vm860_vm5, %v10434_v57, %v10361_v28 }
 0x25e   : > { %7485 = vmatprep.subr.mxu1 %v2076_v13  ;;  %v763_v0 = vadd.f32 %v749_v62, %v705_v37  ;;  %v484_v13 = vmul.f32 %v12821_v2, %v12816_v43  ;;  %v923_v43 = vsel %vm918_vm6, %v9664_v22, %v10446_v6 }
 0x25f   : > { %v10589_v52 = vpop.permute.xlu0 %1378  ;;  %v706_v34 = vadd.f32 %v692_v11, %v648_v54  ;;  %v865_v54 = vsel %vm860_vm5, %v9539_v40, %v10434_v57  ;;  %v635_v11 = vsel %vm628_vm1, %v12819_v41, %v12822_v9  ;;  %v693_v40 = vsel %vm686_vm2, %v10120_v20, %v10165_v4 }
 0x260   : > { %v821_v47 = vadd.f32 %v807_v42, %v763_v0  ;;  %v591_v7 = vadd.f32 %v577_v48, %v484_v13  ;;  %v924_v57 = vsel %vm918_vm6, %v10446_v6, %v10387_v45  ;;  %v751_v41 = vsel %vm744_vm3, %v10204_v35, %v10182_v51 }
 0x261   : > { %v1203_v25 = vpop.permute.xlu1 %1202  ;;  %v764_v15 = vadd.f32 %v750_v30, %v706_v34  ;;  %v981_v42 = vsel %vm976_vm7, %v9692_v33, %v10487_v60  ;;  %v982_v4 = vsel %vm976_vm7, %v10487_v60, %v10419_v44  ;;  %v809_v6 = vsel %vm802_vm4, %v10255_v61, %v10306_v12 }
 0x262   : > { %v879_v21 = vadd.f32 %v865_v54, %v821_v47  ;;  %v649_v37 = vadd.f32 %v635_v11, %v591_v7  ;;  %v867_v33 = vsel %vm860_vm5, %v10361_v28, %v10347_v17  ;;  %v1039_v60 = vsel %vm1034_vm8, %v9743_v26, %v10495_v27 }
 0x263   : > { %v10603_v32 = vpop.permute.xlu0 %1260  ;;  %v822_v53 = vadd.f32 %v808_v50, %v764_v15  ;;  %v1040_v48 = vsel %vm1034_vm8, %v10495_v27, %v10427_v14  ;;  %v925_v61 = vsel %vm918_vm6, %v10387_v45, %v10405_v49  ;;  %v1097_v12 = vsel %vm1092_vm9, %v9801_v19, %v10535_v10 }
 0x264   : > { %v707_v22 = vadd.f32 %v693_v40, %v649_v37  ;;  %v937_v20 = vadd.f32 %v923_v43, %v879_v21  ;;  %v1098_v17 = vsel %vm1092_vm9, %v10535_v10, %v10471_v39  ;;  %v983_v27 = vsel %vm976_vm7, %v10419_v44, %v10417_v16 }
 0x265   : > { %v10616_v59 = vpop.permute.xlu1 %1380  ;;  %v880_v62 = vadd.f32 %v866_v38, %v822_v53  ;;  %v1041_v19 = vsel %vm1034_vm8, %v10427_v14, %v10455_v5  ;;  %v1155_v49 = vsel %vm1150_vm10, %v9841_v36, %v10545_v58  ;;  %v1156_v10 = vsel %vm1150_vm10, %v10545_v58, %v10479_v1 }
 0x266   : > { %v765_v15 = vadd.f32 %v751_v41, %v707_v22  ;;  %v995_v24 = vadd.f32 %v981_v42, %v937_v20  ;;  %v1099_v16 = vsel %vm1092_vm9, %v10471_v39, %v10463_v63  ;;  %vm12823_vm4 = vcmask 506880   ;;  %v12831_v22 = vld [vmem:[#allocation33_spill] sm:$0xff] }
 0x267   : > { %v10621_v30 = vpop.permute.xlu0 %1438  ;;  %v938_v50 = vadd.f32 %v924_v57, %v880_v62  ;;  %v1213_v44 = vsel %vm12823_vm4, %v9893_v46, %v1203_v25  ;;  %vm12824_vm5 = vmmov %vm12823_vm4  ;;  %v1157_v58 = vsel %vm1150_vm10, %v10479_v1, %v10503_v55  ;;  %vm12826_vm7 = vcmask 498688  }
 0x268   : > { %v823_v54 = vadd.f32 %v809_v6, %v765_v15  ;;  %v1053_v26 = vadd.f32 %v1039_v60, %v995_v24  ;;  %v1214_v14 = vsel %vm12824_vm5, %v1203_v25, %v10519_v3  ;;  %vm12825_vm6 = vmmov %vm12823_vm4  ;;  %v1271_v46 = vsel %vm12826_vm7, %v9915_v31, %v10603_v32 }
 0x269   : > { %v10632_v34 = vpop.permute.xlu1 %1436  ;;  %v996_v51 = vadd.f32 %v982_v4, %v938_v50  ;;  %v1215_v63 = vsel %vm12825_vm6, %v10519_v3, %v10511_v8  ;;  %vm12827_vm9 = vmmov %vm12826_vm7  ;;  %vm12833_vm5 = vcmask 261120  }
 0x26a   : > { %v881_v28 = vadd.f32 %v867_v33, %v823_v54  ;;  %v1111_v53 = vadd.f32 %v1097_v12, %v1053_v26  ;;  %v1272_v39 = vsel %vm12827_vm9, %v10603_v32, %v10527_v56  ;;  %vm12828_vm10 = vmmov %vm12826_vm7  ;;  %vm12837_vm9 = vcmask 252928   ;;  %v12838_v33 = vld [vmem:[#allocation44_spill] sm:$0xff] }
 0x26b   : > { %v10643_v0 = vpop.permute.xlu0 %1494  ;;  %v1054_v2 = vadd.f32 %v1040_v48, %v996_v51  ;;  %v1273_v55 = vsel %vm12828_vm10, %v10527_v56, %v10553_v23  ;;  %vm12832_vm4 = vmmov %vm12830_vm11  ;;  %v1389_v56 = vsel %vm12833_vm5, %v10589_v52, %v10616_v59 }
 0x26c   : > { %v939_v47 = vadd.f32 %v925_v61, %v881_v28  ;;  %v1169_v21 = vadd.f32 %v1155_v49, %v1111_v53  ;;  %v1331_v32 = vsel %vm12832_vm4, %v10581_v18, %v12831_v22  ;;  %vm12835_vm6 = vmmov %vm12833_vm5  ;;  %vm3696_vm4 = vcmask 875520  }
 0x26d   : > { %v1319_v35 = vpop.permute.xlu1 %1318  ;;  %v1112_v9 = vadd.f32 %v1098_v17, %v1054_v2  ;;  %vm12836_vm7 = vmmov %vm12833_vm5  ;;  %vm3799_vm5 = vcmask 867328  }
 0x26e   : > { %v997_v11 = vadd.f32 %v983_v27, %v939_v47  ;;  %v1227_v43 = vadd.f32 %v1213_v44, %v1169_v21  ;;  %v1329_v1 = vsel %vm12829_vm12, %v9939_v29, %v1319_v35  ;;  %v1330_v3 = vsel %vm12830_vm11, %v1319_v35, %v10581_v18  ;;  %v12834_v29 = vld [vmem:[#allocation43_spill] sm:$0xff]  ;;  %vm12839_vm10 = vmmov %vm12837_vm9 }
 0x26f   : > { %v1377_v38 = vpop.permute.xlu0 %1376  ;;  %v1170_v62 = vadd.f32 %v1156_v10, %v1112_v9  ;;  %v1447_v18 = vsel %vm12837_vm9, %v10632_v34, %v10621_v30  ;;  %vm12840_vm12 = vmmov %vm12837_vm9  ;;  %v12841_v30 = vld [vmem:[#allocation34_spill] sm:$0xff]  ;;  %vm2899_vm11 = vcmask 48128   ;;  %vm4313_vm9 = vcmask 719872  }
 0x270   : > { %v1055_v5 = vadd.f32 %v1041_v19, %v997_v11  ;;  %v1285_v42 = vadd.f32 %v1271_v46, %v1227_v43  ;;  %v1387_v23 = vsel %vm12835_vm6, %v12834_v29, %v1377_v38  ;;  %v1388_v24 = vsel %vm12836_vm7, %v1377_v38, %v10589_v52  ;;  %v12842_v19 = vld [vmem:[#allocation57_spill] sm:$0xff]  ;;  %v12845_v43 = vld [vmem:[#allocation20_spill] sm:$0xff]  ;;  %v12847_v46 = vld [vmem:[#allocation51_spill] sm:$0xff] }
 0x271   : > { %v1497_v13 = vpop.permute.xlu1 %1496  ;;  %v1228_v57 = vadd.f32 %v1214_v14, %v1170_v62  ;;  %v12843_v62 = vld [vmem:[#allocation35_spill] sm:$0xff]  ;;  %vm4107_vm6 = vcmask 736256   ;;  %vm4210_vm7 = vcmask 728064  }
 0x272   : > { %v1113_v40 = vadd.f32 %v1099_v16, %v1055_v5  ;;  %v1343_v50 = vadd.f32 %v1329_v1, %v1285_v42  ;;  %v1505_v17 = vsel %vm1498_vm13, %v10643_v0, %v1497_v13 }
 0x273   : > { %v1555_v45 = vpop.permute.xlu0 %1554  ;;  %v1286_v4 = vadd.f32 %v1272_v39, %v1228_v57 }
 0x274   : > { %v1171_v25 = vadd.f32 %v1157_v58, %v1113_v40  ;;  %v1401_v59 = vadd.f32 %v1387_v23, %v1343_v50  ;;  %v12844_v40 = vld [vmem:[#allocation60_spill] sm:$0xff] }
 0x275   : > { %v1553_v7 = vpop.permute.xlu1 %1552  ;;  %v1344_v6 = vadd.f32 %v1330_v3, %v1286_v4  ;;  %v1683_v57 = vmul.f32 %v12845_v43, %v12844_v40  ;;  %v2064_v43 = vld [vmem:[%s12459_s3 + $0x298] sm:$0xff] }
 0x276   : > { %v1229_v8 = vadd.f32 %v1215_v63, %v1171_v25  ;;  %v1563_v2 = vsel %vm1556_vm14, %v1553_v7, %v1555_v45  ;;  %v12846_v63 = vld [vmem:[#allocation25_spill] sm:$0xff] }
 0x277   : > { %v1611_v36 = vpop.permute.xlu0 %1610  ;;  %v1402_v61 = vadd.f32 %v1388_v24, %v1344_v6 }
 0x278   : > { %v1287_v20 = vadd.f32 %v1273_v55, %v1229_v8 }
 0x279   : > { %v1435_v37 = vpop.permute.xlu1 %1434 }
 0x27a   : > { %v1345_v51 = vadd.f32 %v1331_v32, %v1287_v20  ;;  %v1445_v60 = vsel %vm12839_vm10, %v12838_v33, %v1435_v37  ;;  %v1446_v48 = vsel %vm12840_vm12, %v1435_v37, %v10632_v34  ;;  %v12849_v32 = vld [vmem:[#allocation36_spill] sm:$0xff]  ;;  %vm4416_vm10 = vcmask 605184  }
 0x27b   : > { %v1493_v41 = vpop.permute.xlu0 %1492  ;;  %v1459_v38 = vadd.f32 %v1445_v60, %v1401_v59  ;;  %v1460_v28 = vadd.f32 %v1446_v48, %v1402_v61  ;;  %v12850_v33 = vld [vmem:[#allocation24_spill] sm:$0xff]  ;;  %vm4519_vm12 = vcmask 596992  }
 0x27c   : > { %v1403_v54 = vadd.f32 %v1389_v56, %v1345_v51  ;;  %v1503_v27 = vsel %vm1498_vm13, %v12841_v30, %v1493_v41  ;;  %v1504_v47 = vsel %vm1498_vm13, %v1493_v41, %v10643_v0  ;;  %vm8406_vm13 = vmmov 0  }
 0x27d   : > { %v1613_v31 = vpop.permute.xlu1 %1612  ;;  %v1517_v11 = vadd.f32 %v1503_v27, %v1459_v38  ;;  %v1518_v16 = vadd.f32 %v1504_v47, %v1460_v28  ;;  %v12852_v28 = vld [vmem:[#allocation27_spill] sm:$0xff] }
 0x27e   : > { %v1461_v52 = vadd.f32 %v1447_v18, %v1403_v54  ;;  %v1621_v9 = vsel %vm1614_vm15, %v1611_v36, %v1613_v31 }
 0x27f   : > { %v1766_v15 = vpop.permute.xlu0 %1765 }
 0x280   : > { %v1519_v34 = vadd.f32 %v1505_v17, %v1461_v52  ;;  %v12851_v17 = vld [vmem:[#allocation40_spill] sm:$0xff] }
 0x281   : > { %v1551_v35 = vpop.permute.xlu1 %1550 }
 0x282   : > { %v1561_v49 = vsel %vm1556_vm14, %v12842_v19, %v1551_v35  ;;  %v1562_v13 = vsel %vm1556_vm14, %v1551_v35, %v1553_v7  ;;  %v1577_v10 = vadd.f32 %v1563_v2, %v1519_v34  ;;  %v1661_v7 = vrot.slane %v12847_v46, %v12846_v63  ;;  %v2028_v34 = vld [vmem:[%s12459_s3 + $0x178] sm:$0xff]  ;;  %v2169_v63 = vld [vmem:[%s12459_s3 + $0x5e0] sm:$0xff] }
 0x283   : > { %v1609_v12 = vpop.permute.xlu0 %1608  ;;  %v1575_v14 = vadd.f32 %v1561_v49, %v1517_v11  ;;  %v1576_v5 = vadd.f32 %v1562_v13, %v1518_v16  ;;  %v2073_v49 = vld [vmem:[%s12459_s3 + $0x2e0] sm:$0xff]  ;;  %v12854_v16 = vld [vmem:[#allocation41_spill] sm:$0xff]  ;;  %vm2883_vm14 = vcmask 619520  }
 0x284   : > { %v1635_v45 = vadd.f32 %v1621_v9, %v1577_v10  ;;  %v1619_v0 = vsel %vm1614_vm15, %v12843_v62, %v1609_v12  ;;  %v1620_v58 = vsel %vm1614_vm15, %v1609_v12, %v1611_v36  ;;  %v1681_v4 = vmul.f32 %v1661_v7, %v12844_v40  ;;  %v12848_v36 = vld [vmem:[#allocation23_spill] sm:$0xff]  ;;  %v2067_v62 = vld [vmem:[%s12459_s3 + $0x2b0] sm:$0xff] }
 0x285   : > { %v1768_v26 = vpop.permute.xlu1 %1767  ;;  %v1633_v25 = vadd.f32 %v1619_v0, %v1575_v14  ;;  %v1634_v41 = vadd.f32 %v1620_v58, %v1576_v5  ;;  %v1682_v31 = vmul.f32 %v12848_v36, %v12844_v40  ;;  %v2025_v11 = vld [vmem:[%s12459_s3 + $0x160] sm:$0xff]  ;;  %v2022_v5 = vld [vmem:[%s12459_s3 + $0x148] sm:$0xff]  ;;  %v2019_v40 = vld [vmem:[%s12459_s3 + $0x130] sm:$0xff]  ;;  %vm2906_vm15 = vcmask 1045504  }
 0x286   : > { %v1775_v39 = vsel %vm570_vm0, %v1766_v15, %v1768_v26  ;;  %v1690_v55 = vadd.f32 %v1683_v57, %v1635_v45  ;;  %v2070_v45 = vld [vmem:[%s12459_s3 + $0x2c8] sm:$0xff]  ;;  %v2124_v57 = vld [vmem:[%s12459_s3 + $0x478] sm:$0xff]  ;;  %v2061_v46 = vld [vmem:[%s12459_s3 + $0x280] sm:$0xff] }
 0x287   : > { %v1825_v53 = vpop.permute.xlu0 %1824  ;;  %v1688_v56 = vadd.f32 %v1681_v4, %v1633_v25  ;;  %v1689_v29 = vadd.f32 %v1682_v31, %v1634_v41  ;;  %v2121_v7 = vld [vmem:[%s12459_s3 + $0x460] sm:$0xff]  ;;  %v2166_v25 = vld [vmem:[%s12459_s3 + $0x5c8] sm:$0xff]  ;;  %v2055_v4 = vld [vmem:[%s12459_s3 + $0x250] sm:$0xff] }
 0x288   : > { %v1789_v8 = vadd.f32 %v1775_v39, %v1690_v55  ;;  %v2013_v39 = vld [vmem:[%s12459_s3 + $0x100] sm:$0xff]  ;;  %v2058_v41 = vld [vmem:[%s12459_s3 + $0x268] sm:$0xff]  ;;  %v2115_v36 = vld [vmem:[%s12459_s3 + $0x430] sm:$0xff] }
 0x289   : > { %v1823_v44 = vpop.permute.xlu1 %1822  ;;  %v12856_v55 = vld [vmem:[#allocation29_spill] sm:$0xff] }
 0x28a   : > { %v1832_v3 = vsel %vm628_vm1, %v1823_v44, %v1825_v53  ;;  %v12853_v53 = vld [vmem:[#allocation30_spill] sm:$0xff] }
 0x28b   : > { %v1882_v21 = vpop.permute.xlu0 %1881  ;;  %v1846_v6 = vadd.f32 %v1832_v3, %v1789_v8  ;;  %v2118_v3 = vld [vmem:[%s12459_s3 + $0x448] sm:$0xff]  ;;  %v2007_v31 = vld [vmem:[%s12459_s3 + $0xd0] sm:$0xff] }
 0x28c   : > { %v2010_v8 = vld [vmem:[%s12459_s3 + $0xe8] sm:$0xff] }
 0x28d   : > { %v1880_v37 = vpop.permute.xlu1 %1879 }
 0x28e   : > { %v1889_v22 = vsel %vm686_vm2, %v1880_v37, %v1882_v21 }
 0x28f   : > { %v1937_v1 = vpop.permute.xlu0 %1936  ;;  %v1903_v24 = vadd.f32 %v1889_v22, %v1846_v6  ;;  %v2160_v22 = vld [vmem:[%s12459_s3 + $0x598] sm:$0xff]  ;;  %v2157_v6 = vld [vmem:[%s12459_s3 + $0x580] sm:$0xff] }
 0x291   : > { %v1764_v42 = vpop.permute.xlu1 %1763 }
 0x292   : > { %v1773_v20 = vsel %vm570_vm0, %v12849_v32, %v1764_v42  ;;  %v1774_v50 = vsel %vm570_vm0, %v1764_v42, %v1766_v15  ;;  %v2163_v42 = vld [vmem:[%s12459_s3 + $0x5b0] sm:$0xff]  ;;  %v2052_v32 = vld [vmem:[%s12459_s3 + $0x238] sm:$0xff] }
 0x293   : > { %v1821_v23 = vpop.permute.xlu0 %1820  ;;  %v1787_v51 = vadd.f32 %v1773_v20, %v1688_v56  ;;  %v1788_v35 = vadd.f32 %v1774_v50, %v1689_v29  ;;  %v2112_v20 = vld [vmem:[%s12459_s3 + $0x418] sm:$0xff]  ;;  %v2049_v56 = vld [vmem:[%s12459_s3 + $0x220] sm:$0xff] }
 0x294   : > { %v1830_v60 = vsel %vm628_vm1, %v12850_v33, %v1821_v23  ;;  %v1831_v48 = vsel %vm628_vm1, %v1821_v23, %v1823_v44  ;;  %v12855_v44 = vmax.f32 %v12854_v16, 0.0  ;;  %v2004_v50 = vld [vmem:[%s12459_s3 + $0xb8] sm:$0xff]  ;;  %v2109_v29 = vld [vmem:[%s12459_s3 + $0x400] sm:$0xff]  ;;  %v2151_v33 = vld [vmem:[%s12459_s3 + $0x550] sm:$0xff] }
 0x295   : > { %v1939_v18 = vpop.permute.xlu1 %1938  ;;  %v1844_v61 = vadd.f32 %v1830_v60, %v1787_v51  ;;  %v1845_v12 = vadd.f32 %v1831_v48, %v1788_v35  ;;  %v2001_v23 = vld [vmem:[%s12459_s3 + $0xa0] sm:$0xff]  ;;  %v2046_v51 = vld [vmem:[%s12459_s3 + $0x208] sm:$0xff]  ;;  %v2043_v60 = vld [vmem:[%s12459_s3 + $0x1f0] sm:$0xff] }
 0x296   : > { %v1946_v54 = vsel %vm744_vm3, %v1937_v1, %v1939_v18  ;;  %v2106_v35 = vld [vmem:[%s12459_s3 + $0x3e8] sm:$0xff]  ;;  %v2103_v48 = vld [vmem:[%s12459_s3 + $0x3d0] sm:$0xff]  ;;  %v2133_v16 = vld [vmem:[%s12459_s3 + $0x4c0] sm:$0xff] }
 0x297   : > { %v1960_v59 = vadd.f32 %v1946_v54, %v1903_v24  ;;  %v1935_v52 = vpop.permute.xlu0 %1934  ;;  %v2154_v24 = vld [vmem:[%s12459_s3 + $0x568] sm:$0xff]  ;;  %v1995_v54 = vld [vmem:[%s12459_s3 + $0x70] sm:$0xff] }
 0x298   : > { %v1944_v9 = vsel %vm744_vm3, %v12853_v53, %v1935_v52  ;;  %v1945_v19 = vsel %vm744_vm3, %v1935_v52, %v1937_v1  ;;  %v12857_v1 = vmax.f32 %v12856_v55, 0.0  ;;  %v1998_v18 = vld [vmem:[%s12459_s3 + $0x88] sm:$0xff]  ;;  %v2145_v52 = vld [vmem:[%s12459_s3 + $0x520] sm:$0xff]  ;;  %v2139_v53 = vld [vmem:[%s12459_s3 + $0x4f0] sm:$0xff] }
 0x299   : > { %v10753_v15 = vadd.f32 %v12851_v17, %v1960_v59  ;;  %v1878_v38 = vpop.permute.xlu1 %1877  ;;  %v2148_v59 = vld [vmem:[%s12459_s3 + $0x538] sm:$0xff] }
 0x29a   : > { %v1887_v26 = vsel %vm686_vm2, %v12852_v28, %v1878_v38  ;;  %v1888_v2 = vsel %vm686_vm2, %v1878_v38, %v1880_v37  ;;  %v2016_v37 = vld [vmem:[%s12459_s3 + $0x118] sm:$0xff]  ;;  %v2037_v38 = vld [vmem:[%s12459_s3 + $0x1c0] sm:$0xff] }
 0x29b   : > { %v1980_v30 = vmax.f32 %v10753_v15, 0.0  ;;  %v1901_v27 = vadd.f32 %v1887_v26, %v1844_v61  ;;  %v1902_v47 = vadd.f32 %v1888_v2, %v1845_v12  ;;  %v2040_v61 = vld [vmem:[%s12459_s3 + $0x1d8] sm:$0xff]  ;;  %v2097_v28 = vld [vmem:[%s12459_s3 + $0x3a0] sm:$0xff]  ;;  %v2142_v2 = vld [vmem:[%s12459_s3 + $0x508] sm:$0xff] }
 0x29c   : > { %v2100_v12 = vld [vmem:[%s12459_s3 + $0x3b8] sm:$0xff]  ;;  %v1989_v26 = vld [vmem:[%s12459_s3 + $0x40] sm:$0xff] }
 0x29d   : > { %v1958_v13 = vadd.f32 %v1944_v9, %v1901_v27  ;;  %v1959_v10 = vadd.f32 %v1945_v19, %v1902_v47  ;;  %2595 = vmatmul.mubr.f32.vlgmr.msra.gmra.mxu1 %v1980_v30  ;;  %v2034_v27 = vld [vmem:[%s12459_s3 + $0x1a8] sm:$0xff]  ;;  %v2031_v9 = vld [vmem:[%s12459_s3 + $0x190] sm:$0xff]  ;;  %v12860_v55 = vld [vmem:[#allocation31_spill] sm:$0xff] }
 0x29e   : > { %7486 = vmatpush3.msra.mxu1 %v2028_v34  ;;  %2665 = vmatprep.mubr.f32.mxu1 %v12855_v44  ;;  %v2094_v47 = vld [vmem:[%s12459_s3 + $0x388] sm:$0xff]  ;;  %v2091_v19 = vld [vmem:[%s12459_s3 + $0x370] sm:$0xff]  ;;  %v2220_v44 = vld [vmem:[%s12459_s3 + $0x778] sm:$0xff] }
 0x29f   : > { %v10779_v14 = vadd.f32 %v12851_v17, %v1958_v13  ;;  %7487 = vmatprep.subr.mxu1 %v2073_v49  ;;  %v10785_v21 = vadd.f32 %v12851_v17, %v1959_v10  ;;  %v1992_v17 = vld [vmem:[%s12459_s3 + $0x58] sm:$0xff]  ;;  %v1986_v34 = vld [vmem:[%s12459_s3 + $0x28] sm:$0xff]  ;;  %v1983_v49 = vld [vmem:[%s12459_s3 + $0x10] sm:$0xff] }
 0x2a0   : > { %7488 = vmatpush3.msra.mxu1 %v2025_v11  ;;  %v2136_v13 = vld [vmem:[%s12459_s3 + $0x4d8] sm:$0xff] }
 0x2a1   : > { %v1978_v0 = vmax.f32 %v10779_v14, 0.0  ;;  %7489 = vmatprep.subr.mxu1 %v2070_v45  ;;  %v1979_v58 = vmax.f32 %v10785_v21, 0.0  ;;  %v2088_v10 = vld [vmem:[%s12459_s3 + $0x358] sm:$0xff]  ;;  %v2079_v21 = vld [vmem:[%s12459_s3 + $0x310] sm:$0xff] }
 0x2a2   : > { %7490 = vmatpush3.msra.mxu1 %v2022_v5  ;;  %v2268_v11 = vld [vmem:[%s12459_s3 + $0x8f8] sm:$0xff]  ;;  %v2271_v14 = vld [vmem:[%s12459_s3 + $0x910] sm:$0xff] }
 0x2a3   : > { %7491 = vmatprep.subr.mxu1 %v2067_v62  ;;  %2523 = vmatprep.mubr.f32.mxu0 %v1979_v58  ;;  %v12858_v45 = vld [vmem:[#allocation42_spill] sm:$0xff]  ;;  %v2085_v62 = vld [vmem:[%s12459_s3 + $0x340] sm:$0xff] }
 0x2a4   : > { %7492 = vmatpush3.msra.mxu1 %v2019_v40  ;;  %2524 = vmatmul.mubr.f32.vlgmr.msra.gmra.mxu0 %v1978_v0  ;;  %v12859_v5 = vmax.f32 %v12858_v45, 0.0  ;;  %v2265_v40 = vld [vmem:[%s12459_s3 + $0x8e0] sm:$0xff] }
 0x2a5   : > { %7493 = vmatprep.subr.mxu1 %v2064_v43  ;;  %7521 = vmatpush3.msra.mxu0 %v2124_v57  ;;  %v2130_v43 = vld [vmem:[%s12459_s3 + $0x4a8] sm:$0xff]  ;;  %v2217_v57 = vld [vmem:[%s12459_s3 + $0x760] sm:$0xff] }
 0x2a6   : > { %7494 = vmatpush3.msra.mxu1 %v2016_v37  ;;  %7522 = vmatprep.subr.mxu0 %v2169_v63  ;;  %v2082_v37 = vld [vmem:[%s12459_s3 + $0x328] sm:$0xff] }
 0x2a7   : > { %2735 = vmatprep.mubr.f32.mxu0 %v12857_v1  ;;  %7495 = vmatprep.subr.mxu1 %v2061_v46  ;;  %v2262_v63 = vld [vmem:[%s12459_s3 + $0x8c8] sm:$0xff]  ;;  %v2127_v46 = vld [vmem:[%s12459_s3 + $0x490] sm:$0xff]  ;;  %v12861_v1 = vmax.f32 %v12860_v55, 0.0 }
 0x2a8   : > { %7523 = vmatpush3.msra.mxu0 %v2121_v7  ;;  %7496 = vmatpush3.msra.mxu1 %v2013_v39  ;;  %v2214_v7 = vld [vmem:[%s12459_s3 + $0x748] sm:$0xff]  ;;  %v2211_v39 = vld [vmem:[%s12459_s3 + $0x730] sm:$0xff] }
 0x2a9   : > { %7524 = vmatprep.subr.mxu0 %v2166_v25  ;;  %7497 = vmatprep.subr.mxu1 %v2058_v41  ;;  %v2256_v25 = vld [vmem:[%s12459_s3 + $0x898] sm:$0xff] }
 0x2aa   : > { %7525 = vmatpush3.msra.mxu0 %v2118_v3  ;;  %7498 = vmatpush3.msra.mxu1 %v2010_v8  ;;  %v2316_v41 = vld [vmem:[%s12459_s3 + $0xa78] sm:$0xff]  ;;  %v12862_v8 = vmov 0.0  }
 0x2ab   : > { %7526 = vmatprep.subr.mxu0 %v2163_v42  ;;  %7499 = vmatprep.subr.mxu1 %v2055_v4  ;;  %v2208_v3 = vld [vmem:[%s12459_s3 + $0x718] sm:$0xff]  ;;  %v2253_v42 = vld [vmem:[%s12459_s3 + $0x880] sm:$0xff] }
 0x2ac   : > { %7527 = vmatpush3.msra.mxu0 %v2115_v36  ;;  %7500 = vmatpush3.msra.mxu1 %v2007_v31  ;;  %v2313_v4 = vld [vmem:[%s12459_s3 + $0xa60] sm:$0xff]  ;;  %v2250_v31 = vld [vmem:[%s12459_s3 + $0x868] sm:$0xff] }
 0x2ad   : > { %7528 = vmatprep.subr.mxu0 %v2160_v22  ;;  %7501 = vmatprep.subr.mxu1 %v2052_v32  ;;  %v2205_v36 = vld [vmem:[%s12459_s3 + $0x700] sm:$0xff]  ;;  %v2310_v22 = vld [vmem:[%s12459_s3 + $0xa48] sm:$0xff] }
 0x2ae   : > { %7529 = vmatpush3.msra.mxu0 %v2112_v20  ;;  %7502 = vmatpush3.msra.mxu1 %v2004_v50  ;;  %v2202_v32 = vld [vmem:[%s12459_s3 + $0x6e8] sm:$0xff]  ;;  %v2247_v20 = vld [vmem:[%s12459_s3 + $0x850] sm:$0xff] }
 0x2af   : > { %7530 = vmatprep.subr.mxu0 %v2157_v6  ;;  %7503 = vmatprep.subr.mxu1 %v2049_v56  ;;  %v2307_v50 = vld [vmem:[%s12459_s3 + $0xa30] sm:$0xff]  ;;  %v2244_v56 = vld [vmem:[%s12459_s3 + $0x838] sm:$0xff] }
 0x2b0   : > { %7531 = vmatpush3.msra.mxu0 %v2109_v29  ;;  %7504 = vmatpush3.msra.mxu1 %v2001_v23  ;;  %v2199_v6 = vld [vmem:[%s12459_s3 + $0x6d0] sm:$0xff]  ;;  %v2304_v29 = vld [vmem:[%s12459_s3 + $0xa18] sm:$0xff] }
 0x2b1   : > { %7532 = vmatprep.subr.mxu0 %v2154_v24  ;;  %7505 = vmatprep.subr.mxu1 %v2046_v51  ;;  %v2196_v23 = vld [vmem:[%s12459_s3 + $0x6b8] sm:$0xff]  ;;  %v2241_v24 = vld [vmem:[%s12459_s3 + $0x820] sm:$0xff] }
 0x2b2   : > { %7533 = vmatpush3.msra.mxu0 %v2106_v35  ;;  %7506 = vmatpush3.msra.mxu1 %v1998_v18  ;;  %v2301_v51 = vld [vmem:[%s12459_s3 + $0xa00] sm:$0xff]  ;;  %v2238_v18 = vld [vmem:[%s12459_s3 + $0x808] sm:$0xff] }
 0x2b3   : > { %7534 = vmatprep.subr.mxu0 %v2151_v33  ;;  %7507 = vmatprep.subr.mxu1 %v2043_v60  ;;  %v2193_v35 = vld [vmem:[%s12459_s3 + $0x6a0] sm:$0xff]  ;;  %v2298_v33 = vld [vmem:[%s12459_s3 + $0x9e8] sm:$0xff] }
 0x2b4   : > { %7535 = vmatpush3.msra.mxu0 %v2103_v48  ;;  %7508 = vmatpush3.msra.mxu1 %v1995_v54  ;;  %v2190_v60 = vld [vmem:[%s12459_s3 + $0x688] sm:$0xff]  ;;  %v2235_v48 = vld [vmem:[%s12459_s3 + $0x7f0] sm:$0xff] }
 0x2b5   : > { %7536 = vmatprep.subr.mxu0 %v2148_v59  ;;  %7509 = vmatprep.subr.mxu1 %v2040_v61  ;;  %v2295_v54 = vld [vmem:[%s12459_s3 + $0x9d0] sm:$0xff]  ;;  %v2232_v61 = vld [vmem:[%s12459_s3 + $0x7d8] sm:$0xff] }
 0x2b6   : > { %7537 = vmatpush3.msra.mxu0 %v2100_v12  ;;  %7510 = vmatpush3.msra.mxu1 %v1992_v17  ;;  %v2187_v59 = vld [vmem:[%s12459_s3 + $0x670] sm:$0xff]  ;;  %v2292_v12 = vld [vmem:[%s12459_s3 + $0x9b8] sm:$0xff] }
 0x2b7   : > { %7538 = vmatprep.subr.mxu0 %v2145_v52  ;;  %7511 = vmatprep.subr.mxu1 %v2037_v38  ;;  %v2184_v17 = vld [vmem:[%s12459_s3 + $0x658] sm:$0xff]  ;;  %v2229_v52 = vld [vmem:[%s12459_s3 + $0x7c0] sm:$0xff] }
 0x2b8   : > { %7539 = vmatpush3.msra.mxu0 %v2097_v28  ;;  %7512 = vmatpush3.msra.mxu1 %v1989_v26  ;;  %v2289_v38 = vld [vmem:[%s12459_s3 + $0x9a0] sm:$0xff]  ;;  %v2226_v26 = vld [vmem:[%s12459_s3 + $0x7a8] sm:$0xff] }
 0x2b9   : > { %7540 = vmatprep.subr.mxu0 %v2142_v2  ;;  %7513 = vmatprep.subr.mxu1 %v2034_v27  ;;  %v2181_v28 = vld [vmem:[%s12459_s3 + $0x640] sm:$0xff]  ;;  %v2286_v2 = vld [vmem:[%s12459_s3 + $0x988] sm:$0xff] }
 0x2ba   : > { %7541 = vmatpush3.msra.mxu0 %v2094_v47  ;;  %7514 = vmatpush3.msra.mxu1 %v1986_v34  ;;  %v2178_v27 = vld [vmem:[%s12459_s3 + $0x628] sm:$0xff]  ;;  %v2223_v47 = vld [vmem:[%s12459_s3 + $0x790] sm:$0xff] }
 0x2bb   : > { %7542 = vmatprep.subr.mxu0 %v2139_v53  ;;  %7515 = vmatprep.subr.mxu1 %v2031_v9  ;;  %v2283_v34 = vld [vmem:[%s12459_s3 + $0x970] sm:$0xff]  ;;  %v2280_v9 = vld [vmem:[%s12459_s3 + $0x958] sm:$0xff] }
 0x2bc   : > { %7543 = vmatpush3.msra.mxu0 %v2091_v19  ;;  %7516 = vmatpush3.msra.mxu1 %v1983_v49  ;;  %v2175_v53 = vld [vmem:[%s12459_s3 + $0x610] sm:$0xff]  ;;  %v2277_v19 = vld [vmem:[%s12459_s3 + $0x940] sm:$0xff]  ;;  %v2274_v49 = vld [vmem:[%s12459_s3 + $0x928] sm:$0xff] }
 0x2bd   : > { %7544 = vmatprep.subr.mxu0 %v2136_v13  ;;  %2666 = vmatmul.mubr.f32.vlgmr.msra.gmra.mxu1 %v12859_v5 }
 0x2be   : > { %7545 = vmatpush3.msra.mxu0 %v2088_v10  ;;  %7555 = vmatprep.subr.mxu1 %v2268_v11 }
 0x2bf   : > { %7546 = vmatprep.subr.mxu0 %v2133_v16  ;;  %7556 = vmatpush3.msra.mxu1 %v2220_v44 }
 0x2c0   : > { %2805 = vmatprep.mubr.f32.mxu1 %v1979_v58  ;;  %7547 = vmatpush3.msra.mxu0 %v2085_v62  ;;  %v2259_v58 = vld [vmem:[%s12459_s3 + $0x8b0] sm:$0xff] }
 0x2c1   : > { %7557 = vmatprep.subr.mxu1 %v2265_v40  ;;  %7548 = vmatprep.subr.mxu0 %v2130_v43 }
 0x2c2   : > { %7558 = vmatpush3.msra.mxu1 %v2217_v57  ;;  %7549 = vmatpush3.msra.mxu0 %v2082_v37 }
 0x2c3   : > { %7559 = vmatprep.subr.mxu1 %v2262_v63  ;;  %7550 = vmatprep.subr.mxu0 %v2127_v46 }
 0x2c4   : > { %7560 = vmatpush3.msra.mxu1 %v2214_v7  ;;  %7551 = vmatpush3.msra.mxu0 %v2079_v21 }
 0x2c5   : > { %7561 = vmatprep.subr.mxu1 %v2259_v58  ;;  %2736 = vmatmul.mubr.f32.vlgmr.msra.gmra.mxu0 %v12861_v1 }
 0x2c6   : > { %7562 = vmatpush3.msra.mxu1 %v2211_v39  ;;  %7801 = vmatprep.subr.mxu0 %v12862_v8 }
 0x2c7   : > { %7563 = vmatprep.subr.mxu1 %v2256_v25  ;;  %7802 = vmatpush3.msra.mxu0 %v2316_v41 }
 0x2c8   : > { %7564 = vmatpush3.msra.mxu1 %v2208_v3  ;;  %7803 = vmatprep.subr.mxu0 %v12862_v8 }
 0x2c9   : > { %7565 = vmatprep.subr.mxu1 %v2253_v42  ;;  %7804 = vmatpush3.msra.mxu0 %v2313_v4 }
 0x2ca   : > { %7566 = vmatpush3.msra.mxu1 %v2205_v36  ;;  %7805 = vmatprep.subr.mxu0 %v12862_v8 }
 0x2cb   : > { %7567 = vmatprep.subr.mxu1 %v2250_v31  ;;  %7806 = vmatpush3.msra.mxu0 %v2310_v22 }
 0x2cc   : > { %7568 = vmatpush3.msra.mxu1 %v2202_v32  ;;  %7807 = vmatprep.subr.mxu0 %v12862_v8 }
 0x2cd   : > { %7569 = vmatprep.subr.mxu1 %v2247_v20  ;;  %7808 = vmatpush3.msra.mxu0 %v2307_v50 }
 0x2ce   : > { %7570 = vmatpush3.msra.mxu1 %v2199_v6  ;;  %7809 = vmatprep.subr.mxu0 %v12862_v8 }
 0x2cf   : > { %7571 = vmatprep.subr.mxu1 %v2244_v56  ;;  %7810 = vmatpush3.msra.mxu0 %v2304_v29 }
 0x2d0   : > { %7572 = vmatpush3.msra.mxu1 %v2196_v23  ;;  %7811 = vmatprep.subr.mxu0 %v12862_v8 }
 0x2d1   : > { %7573 = vmatprep.subr.mxu1 %v2241_v24  ;;  %7812 = vmatpush3.msra.mxu0 %v2301_v51 }
 0x2d2   : > { %7574 = vmatpush3.msra.mxu1 %v2193_v35  ;;  %7813 = vmatprep.subr.mxu0 %v12862_v8 }
 0x2d3   : > { %7575 = vmatprep.subr.mxu1 %v2238_v18  ;;  %7814 = vmatpush3.msra.mxu0 %v2298_v33 }
 0x2d4   : > { %7576 = vmatpush3.msra.mxu1 %v2190_v60  ;;  %7815 = vmatprep.subr.mxu0 %v12862_v8 }
 0x2d5   : > { %7577 = vmatprep.subr.mxu1 %v2235_v48  ;;  %7816 = vmatpush3.msra.mxu0 %v2295_v54 }
 0x2d6   : > { %7578 = vmatpush3.msra.mxu1 %v2187_v59  ;;  %7817 = vmatprep.subr.mxu0 %v12862_v8  ;;  %v7191_v59 = vld [vmem:[%s12460_s4 + $0x10] sm:$0xff] }
 0x2d7   : > { %7579 = vmatprep.subr.mxu1 %v2232_v61  ;;  %7818 = vmatpush3.msra.mxu0 %v2292_v12  ;;  %v5437_v61 = vld [vmem:[%s12461_s5] sm:$0xff] }
 0x2d8   : > { %7580 = vmatpush3.msra.mxu1 %v2184_v17  ;;  %7819 = vmatprep.subr.mxu0 %v12862_v8 }
 0x2d9   : > { %7581 = vmatprep.subr.mxu1 %v2229_v52  ;;  %7820 = vmatpush3.msra.mxu0 %v2289_v38  ;;  %v7192_v52 = vld [vmem:[%s12460_s4 + $0x18] sm:$0xff]  ;;  %v5438_v38 = vld [vmem:[%s12461_s5 + $0x8] sm:$0xff] }
 0x2da   : > { %7582 = vmatpush3.msra.mxu1 %v2181_v28  ;;  %7821 = vmatprep.subr.mxu0 %v12862_v8 }
 0x2db   : > { %7583 = vmatprep.subr.mxu1 %v2226_v26  ;;  %7822 = vmatpush3.msra.mxu0 %v2286_v2  ;;  %v2885_v2 = vld [vmem:[%s12460_s4] sm:$0xff] }
 0x2dc   : > { %7584 = vmatpush3.msra.mxu1 %v2178_v27  ;;  %7823 = vmatprep.subr.mxu0 %v12862_v8 }
 0x2dd   : > { %7585 = vmatprep.subr.mxu1 %v2223_v47  ;;  %7824 = vmatpush3.msra.mxu0 %v2283_v34 }
 0x2de   : > { %7586 = vmatpush3.msra.mxu1 %v2175_v53  ;;  %7825 = vmatprep.subr.mxu0 %v12862_v8 }
 0x2df   : > { %2806 = vmatmul.mubr.f32.vlgmr.msra.gmra.mxu1 %v1978_v0  ;;  %7826 = vmatpush3.msra.mxu0 %v2280_v9  ;;  %v2383_v0 = vpop.f32.mrf.mxu0  ;;  %v2886_v9 = vld [vmem:[%s12460_s4 + $0x8] sm:$0xff] }
 0x2e0   : > { %7827 = vmatprep.subr.mxu0 %v12862_v8  ;;  %7833 = vmatprep.mubr.msk.f32.mxu0 %vm8406_vm13, %v12862_v8 }
 0x2e1   : > { %7828 = vmatpush3.msra.mxu0 %v2277_v19  ;;  %2975 = vmatprep.mubr.f32.mxu1 %v12862_v8  ;;  %v2385_v10 = vpop.f32.mrf.mxu0  ;;  %v7213_v19 = vld [vmem:[%s12460_s4 + $0x40] sm:$0xff] }
 0x2e2   : > { %7829 = vmatprep.subr.mxu0 %v12862_v8 }
 0x2e3   : > { %7830 = vmatpush3.msra.mxu0 %v2274_v49 }
 0x2e4   : > { %7831 = vmatprep.subr.mxu0 %v12862_v8 }
 0x2e5   : > { %7832 = vmatpush3.msra.mxu0 %v2271_v14 }
 0x2e6   : > { %7834 = vmatmul.mubr.f32.vlgmr.msra.gmra.mxu0 %v1980_v30 }
 0x2e7   : > { %3355 = vmatprep.mubr.f32.mxu0 %v12862_v8 }
 0x2fe   : > { %v2454_v13 = vpop.f32.mrf.mxu1 }
 0x2ff   : > { %v2455_v16 = vadd.f32 %v2454_v13, %v2383_v0  ;;  %v7201_v0 = vld [vmem:[%s12460_s4 + $0x20] sm:$0xff]  ;;  %v7214_v13 = vld [vmem:[%s12460_s4 + $0x48] sm:$0xff] }
 0x300   : > { %v2456_v11 = vpop.f32.mrf.mxu1 }
 0x301   : > { %v2457_v5 = vadd.f32 %v2456_v11, %v2385_v10 }
 0x35d   : > { %v2596_v44 = vpop.f32.mrf.mxu1 }
 0x35f   : > { %v2598_v37 = vpop.f32.mrf.mxu1 }
 0x364   : > { %v2525_v45 = vpop.f32.mrf.mxu0 }
 0x365   : > { %v2526_v62 = vadd.f32 %v2525_v45, %v2455_v16  ;;  %v7202_v16 = vld [vmem:[%s12460_s4 + $0x28] sm:$0xff] }
 0x366   : > { %v2527_v40 = vpop.f32.mrf.mxu0 }
 0x367   : > { %v2597_v43 = vadd.f32 %v2596_v44, %v2526_v62  ;;  %v2528_v57 = vadd.f32 %v2527_v40, %v2457_v5  ;;  %v7207_v5 = vld [vmem:[%s12460_s4 + $0x30] sm:$0xff] }
 0x369   : > { %2881 = vst [vmem:[#allocation2] sm:$0x3f] %v2597_v43  ;;  %v2599_v63 = vadd.f32 %v2598_v37, %v2528_v57  ;;  %v7208_v43 = vld [vmem:[%s12460_s4 + $0x38] sm:$0xff] }
 0x36b   : > { %2882 = vst [vmem:[#allocation2 + $0x8] sm:$0x3f] %v2599_v63 }
 0x370   : > { %v11140_v15 = vld [vmem:[#allocation2] sm:$0x3f] }
 0x371   : > { %v11142_v30 = vld [vmem:[#allocation2] sm:$0x3f]  ;;  %3484 = vrot.lane.b32.xlu0 %v11140_v15, %s8407_s16 }
 0x372   : > { %2894 = vrot.lane.b32.xlu1 %v11142_v30, %s12676_s14  ;;  %v11164_v46 = vld [vmem:[#allocation2 + $0x8] sm:$0x3f] }
 0x373   : > { %v11182_v7 = vld [vmem:[#allocation2 + $0x8] sm:$0x3f] }
 0x375   : > { %3690 = vrot.lane.b32.xlu0 %v11140_v15, %s8408_s0 }
 0x376   : > { %3078 = vrot.lane.b32.xlu1 %v11142_v30, %s12679_s25 }
 0x379   : > { %3896 = vrot.lane.b32.xlu0 %v11140_v15, %s12678_s19 }
 0x37a   : > { %3177 = vrot.lane.b32.xlu1 %v11142_v30, %s12687_s17 }
 0x37d   : > { %4101 = vrot.lane.b32.xlu0 %v11140_v15, %s8409_s13  ;;  %v7517_v58 = vpop.f32.mrf.mxu1 }
 0x37e   : > { %3276 = vrot.lane.b32.xlu1 %v11142_v30, %s12694_s12 }
 0x37f   : > { %v7518_v25 = vpop.f32.mrf.mxu1 }
 0x380   : > { %v7519_v1 = vadd.f32 %v7518_v25, %v7517_v58  ;;  %v7219_v58 = vld [vmem:[%s12460_s4 + $0x50] sm:$0xff] }
 0x381   : > { %4307 = vrot.lane.b32.xlu0 %v11140_v15, %s8410_s30 }
 0x382   : > { %3381 = vrot.lane.b32.xlu1 %v11140_v15, %s8411_s10 }
 0x385   : > { %2896 = vrot.lane.b32.xlu0 %v11164_v46, %s12676_s14  ;;  %v7552_v21 = vpop.f32.mrf.mxu0  ;;  %s8417_s14 = smov 73  }
 0x386   : > { %3587 = vrot.lane.b32.xlu1 %v11140_v15, %s8412_s28 }
 0x387   : > { %v7553_v39 = vpop.f32.mrf.mxu0 }
 0x388   : > { %v7554_v41 = vadd.f32 %v7553_v39, %v7552_v21  ;;  %v7225_v39 = vld [vmem:[%s12460_s4 + $0x60] sm:$0xff] }
 0x389   : > { %3080 = vrot.lane.b32.xlu0 %v11164_v46, %s12679_s25  ;;  %s8416_s25 = smov 74  }
 0x38a   : > { %3793 = vrot.lane.b32.xlu1 %v11140_v15, %s8413_s15  ;;  %v2738_v42 = vadd.f32 %v7554_v41, %v7519_v1 }
 0x38d   : > { %3179 = vrot.lane.b32.xlu0 %v11164_v46, %s12687_s17  ;;  %s8418_s17 = smov 72  }
 0x38e   : > { %3998 = vrot.lane.b32.xlu1 %v11140_v15, %s8414_s18 }
 0x391   : > { %3278 = vrot.lane.b32.xlu0 %v11164_v46, %s12694_s12  ;;  %s8419_s12 = smov 71  }
 0x392   : > { %4204 = vrot.lane.b32.xlu1 %v11140_v15, %s8415_s9 }
 0x395   : > { %3486 = vrot.lane.b32.xlu0 %v11182_v7, %s8407_s16 }
 0x396   : > { %3383 = vrot.lane.b32.xlu1 %v11182_v7, %s8411_s10 }
 0x399   : > { %3692 = vrot.lane.b32.xlu0 %v11182_v7, %s8408_s0 }
 0x39a   : > { %3589 = vrot.lane.b32.xlu1 %v11182_v7, %s8412_s28 }
 0x39d   : > { %3898 = vrot.lane.b32.xlu0 %v11182_v7, %s12678_s19 }
 0x39e   : > { %3795 = vrot.lane.b32.xlu1 %v11182_v7, %s8413_s15 }
 0x39f   : > { %v7587_v55 = vpop.f32.mrf.mxu1 }
 0x3a1   : > { %v7588_v3 = vpop.f32.mrf.mxu1  ;;  %4103 = vrot.lane.b32.xlu0 %v11182_v7, %s8409_s13 }
 0x3a2   : > { %4000 = vrot.lane.b32.xlu1 %v11182_v7, %s8414_s18  ;;  %v7589_v4 = vadd.f32 %v7588_v3, %v7587_v55  ;;  %v7220_v3 = vld [vmem:[%s12460_s4 + $0x58] sm:$0xff] }
 0x3a4   : > { %v2808_v36 = vadd.f32 %v7589_v4, %v2738_v42  ;;  %v7226_v42 = vld [vmem:[%s12460_s4 + $0x68] sm:$0xff] }
 0x3a5   : > { %4309 = vrot.lane.b32.xlu0 %v11182_v7, %s8410_s30 }
 0x3a6   : > { %4206 = vrot.lane.b32.xlu1 %v11182_v7, %s8415_s9  ;;  %v2877_v31 = vpop.f32.mrf.mxu0 }
 0x3a7   : > { %v2878_v22 = vadd.f32 %v2877_v31, %v2808_v36 }
 0x3a8   : > { %v7835_v32 = vpop.f32.mrf.mxu0 }
 0x3a9   : > { %2884 = vst.msk [vmem:[#allocation2 + $0x10] sm:$0x3f] %vm2883_vm14, %v2878_v22  ;;  %v7231_v32 = vld [vmem:[%s12460_s4 + $0x70] sm:$0xff]  ;;  %vm4622_vm14 = vcmask 588800  }
 0x3aa   : > { %4412 = vrot.lane.b32.xlu1 %v11182_v7, %s8416_s25 }
 0x3b0   : > { %v11205_v20 = vld [vmem:[#allocation2 + $0x10] sm:$0x3f] }
 0x3b1   : > { %3488 = vrot.lane.b32.xlu1 %v11205_v20, %s8407_s16  ;;  %3385 = vrot.lane.b32.xlu0 %v11205_v20, %s8411_s10 }
 0x3b5   : > { %4410 = vrot.lane.b32.xlu1 %v11140_v15, %s8416_s25  ;;  %4515 = vrot.lane.b32.xlu0 %v11182_v7, %s8417_s14 }
 0x3b9   : > { %3694 = vrot.lane.b32.xlu1 %v11205_v20, %s8408_s0  ;;  %3591 = vrot.lane.b32.xlu0 %v11205_v20, %s8412_s28 }
 0x3bd   : > { %4618 = vrot.lane.b32.xlu1 %v11182_v7, %s8418_s17  ;;  %4513 = vrot.lane.b32.xlu0 %v11140_v15, %s8417_s14 }
 0x3c1   : > { %3900 = vrot.lane.b32.xlu1 %v11205_v20, %s12678_s19  ;;  %3797 = vrot.lane.b32.xlu0 %v11205_v20, %s8413_s15  ;;  %s8421_s19 = smov 56   ;;  %s12867_s15 = sld [smem:[#allocation70_spill]] }
 0x3c5   : > { %4616 = vrot.lane.b32.xlu1 %v11140_v15, %s8418_s17  ;;  %4721 = vrot.lane.b32.xlu0 %v11182_v7, %s8419_s12 }
 0x3c9   : > { %4105 = vrot.lane.b32.xlu1 %v11205_v20, %s8409_s13  ;;  %4002 = vrot.lane.b32.xlu0 %v11205_v20, %s8414_s18  ;;  %s12872_s13 = sld [smem:[#allocation74_spill]] }
 0x3cd   : > { %4824 = vrot.lane.b32.xlu1 %v11182_v7, %s8420_s1  ;;  %4719 = vrot.lane.b32.xlu0 %v11140_v15, %s8419_s12 }
 0x3d1   : > { %4311 = vrot.lane.b32.xlu1 %v11205_v20, %s8410_s30  ;;  %4208 = vrot.lane.b32.xlu0 %v11205_v20, %s8415_s9  ;;  %s12873_s9 = sld [smem:[#allocation75_spill]] }
 0x3d5   : > { %4822 = vrot.lane.b32.xlu1 %v11140_v15, %s8420_s1  ;;  %4927 = vrot.lane.b32.xlu0 %v11182_v7, %s8421_s19 }
 0x3d9   : > { %4517 = vrot.lane.b32.xlu1 %v11205_v20, %s8417_s14  ;;  %4414 = vrot.lane.b32.xlu0 %v11205_v20, %s8416_s25 }
 0x3dd   : > { %5030 = vrot.lane.b32.xlu1 %v11182_v7, %s8422_s27  ;;  %4925 = vrot.lane.b32.xlu0 %v11140_v15, %s8421_s19 }
 0x3e1   : > { %4723 = vrot.lane.b32.xlu1 %v11205_v20, %s8419_s12  ;;  %4620 = vrot.lane.b32.xlu0 %v11205_v20, %s8418_s17  ;;  %s8426_s12 = smov [#allocation3]  }
 0x3e3   : > { %v11243_v50 = vpop.permute.xlu0 %3484 }
 0x3e4   : > { %v2895_v6 = vpop.permute.xlu1 %2894 }
 0x3e5   : > { %5028 = vrot.lane.b32.xlu1 %v11140_v15, %s8422_s27  ;;  %5133 = vrot.lane.b32.xlu0 %v11182_v7, %s8423_s24 }
 0x3e7   : > { %v11247_v56 = vpop.permute.xlu0 %3690 }
 0x3e8   : > { %v3079_v29 = vpop.permute.xlu1 %3078 }
 0x3e9   : > { %4929 = vrot.lane.b32.xlu1 %v11205_v20, %s8421_s19  ;;  %4826 = vrot.lane.b32.xlu0 %v11205_v20, %s8420_s1  ;;  %s12863_s1 = sld [smem:[#allocation68_spill]] }
 0x3ea   : > { %s12865_s19 = sld [smem:[#allocation71_spill]] }
 0x3eb   : > { %v11251_v23 = vpop.permute.xlu0 %3896 }
 0x3ec   : > { %v3178_v24 = vpop.permute.xlu1 %3177 }
 0x3ed   : > { %5236 = vrot.lane.b32.xlu1 %v11182_v7, %s8424_s11  ;;  %5131 = vrot.lane.b32.xlu0 %v11140_v15, %s8423_s24 }
 0x3ef   : > { %v11255_v51 = vpop.permute.xlu0 %4101 }
 0x3f0   : > { %v3277_v35 = vpop.permute.xlu1 %3276 }
 0x3f1   : > { %5135 = vrot.lane.b32.xlu1 %v11205_v20, %s8423_s24  ;;  %5032 = vrot.lane.b32.xlu0 %v11205_v20, %s8422_s27  ;;  %s12868_s27 = sld [smem:[#allocation7_spill]] }
 0x3f2   : > { %s12869_s24 = sld [smem:[#allocation10_spill]] }
 0x3f3   : > { %v11259_v18 = vpop.permute.xlu0 %4307 }
 0x3f4   : > { %v11261_v33 = vpop.permute.xlu1 %3381 }
 0x3f5   : > { %5234 = vrot.lane.b32.xlu1 %v11140_v15, %s8424_s11  ;;  %5339 = vrot.lane.b32.xlu0 %v11182_v7, %s8425_s29 }
 0x3f7   : > { %v2897_v48 = vpop.permute.xlu0 %2896  ;;  %s429_s2 = sand.u32 1, %s12868_s27   ;;  %s8303_s27 = sshll.u32 %s8426_s12, 4  ;;  %s8304_s27 = int_to_ptr.vmem [resolvable:$false] %s8303_s27 }
 0x3f8   : > { %v11265_v60 = vpop.permute.xlu1 %3587  ;;  %v2898_v54 = vsel %vm570_vm0, %v2895_v6, %v2897_v48  ;;  %7193 = vmatprep.subr.msk.mxu1 %vm2906_vm15, %v2897_v48  ;;  %vm3387_vm0 = vcmask 900096   ;;  %s7482_s30 = sshll.u32 %s12869_s24, 4  ;;  %s430_s10 = scalar_lea.vmem [#allocation3], %s429_s2 }
 0x3f9   : > { %5341 = vrot.lane.b32.xlu1 %v11205_v20, %s8425_s29  ;;  %5238 = vrot.lane.b32.xlu0 %v11205_v20, %s8424_s11  ;;  %v7237_v20 = vld [vmem:[%s12460_s4 + $0x80] sm:$0xff]  ;;  %s7132_s28 = sshll.u32 %s430_s10, 4  ;;  %s12421_s25 = scalar_lea.hbm %s12873_s9, %s7482_s30  ;;  %s7133_s28 = int_to_ptr.vmem [resolvable:$true] %s7132_s28 }
 0x3fa   : > { %7194 = vmatpush1.msk.msra.mxu1 %vm2906_vm15, %v2898_v54  ;;  %s7120_s14 = scalar_lea.sflag [#allocation4], %s429_s2  ;;  %s8299_s17 = scalar_lea.vmem %s7133_s28, 16 }
 0x3fb   : > { %7195 = vmatmul.mubr.msk.f32.vlgmr.msra.gmra.mxu1 %vm2899_vm11, %v7191_v59  ;;  %7197 = vmatprep.subr.msk.mxu1 %vm2906_vm15, %v11164_v46  ;;  %v3081_v17 = vpop.permute.xlu0 %3080  ;;  %v7243_v59 = vld [vmem:[%s12460_s4 + $0x90] sm:$0xff]  ;;  %p8300_p11 = scmp.ne.s32.totalorder %s7133_s28, %s8299_s17  ;;  %s8305_s24 = scalar_lea.vmem %s8304_s27, 32 }
 0x3fc   : > { %v11281_v12 = vpop.permute.xlu1 %3793  ;;  %7198 = vmatpush1.msk.msra.mxu1 %vm2906_vm15, %v11142_v30  ;;  %2981 = vmatprep.mubr.f32.mxu1 %v12862_v8  ;;  %v3082_v27 = vsel %vm628_vm1, %v3079_v29, %v3081_v17  ;;  %vm3490_vm1 = vcmask 891904   ;;  %p8306_p0 = scmp.lt.s32.totalorder %s7133_s28, %s8304_s27  ;;  %p8307_p1 = scmp.lt.s32.totalorder %s8305_s24, %s8299_s17 }
 0x3fd   : > { %5441 = vperm.xlu1 %8296, %v5437_v61   ;;  %5337 = vrot.lane.b32.xlu0 %v11140_v15, %s8425_s29  ;;  %v7249_v61 = vld [vmem:[%s12460_s4 + $0xa0] sm:$0xff]  ;;  %p8301_p12 = pnand %p8300_p11, %p8535_p5 }
 0x3fe   : > { %7203 = vmatprep.subr.msk.mxu1 %vm2906_vm15, %v3081_v17  ;;  %p8308_p2 = por %p8307_p1, %p8306_p0 }
 0x3ff   : > { %7196 = vmatmul.mubr.msk.f32.gmra.mxu1 %vm2899_vm11, %v7192_v52  ;;  %v3180_v26 = vpop.permute.xlu0 %3179  ;;  %p8302_p13 = pneg %p8301_p12 }
 0x400   : > { %v11295_v28 = vpop.permute.xlu1 %3998  ;;  %3062 = vmatprep.mubr.f32.mxu1 %v12862_v8  ;;  %v3181_v10 = vsel %vm686_vm2, %v3178_v24, %v3180_v26  ;;  %vm3593_vm2 = vcmask 883712  }
 0x401   : > { %5446 = vperm.xlu0 %8295, %v5438_v38   ;;  %p8309_p3 = pnand %p8308_p2, %p8302_p13 }
 0x403   : > { %7199 = vmatmul.mubr.msk.f32.vlgmr.msra.gmra.mxu1 %vm2899_vm11, %v2885_v2  ;;  %v3279_v34 = vpop.permute.xlu0 %3278 }
 0x404   : > { %v11303_v47 = vpop.permute.xlu1 %4204  ;;  %7204 = vmatpush1.msk.msra.mxu1 %vm2906_vm15, %v3082_v27  ;;  %v3280_v53 = vsel %vm744_vm3, %v3277_v35, %v3279_v34  ;;  %7215 = vmatprep.subr.msk.mxu0 %vm2906_vm15, %v3279_v34  ;;  %v7238_v35 = vld [vmem:[%s12460_s4 + $0x88] sm:$0xff] }
 0x405   : > { %7209 = vmatprep.subr.msk.mxu1 %vm2906_vm15, %v3180_v26  ;;  %3068 = vmatprep.mubr.f32.mxu1 %v12862_v8 }
 0x406   : > { %7216 = vmatpush1.msk.msra.mxu0 %vm2906_vm15, %v3280_v53 }
 0x407   : > { %7200 = vmatmul.mubr.msk.f32.gmra.mxu1 %vm2899_vm11, %v2886_v9  ;;  %v3487_v14 = vpop.permute.xlu0 %3486  ;;  %7217 = vmatmul.mubr.msk.f32.vlgmr.msra.gmra.mxu0 %vm2899_vm11, %v7213_v19  ;;  %v7255_v9 = vld [vmem:[%s12460_s4 + $0xb0] sm:$0xff]  ;;  %v7261_v19 = vld [vmem:[%s12460_s4 + $0xc0] sm:$0xff] }
 0x408   : > { %v3384_v49 = vpop.permute.xlu1 %3383  ;;  %3157 = vmatprep.mubr.f32.mxu1 %v12862_v8  ;;  %3361 = vmatprep.mubr.f32.mxu0 %v12862_v8  ;;  %v3491_v41 = vsel %vm3490_vm1, %v11243_v50, %v3487_v14 }
 0x409   : > { %v3388_v25 = vsel %vm3387_vm0, %v11261_v33, %v3384_v49 }
 0x40b   : > { %7205 = vmatmul.mubr.msk.f32.vlgmr.msra.gmra.mxu1 %vm2899_vm11, %v7201_v0  ;;  %7218 = vmatmul.mubr.msk.f32.gmra.mxu0 %vm2899_vm11, %v7214_v13  ;;  %v3693_v44 = vpop.permute.xlu0 %3692 }
 0x40c   : > { %v3590_v11 = vpop.permute.xlu1 %3589  ;;  %7210 = vmatpush1.msk.msra.mxu1 %vm2906_vm15, %v3181_v10  ;;  %3163 = vmatprep.mubr.f32.mxu1 %v12862_v8  ;;  %v3697_v6 = vsel %vm3696_vm4, %v11247_v56, %v3693_v44  ;;  %v7232_v56 = vld [vmem:[%s12460_s4 + $0x78] sm:$0xff] }
 0x40d   : > { %3567 = vmatprep.mubr.f32.mxu0 %v12862_v8  ;;  %v3594_v50 = vsel %vm3593_vm2, %v11265_v60, %v3590_v11 }
 0x40f   : > { %7206 = vmatmul.mubr.msk.f32.gmra.mxu1 %vm2899_vm11, %v7202_v16  ;;  %v11343_v62 = vpop.permute.xlu0 %3898 }
 0x410   : > { %v11337_v45 = vpop.permute.xlu1 %3795  ;;  %3256 = vmatprep.mubr.f32.mxu1 %v12862_v8  ;;  %v3902_v52 = vsel %vm1034_vm8, %v11251_v23, %v11343_v62  ;;  %v7244_v23 = vld [vmem:[%s12460_s4 + $0x98] sm:$0xff] }
 0x411   : > { %v3800_v17 = vsel %vm3799_vm5, %v11281_v12, %v11337_v45  ;;  %v7250_v12 = vld [vmem:[%s12460_s4 + $0xa8] sm:$0xff] }
 0x413   : > { %7211 = vmatmul.mubr.msk.f32.vlgmr.msra.gmra.mxu1 %vm2899_vm11, %v7207_v5  ;;  %v11356_v37 = vpop.permute.xlu0 %4103  ;;  %v7273_v5 = vld [vmem:[%s12460_s4 + $0xe0] sm:$0xff] }
 0x414   : > { %v11346_v40 = vpop.permute.xlu1 %4000  ;;  %3262 = vmatprep.mubr.f32.mxu1 %v12862_v8 }
 0x417   : > { %7212 = vmatmul.mubr.msk.f32.gmra.mxu1 %vm2899_vm11, %v7208_v43  ;;  %v11360_v15 = vpop.permute.xlu0 %4309 }
 0x418   : > { %v11353_v57 = vpop.permute.xlu1 %4206  ;;  %3464 = vmatprep.mubr.f32.mxu1 %v12862_v8 }
 0x41c   : > { %v11358_v63 = vpop.permute.xlu1 %4412 }
 0x423   : > { %v3489_v30 = vpop.permute.xlu1 %3488  ;;  %v3386_v46 = vpop.permute.xlu0 %3385 }
 0x424   : > { %v3492_v7 = vsel %vm3490_vm1, %v3487_v14, %v3489_v30  ;;  %v3389_v21 = vsel %vm3387_vm0, %v3384_v49, %v3386_v46  ;;  %v4108_v14 = vsel %vm4107_vm6, %v11255_v51, %v11356_v37  ;;  %v7256_v51 = vld [vmem:[%s12460_s4 + $0xb8] sm:$0xff]  ;;  %vm4725_vm0 = vcmask 580608  }
 0x425   : > { %7221 = vmatprep.subr.msk.mxu1 %vm2906_vm15, %v3389_v21  ;;  %7227 = vmatprep.subr.msk.mxu0 %vm2906_vm15, %v3492_v7  ;;  %v7279_v7 = vld [vmem:[%s12460_s4 + $0xf0] sm:$0xff]  ;;  %v7285_v21 = vld [vmem:[%s12460_s4 + $0x100] sm:$0xff]  ;;  %vm4828_vm1 = vcmask 572416  }
 0x426   : > { %7222 = vmatpush1.msk.msra.mxu1 %vm2906_vm15, %v3388_v25  ;;  %7228 = vmatpush1.msk.msra.mxu0 %vm2906_vm15, %v3491_v41 }
 0x427   : > { %v11374_v55 = vpop.permute.xlu1 %4410  ;;  %7223 = vmatmul.mubr.msk.f32.vlgmr.msra.gmra.mxu1 %vm2899_vm11, %v7219_v58  ;;  %v11377_v1 = vpop.permute.xlu0 %4515  ;;  %7229 = vmatmul.mubr.msk.f32.vlgmr.msra.gmra.mxu0 %vm2899_vm11, %v7225_v39 }
 0x428   : > { %3470 = vmatprep.mubr.f32.mxu1 %v12862_v8  ;;  %3573 = vmatprep.mubr.f32.mxu0 %v12862_v8  ;;  %v4417_v58 = vsel %vm4416_vm10, %v11374_v55, %v11358_v63  ;;  %v7286_v55 = vld [vmem:[%s12460_s4 + $0x108] sm:$0xff] }
 0x42b   : > { %v3695_v4 = vpop.permute.xlu1 %3694  ;;  %7224 = vmatmul.mubr.msk.f32.gmra.mxu1 %vm2899_vm11, %v7220_v3  ;;  %v3592_v36 = vpop.permute.xlu0 %3591  ;;  %7230 = vmatmul.mubr.msk.f32.gmra.mxu0 %vm2899_vm11, %v7226_v42 }
 0x42c   : > { %v3698_v31 = vsel %vm3696_vm4, %v3693_v44, %v3695_v4  ;;  %v3595_v22 = vsel %vm3593_vm2, %v3590_v11, %v3592_v36  ;;  %3670 = vmatprep.mubr.f32.mxu1 %v12862_v8  ;;  %3773 = vmatprep.mubr.f32.mxu0 %v12862_v8  ;;  %v7291_v36 = vld [vmem:[%s12460_s4 + $0x110] sm:$0xff]  ;;  %vm4931_vm2 = vcmask 457728   ;;  %vm5034_vm4 = vcmask 449536  }
 0x42d   : > { %7233 = vmatprep.subr.msk.mxu1 %vm2906_vm15, %v3595_v22  ;;  %7239 = vmatprep.subr.msk.mxu0 %vm2906_vm15, %v3698_v31  ;;  %v7297_v31 = vld [vmem:[%s12460_s4 + $0x120] sm:$0xff] }
 0x42e   : > { %7234 = vmatpush1.msk.msra.mxu1 %vm2906_vm15, %v3594_v50  ;;  %7240 = vmatpush1.msk.msra.mxu0 %vm2906_vm15, %v3697_v6  ;;  %v7292_v6 = vld [vmem:[%s12460_s4 + $0x118] sm:$0xff] }
 0x42f   : > { %v11404_v29 = vpop.permute.xlu1 %4618  ;;  %7235 = vmatmul.mubr.msk.f32.vlgmr.msra.gmra.mxu1 %vm2899_vm11, %v7231_v32  ;;  %v11407_v24 = vpop.permute.xlu0 %4513  ;;  %7241 = vmatmul.mubr.msk.f32.vlgmr.msra.gmra.mxu0 %vm2899_vm11, %v7237_v20 }
 0x430   : > { %3676 = vmatprep.mubr.f32.mxu1 %v12862_v8  ;;  %3779 = vmatprep.mubr.f32.mxu0 %v12862_v8  ;;  %v4520_v39 = vsel %vm4519_vm12, %v11407_v24, %v11377_v1 }
 0x433   : > { %v3901_v33 = vpop.permute.xlu1 %3900  ;;  %7236 = vmatmul.mubr.msk.f32.gmra.mxu1 %vm2899_vm11, %v7232_v56  ;;  %v3798_v60 = vpop.permute.xlu0 %3797  ;;  %7242 = vmatmul.mubr.msk.f32.gmra.mxu0 %vm2899_vm11, %v7238_v35 }
 0x434   : > { %v3903_v48 = vsel %vm1034_vm8, %v11343_v62, %v3901_v33  ;;  %v3801_v54 = vsel %vm3799_vm5, %v11337_v45, %v3798_v60  ;;  %3876 = vmatprep.mubr.f32.mxu1 %v12862_v8  ;;  %3978 = vmatprep.mubr.f32.mxu0 %v12862_v8  ;;  %vm4004_vm8 = vcmask 744448   ;;  %v7267_v45 = vld [vmem:[%s12460_s4 + $0xd0] sm:$0xff]  ;;  %v4211_v62 = vsel %vm4210_vm7, %v11303_v47, %v11353_v57  ;;  %v7274_v47 = vld [vmem:[%s12460_s4 + $0xe8] sm:$0xff] }
 0x435   : > { %7245 = vmatprep.subr.msk.mxu1 %vm2906_vm15, %v3801_v54  ;;  %7251 = vmatprep.subr.msk.mxu0 %vm2906_vm15, %v3903_v48  ;;  %v4005_v49 = vsel %vm4004_vm8, %v11295_v28, %v11346_v40  ;;  %v7262_v28 = vld [vmem:[%s12460_s4 + $0xc8] sm:$0xff]  ;;  %v7303_v60 = vld [vmem:[%s12460_s4 + $0x130] sm:$0xff]  ;;  %v7309_v48 = vld [vmem:[%s12460_s4 + $0x140] sm:$0xff]  ;;  %vm5137_vm5 = vcmask 441344  }
 0x436   : > { %7246 = vmatpush1.msk.msra.mxu1 %vm2906_vm15, %v3800_v17  ;;  %7252 = vmatpush1.msk.msra.mxu0 %vm2906_vm15, %v3902_v52  ;;  %v7304_v52 = vld [vmem:[%s12460_s4 + $0x138] sm:$0xff] }
 0x437   : > { %v11440_v38 = vpop.permute.xlu1 %4616  ;;  %7247 = vmatmul.mubr.msk.f32.vlgmr.msra.gmra.mxu1 %vm2899_vm11, %v7243_v59  ;;  %v11443_v26 = vpop.permute.xlu0 %4721  ;;  %7253 = vmatmul.mubr.msk.f32.vlgmr.msra.gmra.mxu0 %vm2899_vm11, %v7249_v61 }
 0x438   : > { %3882 = vmatprep.mubr.f32.mxu1 %v12862_v8  ;;  %3984 = vmatprep.mubr.f32.mxu0 %v12862_v8  ;;  %v4623_v22 = vsel %vm4622_vm14, %v11440_v38, %v11404_v29  ;;  %v7310_v38 = vld [vmem:[%s12460_s4 + $0x148] sm:$0xff] }
 0x43b   : > { %v4106_v2 = vpop.permute.xlu1 %4105  ;;  %7248 = vmatmul.mubr.msk.f32.gmra.mxu1 %vm2899_vm11, %v7244_v23  ;;  %v4003_v27 = vpop.permute.xlu0 %4002  ;;  %7254 = vmatmul.mubr.msk.f32.gmra.mxu0 %vm2899_vm11, %v7250_v12 }
 0x43c   : > { %v4109_v34 = vsel %vm4107_vm6, %v11356_v37, %v4106_v2  ;;  %v4006_v53 = vsel %vm4004_vm8, %v11346_v40, %v4003_v27  ;;  %4081 = vmatprep.mubr.f32.mxu1 %v12862_v8  ;;  %4184 = vmatprep.mubr.f32.mxu0 %v12862_v8  ;;  %v4314_v40 = vsel %vm4313_vm9, %v11259_v18, %v11360_v15  ;;  %v7268_v18 = vld [vmem:[%s12460_s4 + $0xd8] sm:$0xff]  ;;  %v7315_v27 = vld [vmem:[%s12460_s4 + $0x150] sm:$0xff]  ;;  %vm5343_vm8 = vcmask 424960  }
 0x43d   : > { %7257 = vmatprep.subr.msk.mxu1 %vm2906_vm15, %v4006_v53  ;;  %7263 = vmatprep.subr.msk.mxu0 %vm2906_vm15, %v4109_v34  ;;  %v7321_v34 = vld [vmem:[%s12460_s4 + $0x160] sm:$0xff]  ;;  %vm5240_vm6 = vcmask 433152  }
 0x43e   : > { %7258 = vmatpush1.msk.msra.mxu1 %vm2906_vm15, %v4005_v49  ;;  %7264 = vmatpush1.msk.msra.mxu0 %vm2906_vm15, %v4108_v14  ;;  %v7316_v14 = vld [vmem:[%s12460_s4 + $0x158] sm:$0xff] }
 0x43f   : > { %v11474_v0 = vpop.permute.xlu1 %4824  ;;  %7259 = vmatmul.mubr.msk.f32.vlgmr.msra.gmra.mxu1 %vm2899_vm11, %v7255_v9  ;;  %v11477_v13 = vpop.permute.xlu0 %4719  ;;  %7265 = vmatmul.mubr.msk.f32.vlgmr.msra.gmra.mxu0 %vm2899_vm11, %v7261_v19 }
 0x440   : > { %4087 = vmatprep.mubr.f32.mxu1 %v12862_v8  ;;  %4190 = vmatprep.mubr.f32.mxu0 %v12862_v8  ;;  %v4726_v32 = vsel %vm4725_vm0, %v11477_v13, %v11443_v26 }
 0x443   : > { %v4312_v10 = vpop.permute.xlu1 %4311  ;;  %7260 = vmatmul.mubr.msk.f32.gmra.mxu1 %vm2899_vm11, %v7256_v51  ;;  %v4209_v11 = vpop.permute.xlu0 %4208  ;;  %7266 = vmatmul.mubr.msk.f32.gmra.mxu0 %vm2899_vm11, %v7262_v28 }
 0x444   : > { %v4315_v16 = vsel %vm4313_vm9, %v11360_v15, %v4312_v10  ;;  %v4212_v44 = vsel %vm4210_vm7, %v11353_v57, %v4209_v11  ;;  %4287 = vmatprep.mubr.f32.mxu1 %v12862_v8  ;;  %4390 = vmatprep.mubr.f32.mxu0 %v12862_v8  ;;  %v7327_v11 = vld [vmem:[%s12460_s4 + $0x170] sm:$0xff]  ;;  %vm7040_vm7 = vcmask 687104   ;;  %vm7117_vm9 = vcmask 73728  }
 0x445   : > { %7269 = vmatprep.subr.msk.mxu1 %vm2906_vm15, %v4212_v44  ;;  %7275 = vmatprep.subr.msk.mxu0 %vm2906_vm15, %v4315_v16 }
 0x446   : > { %7270 = vmatpush1.msk.msra.mxu1 %vm2906_vm15, %v4211_v62  ;;  %7276 = vmatpush1.msk.msra.mxu0 %vm2906_vm15, %v4314_v40  ;;  %v7328_v62 = vld [vmem:[%s12460_s4 + $0x178] sm:$0xff]  ;;  %v7334_v40 = vld [vmem:[%s12460_s4 + $0x188] sm:$0xff] }
 0x447   : > { %v11508_v43 = vpop.permute.xlu1 %4822  ;;  %7271 = vmatmul.mubr.msk.f32.vlgmr.msra.gmra.mxu1 %vm2899_vm11, %v7267_v45  ;;  %v11511_v37 = vpop.permute.xlu0 %4927  ;;  %7277 = vmatmul.mubr.msk.f32.vlgmr.msra.gmra.mxu0 %vm2899_vm11, %v7273_v5  ;;  %v7333_v45 = vld [vmem:[%s12460_s4 + $0x180] sm:$0xff] }
 0x448   : > { %4293 = vmatprep.mubr.f32.mxu1 %v12862_v8  ;;  %4396 = vmatprep.mubr.f32.mxu0 %v12862_v8  ;;  %v4829_v54 = vsel %vm4828_vm1, %v11508_v43, %v11474_v0  ;;  %v5488_v43 = vld [vmem:[%s12863_s1 + $0xf8] sm:$0xf] }
 0x44b   : > { %v4518_v57 = vpop.permute.xlu1 %4517  ;;  %7272 = vmatmul.mubr.msk.f32.gmra.mxu1 %vm2899_vm11, %v7268_v18  ;;  %v4415_v15 = vpop.permute.xlu0 %4414  ;;  %7278 = vmatmul.mubr.msk.f32.gmra.mxu0 %vm2899_vm11, %v7274_v47  ;;  %v5487_v18 = vld [vmem:[%s12863_s1 + $0xf0] sm:$0xff] }
 0x44c   : > { %v4521_v30 = vsel %vm4519_vm12, %v11377_v1, %v4518_v57  ;;  %v4418_v46 = vsel %vm4416_vm10, %v11358_v63, %v4415_v15  ;;  %4493 = vmatprep.mubr.f32.mxu1 %v12862_v8  ;;  %4596 = vmatprep.mubr.f32.mxu0 %v12862_v8  ;;  %v7280_v63 = vld [vmem:[%s12460_s4 + $0xf8] sm:$0xff]  ;;  %v5471_v47 = vld [vmem:[%s12863_s1 + $0x70] sm:$0xff]  ;;  %v5486_v57 = vld [vmem:[%s12863_s1 + $0xe8] sm:$0xff] }
 0x44d   : > { %7281 = vmatprep.subr.msk.mxu1 %vm2906_vm15, %v4418_v46  ;;  %7287 = vmatprep.subr.msk.mxu0 %vm2906_vm15, %v4521_v30  ;;  %v5470_v15 = vld [vmem:[%s12863_s1 + $0x68] sm:$0xff]  ;;  %v5485_v30 = vld [vmem:[%s12863_s1 + $0xe0] sm:$0xff] }
 0x44e   : > { %7282 = vmatpush1.msk.msra.mxu1 %vm2906_vm15, %v4417_v58  ;;  %7288 = vmatpush1.msk.msra.mxu0 %vm2906_vm15, %v4520_v39  ;;  %v5469_v46 = vld [vmem:[%s12863_s1 + $0x60] sm:$0xff]  ;;  %v5483_v58 = vld [vmem:[%s12863_s1 + $0xd0] sm:$0xff] }
 0x44f   : > { %v11542_v25 = vpop.permute.xlu1 %5030  ;;  %7283 = vmatmul.mubr.msk.f32.vlgmr.msra.gmra.mxu1 %vm2899_vm11, %v7279_v7  ;;  %v4926_v41 = vpop.permute.xlu0 %4925  ;;  %7289 = vmatmul.mubr.msk.f32.vlgmr.msra.gmra.mxu0 %vm2899_vm11, %v7285_v21  ;;  %v5484_v7 = vld [vmem:[%s12863_s1 + $0xd8] sm:$0xff]  ;;  %v5467_v39 = vld [vmem:[%s12863_s1 + $0x50] sm:$0xff] }
 0x450   : > { %4499 = vmatprep.mubr.f32.mxu1 %v12862_v8  ;;  %4602 = vmatprep.mubr.f32.mxu0 %v12862_v8  ;;  %v4932_v59 = vsel %vm4931_vm2, %v4926_v41, %v11511_v37  ;;  %v5468_v21 = vld [vmem:[%s12863_s1 + $0x58] sm:$0xff]  ;;  %v5466_v41 = vld [vmem:[%s12863_s1 + $0x48] sm:$0xff] }
 0x453   : > { %v4724_v1 = vpop.permute.xlu1 %4723  ;;  %7284 = vmatmul.mubr.msk.f32.gmra.mxu1 %vm2899_vm11, %v7280_v63  ;;  %v4621_v3 = vpop.permute.xlu0 %4620  ;;  %7290 = vmatmul.mubr.msk.f32.gmra.mxu0 %vm2899_vm11, %v7286_v55  ;;  %v5481_v63 = vld [vmem:[%s12863_s1 + $0xc0] sm:$0xff] }
 0x454   : > { %v4727_v42 = vsel %vm4725_vm0, %v11443_v26, %v4724_v1  ;;  %v4624_v4 = vsel %vm4622_vm14, %v11404_v29, %v4621_v3  ;;  %4699 = vmatprep.mubr.f32.mxu1 %v12862_v8  ;;  %4802 = vmatprep.mubr.f32.mxu0 %v12862_v8  ;;  %v7298_v29 = vld [vmem:[%s12460_s4 + $0x128] sm:$0xff]  ;;  %v5465_v55 = vld [vmem:[%s12863_s1 + $0x40] sm:$0xff]  ;;  %v5480_v1 = vld [vmem:[%s12863_s1 + $0xb8] sm:$0xff] }
 0x455   : > { %7293 = vmatprep.subr.msk.mxu1 %vm2906_vm15, %v4624_v4  ;;  %7299 = vmatprep.subr.msk.mxu0 %vm2906_vm15, %v4727_v42  ;;  %v5464_v3 = vld [vmem:[%s12863_s1 + $0x38] sm:$0xff]  ;;  %v5479_v42 = vld [vmem:[%s12863_s1 + $0xb0] sm:$0xff] }
 0x456   : > { %7294 = vmatpush1.msk.msra.mxu1 %vm2906_vm15, %v4623_v22  ;;  %7300 = vmatpush1.msk.msra.mxu0 %vm2906_vm15, %v4726_v32  ;;  %v5463_v4 = vld [vmem:[%s12863_s1 + $0x30] sm:$0xff]  ;;  %v5477_v22 = vld [vmem:[%s12863_s1 + $0xa0] sm:$0xff] }
 0x457   : > { %v5029_v20 = vpop.permute.xlu1 %5028  ;;  %7295 = vmatmul.mubr.msk.f32.vlgmr.msra.gmra.mxu1 %vm2899_vm11, %v7291_v36  ;;  %v5134_v50 = vpop.permute.xlu0 %5133  ;;  %7301 = vmatmul.mubr.msk.f32.vlgmr.msra.gmra.mxu0 %vm2899_vm11, %v7297_v31  ;;  %v5478_v36 = vld [vmem:[%s12863_s1 + $0xa8] sm:$0xff]  ;;  %v5461_v32 = vld [vmem:[%s12863_s1 + $0x20] sm:$0xff] }
 0x458   : > { %4705 = vmatprep.mubr.f32.mxu1 %v12862_v8  ;;  %4808 = vmatprep.mubr.f32.mxu0 %v12862_v8  ;;  %v5035_v53 = vsel %vm5034_vm4, %v5029_v20, %v11542_v25  ;;  %v5462_v31 = vld [vmem:[%s12863_s1 + $0x28] sm:$0xff]  ;;  %v5476_v20 = vld [vmem:[%s12863_s1 + $0x98] sm:$0xff] }
 0x45b   : > { %v4930_v24 = vpop.permute.xlu1 %4929  ;;  %7296 = vmatmul.mubr.msk.f32.gmra.mxu1 %vm2899_vm11, %v7292_v6  ;;  %v4827_v56 = vpop.permute.xlu0 %4826  ;;  %7302 = vmatmul.mubr.msk.f32.gmra.mxu0 %vm2899_vm11, %v7298_v29  ;;  %v5475_v6 = vld [vmem:[%s12863_s1 + $0x90] sm:$0xff] }
 0x45c   : > { %v4933_v35 = vsel %vm4931_vm2, %v11511_v37, %v4930_v24  ;;  %v4830_v33 = vsel %vm4828_vm1, %v11474_v0, %v4827_v56  ;;  %4905 = vmatprep.mubr.f32.mxu1 %v12862_v8  ;;  %5008 = vmatprep.mubr.f32.mxu0 %v12862_v8  ;;  %v7322_v0 = vld [vmem:[%s12460_s4 + $0x168] sm:$0xff]  ;;  %v5472_v37 = vld [vmem:[%s12863_s1 + $0x78] sm:$0xff]  ;;  %v5459_v29 = vld [vmem:[%s12863_s1 + $0x10] sm:$0xff] }
 0x45d   : > { %7305 = vmatprep.subr.msk.mxu1 %vm2906_vm15, %v4830_v33  ;;  %7311 = vmatprep.subr.msk.mxu0 %vm2906_vm15, %v4933_v35  ;;  %v5474_v24 = vld [vmem:[%s12863_s1 + $0x88] sm:$0xff]  ;;  %v5473_v35 = vld [vmem:[%s12863_s1 + $0x80] sm:$0xff] }
 0x45e   : > { %7306 = vmatpush1.msk.msra.mxu1 %vm2906_vm15, %v4829_v54  ;;  %7312 = vmatpush1.msk.msra.mxu0 %vm2906_vm15, %v4932_v59  ;;  %v5458_v56 = vld [vmem:[%s12863_s1 + $0x8] sm:$0xff]  ;;  %v5457_v33 = vld [vmem:[%s12863_s1] sm:$0xff]  ;;  %v5581_v59 = vld [vmem:[%s12864_s7 + $0x30] sm:$0x1] }
 0x45f   : > { %v5237_v61 = vpop.permute.xlu1 %5236  ;;  %7307 = vmatmul.mubr.msk.f32.vlgmr.msra.gmra.mxu1 %vm2899_vm11, %v7303_v60  ;;  %v5132_v17 = vpop.permute.xlu0 %5131  ;;  %7313 = vmatmul.mubr.msk.f32.vlgmr.msra.gmra.mxu0 %vm2899_vm11, %v7309_v48 }
 0x460   : > { %4911 = vmatprep.mubr.f32.mxu1 %v12862_v8  ;;  %5014 = vmatprep.mubr.f32.mxu0 %v12862_v8  ;;  %v5138_v9 = vsel %vm5137_vm5, %v5132_v17, %v5134_v50 }
 0x463   : > { %v5136_v26 = vpop.permute.xlu1 %5135  ;;  %7308 = vmatmul.mubr.msk.f32.gmra.mxu1 %vm2899_vm11, %v7304_v52  ;;  %v5033_v23 = vpop.permute.xlu0 %5032  ;;  %7314 = vmatmul.mubr.msk.f32.gmra.mxu0 %vm2899_vm11, %v7310_v38  ;;  %v5579_v52 = vld [vmem:[%s12864_s7 + $0x20] sm:$0xff] }
 0x464   : > { %v5139_v12 = vsel %vm5137_vm5, %v5134_v50, %v5136_v26  ;;  %v5036_v2 = vsel %vm5034_vm4, %v11542_v25, %v5033_v23  ;;  %5111 = vmatprep.mubr.f32.mxu1 %v12862_v8  ;;  %5214 = vmatprep.mubr.f32.mxu0 %v12862_v8  ;;  %v5482_v25 = vld [vmem:[%s12863_s1 + $0xc8] sm:$0xff]  ;;  %v5460_v50 = vld [vmem:[%s12863_s1 + $0x18] sm:$0xff] }
 0x465   : > { %7317 = vmatprep.subr.msk.mxu1 %vm2906_vm15, %v5036_v2  ;;  %7323 = vmatprep.subr.msk.mxu0 %vm2906_vm15, %v5139_v12  ;;  %v5578_v26 = vld [vmem:[%s12864_s7 + $0x18] sm:$0xff]  ;;  %v5577_v12 = vld [vmem:[%s12864_s7 + $0x10] sm:$0xff] }
 0x466   : > { %7318 = vmatpush1.msk.msra.mxu1 %vm2906_vm15, %v5035_v53  ;;  %7324 = vmatpush1.msk.msra.mxu0 %vm2906_vm15, %v5138_v9 }
 0x467   : > { %v5235_v19 = vpop.permute.xlu1 %5234  ;;  %7319 = vmatmul.mubr.msk.f32.vlgmr.msra.gmra.mxu1 %vm2899_vm11, %v7315_v27  ;;  %v5340_v49 = vpop.permute.xlu0 %5339  ;;  %7325 = vmatmul.mubr.msk.f32.vlgmr.msra.gmra.mxu0 %vm2899_vm11, %v7321_v34 }
 0x468   : > { %5117 = vmatprep.mubr.f32.mxu1 %v12862_v8  ;;  %5220 = vmatprep.mubr.f32.mxu0 %v12862_v8  ;;  %v5241_v16 = vsel %vm5240_vm6, %v5235_v19, %v5237_v61 }
 0x46b   : > { %v5342_v13 = vpop.permute.xlu1 %5341  ;;  %7320 = vmatmul.mubr.msk.f32.gmra.mxu1 %vm2899_vm11, %v7316_v14  ;;  %v5239_v51 = vpop.permute.xlu0 %5238  ;;  %7326 = vmatmul.mubr.msk.f32.gmra.mxu0 %vm2899_vm11, %v7322_v0 }
 0x46c   : > { %v5345_v28 = vsel %vm5343_vm8, %v5340_v49, %v5342_v13  ;;  %v5242_v10 = vsel %vm5240_vm6, %v5237_v61, %v5239_v51  ;;  %5317 = vmatprep.mubr.f32.mxu1 %v12862_v8  ;;  %5420 = vmatprep.mubr.f32.mxu0 %v12862_v8  ;;  %v5580_v61 = vld [vmem:[%s12864_s7 + $0x28] sm:$0xff] }
 0x46d   : > { %7329 = vmatprep.subr.msk.mxu1 %vm2906_vm15, %v5242_v10  ;;  %7335 = vmatprep.subr.msk.mxu0 %vm2906_vm15, %v5345_v28 }
 0x46e   : > { %7330 = vmatpush1.msk.msra.mxu1 %vm2906_vm15, %v5241_v16 }
 0x46f   : > { %7331 = vmatmul.mubr.msk.f32.vlgmr.msra.gmra.mxu1 %vm2899_vm11, %v7327_v11  ;;  %v5338_v44 = vpop.permute.xlu0 %5337 }
 0x470   : > { %v5344_v5 = vsel %vm5343_vm8, %v5338_v44, %v5340_v49  ;;  %5323 = vmatprep.mubr.f32.mxu1 %v12862_v8 }
 0x471   : > { %7336 = vmatpush1.msk.msra.mxu0 %vm2906_vm15, %v5344_v5  ;;  %vm5495_vm15 = vcmask 1043456  }
 0x472   : > { %7337 = vmatmul.mubr.msk.f32.vlgmr.msra.gmra.mxu0 %vm2899_vm11, %v7333_v45  ;;  %7836 = vmatprep.subr.mxu0 %v12862_v8 }
 0x473   : > { %7332 = vmatmul.mubr.msk.f32.gmra.mxu1 %vm2899_vm11, %v7328_v62  ;;  %5426 = vmatprep.mubr.f32.mxu0 %v12862_v8 }
 0x474   : > { %7607 = vmatprep.subr.msk.mxu1 %vm5495_vm15, %v5488_v43 }
 0x475   : > { %7608 = vmatpush3.msra.mxu1 %v5472_v37 }
 0x476   : > { %7338 = vmatmul.mubr.msk.f32.gmra.mxu0 %vm2899_vm11, %v7334_v40  ;;  %7609 = vmatprep.subr.mxu1 %v5487_v18  ;;  %vm5586_vm11 = vcmask 1040384  }
 0x477   : > { %7850 = vmatprep.mubr.msk.f32.mxu0 %vm8406_vm13, %v12862_v8  ;;  %7610 = vmatpush3.msra.mxu1 %v5471_v47 }
 0x478   : > { %7611 = vmatprep.subr.mxu1 %v5486_v57  ;;  %7837 = vmatpush3.msk.msra.mxu0 %vm5586_vm11, %v5581_v59 }
 0x479   : > { %7612 = vmatpush3.msra.mxu1 %v5470_v15  ;;  %7838 = vmatprep.subr.mxu0 %v12862_v8 }
 0x47a   : > { %7613 = vmatprep.subr.mxu1 %v5485_v30  ;;  %7839 = vmatpush3.msra.mxu0 %v5580_v61 }
 0x47b   : > { %7614 = vmatpush3.msra.mxu1 %v5469_v46  ;;  %7840 = vmatprep.subr.mxu0 %v12862_v8 }
 0x47c   : > { %7615 = vmatprep.subr.mxu1 %v5484_v7  ;;  %7841 = vmatpush3.msra.mxu0 %v5579_v52 }
 0x47d   : > { %7616 = vmatpush3.msra.mxu1 %v5468_v21  ;;  %7842 = vmatprep.subr.mxu0 %v12862_v8 }
 0x47e   : > { %7617 = vmatprep.subr.mxu1 %v5483_v58  ;;  %7843 = vmatpush3.msra.mxu0 %v5578_v26 }
 0x47f   : > { %7618 = vmatpush3.msra.mxu1 %v5467_v39  ;;  %7844 = vmatprep.subr.mxu0 %v12862_v8 }
 0x480   : > { %7619 = vmatprep.subr.mxu1 %v5482_v25  ;;  %7845 = vmatpush3.msra.mxu0 %v5577_v12 }
 0x481   : > { %7620 = vmatpush3.msra.mxu1 %v5466_v41  ;;  %7846 = vmatprep.subr.mxu0 %v12862_v8 }
 0x482   : > { %7621 = vmatprep.subr.mxu1 %v5481_v63 }
 0x483   : > { %7622 = vmatpush3.msra.mxu1 %v5465_v55 }
 0x484   : > { %7623 = vmatprep.subr.mxu1 %v5480_v1 }
 0x485   : > { %7624 = vmatpush3.msra.mxu1 %v5464_v3 }
 0x486   : > { %7625 = vmatprep.subr.mxu1 %v5479_v42 }
 0x487   : > { %7626 = vmatpush3.msra.mxu1 %v5463_v4 }
 0x488   : > { %7627 = vmatprep.subr.mxu1 %v5478_v36 }
 0x489   : > { %7628 = vmatpush3.msra.mxu1 %v5462_v31 }
 0x48a   : > { %7629 = vmatprep.subr.mxu1 %v5477_v22 }
 0x48b   : > { %7630 = vmatpush3.msra.mxu1 %v5461_v32 }
 0x48c   : > { %7631 = vmatprep.subr.mxu1 %v5476_v20 }
 0x48d   : > { %7632 = vmatpush3.msra.mxu1 %v5460_v50 }
 0x48e   : > { %7633 = vmatprep.subr.mxu1 %v5475_v6 }
 0x48f   : > { %7634 = vmatpush3.msra.mxu1 %v5459_v29 }
 0x490   : > { %7635 = vmatprep.subr.mxu1 %v5474_v24 }
 0x491   : > { %7636 = vmatpush3.msra.mxu1 %v5458_v56 }
 0x492   : > { %7637 = vmatprep.subr.mxu1 %v5473_v35 }
 0x493   : > { %7638 = vmatpush3.msra.mxu1 %v5457_v33 }
 0x494   : > { %7870 = vmatprep.subr.mxu1 %v12862_v8 }
 0x4bb   : > { %v2977_v60 = vpop.f32.mrf.mxu1 }
 0x4bd   : > { %v2979_v48 = vpop.f32.mrf.mxu1 }
 0x4bf   : > { %v2983_v54 = vpop.f32.mrf.mxu1 }
 0x4c1   : > { %v2985_v17 = vpop.f32.mrf.mxu1 }
 0x4c3   : > { %v3064_v38 = vpop.f32.mrf.mxu1 }
 0x4c4   : > { %v3065_v57 = vadd.f32 %v3064_v38, %v2977_v60 }
 0x4c5   : > { %v3066_v23 = vpop.f32.mrf.mxu1 }
 0x4c6   : > { %v3067_v46 = vadd.f32 %v3066_v23, %v2979_v48 }
 0x4c7   : > { %v3070_v2 = vpop.f32.mrf.mxu1  ;;  %v3357_v14 = vpop.f32.mrf.mxu0 }
 0x4c8   : > { %v3071_v39 = vadd.f32 %v3070_v2, %v2983_v54 }
 0x4c9   : > { %v3072_v27 = vpop.f32.mrf.mxu1  ;;  %v3359_v13 = vpop.f32.mrf.mxu0 }
 0x4ca   : > { %v3073_v1 = vadd.f32 %v3072_v27, %v2985_v17 }
 0x4cb   : > { %v3159_v34 = vpop.f32.mrf.mxu1  ;;  %v3363_v28 = vpop.f32.mrf.mxu0 }
 0x4cc   : > { %v3170_v7 = vadd.f32 %v3159_v34, %v3065_v57 }
 0x4cd   : > { %v3161_v53 = vpop.f32.mrf.mxu1  ;;  %v3365_v11 = vpop.f32.mrf.mxu0 }
 0x4ce   : > { %v3171_v25 = vadd.f32 %v3161_v53, %v3067_v46 }
 0x4cf   : > { %v3165_v9 = vpop.f32.mrf.mxu1 }
 0x4d0   : > { %v3172_v3 = vadd.f32 %v3165_v9, %v3071_v39 }
 0x4d1   : > { %v3167_v19 = vpop.f32.mrf.mxu1 }
 0x4d2   : > { %v3173_v31 = vadd.f32 %v3167_v19, %v3073_v1 }
 0x4d3   : > { %v3258_v49 = vpop.f32.mrf.mxu1 }
 0x4d4   : > { %v3269_v41 = vadd.f32 %v3258_v49, %v3170_v7 }
 0x4d5   : > { %v3260_v0 = vpop.f32.mrf.mxu1 }
 0x4d6   : > { %v3270_v42 = vadd.f32 %v3260_v0, %v3171_v25  ;;  %v3368_v22 = vadd.f32 %v3357_v14, %v3269_v41 }
 0x4d7   : > { %v3264_v51 = vpop.f32.mrf.mxu1 }
 0x4d8   : > { %v3271_v32 = vadd.f32 %v3264_v51, %v3172_v3  ;;  %v3369_v6 = vadd.f32 %v3359_v13, %v3270_v42 }
 0x4d9   : > { %v3266_v10 = vpop.f32.mrf.mxu1 }
 0x4da   : > { %v3272_v29 = vadd.f32 %v3266_v10, %v3173_v31  ;;  %v3370_v33 = vadd.f32 %v3363_v28, %v3271_v32 }
 0x4dc   : > { %v3371_v59 = vadd.f32 %v3365_v11, %v3272_v29 }
 0x4e7   : > { %v3466_v16 = vpop.f32.mrf.mxu1  ;;  %v3569_v44 = vpop.f32.mrf.mxu0 }
 0x4e8   : > { %v3477_v24 = vadd.f32 %v3466_v16, %v3368_v22 }
 0x4e9   : > { %v3468_v45 = vpop.f32.mrf.mxu1  ;;  %v3571_v5 = vpop.f32.mrf.mxu0 }
 0x4ea   : > { %v3478_v60 = vadd.f32 %v3468_v45, %v3369_v6  ;;  %v3580_v61 = vadd.f32 %v3569_v44, %v3477_v24 }
 0x4eb   : > { %v3472_v62 = vpop.f32.mrf.mxu1  ;;  %v3575_v40 = vpop.f32.mrf.mxu0 }
 0x4ec   : > { %v3479_v17 = vadd.f32 %v3472_v62, %v3370_v33  ;;  %v3581_v26 = vadd.f32 %v3571_v5, %v3478_v60 }
 0x4ed   : > { %v3474_v43 = vpop.f32.mrf.mxu1  ;;  %v3577_v37 = vpop.f32.mrf.mxu0 }
 0x4ee   : > { %v3480_v23 = vadd.f32 %v3474_v43, %v3371_v59  ;;  %v3582_v34 = vadd.f32 %v3575_v40, %v3479_v17 }
 0x4ef   : > { %v3672_v18 = vpop.f32.mrf.mxu1  ;;  %v3775_v47 = vpop.f32.mrf.mxu0 }
 0x4f0   : > { %v3683_v12 = vadd.f32 %v3672_v18, %v3580_v61  ;;  %v3583_v49 = vadd.f32 %v3577_v37, %v3480_v23 }
 0x4f1   : > { %v3674_v15 = vpop.f32.mrf.mxu1  ;;  %v3777_v30 = vpop.f32.mrf.mxu0 }
 0x4f2   : > { %v3684_v53 = vadd.f32 %v3674_v15, %v3581_v26  ;;  %v3786_v14 = vadd.f32 %v3775_v47, %v3683_v12 }
 0x4f3   : > { %v3678_v21 = vpop.f32.mrf.mxu1  ;;  %v3781_v58 = vpop.f32.mrf.mxu0 }
 0x4f4   : > { %v3685_v0 = vadd.f32 %v3678_v21, %v3582_v34  ;;  %v3787_v28 = vadd.f32 %v3777_v30, %v3684_v53 }
 0x4f5   : > { %v3680_v63 = vpop.f32.mrf.mxu1  ;;  %v3783_v55 = vpop.f32.mrf.mxu0 }
 0x4f6   : > { %v3686_v10 = vadd.f32 %v3680_v63, %v3583_v49  ;;  %v3788_v45 = vadd.f32 %v3781_v58, %v3685_v0 }
 0x4f7   : > { %v3878_v4 = vpop.f32.mrf.mxu1  ;;  %v3980_v36 = vpop.f32.mrf.mxu0 }
 0x4f8   : > { %v3889_v11 = vadd.f32 %v3878_v4, %v3786_v14  ;;  %v3789_v18 = vadd.f32 %v3783_v55, %v3686_v10 }
 0x4f9   : > { %v3880_v20 = vpop.f32.mrf.mxu1  ;;  %v3982_v50 = vpop.f32.mrf.mxu0 }
 0x4fa   : > { %v3890_v5 = vadd.f32 %v3880_v20, %v3787_v28  ;;  %v3991_v57 = vadd.f32 %v3980_v36, %v3889_v11 }
 0x4fb   : > { %v3884_v56 = vpop.f32.mrf.mxu1  ;;  %v3986_v35 = vpop.f32.mrf.mxu0 }
 0x4fc   : > { %v3891_v40 = vadd.f32 %v3884_v56, %v3788_v45  ;;  %v3992_v7 = vadd.f32 %v3982_v50, %v3890_v5 }
 0x4fd   : > { %v3886_v48 = vpop.f32.mrf.mxu1  ;;  %v3988_v54 = vpop.f32.mrf.mxu0 }
 0x4fe   : > { %v3892_v37 = vadd.f32 %v3886_v48, %v3789_v18  ;;  %v3993_v25 = vadd.f32 %v3986_v35, %v3891_v40 }
 0x4ff   : > { %v4083_v52 = vpop.f32.mrf.mxu1  ;;  %v4186_v38 = vpop.f32.mrf.mxu0 }
 0x500   : > { %v4094_v47 = vadd.f32 %v4083_v52, %v3991_v57  ;;  %v3994_v1 = vadd.f32 %v3988_v54, %v3892_v37 }
 0x501   : > { %v4085_v2 = vpop.f32.mrf.mxu1  ;;  %v4188_v27 = vpop.f32.mrf.mxu0 }
 0x502   : > { %v4095_v30 = vadd.f32 %v4085_v2, %v3992_v7  ;;  %v4197_v3 = vadd.f32 %v4186_v38, %v4094_v47 }
 0x503   : > { %v4089_v9 = vpop.f32.mrf.mxu1  ;;  %v4192_v19 = vpop.f32.mrf.mxu0 }
 0x504   : > { %v4096_v58 = vadd.f32 %v4089_v9, %v3993_v25  ;;  %v4198_v31 = vadd.f32 %v4188_v27, %v4095_v30 }
 0x505   : > { %v4091_v13 = vpop.f32.mrf.mxu1  ;;  %v4194_v51 = vpop.f32.mrf.mxu0 }
 0x506   : > { %v4097_v55 = vadd.f32 %v4091_v13, %v3994_v1  ;;  %v4199_v20 = vadd.f32 %v4192_v19, %v4096_v58 }
 0x507   : > { %v4289_v16 = vpop.f32.mrf.mxu1  ;;  %v4392_v44 = vpop.f32.mrf.mxu0 }
 0x508   : > { %v4300_v36 = vadd.f32 %v4289_v16, %v4197_v3  ;;  %v4200_v24 = vadd.f32 %v4194_v51, %v4097_v55 }
 0x509   : > { %v4291_v62 = vpop.f32.mrf.mxu1  ;;  %v4394_v43 = vpop.f32.mrf.mxu0 }
 0x50a   : > { %v4301_v50 = vadd.f32 %v4291_v62, %v4198_v31  ;;  %v4403_v56 = vadd.f32 %v4392_v44, %v4300_v36 }
 0x50b   : > { %v4295_v15 = vpop.f32.mrf.mxu1  ;;  %v4398_v46 = vpop.f32.mrf.mxu0 }
 0x50c   : > { %v4302_v35 = vadd.f32 %v4295_v15, %v4199_v20  ;;  %v4404_v48 = vadd.f32 %v4394_v43, %v4301_v50 }
 0x50d   : > { %v4297_v21 = vpop.f32.mrf.mxu1  ;;  %v4400_v39 = vpop.f32.mrf.mxu0 }
 0x50e   : > { %v4303_v54 = vadd.f32 %v4297_v21, %v4200_v24  ;;  %v4405_v52 = vadd.f32 %v4398_v46, %v4302_v35 }
 0x50f   : > { %v4495_v41 = vpop.f32.mrf.mxu1  ;;  %v4598_v63 = vpop.f32.mrf.mxu0 }
 0x510   : > { %v4506_v59 = vadd.f32 %v4495_v41, %v4403_v56  ;;  %v4406_v12 = vadd.f32 %v4400_v39, %v4303_v54 }
 0x511   : > { %v4497_v42 = vpop.f32.mrf.mxu1  ;;  %v4600_v4 = vpop.f32.mrf.mxu0 }
 0x512   : > { %v4507_v38 = vadd.f32 %v4497_v42, %v4404_v48  ;;  %v4609_v2 = vadd.f32 %v4598_v63, %v4506_v59 }
 0x513   : > { %v4501_v22 = vpop.f32.mrf.mxu1  ;;  %v4604_v32 = vpop.f32.mrf.mxu0 }
 0x514   : > { %v4508_v27 = vadd.f32 %v4501_v22, %v4405_v52  ;;  %v4610_v9 = vadd.f32 %v4600_v4, %v4507_v38 }
 0x515   : > { %v4503_v6 = vpop.f32.mrf.mxu1  ;;  %v4606_v29 = vpop.f32.mrf.mxu0 }
 0x516   : > { %v4509_v19 = vadd.f32 %v4503_v6, %v4406_v12  ;;  %v4611_v13 = vadd.f32 %v4604_v32, %v4508_v27 }
 0x517   : > { %v4701_v33 = vpop.f32.mrf.mxu1  ;;  %v4804_v60 = vpop.f32.mrf.mxu0 }
 0x518   : > { %v4712_v49 = vadd.f32 %v4701_v33, %v4609_v2  ;;  %v4612_v11 = vadd.f32 %v4606_v29, %v4509_v19 }
 0x519   : > { %v4703_v61 = vpop.f32.mrf.mxu1  ;;  %v4806_v17 = vpop.f32.mrf.mxu0 }
 0x51a   : > { %v4713_v51 = vadd.f32 %v4703_v61, %v4610_v9  ;;  %v4815_v16 = vadd.f32 %v4804_v60, %v4712_v49 }
 0x51b   : > { %v4707_v26 = vpop.f32.mrf.mxu1  ;;  %v4810_v23 = vpop.f32.mrf.mxu0 }
 0x51c   : > { %v4714_v44 = vadd.f32 %v4707_v26, %v4611_v13  ;;  %v4816_v62 = vadd.f32 %v4806_v17, %v4713_v51  ;;  %v5442_v17 = vpop.permute.xlu1 %5441  ;;  %v7358_v51 = vld [vmem:[%s12864_s7 + $0x98] sm:$0xff] }
 0x51d   : > { %v4709_v34 = vpop.f32.mrf.mxu1  ;;  %v4812_v53 = vpop.f32.mrf.mxu0 }
 0x51e   : > { %v4715_v43 = vadd.f32 %v4709_v34, %v4612_v11  ;;  %v4817_v15 = vadd.f32 %v4810_v23, %v4714_v44  ;;  %v7357_v11 = vld [vmem:[%s12864_s7 + $0x90] sm:$0xff]  ;;  %v5576_v44 = vld [vmem:[%s12864_s7 + $0x8] sm:$0xff] }
 0x51f   : > { %v4907_v14 = vpop.f32.mrf.mxu1  ;;  %v5010_v0 = vpop.f32.mrf.mxu0  ;;  %7847 = vmatpush3.msra.mxu0 %v5576_v44  ;;  %v7430_v44 = vld [vmem:[%s12864_s7 + $0x258] sm:$0xff] }
 0x520   : > { %v4918_v18 = vadd.f32 %v4907_v14, %v4815_v16  ;;  %v4818_v47 = vadd.f32 %v4812_v53, %v4715_v43  ;;  %v5447_v53 = vpop.permute.xlu0 %5446  ;;  %v7356_v16 = vld [vmem:[%s12864_s7 + $0x88] sm:$0xff]  ;;  %7848 = vmatprep.subr.mxu0 %v12862_v8  ;;  %v7353_v43 = vld [vmem:[%s12864_s7 + $0x70] sm:$0xff] }
 0x521   : > { %v4909_v28 = vpop.f32.mrf.mxu1  ;;  %v5012_v10 = vpop.f32.mrf.mxu0 }
 0x522   : > { %v4919_v46 = vadd.f32 %v4909_v28, %v4816_v62  ;;  %v5021_v21 = vadd.f32 %v5010_v0, %v4918_v18  ;;  %v7359_v0 = vld [vmem:[%s12864_s7 + $0xa0] sm:$0x1]  ;;  %v7354_v62 = vld [vmem:[%s12864_s7 + $0x78] sm:$0xff] }
 0x523   : > { %v4913_v45 = vpop.f32.mrf.mxu1  ;;  %v5016_v5 = vpop.f32.mrf.mxu0 }
 0x524   : > { %v4920_v39 = vadd.f32 %v4913_v45, %v4817_v15  ;;  %v5022_v41 = vadd.f32 %v5012_v10, %v4919_v46  ;;  %v7355_v45 = vld [vmem:[%s12864_s7 + $0x80] sm:$0xff]  ;;  %v7350_v15 = vld [vmem:[%s12864_s7 + $0x68] sm:$0x1] }
 0x525   : > { %v4915_v57 = vpop.f32.mrf.mxu1  ;;  %v5018_v40 = vpop.f32.mrf.mxu0  ;;  %v7349_v46 = vld [vmem:[%s12864_s7 + $0x60] sm:$0xff] }
 0x526   : > { %v4921_v63 = vadd.f32 %v4915_v57, %v4818_v47  ;;  %v5023_v58 = vadd.f32 %v5016_v5, %v4920_v39  ;;  %v5575_v5 = vld [vmem:[%s12864_s7] sm:$0xff]  ;;  %v7348_v47 = vld [vmem:[%s12864_s7 + $0x58] sm:$0xff]  ;;  %v7347_v39 = vld [vmem:[%s12864_s7 + $0x50] sm:$0xff] }
 0x527   : > { %v5113_v7 = vpop.f32.mrf.mxu1  ;;  %v5216_v37 = vpop.f32.mrf.mxu0  ;;  %7849 = vmatpush3.msra.mxu0 %v5575_v5  ;;  %v7429_v5 = vld [vmem:[%s12864_s7 + $0x250] sm:$0xff] }
 0x528   : > { %v5124_v1 = vadd.f32 %v5113_v7, %v5021_v21  ;;  %v5024_v55 = vadd.f32 %v5018_v40, %v4921_v63  ;;  %7853 = vmatprep.subr.mxu0 %v12862_v8  ;;  %v7376_v21 = vld [vmem:[%s12864_s7 + $0x108] sm:$0xff]  ;;  %v7345_v63 = vld [vmem:[%s12864_s7 + $0x40] sm:$0xff] }
 0x529   : > { %v5115_v25 = vpop.f32.mrf.mxu1  ;;  %v5218_v30 = vpop.f32.mrf.mxu0 }
 0x52a   : > { %v5125_v42 = vadd.f32 %v5115_v25, %v5022_v41  ;;  %v5227_v36 = vadd.f32 %v5216_v37, %v5124_v1  ;;  %v7377_v37 = vld [vmem:[%s12864_s7 + $0x110] sm:$0x1]  ;;  %v7375_v25 = vld [vmem:[%s12864_s7 + $0x100] sm:$0xff]  ;;  %v7374_v41 = vld [vmem:[%s12864_s7 + $0xf8] sm:$0xff] }
 0x52b   : > { %v5119_v3 = vpop.f32.mrf.mxu1  ;;  %v5222_v4 = vpop.f32.mrf.mxu0  ;;  %v7373_v1 = vld [vmem:[%s12864_s7 + $0xf0] sm:$0xff] }
 0x52c   : > { %v5126_v22 = vadd.f32 %v5119_v3, %v5023_v58  ;;  %v5228_v20 = vadd.f32 %v5218_v30, %v5125_v42  ;;  %v7346_v30 = vld [vmem:[%s12864_s7 + $0x48] sm:$0xff]  ;;  %v7344_v3 = vld [vmem:[%s12864_s7 + $0x38] sm:$0xff] }
 0x52d   : > { %v5121_v31 = vpop.f32.mrf.mxu1  ;;  %v5224_v6 = vpop.f32.mrf.mxu0  ;;  %v7372_v58 = vld [vmem:[%s12864_s7 + $0xe8] sm:$0xff] }
 0x52e   : > { %v5127_v50 = vadd.f32 %v5121_v31, %v5024_v55  ;;  %v5229_v56 = vadd.f32 %v5222_v4, %v5126_v22  ;;  %v7368_v4 = vld [vmem:[%s12864_s7 + $0xd8] sm:$0x1]  ;;  %v7371_v31 = vld [vmem:[%s12864_s7 + $0xe0] sm:$0xff] }
 0x52f   : > { %v5319_v32 = vpop.f32.mrf.mxu1  ;;  %v7395_v22 = vld [vmem:[%s12864_s7 + $0x180] sm:$0x1] }
 0x530   : > { %v5330_v29 = vadd.f32 %v5319_v32, %v5227_v36  ;;  %v5230_v54 = vadd.f32 %v5224_v6, %v5127_v50  ;;  %v7367_v36 = vld [vmem:[%s12864_s7 + $0xd0] sm:$0xff]  ;;  %v7366_v32 = vld [vmem:[%s12864_s7 + $0xc8] sm:$0xff]  ;;  %v7365_v50 = vld [vmem:[%s12864_s7 + $0xc0] sm:$0xff] }
 0x531   : > { %v5321_v24 = vpop.f32.mrf.mxu1  ;;  %v7393_v6 = vld [vmem:[%s12864_s7 + $0x170] sm:$0xff] }
 0x532   : > { %v5331_v35 = vadd.f32 %v5321_v24, %v5228_v20  ;;  %v5422_v33 = vpop.f32.mrf.mxu0  ;;  %v7394_v20 = vld [vmem:[%s12864_s7 + $0x178] sm:$0xff]  ;;  %v7392_v24 = vld [vmem:[%s12864_s7 + $0x168] sm:$0xff] }
 0x533   : > { %v5433_v60 = vadd.f32 %v5422_v33, %v5330_v29  ;;  %v5325_v48 = vpop.f32.mrf.mxu1  ;;  %v7364_v29 = vld [vmem:[%s12864_s7 + $0xb8] sm:$0xff]  ;;  %v7362_v33 = vld [vmem:[%s12864_s7 + $0xa8] sm:$0xff] }
 0x534   : > { %v5332_v59 = vadd.f32 %v5325_v48, %v5229_v56  ;;  %v5424_v61 = vpop.f32.mrf.mxu0  ;;  %v7363_v56 = vld [vmem:[%s12864_s7 + $0xb0] sm:$0xff] }
 0x535   : > { %v5434_v52 = vadd.f32 %v5424_v61, %v5331_v35  ;;  %v5327_v38 = vpop.f32.mrf.mxu1  ;;  %v5449_v26 = vadd.f32 %v5442_v17, %v5433_v60  ;;  %v7391_v35 = vld [vmem:[%s12864_s7 + $0x160] sm:$0xff]  ;;  %v7390_v60 = vld [vmem:[%s12864_s7 + $0x158] sm:$0xff] }
 0x536   : > { %v5333_v23 = vadd.f32 %v5327_v38, %v5230_v54  ;;  %v5428_v12 = vpop.f32.mrf.mxu0  ;;  %v7386_v54 = vld [vmem:[%s12864_s7 + $0x148] sm:$0x1]  ;;  %v7384_v38 = vld [vmem:[%s12864_s7 + $0x138] sm:$0xff] }
 0x537   : > { %v5450_v2 = vadd.f32 %v5442_v17, %v5434_v52  ;;  %v5435_v27 = vadd.f32 %v5428_v12, %v5332_v59  ;;  %v5453_v49 = vmax.f32 %v5449_v26, 0.0  ;;  %v7389_v59 = vld [vmem:[%s12864_s7 + $0x150] sm:$0xff]  ;;  %v7385_v17 = vld [vmem:[%s12864_s7 + $0x140] sm:$0xff]  ;;  %v7412_v26 = vld [vmem:[%s12864_s7 + $0x1e8] sm:$0xff] }
 0x538   : > { %v5430_v34 = vpop.f32.mrf.mxu0  ;;  %v7413_v52 = vld [vmem:[%s12864_s7 + $0x1f0] sm:$0x1]  ;;  %v7411_v12 = vld [vmem:[%s12864_s7 + $0x1e0] sm:$0xff] }
 0x539   : > { %v5454_v9 = vmax.f32 %v5450_v2, 0.0  ;;  %v5436_v19 = vadd.f32 %v5430_v34, %v5333_v23  ;;  %v5451_v14 = vadd.f32 %v5447_v53, %v5435_v27  ;;  %v7383_v23 = vld [vmem:[%s12864_s7 + $0x130] sm:$0xff]  ;;  %v7382_v2 = vld [vmem:[%s12864_s7 + $0x128] sm:$0xff]  ;;  %v7410_v27 = vld [vmem:[%s12864_s7 + $0x1d8] sm:$0xff] }
 0x53a   : > { %v7381_v34 = vld [vmem:[%s12864_s7 + $0x120] sm:$0xff] }
 0x53b   : > { %v5452_v13 = vadd.f32 %v5447_v53, %v5436_v19  ;;  %7340 = vmatprep.mubr.msk.f32.mxu1 %vm744_vm3, %v5454_v9  ;;  %v5455_v10 = vmax.f32 %v5451_v14, 0.0  ;;  %v7409_v9 = vld [vmem:[%s12864_s7 + $0x1d0] sm:$0xff]  ;;  %v7380_v19 = vld [vmem:[%s12864_s7 + $0x118] sm:$0xff] }
 0x53c   : > { %5564 = vmatmul.mubr.f32.vlgmr.msra.gmra.mxu1 %v5453_v49  ;;  %v7408_v49 = vld [vmem:[%s12864_s7 + $0x1c8] sm:$0xff] }
 0x53d   : > { %v5456_v28 = vmax.f32 %v5452_v13, 0.0  ;;  %7871 = vmatpush3.msk.msra.mxu1 %vm5586_vm11, %v7359_v0  ;;  %v7404_v13 = vld [vmem:[%s12864_s7 + $0x1b8] sm:$0x1] }
 0x53e   : > { %7872 = vmatprep.subr.mxu1 %v12862_v8 }
 0x53f   : > { %7341 = vmatprep.mubr.msk.f32.mxu1 %vm744_vm3, %v5456_v28  ;;  %7873 = vmatpush3.msra.mxu1 %v7358_v51  ;;  %vm5582_vm3 = vcmask 400384   ;;  %v7407_v51 = vld [vmem:[%s12864_s7 + $0x1c0] sm:$0xff] }
 0x540   : > { %5569 = vmatmul.mubr.f32.gmra.mxu1 %v5455_v10  ;;  %7874 = vmatprep.subr.mxu1 %v12862_v8  ;;  %v7403_v10 = vld [vmem:[%s12864_s7 + $0x1b0] sm:$0xff] }
 0x541   : > { %7875 = vmatpush3.msra.mxu1 %v7357_v11  ;;  %7884 = vmatprep.mubr.msk.f32.mxu1 %vm8406_vm13, %v12862_v8  ;;  %v7431_v11 = vld [vmem:[%s12864_s7 + $0x260] sm:$0x1] }
 0x542   : > { %7876 = vmatprep.subr.mxu1 %v12862_v8 }
 0x543   : > { %7877 = vmatpush3.msra.mxu1 %v7356_v16  ;;  %v7402_v16 = vld [vmem:[%s12864_s7 + $0x1a8] sm:$0xff] }
 0x544   : > { %7878 = vmatprep.subr.mxu1 %v12862_v8 }
 0x545   : > { %7879 = vmatpush3.msra.mxu1 %v7355_v45  ;;  %v7401_v45 = vld [vmem:[%s12864_s7 + $0x1a0] sm:$0xff] }
 0x546   : > { %7880 = vmatprep.subr.mxu1 %v12862_v8 }
 0x547   : > { %7881 = vmatpush3.msra.mxu1 %v7354_v62  ;;  %v7400_v62 = vld [vmem:[%s12864_s7 + $0x198] sm:$0xff] }
 0x548   : > { %7882 = vmatprep.subr.mxu1 %v12862_v8 }
 0x549   : > { %7883 = vmatpush3.msra.mxu1 %v7353_v43  ;;  %v7428_v43 = vld [vmem:[%s12864_s7 + $0x248] sm:$0xff] }
 0x54a   : > { %7904 = vmatprep.subr.mxu1 %v12862_v8 }
 0x5fc   : > { %v7639_v18 = vpop.f32.mrf.mxu1 }
 0x5fe   : > { %v7640_v57 = vpop.f32.mrf.mxu1 }
 0x5ff   : > { %v11830_v40 = vadd.f32 %v7640_v57, %v7639_v18  ;;  %v7399_v18 = vld [vmem:[%s12864_s7 + $0x190] sm:$0xff]  ;;  %v7427_v57 = vld [vmem:[%s12864_s7 + $0x240] sm:$0xff] }
 0x600   : > { %v7642_v53 = vpop.f32.mrf.mxu1 }
 0x601   : > { %7851 = vmatmul.mubr.msk.f32.vlgmr.msra.gmra.mxu0 %vm5582_vm3, %v11830_v40  ;;  %v5754_v7 = vrot.slane %v11830_v40, 2  ;;  %v5669_v42 = vrot.slane %v11830_v40, 1  ;;  %v5924_v55 = vrot.slane %v11830_v40, 4  ;;  %v5839_v48 = vrot.slane %v11830_v40, 3 }
 0x602   : > { %7854 = vmatpush3.msk.msra.mxu0 %vm5586_vm11, %v7350_v15  ;;  %7867 = vmatprep.mubr.msk.f32.mxu0 %vm8406_vm13, %v12862_v8  ;;  %v6094_v61 = vrot.slane %v11830_v40, 6  ;;  %v7643_v14 = vpop.f32.mrf.mxu1  ;;  %v6009_v0 = vrot.slane %v11830_v40, 5  ;;  %v7398_v15 = vld [vmem:[%s12864_s7 + $0x188] sm:$0xff] }
 0x603   : > { %7855 = vmatprep.subr.mxu0 %v12862_v8  ;;  %7885 = vmatmul.mubr.msk.f32.vlgmr.msra.gmra.mxu1 %vm5582_vm3, %v5754_v7  ;;  %v12031_v28 = vadd.f32 %v7643_v14, %v7642_v53  ;;  %v6179_v7 = vrot.slane %v11830_v40, 7  ;;  %v7473_v14 = vld [vmem:[%s12864_s7 + $0x360] sm:$0xff] }
 0x604   : > { %7856 = vmatpush3.msra.mxu0 %v7349_v46  ;;  %7905 = vmatpush3.msk.msra.mxu1 %vm5586_vm11, %v7377_v37  ;;  %v7426_v46 = vld [vmem:[%s12864_s7 + $0x238] sm:$0xff]  ;;  %v7422_v37 = vld [vmem:[%s12864_s7 + $0x228] sm:$0x1] }
 0x605   : > { %7857 = vmatprep.subr.mxu0 %v12862_v8  ;;  %7906 = vmatprep.subr.mxu1 %v12862_v8  ;;  %v6434_v40 = vrot.slane %v12031_v28, 2  ;;  %v6689_v53 = vrot.slane %v12031_v28, 5 }
 0x606   : > { %7858 = vmatpush3.msra.mxu0 %v7348_v47  ;;  %7907 = vmatpush3.msra.mxu1 %v7376_v21  ;;  %v7425_v47 = vld [vmem:[%s12864_s7 + $0x230] sm:$0xff]  ;;  %v7421_v21 = vld [vmem:[%s12864_s7 + $0x220] sm:$0xff] }
 0x607   : > { %7859 = vmatprep.subr.mxu0 %v12862_v8  ;;  %7908 = vmatprep.subr.mxu1 %v12862_v8 }
 0x608   : > { %7860 = vmatpush3.msra.mxu0 %v7347_v39  ;;  %7909 = vmatpush3.msra.mxu1 %v7375_v25  ;;  %v7449_v39 = vld [vmem:[%s12864_s7 + $0x2d0] sm:$0x1]  ;;  %v7420_v25 = vld [vmem:[%s12864_s7 + $0x218] sm:$0xff] }
 0x609   : > { %7861 = vmatprep.subr.mxu0 %v12862_v8  ;;  %7910 = vmatprep.subr.mxu1 %v12862_v8 }
 0x60a   : > { %7862 = vmatpush3.msra.mxu0 %v7346_v30  ;;  %7911 = vmatpush3.msra.mxu1 %v7374_v41  ;;  %v7448_v30 = vld [vmem:[%s12864_s7 + $0x2c8] sm:$0xff]  ;;  %v7419_v41 = vld [vmem:[%s12864_s7 + $0x210] sm:$0xff] }
 0x60b   : > { %7863 = vmatprep.subr.mxu0 %v12862_v8  ;;  %7912 = vmatprep.subr.mxu1 %v12862_v8 }
 0x60c   : > { %7864 = vmatpush3.msra.mxu0 %v7345_v63  ;;  %7913 = vmatpush3.msra.mxu1 %v7373_v1  ;;  %v7447_v63 = vld [vmem:[%s12864_s7 + $0x2c0] sm:$0xff]  ;;  %v7418_v1 = vld [vmem:[%s12864_s7 + $0x208] sm:$0xff] }
 0x60d   : > { %7865 = vmatprep.subr.mxu0 %v12862_v8  ;;  %7914 = vmatprep.subr.mxu1 %v12862_v8 }
 0x60e   : > { %7866 = vmatpush3.msra.mxu0 %v7344_v3  ;;  %7915 = vmatpush3.msra.mxu1 %v7372_v58  ;;  %v7446_v3 = vld [vmem:[%s12864_s7 + $0x2b8] sm:$0xff]  ;;  %v7417_v58 = vld [vmem:[%s12864_s7 + $0x200] sm:$0xff] }
 0x60f   : > { %7868 = vmatmul.mubr.msk.f32.vlgmr.msra.gmra.mxu0 %vm5582_vm3, %v5669_v42  ;;  %7887 = vmatprep.subr.mxu0 %v12862_v8  ;;  %v7445_v42 = vld [vmem:[%s12864_s7 + $0x2b0] sm:$0xff] }
 0x610   : > { %7916 = vmatprep.subr.mxu1 %v12862_v8  ;;  %7888 = vmatpush3.msk.msra.mxu0 %vm5586_vm11, %v7368_v4  ;;  %v7416_v4 = vld [vmem:[%s12864_s7 + $0x1f8] sm:$0xff] }
 0x611   : > { %7917 = vmatpush3.msra.mxu1 %v7371_v31  ;;  %7918 = vmatprep.mubr.msk.f32.mxu1 %vm8406_vm13, %v12862_v8  ;;  %v7444_v31 = vld [vmem:[%s12864_s7 + $0x2a8] sm:$0xff] }
 0x612   : > { %7889 = vmatprep.subr.mxu0 %v12862_v8  ;;  %7919 = vmatmul.mubr.msk.f32.vlgmr.msra.gmra.mxu1 %vm5582_vm3, %v5924_v55  ;;  %v6349_v55 = vrot.slane %v12031_v28, 1 }
 0x613   : > { %7938 = vmatprep.subr.mxu1 %v12862_v8  ;;  %7890 = vmatpush3.msra.mxu0 %v7367_v36  ;;  %v7440_v36 = vld [vmem:[%s12864_s7 + $0x298] sm:$0x1] }
 0x614   : > { %7939 = vmatpush3.msk.msra.mxu1 %vm5586_vm11, %v7395_v22  ;;  %7891 = vmatprep.subr.mxu0 %v12862_v8  ;;  %v7443_v22 = vld [vmem:[%s12864_s7 + $0x2a0] sm:$0xff] }
 0x615   : > { %7940 = vmatprep.subr.mxu1 %v12862_v8  ;;  %7892 = vmatpush3.msra.mxu0 %v7366_v32  ;;  %v6604_v32 = vrot.slane %v12031_v28, 4 }
 0x616   : > { %7941 = vmatpush3.msra.mxu1 %v7394_v20  ;;  %7893 = vmatprep.subr.mxu0 %v12862_v8  ;;  %v7439_v20 = vld [vmem:[%s12864_s7 + $0x290] sm:$0xff] }
 0x617   : > { %7942 = vmatprep.subr.mxu1 %v12862_v8  ;;  %7894 = vmatpush3.msra.mxu0 %v7365_v50  ;;  %v7467_v50 = vld [vmem:[%s12864_s7 + $0x340] sm:$0x1] }
 0x618   : > { %7943 = vmatpush3.msra.mxu1 %v7393_v6  ;;  %7895 = vmatprep.subr.mxu0 %v12862_v8  ;;  %v7438_v6 = vld [vmem:[%s12864_s7 + $0x288] sm:$0xff] }
 0x619   : > { %7944 = vmatprep.subr.mxu1 %v12862_v8  ;;  %7896 = vmatpush3.msra.mxu0 %v7364_v29  ;;  %v7466_v29 = vld [vmem:[%s12864_s7 + $0x338] sm:$0xff] }
 0x61a   : > { %7945 = vmatpush3.msra.mxu1 %v7392_v24  ;;  %7897 = vmatprep.subr.mxu0 %v12862_v8  ;;  %v7437_v24 = vld [vmem:[%s12864_s7 + $0x280] sm:$0xff] }
 0x61b   : > { %7946 = vmatprep.subr.mxu1 %v12862_v8  ;;  %7898 = vmatpush3.msra.mxu0 %v7363_v56  ;;  %v7465_v56 = vld [vmem:[%s12864_s7 + $0x330] sm:$0xff] }
 0x61c   : > { %7947 = vmatpush3.msra.mxu1 %v7391_v35  ;;  %7899 = vmatprep.subr.mxu0 %v12862_v8  ;;  %v7436_v35 = vld [vmem:[%s12864_s7 + $0x278] sm:$0xff] }
 0x61d   : > { %7948 = vmatprep.subr.mxu1 %v12862_v8  ;;  %7900 = vmatpush3.msra.mxu0 %v7362_v33  ;;  %v7464_v33 = vld [vmem:[%s12864_s7 + $0x328] sm:$0xff] }
 0x61e   : > { %7901 = vmatprep.mubr.msk.f32.mxu0 %vm8406_vm13, %v12862_v8  ;;  %7949 = vmatpush3.msra.mxu1 %v7390_v60  ;;  %v7435_v60 = vld [vmem:[%s12864_s7 + $0x270] sm:$0xff] }
 0x61f   : > { %7902 = vmatmul.mubr.msk.f32.vlgmr.msra.gmra.mxu0 %vm5582_vm3, %v5839_v48  ;;  %7921 = vmatprep.subr.mxu0 %v12862_v8  ;;  %v7463_v48 = vld [vmem:[%s12864_s7 + $0x320] sm:$0xff] }
 0x620   : > { %7950 = vmatprep.subr.mxu1 %v12862_v8  ;;  %7922 = vmatpush3.msk.msra.mxu0 %vm5586_vm11, %v7386_v54  ;;  %v7434_v54 = vld [vmem:[%s12864_s7 + $0x268] sm:$0xff] }
 0x621   : > { %7951 = vmatpush3.msra.mxu1 %v7389_v59  ;;  %7952 = vmatprep.mubr.msk.f32.mxu1 %vm8406_vm13, %v12862_v8  ;;  %v7462_v59 = vld [vmem:[%s12864_s7 + $0x318] sm:$0xff] }
 0x622   : > { %7923 = vmatprep.subr.mxu0 %v12862_v8  ;;  %7953 = vmatmul.mubr.msk.f32.vlgmr.msra.gmra.mxu1 %vm5582_vm3, %v6094_v61  ;;  %v6519_v61 = vrot.slane %v12031_v28, 3 }
 0x623   : > { %7972 = vmatprep.subr.mxu1 %v12862_v8  ;;  %7924 = vmatpush3.msra.mxu0 %v7385_v17  ;;  %v7458_v17 = vld [vmem:[%s12864_s7 + $0x308] sm:$0x1] }
 0x624   : > { %7973 = vmatpush3.msk.msra.mxu1 %vm5586_vm11, %v7413_v52  ;;  %7925 = vmatprep.subr.mxu0 %v12862_v8  ;;  %v7461_v52 = vld [vmem:[%s12864_s7 + $0x310] sm:$0xff] }
 0x625   : > { %7974 = vmatprep.subr.mxu1 %v12862_v8  ;;  %7926 = vmatpush3.msra.mxu0 %v7384_v38  ;;  %v6774_v38 = vrot.slane %v12031_v28, 6 }
 0x626   : > { %7975 = vmatpush3.msra.mxu1 %v7412_v26  ;;  %7927 = vmatprep.subr.mxu0 %v12862_v8  ;;  %v7457_v26 = vld [vmem:[%s12864_s7 + $0x300] sm:$0xff] }
 0x627   : > { %7976 = vmatprep.subr.mxu1 %v12862_v8  ;;  %7928 = vmatpush3.msra.mxu0 %v7383_v23  ;;  %v7456_v23 = vld [vmem:[%s12864_s7 + $0x2f8] sm:$0xff] }
 0x628   : > { %7977 = vmatpush3.msra.mxu1 %v7411_v12  ;;  %7929 = vmatprep.subr.mxu0 %v12862_v8  ;;  %v7455_v12 = vld [vmem:[%s12864_s7 + $0x2f0] sm:$0xff] }
 0x629   : > { %7978 = vmatprep.subr.mxu1 %v12862_v8  ;;  %7930 = vmatpush3.msra.mxu0 %v7382_v2  ;;  %v7454_v2 = vld [vmem:[%s12864_s7 + $0x2e8] sm:$0xff] }
 0x62a   : > { %7979 = vmatpush3.msra.mxu1 %v7410_v27  ;;  %7931 = vmatprep.subr.mxu0 %v12862_v8  ;;  %v7453_v27 = vld [vmem:[%s12864_s7 + $0x2e0] sm:$0xff] }
 0x62b   : > { %7980 = vmatprep.subr.mxu1 %v12862_v8  ;;  %7932 = vmatpush3.msra.mxu0 %v7381_v34  ;;  %v7452_v34 = vld [vmem:[%s12864_s7 + $0x2d8] sm:$0xff] }
 0x62c   : > { %7981 = vmatpush3.msra.mxu1 %v7409_v9  ;;  %7933 = vmatprep.subr.mxu0 %v12862_v8  ;;  %v7476_v9 = vld [vmem:[%s12864_s7 + $0x378] sm:$0x1] }
 0x62d   : > { %7982 = vmatprep.subr.mxu1 %v12862_v8  ;;  %7934 = vmatpush3.msra.mxu0 %v7380_v19  ;;  %v7475_v19 = vld [vmem:[%s12864_s7 + $0x370] sm:$0xff] }
 0x62e   : > { %7935 = vmatprep.mubr.msk.f32.mxu0 %vm8406_vm13, %v12862_v8  ;;  %7983 = vmatpush3.msra.mxu1 %v7408_v49  ;;  %v7474_v49 = vld [vmem:[%s12864_s7 + $0x368] sm:$0xff] }
 0x62f   : > { %7936 = vmatmul.mubr.msk.f32.vlgmr.msra.gmra.mxu0 %vm5582_vm3, %v6009_v0  ;;  %7955 = vmatprep.subr.mxu0 %v12862_v8  ;;  %v7472_v0 = vld [vmem:[%s12864_s7 + $0x358] sm:$0xff] }
 0x630   : > { %7984 = vmatprep.subr.mxu1 %v12862_v8  ;;  %7956 = vmatpush3.msk.msra.mxu0 %vm5586_vm11, %v7404_v13  ;;  %v7471_v13 = vld [vmem:[%s12864_s7 + $0x350] sm:$0xff] }
 0x631   : > { %7985 = vmatpush3.msra.mxu1 %v7407_v51  ;;  %7986 = vmatprep.mubr.msk.f32.mxu1 %vm8406_vm13, %v12862_v8  ;;  %v7470_v51 = vld [vmem:[%s12864_s7 + $0x348] sm:$0xff] }
 0x632   : > { %7957 = vmatprep.subr.mxu0 %v12862_v8  ;;  %7987 = vmatmul.mubr.msk.f32.vlgmr.msra.gmra.mxu1 %vm5582_vm3, %v12031_v28 }
 0x633   : > { %8006 = vmatprep.subr.mxu1 %v12862_v8  ;;  %7958 = vmatpush3.msra.mxu0 %v7403_v10  ;;  %v6859_v10 = vrot.slane %v12031_v28, 7  ;;  %v6949_v28 = vld [vmem:[%s12865_s19 + $0x60] sm:$0xff] }
 0x634   : > { %8007 = vmatpush3.msk.msra.mxu1 %vm5586_vm11, %v7431_v11  ;;  %7959 = vmatprep.subr.mxu0 %v12862_v8  ;;  %v6951_v11 = vld [vmem:[%s12865_s19 + $0x70] sm:$0xff] }
 0x635   : > { %8008 = vmatprep.subr.mxu1 %v12862_v8  ;;  %7960 = vmatpush3.msra.mxu0 %v7402_v16  ;;  %v6950_v16 = vld [vmem:[%s12865_s19 + $0x68] sm:$0xff] }
 0x636   : > { %8009 = vmatpush3.msra.mxu1 %v7430_v44  ;;  %7961 = vmatprep.subr.mxu0 %v12862_v8  ;;  %v6948_v44 = vld [vmem:[%s12865_s19 + $0x58] sm:$0xff] }
 0x637   : > { %8010 = vmatprep.subr.mxu1 %v12862_v8  ;;  %7962 = vmatpush3.msra.mxu0 %v7401_v45  ;;  %v6947_v45 = vld [vmem:[%s12865_s19 + $0x50] sm:$0xff] }
 0x638   : > { %8011 = vmatpush3.msra.mxu1 %v7429_v5  ;;  %7963 = vmatprep.subr.mxu0 %v12862_v8  ;;  %v6946_v5 = vld [vmem:[%s12865_s19 + $0x48] sm:$0xff] }
 0x639   : > { %8012 = vmatprep.subr.mxu1 %v12862_v8  ;;  %7964 = vmatpush3.msra.mxu0 %v7400_v62  ;;  %v6945_v62 = vld [vmem:[%s12865_s19 + $0x40] sm:$0xff] }
 0x63a   : > { %8013 = vmatpush3.msra.mxu1 %v7428_v43  ;;  %7965 = vmatprep.subr.mxu0 %v12862_v8  ;;  %v6944_v43 = vld [vmem:[%s12865_s19 + $0x38] sm:$0xff] }
 0x63b   : > { %8014 = vmatprep.subr.mxu1 %v12862_v8  ;;  %7966 = vmatpush3.msra.mxu0 %v7399_v18  ;;  %v6943_v18 = vld [vmem:[%s12865_s19 + $0x30] sm:$0xff] }
 0x63c   : > { %8015 = vmatpush3.msra.mxu1 %v7427_v57  ;;  %7967 = vmatprep.subr.mxu0 %v12862_v8  ;;  %v6942_v57 = vld [vmem:[%s12865_s19 + $0x28] sm:$0xff] }
 0x63d   : > { %8016 = vmatprep.subr.mxu1 %v12862_v8  ;;  %7968 = vmatpush3.msra.mxu0 %v7398_v15  ;;  %v6941_v15 = vld [vmem:[%s12865_s19 + $0x20] sm:$0xff] }
 0x63e   : > { %7969 = vmatprep.mubr.msk.f32.mxu0 %vm8406_vm13, %v12862_v8  ;;  %8017 = vmatpush3.msra.mxu1 %v7426_v46  ;;  %v6940_v46 = vld [vmem:[%s12865_s19 + $0x18] sm:$0xff] }
 0x63f   : > { %7970 = vmatmul.mubr.msk.f32.vlgmr.msra.gmra.mxu0 %vm5582_vm3, %v6179_v7  ;;  %7989 = vmatprep.subr.mxu0 %v12862_v8  ;;  %v6939_v7 = vld [vmem:[%s12865_s19 + $0x10] sm:$0xff] }
 0x640   : > { %8018 = vmatprep.subr.mxu1 %v12862_v8  ;;  %7990 = vmatpush3.msk.msra.mxu0 %vm5586_vm11, %v7422_v37  ;;  %v6938_v37 = vld [vmem:[%s12865_s19 + $0x8] sm:$0xff] }
 0x641   : > { %8019 = vmatpush3.msra.mxu1 %v7425_v47  ;;  %8020 = vmatprep.mubr.msk.f32.mxu1 %vm8406_vm13, %v12862_v8  ;;  %v6937_v47 = vld [vmem:[%s12865_s19] sm:$0xff] }
 0x642   : > { %7991 = vmatprep.subr.mxu0 %v12862_v8  ;;  %8021 = vmatmul.mubr.msk.f32.vlgmr.msra.gmra.mxu1 %vm5582_vm3, %v6434_v40 }
 0x643   : > { %8040 = vmatprep.subr.mxu1 %v12862_v8  ;;  %7992 = vmatpush3.msra.mxu0 %v7421_v21  ;;  %v7038_v21 = vld [vmem:[%s12866_s23 + $0x50] sm:$0xf] }
 0x644   : > { %8041 = vmatpush3.msk.msra.mxu1 %vm5586_vm11, %v7449_v39  ;;  %7993 = vmatprep.subr.mxu0 %v12862_v8  ;;  %v7037_v39 = vld [vmem:[%s12866_s23 + $0x48] sm:$0xff] }
 0x645   : > { %8042 = vmatprep.subr.mxu1 %v12862_v8  ;;  %7994 = vmatpush3.msra.mxu0 %v7420_v25 }
 0x646   : > { %8043 = vmatpush3.msra.mxu1 %v7448_v30  ;;  %7995 = vmatprep.subr.mxu0 %v12862_v8 }
 0x647   : > { %8044 = vmatprep.subr.mxu1 %v12862_v8  ;;  %7996 = vmatpush3.msra.mxu0 %v7419_v41  ;;  %v7036_v41 = vld [vmem:[%s12866_s23 + $0x40] sm:$0xff] }
 0x648   : > { %8045 = vmatpush3.msra.mxu1 %v7447_v63  ;;  %7997 = vmatprep.subr.mxu0 %v12862_v8 }
 0x649   : > { %8046 = vmatprep.subr.mxu1 %v12862_v8  ;;  %7998 = vmatpush3.msra.mxu0 %v7418_v1  ;;  %v7035_v1 = vld [vmem:[%s12866_s23 + $0x38] sm:$0xff] }
 0x64a   : > { %8047 = vmatpush3.msra.mxu1 %v7446_v3  ;;  %7999 = vmatprep.subr.mxu0 %v12862_v8  ;;  %v7034_v3 = vld [vmem:[%s12866_s23 + $0x30] sm:$0xff] }
 0x64b   : > { %8048 = vmatprep.subr.mxu1 %v12862_v8  ;;  %8000 = vmatpush3.msra.mxu0 %v7417_v58  ;;  %v7033_v58 = vld [vmem:[%s12866_s23 + $0x28] sm:$0xff] }
 0x64c   : > { %8049 = vmatpush3.msra.mxu1 %v7445_v42  ;;  %8001 = vmatprep.subr.mxu0 %v12862_v8  ;;  %v5574_v42 = vld [vmem:[%s12867_s15] sm:$0x1] }
 0x64d   : > { %8050 = vmatprep.subr.mxu1 %v12862_v8  ;;  %8002 = vmatpush3.msra.mxu0 %v7416_v4  ;;  %v7032_v4 = vld [vmem:[%s12866_s23 + $0x20] sm:$0xff] }
 0x64e   : > { %8003 = vmatprep.mubr.msk.f32.mxu0 %vm8406_vm13, %v12862_v8  ;;  %8051 = vmatpush3.msra.mxu1 %v7444_v31  ;;  %v7031_v31 = vld [vmem:[%s12866_s23 + $0x18] sm:$0xff] }
 0x64f   : > { %8004 = vmatmul.mubr.msk.f32.vlgmr.msra.gmra.mxu0 %vm5582_vm3, %v6349_v55  ;;  %8023 = vmatprep.subr.mxu0 %v12862_v8 }
 0x650   : > { %8052 = vmatprep.subr.mxu1 %v12862_v8  ;;  %8024 = vmatpush3.msk.msra.mxu0 %vm5586_vm11, %v7440_v36 }
 0x651   : > { %8053 = vmatpush3.msra.mxu1 %v7443_v22  ;;  %8054 = vmatprep.mubr.msk.f32.mxu1 %vm8406_vm13, %v12862_v8 }
 0x652   : > { %8025 = vmatprep.subr.mxu0 %v12862_v8  ;;  %8055 = vmatmul.mubr.msk.f32.vlgmr.msra.gmra.mxu1 %vm5582_vm3, %v6604_v32 }
 0x653   : > { %8074 = vmatprep.subr.mxu1 %v12862_v8  ;;  %8026 = vmatpush3.msra.mxu0 %v7439_v20 }
 0x654   : > { %8075 = vmatpush3.msk.msra.mxu1 %vm5586_vm11, %v7467_v50  ;;  %8027 = vmatprep.subr.mxu0 %v12862_v8 }
 0x655   : > { %8076 = vmatprep.subr.mxu1 %v12862_v8  ;;  %8028 = vmatpush3.msra.mxu0 %v7438_v6 }
 0x656   : > { %8077 = vmatpush3.msra.mxu1 %v7466_v29  ;;  %8029 = vmatprep.subr.mxu0 %v12862_v8 }
 0x657   : > { %8078 = vmatprep.subr.mxu1 %v12862_v8  ;;  %8030 = vmatpush3.msra.mxu0 %v7437_v24 }
 0x658   : > { %8079 = vmatpush3.msra.mxu1 %v7465_v56  ;;  %8031 = vmatprep.subr.mxu0 %v12862_v8 }
 0x659   : > { %8080 = vmatprep.subr.mxu1 %v12862_v8  ;;  %8032 = vmatpush3.msra.mxu0 %v7436_v35 }
 0x65a   : > { %8081 = vmatpush3.msra.mxu1 %v7464_v33  ;;  %8033 = vmatprep.subr.mxu0 %v12862_v8 }
 0x65b   : > { %8082 = vmatprep.subr.mxu1 %v12862_v8  ;;  %8034 = vmatpush3.msra.mxu0 %v7435_v60 }
 0x65c   : > { %8083 = vmatpush3.msra.mxu1 %v7463_v48  ;;  %8035 = vmatprep.subr.mxu0 %v12862_v8 }
 0x65d   : > { %8084 = vmatprep.subr.mxu1 %v12862_v8  ;;  %8036 = vmatpush3.msra.mxu0 %v7434_v54 }
 0x65e   : > { %8037 = vmatprep.mubr.msk.f32.mxu0 %vm8406_vm13, %v12862_v8  ;;  %8085 = vmatpush3.msra.mxu1 %v7462_v59 }
 0x65f   : > { %8038 = vmatmul.mubr.msk.f32.vlgmr.msra.gmra.mxu0 %vm5582_vm3, %v6519_v61  ;;  %8057 = vmatprep.subr.mxu0 %v12862_v8 }
 0x660   : > { %8086 = vmatprep.subr.mxu1 %v12862_v8  ;;  %8058 = vmatpush3.msk.msra.mxu0 %vm5586_vm11, %v7458_v17 }
 0x661   : > { %8087 = vmatpush3.msra.mxu1 %v7461_v52  ;;  %8088 = vmatprep.mubr.msk.f32.mxu1 %vm8406_vm13, %v12862_v8 }
 0x662   : > { %8059 = vmatprep.subr.mxu0 %v12862_v8  ;;  %8089 = vmatmul.mubr.msk.f32.vlgmr.msra.gmra.mxu1 %vm5582_vm3, %v6774_v38 }
 0x663   : > { %8060 = vmatpush3.msra.mxu0 %v7457_v26  ;;  %8071 = vmatprep.mubr.msk.f32.mxu0 %vm8406_vm13, %v12862_v8 }
 0x664   : > { %8061 = vmatprep.subr.mxu0 %v12862_v8  ;;  %8108 = vmatprep.subr.mxu1 %v12862_v8 }
 0x665   : > { %8062 = vmatpush3.msra.mxu0 %v7456_v23  ;;  %8138 = vmatprep.mubr.msk.f32.mxu1 %vm8406_vm13, %v12862_v8 }
 0x666   : > { %8063 = vmatprep.subr.mxu0 %v12862_v8  ;;  %8109 = vmatpush3.msra.mxu1 %v6951_v11 }
 0x667   : > { %8064 = vmatpush3.msra.mxu0 %v7455_v12  ;;  %8110 = vmatprep.subr.mxu1 %v12862_v8 }
 0x668   : > { %8065 = vmatprep.subr.mxu0 %v12862_v8  ;;  %8111 = vmatpush3.msra.mxu1 %v6950_v16 }
 0x669   : > { %8066 = vmatpush3.msra.mxu0 %v7454_v2  ;;  %8112 = vmatprep.subr.mxu1 %v12862_v8 }
 0x66a   : > { %8067 = vmatprep.subr.mxu0 %v12862_v8  ;;  %8113 = vmatpush3.msra.mxu1 %v6949_v28 }
 0x66b   : > { %8068 = vmatpush3.msra.mxu0 %v7453_v27  ;;  %8114 = vmatprep.subr.mxu1 %v12862_v8 }
 0x66c   : > { %8069 = vmatprep.subr.mxu0 %v12862_v8  ;;  %8115 = vmatpush3.msra.mxu1 %v6948_v44 }
 0x66d   : > { %8070 = vmatpush3.msra.mxu0 %v7452_v34  ;;  %8116 = vmatprep.subr.mxu1 %v12862_v8 }
 0x66e   : > { %8072 = vmatmul.mubr.msk.f32.vlgmr.msra.gmra.mxu0 %vm5582_vm3, %v6689_v53  ;;  %8091 = vmatprep.subr.mxu0 %v12862_v8 }
 0x66f   : > { %8092 = vmatpush3.msk.msra.mxu0 %vm5586_vm11, %v7476_v9  ;;  %8105 = vmatprep.mubr.msk.f32.mxu0 %vm8406_vm13, %v12862_v8 }
 0x670   : > { %8093 = vmatprep.subr.mxu0 %v12862_v8  ;;  %8117 = vmatpush3.msra.mxu1 %v6947_v45 }
 0x671   : > { %8094 = vmatpush3.msra.mxu0 %v7475_v19  ;;  %8118 = vmatprep.subr.mxu1 %v12862_v8 }
 0x672   : > { %8095 = vmatprep.subr.mxu0 %v12862_v8  ;;  %8119 = vmatpush3.msra.mxu1 %v6946_v5 }
 0x673   : > { %8096 = vmatpush3.msra.mxu0 %v7474_v49  ;;  %8120 = vmatprep.subr.mxu1 %v12862_v8 }
 0x674   : > { %8097 = vmatprep.subr.mxu0 %v12862_v8  ;;  %8121 = vmatpush3.msra.mxu1 %v6945_v62 }
 0x675   : > { %8098 = vmatpush3.msra.mxu0 %v7473_v14  ;;  %8122 = vmatprep.subr.mxu1 %v12862_v8 }
 0x676   : > { %8099 = vmatprep.subr.mxu0 %v12862_v8  ;;  %8123 = vmatpush3.msra.mxu1 %v6944_v43 }
 0x677   : > { %8100 = vmatpush3.msra.mxu0 %v7472_v0  ;;  %8124 = vmatprep.subr.mxu1 %v12862_v8 }
 0x678   : > { %8101 = vmatprep.subr.mxu0 %v12862_v8  ;;  %8125 = vmatpush3.msra.mxu1 %v6943_v18 }
 0x679   : > { %8102 = vmatpush3.msra.mxu0 %v7471_v13  ;;  %8126 = vmatprep.subr.mxu1 %v12862_v8 }
 0x67a   : > { %8103 = vmatprep.subr.mxu0 %v12862_v8  ;;  %8127 = vmatpush3.msra.mxu1 %v6942_v57 }
 0x67b   : > { %8104 = vmatpush3.msra.mxu0 %v7470_v51  ;;  %8128 = vmatprep.subr.mxu1 %v12862_v8 }
 0x67c   : > { %8106 = vmatmul.mubr.msk.f32.vlgmr.msra.gmra.mxu0 %vm5582_vm3, %v6859_v10  ;;  %8141 = vmatprep.subr.mxu0 %v12862_v8 }
 0x67d   : > { %8163 = vmatprep.mubr.msk.f32.mxu0 %vm8406_vm13, %v12862_v8  ;;  %8129 = vmatpush3.msra.mxu1 %v6941_v15  ;;  %vm6953_vm13 = vcmask 982016   ;;  %v7030_v15 = vld [vmem:[%s12866_s23 + $0x10] sm:$0xff] }
 0x67e   : > { %8130 = vmatprep.subr.mxu1 %v12862_v8  ;;  %8142 = vmatpush3.msk.msra.mxu0 %vm5495_vm15, %v7038_v21 }
 0x67f   : > { %8131 = vmatpush3.msra.mxu1 %v6940_v46  ;;  %8143 = vmatprep.subr.mxu0 %v12862_v8  ;;  %v7029_v46 = vld [vmem:[%s12866_s23 + $0x8] sm:$0xff] }
 0x680   : > { %8132 = vmatprep.subr.mxu1 %v12862_v8  ;;  %8144 = vmatpush3.msra.mxu0 %v7037_v39 }
 0x681   : > { %8133 = vmatpush3.msra.mxu1 %v6939_v7  ;;  %8145 = vmatprep.subr.mxu0 %v12862_v8  ;;  %v7028_v7 = vld [vmem:[%s12866_s23] sm:$0xff] }
 0x682   : > { %8134 = vmatprep.subr.mxu1 %v12862_v8  ;;  %8146 = vmatpush3.msra.mxu0 %v7036_v41 }
 0x683   : > { %8135 = vmatpush3.msra.mxu1 %v6938_v37  ;;  %8147 = vmatprep.subr.mxu0 %v12862_v8  ;;  %v6952_v37 = vld [vmem:[%s12870_s21] sm:$0x1] }
 0x684   : > { %8136 = vmatprep.subr.mxu1 %v12862_v8  ;;  %8148 = vmatpush3.msra.mxu0 %v7035_v1 }
 0x685   : > { %8137 = vmatpush3.msra.mxu1 %v6937_v47  ;;  %8149 = vmatprep.subr.mxu0 %v12862_v8 }
 0x686   : > { %8150 = vmatpush3.msra.mxu0 %v7034_v3 }
 0x687   : > { %8151 = vmatprep.subr.mxu0 %v12862_v8 }
 0x688   : > { %8152 = vmatpush3.msra.mxu0 %v7033_v58 }
 0x689   : > { %8153 = vmatprep.subr.mxu0 %v12862_v8 }
 0x68a   : > { %8154 = vmatpush3.msra.mxu0 %v7032_v4 }
 0x68b   : > { %8155 = vmatprep.subr.mxu0 %v12862_v8 }
 0x68c   : > { %8156 = vmatpush3.msra.mxu0 %v7031_v31 }
 0x68d   : > { %8157 = vmatprep.subr.mxu0 %v12862_v8 }
 0x68e   : > { %8158 = vmatpush3.msra.mxu0 %v7030_v15 }
 0x68f   : > { %8159 = vmatprep.subr.mxu0 %v12862_v8 }
 0x690   : > { %8160 = vmatpush3.msra.mxu0 %v7029_v46 }
 0x691   : > { %8161 = vmatprep.subr.mxu0 %v12862_v8  ;;  %v7039_v8 = vld [vmem:[%s12872_s13] sm:$0x1] }
 0x692   : > { %8162 = vmatpush3.msra.mxu0 %v7028_v7 }
 0x6c1   : > { %v5656_v40 = vpop.f32.mrf.mxu0 }
 0x6c2   : > { %v5660_v55 = vadd.f32 %v5656_v40, %v5574_v42 }
 0x6c3   : > { %v7852_v25 = vpop.f32.mrf.mxu0  ;;  %v5826_v30 = vpop.f32.mrf.mxu1 }
 0x6c5   : > { %v7886_v63 = vpop.f32.mrf.mxu1 }
 0x6cf   : > { %v5741_v36 = vpop.f32.mrf.mxu0 }
 0x6d0   : > { %v5745_v22 = vadd.f32 %v5741_v36, %v5660_v55 }
 0x6d1   : > { %v7869_v32 = vpop.f32.mrf.mxu0 }
 0x6d2   : > { %v5996_v20 = vpop.f32.mrf.mxu1  ;;  %v5830_v50 = vadd.f32 %v5826_v30, %v5745_v22 }
 0x6d4   : > { %v7920_v6 = vpop.f32.mrf.mxu1 }
 0x6df   : > { %v5911_v29 = vpop.f32.mrf.mxu0 }
 0x6e0   : > { %v5915_v24 = vadd.f32 %v5911_v29, %v5830_v50 }
 0x6e1   : > { %v7903_v56 = vpop.f32.mrf.mxu0 }
 0x6e2   : > { %v6166_v35 = vpop.f32.mrf.mxu1  ;;  %v6000_v33 = vadd.f32 %v5996_v20, %v5915_v24 }
 0x6e4   : > { %v7954_v60 = vpop.f32.mrf.mxu1 }
 0x6ef   : > { %v6081_v48 = vpop.f32.mrf.mxu0 }
 0x6f0   : > { %v6085_v54 = vadd.f32 %v6081_v48, %v6000_v33 }
 0x6f1   : > { %v7937_v59 = vpop.f32.mrf.mxu0 }
 0x6f2   : > { %v6336_v61 = vpop.f32.mrf.mxu1  ;;  %v6170_v17 = vadd.f32 %v6166_v35, %v6085_v54 }
 0x6f4   : > { %v7988_v52 = vpop.f32.mrf.mxu1 }
 0x6ff   : > { %v6251_v38 = vpop.f32.mrf.mxu0 }
 0x700   : > { %v6255_v0 = vadd.f32 %v6251_v38, %v6170_v17 }
 0x701   : > { %v7971_v26 = vpop.f32.mrf.mxu0 }
 0x702   : > { %v6506_v23 = vpop.f32.mrf.mxu1  ;;  %v6340_v13 = vadd.f32 %v6336_v61, %v6255_v0 }
 0x704   : > { %v8022_v12 = vpop.f32.mrf.mxu1 }
 0x70f   : > { %v6421_v2 = vpop.f32.mrf.mxu0 }
 0x710   : > { %v6425_v51 = vadd.f32 %v6421_v2, %v6340_v13 }
 0x711   : > { %v8005_v27 = vpop.f32.mrf.mxu0 }
 0x712   : > { %v6676_v34 = vpop.f32.mrf.mxu1  ;;  %v6510_v11 = vadd.f32 %v6506_v23, %v6425_v51 }
 0x714   : > { %v8056_v53 = vpop.f32.mrf.mxu1 }
 0x71f   : > { %v6591_v9 = vpop.f32.mrf.mxu0 }
 0x720   : > { %v6595_v28 = vadd.f32 %v6591_v9, %v6510_v11 }
 0x721   : > { %v8039_v19 = vpop.f32.mrf.mxu0 }
 0x722   : > { %v6846_v49 = vpop.f32.mrf.mxu1  ;;  %v6680_v44 = vadd.f32 %v6676_v34, %v6595_v28 }
 0x724   : > { %v8090_v14 = vpop.f32.mrf.mxu1 }
 0x72e   : > { %v6761_v10 = vpop.f32.mrf.mxu0 }
 0x72f   : > { %v6765_v45 = vadd.f32 %v6761_v10, %v6680_v44 }
 0x730   : > { %v8073_v16 = vpop.f32.mrf.mxu0 }
 0x731   : > { %v6850_v5 = vadd.f32 %v6846_v49, %v6765_v45 }
 0x73c   : > { %v6931_v62 = vpop.f32.mrf.mxu0 }
 0x73d   : > { %v6935_v43 = vadd.f32 %v6931_v62, %v6850_v5 }
 0x73e   : > { %v8107_v18 = vpop.f32.mrf.mxu0 }
 0x73f   : > { %v6936_v57 = vmax.f32 %v6935_v43, 0.0 }
 0x741   : > { %8139 = vmatmul.mubr.msk.f32.vlgmr.msra.gmra.mxu1 %vm6953_vm13, %v6936_v57 }
 0x801   : > { %v7023_v47 = vpop.f32.mrf.mxu1 }
 0x802   : > { %v7024_v40 = vadd.f32 %v7023_v47, %v6952_v37 }
 0x803   : > { %v8140_v21 = vpop.f32.mrf.mxu1 }
 0x804   : > { %v7027_v39 = vmax.f32 %v7024_v40, 0.0 }
 0x806   : > { %8164 = vmatmul.mubr.msk.f32.vlgmr.msra.gmra.mxu0 %vm7040_vm7, %v7027_v39 }
 0x8c6   : > { %v7113_v25 = vpop.f32.mrf.mxu0 }
 0x8c7   : > { %v7114_v30 = vadd.f32 %v7113_v25, %v7039_v8 }
 0x8c8   : > { %v8165_v41 = vpop.f32.mrf.mxu0 }
 0x8c9   : > { %7118 = vst.msk [vmem:[%s430_s10] sm:$0x1] %vm7117_vm9, %v7114_v30 }
 0x8ca   : > { %8312 = shalt.err (!%p8309_p3)
}
 0x8cb   : > { %s8313_s11 = scalar_lea.hbm %s12421_s25, 16  ;;  %s8317_s6 = scalar_lea.hbm %s12873_s9, 32 }
 0x8cc   : > { %p8314_p4 = scmp.ne.s32.totalorder %s12421_s25, %s8313_s11  ;;  %p8318_p9 = scmp.lt.s32.totalorder %s12421_s25, %s12873_s9 }
 0x8cd   : > { %p8319_p10 = scmp.lt.s32.totalorder %s8317_s6, %s8313_s11 }
 0x8ce   : > { %p8315_p7 = pnand %p8314_p4, %p8535_p5 }
 0x8cf   : > { %p8320_p11 = por %p8319_p10, %p8318_p9 }
 0x8d0   : > { %p8316_p8 = pneg %p8315_p7 }
 0x8d2   : > { %p8321_p12 = pnand %p8320_p11, %p8316_p8 }
 0x8d4   : > { %8324 = shalt.err (!%p8321_p12)
}
 0x8d5   : > { %8167 = dma.vmem_to_hbm [thread:$0]  (%p8535_p5), %s7133_s28, 16, %s12421_s25, %s7120_s14  }
 0x8d6 PF: > { %s12874_s21 = sld [smem:[#allocation9_spill]] }
 0x8d7   : > { %s12875_s2 = sld [smem:[#allocation6_spill]] }
 0x8dc   : > { %p8173_p13 = scmp.ge.s32.totalorder %s12874_s21, 2 }
 0x8dd   : > { %s7144_s0 = sand.u32 1, %s12875_s2  }
 0x8de   : > { %p8170_p0 = pnand %p8173_p13, %p8539_p6  ;;  %s7145_s13 = scalar_lea.sflag [#allocation4], %s7144_s0 }
 0x8e0   : > { %p8171_p1 = pneg %p8170_p0 }
 0x8e2   : > { %8342 = dma.done.wait (%p8171_p1), %s7145_s13, 16  }
 0x8e3   : > { %8344 = vsyncadd (%p8171_p1), %s7145_s13, 4294967280  ;;  %s12877_s28 = sld [smem:[#allocation11_spill]] }
 0x8e4   : > { %s12878_s25 = sld [smem:[#allocation7_spill]] }
 0x8e5   : > { %s12879_s26 = sld [smem:[#allocation8_spill]] }
 0x8e6   : > { %s12880_s27 = sld [smem:[#allocation12_spill]] }
 0x8e9   : > { %p23_p2 = scmp.ge.s32.totalorder %s12877_s28, 4  }
 0x8eb   :  { %25 = sbr.rel (!%p23_p2) target bundleno = 15 (0xf), region = 146 }
 0x8f0   :  { %7149 = vsyncpa [#allocation4], 1 }
 0x8f1   :  { %7151 = vsyncpa [#allocation4 + $0x1], 1 }

</bundles_post_ra>
